<compile_context>
chip_gen: v5e
topology: v5e:2x2
jax: 0.10.0
libtpu: 0.0.40
codegen_flags: <defaults>
</compile_context>

<pallas_src>
import jax
import jax.numpy as jnp
import numpy as np
from jax.experimental import pallas as pl
from jax.experimental.pallas import tpu as pltpu

NEG_SLOPE = 0.01  # PyTorch nn.LeakyReLU() default


def _leaky(x):
    return jnp.where(x >= 0, x, jnp.float32(NEG_SLOPE) * x)


# ----------------------------------------------------------------------------
# Fused kernel (one image per grid step)
# ----------------------------------------------------------------------------

def _make_fused_kernel(ops, base, c_max):
    """ops (static):
         ("conv1x1", cin, cout, act)
         ("conv3x3", H, W, cin, cout, act)
         ("pool",    H, W, C)
    Weight/bias refs are passed, in order, for every conv op."""

    def kernel(*refs):
        x_ref = refs[0]
        w_refs = refs[1:-2]
        o_ref = refs[-2]
        scr = refs[-1]                       # (rows, c_max) f32 staging scratch

        # Lower halo strip: zero once per image.  Staging never writes rows
        # below `base`, so it stays zero for every conv at every resolution.
        scr[pl.ds(0, base), :] = jnp.zeros((base, c_max), jnp.float32)

        A = x_ref[...].astype(jnp.float32)   # flat (H0*W0, 3) for this image
        mask_cache = {}                      # hoisted per-(H, W, cin) masks
        wi = 0

        for op in ops:
            kind = op[0]

            if kind == "conv1x1":
                _, cin, cout, act = op
                w_ref, b_ref = w_refs[wi], w_refs[wi + 1]
                wi += 2
                A = jnp.dot(A, w_ref[...],
                            preferred_element_type=jnp.float32) + b_ref[...]
                if act:
                    A = _leaky(A)

            elif kind == "conv3x3":
                _, H, W, cin, cout, act = op
                M = H * W
                w_ref, b_ref = w_refs[wi], w_refs[wi + 1]
                wi += 2

                # Zero the upper halo strip (covers reads up to base+M+W),
                # then stage the activation.  With base >= W+1 every tap that
                # falls above/below the image reads zeros, so no row masks.
                scr[pl.ds(base + M, base), pl.ds(0, cin)] = jnp.zeros(
                    (base, cin), jnp.float32)
                scr[pl.ds(base, M), pl.ds(0, cin)] = A

                key = (H, W, cin)
                if key not in mask_cache:    # built once per resolution
                    col = jax.lax.broadcasted_iota(jnp.int32, (M, cin), 0) % W
                    mask_cache[key] = (col > 0, col < (W - 1))
                mask_l, mask_r = mask_cache[key]

                # im2col: 9 shifted, column-masked tap slices concatenated
                # along lanes -> ONE (M, 9*cin) @ (9*cin, cout) MXU matmul.
                taps = []
                for dy in (-1, 0, 1):
                    for dx in (-1, 0, 1):
                        xs = scr[pl.ds(base + dy * W + dx, M), pl.ds(0, cin)]
                        if dx == -1:
                            xs = jnp.where(mask_l, xs, jnp.float32(0.0))
                        elif dx == 1:
                            xs = jnp.where(mask_r, xs, jnp.float32(0.0))
                        taps.append(xs)
                T = jnp.concatenate(taps, axis=1)
                A = jnp.dot(T, w_ref[...],
                            preferred_element_type=jnp.float32) + b_ref[...]
                if act:
                    A = _leaky(A)

            else:  # "pool": 2x2 average pool via stride-2 reads (no matmul)
                _, H, W, C = op
                M, Ho, Wo = H * W, H // 2, W // 2
                scr[pl.ds(base, M), pl.ds(0, C)] = A
                out_rows = []
                for ip in range(Ho):
                    r0 = base + (2 * ip) * W        # input row 2*ip
                    r1 = r0 + W                     # input row 2*ip + 1
                    s = (scr[pl.ds(r0, Wo, stride=2), pl.ds(0, C)]
                         + scr[pl.ds(r0 + 1, Wo, stride=2), pl.ds(0, C)]
                         + scr[pl.ds(r1, Wo, stride=2), pl.ds(0, C)]
                         + scr[pl.ds(r1 + 1, Wo, stride=2), pl.ds(0, C)])
                    out_rows.append(s)
                A = jnp.concatenate(out_rows, axis=0) * jnp.float32(0.25)

        # Final conv's cout is pre-padded to a multiple of 128 -> dense store.
        o_ref[...] = A.astype(o_ref.dtype)

    return kernel


# ----------------------------------------------------------------------------
# Parameters + forward pass wrapper
# ----------------------------------------------------------------------------

def init_params(key, input_power, output_power, start_filters=8, max_filters=32):
    assert input_power > output_power
    num_layers = input_power - output_power
    keys = iter(jax.random.split(key, 4 + 4 * num_layers))
    nrm = lambda k, shape: 0.1 * jax.random.normal(k, shape, jnp.float32)

    params = {}
    sf = start_filters
    params["from_rgb_w"] = nrm(next(keys), (1, 1, 3, sf))        # HWIO
    params["from_rgb_b"] = nrm(next(keys), (sf,))

    layers = []
    cin = sf
    cout = cin
    for _ in range(num_layers):
        cout = min(cin * 2, max_filters)
        layers.append({
            "starter_w": nrm(next(keys), (3, 3, cin, cin)),      # HWIO
            "starter_b": nrm(next(keys), (cin,)),
            "grow_w": nrm(next(keys), (3, 3, cin, cout)),
            "grow_b": nrm(next(keys), (cout,)),
        })
        cin = cout
    params["layers"] = layers

    params["final_w"] = nrm(next(keys), (3, 3, cout, cout))
    params["final_b"] = nrm(next(keys), (cout,))
    params["output_shape"] = (cout, 2 ** output_power, 2 ** output_power)
    return params


def progan_encoder_forward(x_nchw, params):
    N, Cx, H0, W0 = x_nchw.shape
    assert Cx == 3
    # NCHW (PyTorch) -> per-image flat (H*W, 3) for the fused kernel.
    x = jnp.transpose(x_nchw, (0, 2, 3, 1)).astype(jnp.float32)
    x = x.reshape(N, H0 * W0, 3)

    # Static op sequence + flat weight/bias arg list (kernel consumes in order).
    ops = []
    flat_args = []

    sf = params["from_rgb_w"].shape[-1]
    ops.append(("conv1x1", 3, sf, True))
    flat_args += [params["from_rgb_w"].reshape(3, sf).astype(jnp.float32),
                  params["from_rgb_b"].reshape(1, sf).astype(jnp.float32)]

    H, W = H0, W0
    for lp in params["layers"]:
        cin = lp["starter_w"].shape[2]
        cmid = lp["starter_w"].shape[3]
        cout = lp["grow_w"].shape[3]
        ops.append(("conv3x3", H, W, cin, cmid, True))
        flat_args += [lp["starter_w"].reshape(9 * cin, cmid).astype(jnp.float32),
                      lp["starter_b"].reshape(1, cmid).astype(jnp.float32)]
        ops.append(("conv3x3", H, W, cmid, cout, True))
        flat_args += [lp["grow_w"].reshape(9 * cmid, cout).astype(jnp.float32),
                      lp["grow_b"].reshape(1, cout).astype(jnp.float32)]
        ops.append(("pool", H, W, cout))
        H, W = H // 2, W // 2

    cin_f = params["final_w"].shape[2]
    cfin = params["final_w"].shape[3]
    cfin_pad = ((cfin + 127) // 128) * 128           # lane-dense output store
    wf = params["final_w"].reshape(9 * cin_f, cfin).astype(jnp.float32)
    wf = jnp.pad(wf, ((0, 0), (0, cfin_pad - cfin)))
    bf = jnp.pad(params["final_b"].reshape(1, cfin).astype(jnp.float32),
                 ((0, 0), (0, cfin_pad - cfin)))
    ops.append(("conv3x3", H, W, cin_f, cfin_pad, False))
    flat_args += [wf, bf]

    Ho, Wo = H, W
    m_out = Ho * Wo
    m0 = H0 * W0

    # Per-image staging scratch: flat activation with a sublane-aligned halo
    # of `base` rows (>= W0+1) on each side; lane dim = widest staged channel
    # count (conv inputs + pool inputs).
    c_max = max(op[3] for op in ops if op[0] != "conv1x1")
    base = ((W0 + 1 + 7) // 8) * 8
    rows_scr = m0 + 2 * base

    kernel = _make_fused_kernel(ops, base, c_max)

    in_specs = [pl.BlockSpec((None, m0, 3), lambda n: (n, 0, 0))]
    in_specs += [pl.BlockSpec(a.shape, lambda n: (0, 0)) for a in flat_args]

    out_flat = pl.pallas_call(
        kernel,
        out_shape=jax.ShapeDtypeStruct((N, m_out, cfin_pad), jnp.float32),
        grid=(N,),
        in_specs=in_specs,
        out_specs=pl.BlockSpec((None, m_out, cfin_pad), lambda n: (n, 0, 0)),
        scratch_shapes=[pltpu.VMEM((rows_scr, c_max), jnp.float32)],
        compiler_params=pltpu.CompilerParams(
            dimension_semantics=("parallel",)),
    )(x, *flat_args)

    # drop channel pad, back to NCHW
    out = out_flat[:, :, :cfin].reshape(N, Ho, Wo, cfin)
    return jnp.transpose(out, (0, 3, 1, 2))


# ----------------------------------------------------------------------------
# Pure-JAX reference (correctness check only)
# ----------------------------------------------------------------------------

def _conv_ref(x, w, b, ksize):
    pad = (ksize - 1) // 2
    y = jax.lax.conv_general_dilated(
        x, w, window_strides=(1, 1), padding=((pad, pad), (pad, pad)),
        dimension_numbers=("NHWC", "HWIO", "NHWC"))
    return y + b[None, None, None, :]


def reference_forward(x_nchw, params):
    x = jnp.transpose(x_nchw, (0, 2, 3, 1)).astype(jnp.float32)
    x = _leaky(_conv_ref(x, params["from_rgb_w"], params["from_rgb_b"], 1))
    for lp in params["layers"]:
        x = _leaky(_conv_ref(x, lp["starter_w"], lp["starter_b"], 3))
        x = _leaky(_conv_ref(x, lp["grow_w"], lp["grow_b"], 3))
        N, H, W, C = x.shape
        x = x.reshape(N, H // 2, 2, W // 2, 2, C).mean(axis=(2, 4))
    x = _conv_ref(x, params["final_w"], params["final_b"], 3)
    return jnp.transpose(x, (0, 3, 1, 2))


if __name__ == "__main__":
    input_power, output_power = 4, 2          # 16x16 input -> 4x4 output
    start_filters, max_filters = 8, 32

    key = jax.random.PRNGKey(0)
    kp, kx = jax.random.split(key)
    params = init_params(kp, input_power, output_power, start_filters, max_filters)

    N = 2
    side = 2 ** input_power
    x = jax.random.normal(kx, (N, 3, side, side), jnp.float32)   # NCHW

    out = jax.block_until_ready(progan_encoder_forward(x, params))

    expected_shape = (N,) + params["output_shape"]               # (2, 32, 4, 4)
    assert out.shape == expected_shape, (out.shape, expected_shape)

    ref = reference_forward(x, params)
    np.testing.assert_allclose(np.asarray(out), np.asarray(ref),
                               atol=1e-4, rtol=1e-4)

    print("KERNEL_OK")
</pallas_src>

<mosaic_0001>
module attributes {stable_mosaic.version = 11 : i64} {
  func.func @kernel(%arg0: i32, %arg1: memref<1x256x3xf32, #tpu.memory_space<vmem>>, %arg2: memref<3x8xf32, #tpu.memory_space<vmem>>, %arg3: memref<1x8xf32, #tpu.memory_space<vmem>>, %arg4: memref<72x8xf32, #tpu.memory_space<vmem>>, %arg5: memref<1x8xf32, #tpu.memory_space<vmem>>, %arg6: memref<72x16xf32, #tpu.memory_space<vmem>>, %arg7: memref<1x16xf32, #tpu.memory_space<vmem>>, %arg8: memref<144x16xf32, #tpu.memory_space<vmem>>, %arg9: memref<1x16xf32, #tpu.memory_space<vmem>>, %arg10: memref<144x32xf32, #tpu.memory_space<vmem>>, %arg11: memref<1x32xf32, #tpu.memory_space<vmem>>, %arg12: memref<288x128xf32, #tpu.memory_space<vmem>>, %arg13: memref<1x128xf32, #tpu.memory_space<vmem>>, %arg14: memref<1x16x128xf32, #tpu.memory_space<vmem>>, %arg15: memref<304x32xf32, #tpu.memory_space<vmem>>) attributes {dimension_semantics = [#tpu.dimension_semantics<parallel>], iteration_bounds = array<i64: 2>, scalar_prefetch = 0 : i64, scratch_operands = 1 : i64, tpu.core_type = #tpu.core_type<tc>, window_params = [{transform_indices = @transform_0, window_bounds = array<i64: 1, 256, 3>}, {pipeline_mode = #tpu.pipeline_mode<synchronous>, transform_indices = @transform_1, window_bounds = array<i64: 3, 8>}, {pipeline_mode = #tpu.pipeline_mode<synchronous>, transform_indices = @transform_2, window_bounds = array<i64: 1, 8>}, {pipeline_mode = #tpu.pipeline_mode<synchronous>, transform_indices = @transform_3, window_bounds = array<i64: 72, 8>}, {pipeline_mode = #tpu.pipeline_mode<synchronous>, transform_indices = @transform_4, window_bounds = array<i64: 1, 8>}, {pipeline_mode = #tpu.pipeline_mode<synchronous>, transform_indices = @transform_5, window_bounds = array<i64: 72, 16>}, {pipeline_mode = #tpu.pipeline_mode<synchronous>, transform_indices = @transform_6, window_bounds = array<i64: 1, 16>}, {pipeline_mode = #tpu.pipeline_mode<synchronous>, transform_indices = @transform_7, window_bounds = array<i64: 144, 16>}, {pipeline_mode = #tpu.pipeline_mode<synchronous>, transform_indices = @transform_8, window_bounds = array<i64: 1, 16>}, {pipeline_mode = #tpu.pipeline_mode<synchronous>, transform_indices = @transform_9, window_bounds = array<i64: 144, 32>}, {pipeline_mode = #tpu.pipeline_mode<synchronous>, transform_indices = @transform_10, window_bounds = array<i64: 1, 32>}, {pipeline_mode = #tpu.pipeline_mode<synchronous>, transform_indices = @transform_11, window_bounds = array<i64: 288, 128>}, {pipeline_mode = #tpu.pipeline_mode<synchronous>, transform_indices = @transform_12, window_bounds = array<i64: 1, 128>}, {transform_indices = @transform_13, window_bounds = array<i64: 1, 16, 128>}]} {
    %cst = arith.constant 0.000000e+00 : f32
    %0 = vector.broadcast %cst : f32 to vector<24x32xf32>
    %c0 = arith.constant 0 : index
    %c0_0 = arith.constant 0 : index
    %1 = vector.load %arg15[%c0, %c0_0] : memref<304x32xf32, #tpu.memory_space<vmem>>, vector<24x32xf32>
    tpu.vector_store %arg15[%c0, %c0_0], %0 {strides = array<i32>} : memref<304x32xf32, #tpu.memory_space<vmem>>, vector<24x32xf32>,
    %c0_1 = arith.constant 0 : index
    %c0_2 = arith.constant 0 : index
    %c0_3 = arith.constant 0 : index
    %2 = vector.load %arg1[%c0_1, %c0_2, %c0_3] : memref<1x256x3xf32, #tpu.memory_space<vmem>>, vector<1x256x3xf32>
    %3 = vector.shape_cast %2 : vector<1x256x3xf32> to vector<256x3xf32>
    %c0_4 = arith.constant 0 : index
    %c0_5 = arith.constant 0 : index
    %4 = vector.load %arg2[%c0_4, %c0_5] : memref<3x8xf32, #tpu.memory_space<vmem>>, vector<3x8xf32>
    %cst_6 = arith.constant dense<0.000000e+00> : vector<256x8xf32>
    %5 = tpu.matmul %3, %4, %cst_6 {dimension_numbers = #tpu.dot_dimension_numbers<[1], [0], [0], [1], [0, 0, 1, 1], [], []>} : vector<256x3xf32>, vector<3x8xf32>, vector<256x8xf32> -> vector<256x8xf32>
    %c0_7 = arith.constant 0 : index
    %c0_8 = arith.constant 0 : index
    %6 = vector.load %arg3[%c0_7, %c0_8] : memref<1x8xf32, #tpu.memory_space<vmem>>, vector<1x8xf32>
    %7 = vector.broadcast %6 : vector<1x8xf32> to vector<256x8xf32>
    %8 = arith.addf %5, %7 : vector<256x8xf32>
    %cst_9 = arith.constant 0.000000e+00 : f32
    %9 = vector.broadcast %cst_9 : f32 to vector<256x8xf32>
    %10 = arith.cmpf oge, %8, %9 : vector<256x8xf32>
    %cst_10 = arith.constant 0.00999999977 : f32
    %11 = vector.broadcast %cst_10 : f32 to vector<256x8xf32>
    %12 = arith.mulf %11, %8 : vector<256x8xf32>
    %13 = arith.select %10, %8, %12 : vector<256x8xi1>, vector<256x8xf32>
    %cst_11 = arith.constant 0.000000e+00 : f32
    %14 = vector.broadcast %cst_11 : f32 to vector<24x8xf32>
    %c280 = arith.constant 280 : index
    %c0_12 = arith.constant 0 : index
    %15 = vector.load %arg15[%c280, %c0_12] : memref<304x32xf32, #tpu.memory_space<vmem>>, vector<24x8xf32>
    tpu.vector_store %arg15[%c280, %c0_12], %14 {strides = array<i32>} : memref<304x32xf32, #tpu.memory_space<vmem>>, vector<24x8xf32>,
    %c24 = arith.constant 24 : index
    %c0_13 = arith.constant 0 : index
    %16 = vector.load %arg15[%c24, %c0_13] : memref<304x32xf32, #tpu.memory_space<vmem>>, vector<256x8xf32>
    tpu.vector_store %arg15[%c24, %c0_13], %13 {strides = array<i32>} : memref<304x32xf32, #tpu.memory_space<vmem>>, vector<256x8xf32>,
    %17 = tpu.iota {dimensions = array<i32: 0>} : vector<256x8xi32>
    %c16_i32 = arith.constant 16 : i32
    %c0_i32 = arith.constant 0 : i32
    %18 = arith.cmpi eq, %c16_i32, %c0_i32 : i32
    %c1_i32 = arith.constant 1 : i32
    %19 = arith.select %18, %c1_i32, %c16_i32 : i32
    %20 = vector.broadcast %19 : i32 to vector<256x8xi32>
    %21 = arith.remsi %17, %20 : vector<256x8xi32>
    %c0_i32_14 = arith.constant 0 : i32
    %22 = vector.broadcast %c0_i32_14 : i32 to vector<256x8xi32>
    %23 = arith.cmpi ne, %21, %22 : vector<256x8xi32>
    %c0_i32_15 = arith.constant 0 : i32
    %24 = vector.broadcast %c0_i32_15 : i32 to vector<256x8xi32>
    %25 = arith.cmpi slt, %21, %24 : vector<256x8xi32>
    %c0_i32_16 = arith.constant 0 : i32
    %26 = arith.cmpi slt, %19, %c0_i32_16 : i32
    %27 = vector.broadcast %26 : i1 to vector<256x8xi1>
    %28 = vector.broadcast %27 : vector<256x8xi1> to vector<256x8xi1>
    %29 = arith.xori %25, %28 : vector<256x8xi1>
    %30 = arith.andi %29, %23 : vector<256x8xi1>
    %31 = vector.broadcast %19 : i32 to vector<256x8xi32>
    %32 = arith.addi %21, %31 : vector<256x8xi32>
    %33 = arith.select %30, %32, %21 : vector<256x8xi1>, vector<256x8xi32>
    %c0_i32_17 = arith.constant 0 : i32
    %34 = vector.broadcast %c0_i32_17 : i32 to vector<256x8xi32>
    %35 = arith.cmpi sgt, %33, %34 : vector<256x8xi32>
    %c15_i32 = arith.constant 15 : i32
    %36 = vector.broadcast %c15_i32 : i32 to vector<256x8xi32>
    %37 = arith.cmpi slt, %33, %36 : vector<256x8xi32>
    %c7 = arith.constant 7 : index
    %c0_18 = arith.constant 0 : index
    %38 = vector.load %arg15[%c7, %c0_18] : memref<304x32xf32, #tpu.memory_space<vmem>>, vector<256x8xf32>
    %cst_19 = arith.constant 0.000000e+00 : f32
    %39 = vector.broadcast %cst_19 : f32 to vector<256x8xf32>
    %40 = arith.select %35, %38, %39 : vector<256x8xi1>, vector<256x8xf32>
    %c8 = arith.constant 8 : index
    %c0_20 = arith.constant 0 : index
    %41 = vector.load %arg15[%c8, %c0_20] : memref<304x32xf32, #tpu.memory_space<vmem>>, vector<256x8xf32>
    %c9 = arith.constant 9 : index
    %c0_21 = arith.constant 0 : index
    %42 = vector.load %arg15[%c9, %c0_21] : memref<304x32xf32, #tpu.memory_space<vmem>>, vector<256x8xf32>
    %cst_22 = arith.constant 0.000000e+00 : f32
    %43 = vector.broadcast %cst_22 : f32 to vector<256x8xf32>
    %44 = arith.select %37, %42, %43 : vector<256x8xi1>, vector<256x8xf32>
    %c23 = arith.constant 23 : index
    %c0_23 = arith.constant 0 : index
    %45 = vector.load %arg15[%c23, %c0_23] : memref<304x32xf32, #tpu.memory_space<vmem>>, vector<256x8xf32>
    %cst_24 = arith.constant 0.000000e+00 : f32
    %46 = vector.broadcast %cst_24 : f32 to vector<256x8xf32>
    %47 = arith.select %35, %45, %46 : vector<256x8xi1>, vector<256x8xf32>
    %c24_25 = arith.constant 24 : index
    %c0_26 = arith.constant 0 : index
    %48 = vector.load %arg15[%c24_25, %c0_26] : memref<304x32xf32, #tpu.memory_space<vmem>>, vector<256x8xf32>
    %c25 = arith.constant 25 : index
    %c0_27 = arith.constant 0 : index
    %49 = vector.load %arg15[%c25, %c0_27] : memref<304x32xf32, #tpu.memory_space<vmem>>, vector<256x8xf32>
    %cst_28 = arith.constant 0.000000e+00 : f32
    %50 = vector.broadcast %cst_28 : f32 to vector<256x8xf32>
    %51 = arith.select %37, %49, %50 : vector<256x8xi1>, vector<256x8xf32>
    %c39 = arith.constant 39 : index
    %c0_29 = arith.constant 0 : index
    %52 = vector.load %arg15[%c39, %c0_29] : memref<304x32xf32, #tpu.memory_space<vmem>>, vector<256x8xf32>
    %cst_30 = arith.constant 0.000000e+00 : f32
    %53 = vector.broadcast %cst_30 : f32 to vector<256x8xf32>
    %54 = arith.select %35, %52, %53 : vector<256x8xi1>, vector<256x8xf32>
    %c40 = arith.constant 40 : index
    %c0_31 = arith.constant 0 : index
    %55 = vector.load %arg15[%c40, %c0_31] : memref<304x32xf32, #tpu.memory_space<vmem>>, vector<256x8xf32>
    %c41 = arith.constant 41 : index
    %c0_32 = arith.constant 0 : index
    %56 = vector.load %arg15[%c41, %c0_32] : memref<304x32xf32, #tpu.memory_space<vmem>>, vector<256x8xf32>
    %cst_33 = arith.constant 0.000000e+00 : f32
    %57 = vector.broadcast %cst_33 : f32 to vector<256x8xf32>
    %58 = arith.select %37, %56, %57 : vector<256x8xi1>, vector<256x8xf32>
    %59 = tpu.concatenate %40, %41, %44, %47, %48, %51, %54, %55, %58 in 1 : vector<256x8xf32>, vector<256x8xf32>, vector<256x8xf32>, vector<256x8xf32>, vector<256x8xf32>, vector<256x8xf32>, vector<256x8xf32>, vector<256x8xf32>, vector<256x8xf32> -> vector<256x72xf32>
    %c0_34 = arith.constant 0 : index
    %c0_35 = arith.constant 0 : index
    %60 = vector.load %arg4[%c0_34, %c0_35] : memref<72x8xf32, #tpu.memory_space<vmem>>, vector<72x8xf32>
    %cst_36 = arith.constant dense<0.000000e+00> : vector<256x8xf32>
    %61 = tpu.matmul %59, %60, %cst_36 {dimension_numbers = #tpu.dot_dimension_numbers<[1], [0], [0], [1], [0, 0, 1, 1], [], []>} : vector<256x72xf32>, vector<72x8xf32>, vector<256x8xf32> -> vector<256x8xf32>
    %c0_37 = arith.constant 0 : index
    %c0_38 = arith.constant 0 : index
    %62 = vector.load %arg5[%c0_37, %c0_38] : memref<1x8xf32, #tpu.memory_space<vmem>>, vector<1x8xf32>
    %63 = vector.broadcast %62 : vector<1x8xf32> to vector<256x8xf32>
    %64 = arith.addf %61, %63 : vector<256x8xf32>
    %cst_39 = arith.constant 0.000000e+00 : f32
    %65 = vector.broadcast %cst_39 : f32 to vector<256x8xf32>
    %66 = arith.cmpf oge, %64, %65 : vector<256x8xf32>
    %cst_40 = arith.constant 0.00999999977 : f32
    %67 = vector.broadcast %cst_40 : f32 to vector<256x8xf32>
    %68 = arith.mulf %67, %64 : vector<256x8xf32>
    %69 = arith.select %66, %64, %68 : vector<256x8xi1>, vector<256x8xf32>
    %cst_41 = arith.constant 0.000000e+00 : f32
    %70 = vector.broadcast %cst_41 : f32 to vector<24x8xf32>
    %c280_42 = arith.constant 280 : index
    %c0_43 = arith.constant 0 : index
    %71 = vector.load %arg15[%c280_42, %c0_43] : memref<304x32xf32, #tpu.memory_space<vmem>>, vector<24x8xf32>
    tpu.vector_store %arg15[%c280_42, %c0_43], %70 {strides = array<i32>} : memref<304x32xf32, #tpu.memory_space<vmem>>, vector<24x8xf32>,
    %c24_44 = arith.constant 24 : index
    %c0_45 = arith.constant 0 : index
    %72 = vector.load %arg15[%c24_44, %c0_45] : memref<304x32xf32, #tpu.memory_space<vmem>>, vector<256x8xf32>
    tpu.vector_store %arg15[%c24_44, %c0_45], %69 {strides = array<i32>} : memref<304x32xf32, #tpu.memory_space<vmem>>, vector<256x8xf32>,
    %c7_46 = arith.constant 7 : index
    %c0_47 = arith.constant 0 : index
    %73 = vector.load %arg15[%c7_46, %c0_47] : memref<304x32xf32, #tpu.memory_space<vmem>>, vector<256x8xf32>
    %cst_48 = arith.constant 0.000000e+00 : f32
    %74 = vector.broadcast %cst_48 : f32 to vector<256x8xf32>
    %75 = arith.select %35, %73, %74 : vector<256x8xi1>, vector<256x8xf32>
    %c8_49 = arith.constant 8 : index
    %c0_50 = arith.constant 0 : index
    %76 = vector.load %arg15[%c8_49, %c0_50] : memref<304x32xf32, #tpu.memory_space<vmem>>, vector<256x8xf32>
    %c9_51 = arith.constant 9 : index
    %c0_52 = arith.constant 0 : index
    %77 = vector.load %arg15[%c9_51, %c0_52] : memref<304x32xf32, #tpu.memory_space<vmem>>, vector<256x8xf32>
    %cst_53 = arith.constant 0.000000e+00 : f32
    %78 = vector.broadcast %cst_53 : f32 to vector<256x8xf32>
    %79 = arith.select %37, %77, %78 : vector<256x8xi1>, vector<256x8xf32>
    %c23_54 = arith.constant 23 : index
    %c0_55 = arith.constant 0 : index
    %80 = vector.load %arg15[%c23_54, %c0_55] : memref<304x32xf32, #tpu.memory_space<vmem>>, vector<256x8xf32>
    %cst_56 = arith.constant 0.000000e+00 : f32
    %81 = vector.broadcast %cst_56 : f32 to vector<256x8xf32>
    %82 = arith.select %35, %80, %81 : vector<256x8xi1>, vector<256x8xf32>
    %c24_57 = arith.constant 24 : index
    %c0_58 = arith.constant 0 : index
    %83 = vector.load %arg15[%c24_57, %c0_58] : memref<304x32xf32, #tpu.memory_space<vmem>>, vector<256x8xf32>
    %c25_59 = arith.constant 25 : index
    %c0_60 = arith.constant 0 : index
    %84 = vector.load %arg15[%c25_59, %c0_60] : memref<304x32xf32, #tpu.memory_space<vmem>>, vector<256x8xf32>
    %cst_61 = arith.constant 0.000000e+00 : f32
    %85 = vector.broadcast %cst_61 : f32 to vector<256x8xf32>
    %86 = arith.select %37, %84, %85 : vector<256x8xi1>, vector<256x8xf32>
    %c39_62 = arith.constant 39 : index
    %c0_63 = arith.constant 0 : index
    %87 = vector.load %arg15[%c39_62, %c0_63] : memref<304x32xf32, #tpu.memory_space<vmem>>, vector<256x8xf32>
    %cst_64 = arith.constant 0.000000e+00 : f32
    %88 = vector.broadcast %cst_64 : f32 to vector<256x8xf32>
    %89 = arith.select %35, %87, %88 : vector<256x8xi1>, vector<256x8xf32>
    %c40_65 = arith.constant 40 : index
    %c0_66 = arith.constant 0 : index
    %90 = vector.load %arg15[%c40_65, %c0_66] : memref<304x32xf32, #tpu.memory_space<vmem>>, vector<256x8xf32>
    %c41_67 = arith.constant 41 : index
    %c0_68 = arith.constant 0 : index
    %91 = vector.load %arg15[%c41_67, %c0_68] : memref<304x32xf32, #tpu.memory_space<vmem>>, vector<256x8xf32>
    %cst_69 = arith.constant 0.000000e+00 : f32
    %92 = vector.broadcast %cst_69 : f32 to vector<256x8xf32>
    %93 = arith.select %37, %91, %92 : vector<256x8xi1>, vector<256x8xf32>
    %94 = tpu.concatenate %75, %76, %79, %82, %83, %86, %89, %90, %93 in 1 : vector<256x8xf32>, vector<256x8xf32>, vector<256x8xf32>, vector<256x8xf32>, vector<256x8xf32>, vector<256x8xf32>, vector<256x8xf32>, vector<256x8xf32>, vector<256x8xf32> -> vector<256x72xf32>
    %c0_70 = arith.constant 0 : index
    %c0_71 = arith.constant 0 : index
    %95 = vector.load %arg6[%c0_70, %c0_71] : memref<72x16xf32, #tpu.memory_space<vmem>>, vector<72x16xf32>
    %cst_72 = arith.constant dense<0.000000e+00> : vector<256x16xf32>
    %96 = tpu.matmul %94, %95, %cst_72 {dimension_numbers = #tpu.dot_dimension_numbers<[1], [0], [0], [1], [0, 0, 1, 1], [], []>} : vector<256x72xf32>, vector<72x16xf32>, vector<256x16xf32> -> vector<256x16xf32>
    %c0_73 = arith.constant 0 : index
    %c0_74 = arith.constant 0 : index
    %97 = vector.load %arg7[%c0_73, %c0_74] : memref<1x16xf32, #tpu.memory_space<vmem>>, vector<1x16xf32>
    %98 = vector.broadcast %97 : vector<1x16xf32> to vector<256x16xf32>
    %99 = arith.addf %96, %98 : vector<256x16xf32>
    %cst_75 = arith.constant 0.000000e+00 : f32
    %100 = vector.broadcast %cst_75 : f32 to vector<256x16xf32>
    %101 = arith.cmpf oge, %99, %100 : vector<256x16xf32>
    %cst_76 = arith.constant 0.00999999977 : f32
    %102 = vector.broadcast %cst_76 : f32 to vector<256x16xf32>
    %103 = arith.mulf %102, %99 : vector<256x16xf32>
    %104 = arith.select %101, %99, %103 : vector<256x16xi1>, vector<256x16xf32>
    %c24_77 = arith.constant 24 : index
    %c0_78 = arith.constant 0 : index
    %105 = vector.load %arg15[%c24_77, %c0_78] : memref<304x32xf32, #tpu.memory_space<vmem>>, vector<256x16xf32>
    tpu.vector_store %arg15[%c24_77, %c0_78], %104 {strides = array<i32>} : memref<304x32xf32, #tpu.memory_space<vmem>>, vector<256x16xf32>,
    %c24_79 = arith.constant 24 : index
    %c0_80 = arith.constant 0 : index
    %106 = tpu.strided_load %arg15[%c24_79, %c0_80] {strides = array<i32: 2, 1>} : memref<304x32xf32, #tpu.memory_space<vmem>>, vector<8x16xf32>
    %c25_81 = arith.constant 25 : index
    %c0_82 = arith.constant 0 : index
    %107 = tpu.strided_load %arg15[%c25_81, %c0_82] {strides = array<i32: 2, 1>} : memref<304x32xf32, #tpu.memory_space<vmem>>, vector<8x16xf32>
    %108 = arith.addf %106, %107 : vector<8x16xf32>
    %c40_83 = arith.constant 40 : index
    %c0_84 = arith.constant 0 : index
    %109 = tpu.strided_load %arg15[%c40_83, %c0_84] {strides = array<i32: 2, 1>} : memref<304x32xf32, #tpu.memory_space<vmem>>, vector<8x16xf32>
    %110 = arith.addf %108, %109 : vector<8x16xf32>
    %c41_85 = arith.constant 41 : index
    %c0_86 = arith.constant 0 : index
    %111 = tpu.strided_load %arg15[%c41_85, %c0_86] {strides = array<i32: 2, 1>} : memref<304x32xf32, #tpu.memory_space<vmem>>, vector<8x16xf32>
    %112 = arith.addf %110, %111 : vector<8x16xf32>
    %c56 = arith.constant 56 : index
    %c0_87 = arith.constant 0 : index
    %113 = tpu.strided_load %arg15[%c56, %c0_87] {strides = array<i32: 2, 1>} : memref<304x32xf32, #tpu.memory_space<vmem>>, vector<8x16xf32>
    %c57 = arith.constant 57 : index
    %c0_88 = arith.constant 0 : index
    %114 = tpu.strided_load %arg15[%c57, %c0_88] {strides = array<i32: 2, 1>} : memref<304x32xf32, #tpu.memory_space<vmem>>, vector<8x16xf32>
    %115 = arith.addf %113, %114 : vector<8x16xf32>
    %c72 = arith.constant 72 : index
    %c0_89 = arith.constant 0 : index
    %116 = tpu.strided_load %arg15[%c72, %c0_89] {strides = array<i32: 2, 1>} : memref<304x32xf32, #tpu.memory_space<vmem>>, vector<8x16xf32>
    %117 = arith.addf %115, %116 : vector<8x16xf32>
    %c73 = arith.constant 73 : index
    %c0_90 = arith.constant 0 : index
    %118 = tpu.strided_load %arg15[%c73, %c0_90] {strides = array<i32: 2, 1>} : memref<304x32xf32, #tpu.memory_space<vmem>>, vector<8x16xf32>
    %119 = arith.addf %117, %118 : vector<8x16xf32>
    %c88 = arith.constant 88 : index
    %c0_91 = arith.constant 0 : index
    %120 = tpu.strided_load %arg15[%c88, %c0_91] {strides = array<i32: 2, 1>} : memref<304x32xf32, #tpu.memory_space<vmem>>, vector<8x16xf32>
    %c89 = arith.constant 89 : index
    %c0_92 = arith.constant 0 : index
    %121 = tpu.strided_load %arg15[%c89, %c0_92] {strides = array<i32: 2, 1>} : memref<304x32xf32, #tpu.memory_space<vmem>>, vector<8x16xf32>
    %122 = arith.addf %120, %121 : vector<8x16xf32>
    %c104 = arith.constant 104 : index
    %c0_93 = arith.constant 0 : index
    %123 = tpu.strided_load %arg15[%c104, %c0_93] {strides = array<i32: 2, 1>} : memref<304x32xf32, #tpu.memory_space<vmem>>, vector<8x16xf32>
    %124 = arith.addf %122, %123 : vector<8x16xf32>
    %c105 = arith.constant 105 : index
    %c0_94 = arith.constant 0 : index
    %125 = tpu.strided_load %arg15[%c105, %c0_94] {strides = array<i32: 2, 1>} : memref<304x32xf32, #tpu.memory_space<vmem>>, vector<8x16xf32>
    %126 = arith.addf %124, %125 : vector<8x16xf32>
    %c120 = arith.constant 120 : index
    %c0_95 = arith.constant 0 : index
    %127 = tpu.strided_load %arg15[%c120, %c0_95] {strides = array<i32: 2, 1>} : memref<304x32xf32, #tpu.memory_space<vmem>>, vector<8x16xf32>
    %c121 = arith.constant 121 : index
    %c0_96 = arith.constant 0 : index
    %128 = tpu.strided_load %arg15[%c121, %c0_96] {strides = array<i32: 2, 1>} : memref<304x32xf32, #tpu.memory_space<vmem>>, vector<8x16xf32>
    %129 = arith.addf %127, %128 : vector<8x16xf32>
    %c136 = arith.constant 136 : index
    %c0_97 = arith.constant 0 : index
    %130 = tpu.strided_load %arg15[%c136, %c0_97] {strides = array<i32: 2, 1>} : memref<304x32xf32, #tpu.memory_space<vmem>>, vector<8x16xf32>
    %131 = arith.addf %129, %130 : vector<8x16xf32>
    %c137 = arith.constant 137 : index
    %c0_98 = arith.constant 0 : index
    %132 = tpu.strided_load %arg15[%c137, %c0_98] {strides = array<i32: 2, 1>} : memref<304x32xf32, #tpu.memory_space<vmem>>, vector<8x16xf32>
    %133 = arith.addf %131, %132 : vector<8x16xf32>
    %c152 = arith.constant 152 : index
    %c0_99 = arith.constant 0 : index
    %134 = tpu.strided_load %arg15[%c152, %c0_99] {strides = array<i32: 2, 1>} : memref<304x32xf32, #tpu.memory_space<vmem>>, vector<8x16xf32>
    %c153 = arith.constant 153 : index
    %c0_100 = arith.constant 0 : index
    %135 = tpu.strided_load %arg15[%c153, %c0_100] {strides = array<i32: 2, 1>} : memref<304x32xf32, #tpu.memory_space<vmem>>, vector<8x16xf32>
    %136 = arith.addf %134, %135 : vector<8x16xf32>
    %c168 = arith.constant 168 : index
    %c0_101 = arith.constant 0 : index
    %137 = tpu.strided_load %arg15[%c168, %c0_101] {strides = array<i32: 2, 1>} : memref<304x32xf32, #tpu.memory_space<vmem>>, vector<8x16xf32>
    %138 = arith.addf %136, %137 : vector<8x16xf32>
    %c169 = arith.constant 169 : index
    %c0_102 = arith.constant 0 : index
    %139 = tpu.strided_load %arg15[%c169, %c0_102] {strides = array<i32: 2, 1>} : memref<304x32xf32, #tpu.memory_space<vmem>>, vector<8x16xf32>
    %140 = arith.addf %138, %139 : vector<8x16xf32>
    %c184 = arith.constant 184 : index
    %c0_103 = arith.constant 0 : index
    %141 = tpu.strided_load %arg15[%c184, %c0_103] {strides = array<i32: 2, 1>} : memref<304x32xf32, #tpu.memory_space<vmem>>, vector<8x16xf32>
    %c185 = arith.constant 185 : index
    %c0_104 = arith.constant 0 : index
    %142 = tpu.strided_load %arg15[%c185, %c0_104] {strides = array<i32: 2, 1>} : memref<304x32xf32, #tpu.memory_space<vmem>>, vector<8x16xf32>
    %143 = arith.addf %141, %142 : vector<8x16xf32>
    %c200 = arith.constant 200 : index
    %c0_105 = arith.constant 0 : index
    %144 = tpu.strided_load %arg15[%c200, %c0_105] {strides = array<i32: 2, 1>} : memref<304x32xf32, #tpu.memory_space<vmem>>, vector<8x16xf32>
    %145 = arith.addf %143, %144 : vector<8x16xf32>
    %c201 = arith.constant 201 : index
    %c0_106 = arith.constant 0 : index
    %146 = tpu.strided_load %arg15[%c201, %c0_106] {strides = array<i32: 2, 1>} : memref<304x32xf32, #tpu.memory_space<vmem>>, vector<8x16xf32>
    %147 = arith.addf %145, %146 : vector<8x16xf32>
    %c216 = arith.constant 216 : index
    %c0_107 = arith.constant 0 : index
    %148 = tpu.strided_load %arg15[%c216, %c0_107] {strides = array<i32: 2, 1>} : memref<304x32xf32, #tpu.memory_space<vmem>>, vector<8x16xf32>
    %c217 = arith.constant 217 : index
    %c0_108 = arith.constant 0 : index
    %149 = tpu.strided_load %arg15[%c217, %c0_108] {strides = array<i32: 2, 1>} : memref<304x32xf32, #tpu.memory_space<vmem>>, vector<8x16xf32>
    %150 = arith.addf %148, %149 : vector<8x16xf32>
    %c232 = arith.constant 232 : index
    %c0_109 = arith.constant 0 : index
    %151 = tpu.strided_load %arg15[%c232, %c0_109] {strides = array<i32: 2, 1>} : memref<304x32xf32, #tpu.memory_space<vmem>>, vector<8x16xf32>
    %152 = arith.addf %150, %151 : vector<8x16xf32>
    %c233 = arith.constant 233 : index
    %c0_110 = arith.constant 0 : index
    %153 = tpu.strided_load %arg15[%c233, %c0_110] {strides = array<i32: 2, 1>} : memref<304x32xf32, #tpu.memory_space<vmem>>, vector<8x16xf32>
    %154 = arith.addf %152, %153 : vector<8x16xf32>
    %c248 = arith.constant 248 : index
    %c0_111 = arith.constant 0 : index
    %155 = tpu.strided_load %arg15[%c248, %c0_111] {strides = array<i32: 2, 1>} : memref<304x32xf32, #tpu.memory_space<vmem>>, vector<8x16xf32>
    %c249 = arith.constant 249 : index
    %c0_112 = arith.constant 0 : index
    %156 = tpu.strided_load %arg15[%c249, %c0_112] {strides = array<i32: 2, 1>} : memref<304x32xf32, #tpu.memory_space<vmem>>, vector<8x16xf32>
    %157 = arith.addf %155, %156 : vector<8x16xf32>
    %c264 = arith.constant 264 : index
    %c0_113 = arith.constant 0 : index
    %158 = tpu.strided_load %arg15[%c264, %c0_113] {strides = array<i32: 2, 1>} : memref<304x32xf32, #tpu.memory_space<vmem>>, vector<8x16xf32>
    %159 = arith.addf %157, %158 : vector<8x16xf32>
    %c265 = arith.constant 265 : index
    %c0_114 = arith.constant 0 : index
    %160 = tpu.strided_load %arg15[%c265, %c0_114] {strides = array<i32: 2, 1>} : memref<304x32xf32, #tpu.memory_space<vmem>>, vector<8x16xf32>
    %161 = arith.addf %159, %160 : vector<8x16xf32>
    %162 = tpu.concatenate %112, %119, %126, %133, %140, %147, %154, %161 in 0 : vector<8x16xf32>, vector<8x16xf32>, vector<8x16xf32>, vector<8x16xf32>, vector<8x16xf32>, vector<8x16xf32>, vector<8x16xf32>, vector<8x16xf32> -> vector<64x16xf32>
    %cst_115 = arith.constant 2.500000e-01 : f32
    %163 = vector.broadcast %cst_115 : f32 to vector<64x16xf32>
    %164 = arith.mulf %162, %163 : vector<64x16xf32>
    %cst_116 = arith.constant 0.000000e+00 : f32
    %165 = vector.broadcast %cst_116 : f32 to vector<24x16xf32>
    %c88_117 = arith.constant 88 : index
    %c0_118 = arith.constant 0 : index
    %166 = vector.load %arg15[%c88_117, %c0_118] : memref<304x32xf32, #tpu.memory_space<vmem>>, vector<24x16xf32>
    tpu.vector_store %arg15[%c88_117, %c0_118], %165 {strides = array<i32>} : memref<304x32xf32, #tpu.memory_space<vmem>>, vector<24x16xf32>,
    %c24_119 = arith.constant 24 : index
    %c0_120 = arith.constant 0 : index
    %167 = vector.load %arg15[%c24_119, %c0_120] : memref<304x32xf32, #tpu.memory_space<vmem>>, vector<64x16xf32>
    tpu.vector_store %arg15[%c24_119, %c0_120], %164 {strides = array<i32>} : memref<304x32xf32, #tpu.memory_space<vmem>>, vector<64x16xf32>,
    %168 = tpu.iota {dimensions = array<i32: 0>} : vector<64x16xi32>
    %c8_i32 = arith.constant 8 : i32
    %c0_i32_121 = arith.constant 0 : i32
    %169 = arith.cmpi eq, %c8_i32, %c0_i32_121 : i32
    %c1_i32_122 = arith.constant 1 : i32
    %170 = arith.select %169, %c1_i32_122, %c8_i32 : i32
    %171 = vector.broadcast %170 : i32 to vector<64x16xi32>
    %172 = arith.remsi %168, %171 : vector<64x16xi32>
    %c0_i32_123 = arith.constant 0 : i32
    %173 = vector.broadcast %c0_i32_123 : i32 to vector<64x16xi32>
    %174 = arith.cmpi ne, %172, %173 : vector<64x16xi32>
    %c0_i32_124 = arith.constant 0 : i32
    %175 = vector.broadcast %c0_i32_124 : i32 to vector<64x16xi32>
    %176 = arith.cmpi slt, %172, %175 : vector<64x16xi32>
    %c0_i32_125 = arith.constant 0 : i32
    %177 = arith.cmpi slt, %170, %c0_i32_125 : i32
    %178 = vector.broadcast %177 : i1 to vector<64x16xi1>
    %179 = vector.broadcast %178 : vector<64x16xi1> to vector<64x16xi1>
    %180 = arith.xori %176, %179 : vector<64x16xi1>
    %181 = arith.andi %180, %174 : vector<64x16xi1>
    %182 = vector.broadcast %170 : i32 to vector<64x16xi32>
    %183 = arith.addi %172, %182 : vector<64x16xi32>
    %184 = arith.select %181, %183, %172 : vector<64x16xi1>, vector<64x16xi32>
    %c0_i32_126 = arith.constant 0 : i32
    %185 = vector.broadcast %c0_i32_126 : i32 to vector<64x16xi32>
    %186 = arith.cmpi sgt, %184, %185 : vector<64x16xi32>
    %c7_i32 = arith.constant 7 : i32
    %187 = vector.broadcast %c7_i32 : i32 to vector<64x16xi32>
    %188 = arith.cmpi slt, %184, %187 : vector<64x16xi32>
    %c15 = arith.constant 15 : index
    %c0_127 = arith.constant 0 : index
    %189 = vector.load %arg15[%c15, %c0_127] : memref<304x32xf32, #tpu.memory_space<vmem>>, vector<64x16xf32>
    %cst_128 = arith.constant 0.000000e+00 : f32
    %190 = vector.broadcast %cst_128 : f32 to vector<64x16xf32>
    %191 = arith.select %186, %189, %190 : vector<64x16xi1>, vector<64x16xf32>
    %c16 = arith.constant 16 : index
    %c0_129 = arith.constant 0 : index
    %192 = vector.load %arg15[%c16, %c0_129] : memref<304x32xf32, #tpu.memory_space<vmem>>, vector<64x16xf32>
    %c17 = arith.constant 17 : index
    %c0_130 = arith.constant 0 : index
    %193 = vector.load %arg15[%c17, %c0_130] : memref<304x32xf32, #tpu.memory_space<vmem>>, vector<64x16xf32>
    %cst_131 = arith.constant 0.000000e+00 : f32
    %194 = vector.broadcast %cst_131 : f32 to vector<64x16xf32>
    %195 = arith.select %188, %193, %194 : vector<64x16xi1>, vector<64x16xf32>
    %c23_132 = arith.constant 23 : index
    %c0_133 = arith.constant 0 : index
    %196 = vector.load %arg15[%c23_132, %c0_133] : memref<304x32xf32, #tpu.memory_space<vmem>>, vector<64x16xf32>
    %cst_134 = arith.constant 0.000000e+00 : f32
    %197 = vector.broadcast %cst_134 : f32 to vector<64x16xf32>
    %198 = arith.select %186, %196, %197 : vector<64x16xi1>, vector<64x16xf32>
    %c24_135 = arith.constant 24 : index
    %c0_136 = arith.constant 0 : index
    %199 = vector.load %arg15[%c24_135, %c0_136] : memref<304x32xf32, #tpu.memory_space<vmem>>, vector<64x16xf32>
    %c25_137 = arith.constant 25 : index
    %c0_138 = arith.constant 0 : index
    %200 = vector.load %arg15[%c25_137, %c0_138] : memref<304x32xf32, #tpu.memory_space<vmem>>, vector<64x16xf32>
    %cst_139 = arith.constant 0.000000e+00 : f32
    %201 = vector.broadcast %cst_139 : f32 to vector<64x16xf32>
    %202 = arith.select %188, %200, %201 : vector<64x16xi1>, vector<64x16xf32>
    %c31 = arith.constant 31 : index
    %c0_140 = arith.constant 0 : index
    %203 = vector.load %arg15[%c31, %c0_140] : memref<304x32xf32, #tpu.memory_space<vmem>>, vector<64x16xf32>
    %cst_141 = arith.constant 0.000000e+00 : f32
    %204 = vector.broadcast %cst_141 : f32 to vector<64x16xf32>
    %205 = arith.select %186, %203, %204 : vector<64x16xi1>, vector<64x16xf32>
    %c32 = arith.constant 32 : index
    %c0_142 = arith.constant 0 : index
    %206 = vector.load %arg15[%c32, %c0_142] : memref<304x32xf32, #tpu.memory_space<vmem>>, vector<64x16xf32>
    %c33 = arith.constant 33 : index
    %c0_143 = arith.constant 0 : index
    %207 = vector.load %arg15[%c33, %c0_143] : memref<304x32xf32, #tpu.memory_space<vmem>>, vector<64x16xf32>
    %cst_144 = arith.constant 0.000000e+00 : f32
    %208 = vector.broadcast %cst_144 : f32 to vector<64x16xf32>
    %209 = arith.select %188, %207, %208 : vector<64x16xi1>, vector<64x16xf32>
    %210 = tpu.concatenate %191, %192, %195, %198, %199, %202, %205, %206, %209 in 1 : vector<64x16xf32>, vector<64x16xf32>, vector<64x16xf32>, vector<64x16xf32>, vector<64x16xf32>, vector<64x16xf32>, vector<64x16xf32>, vector<64x16xf32>, vector<64x16xf32> -> vector<64x144xf32>
    %c0_145 = arith.constant 0 : index
    %c0_146 = arith.constant 0 : index
    %211 = vector.load %arg8[%c0_145, %c0_146] : memref<144x16xf32, #tpu.memory_space<vmem>>, vector<144x16xf32>
    %cst_147 = arith.constant dense<0.000000e+00> : vector<64x16xf32>
    %212 = tpu.matmul %210, %211, %cst_147 {dimension_numbers = #tpu.dot_dimension_numbers<[1], [0], [0], [1], [0, 0, 1, 1], [], []>} : vector<64x144xf32>, vector<144x16xf32>, vector<64x16xf32> -> vector<64x16xf32>
    %c0_148 = arith.constant 0 : index
    %c0_149 = arith.constant 0 : index
    %213 = vector.load %arg9[%c0_148, %c0_149] : memref<1x16xf32, #tpu.memory_space<vmem>>, vector<1x16xf32>
    %214 = vector.broadcast %213 : vector<1x16xf32> to vector<64x16xf32>
    %215 = arith.addf %212, %214 : vector<64x16xf32>
    %cst_150 = arith.constant 0.000000e+00 : f32
    %216 = vector.broadcast %cst_150 : f32 to vector<64x16xf32>
    %217 = arith.cmpf oge, %215, %216 : vector<64x16xf32>
    %cst_151 = arith.constant 0.00999999977 : f32
    %218 = vector.broadcast %cst_151 : f32 to vector<64x16xf32>
    %219 = arith.mulf %218, %215 : vector<64x16xf32>
    %220 = arith.select %217, %215, %219 : vector<64x16xi1>, vector<64x16xf32>
    %cst_152 = arith.constant 0.000000e+00 : f32
    %221 = vector.broadcast %cst_152 : f32 to vector<24x16xf32>
    %c88_153 = arith.constant 88 : index
    %c0_154 = arith.constant 0 : index
    %222 = vector.load %arg15[%c88_153, %c0_154] : memref<304x32xf32, #tpu.memory_space<vmem>>, vector<24x16xf32>
    tpu.vector_store %arg15[%c88_153, %c0_154], %221 {strides = array<i32>} : memref<304x32xf32, #tpu.memory_space<vmem>>, vector<24x16xf32>,
    %c24_155 = arith.constant 24 : index
    %c0_156 = arith.constant 0 : index
    %223 = vector.load %arg15[%c24_155, %c0_156] : memref<304x32xf32, #tpu.memory_space<vmem>>, vector<64x16xf32>
    tpu.vector_store %arg15[%c24_155, %c0_156], %220 {strides = array<i32>} : memref<304x32xf32, #tpu.memory_space<vmem>>, vector<64x16xf32>,
    %c15_157 = arith.constant 15 : index
    %c0_158 = arith.constant 0 : index
    %224 = vector.load %arg15[%c15_157, %c0_158] : memref<304x32xf32, #tpu.memory_space<vmem>>, vector<64x16xf32>
    %cst_159 = arith.constant 0.000000e+00 : f32
    %225 = vector.broadcast %cst_159 : f32 to vector<64x16xf32>
    %226 = arith.select %186, %224, %225 : vector<64x16xi1>, vector<64x16xf32>
    %c16_160 = arith.constant 16 : index
    %c0_161 = arith.constant 0 : index
    %227 = vector.load %arg15[%c16_160, %c0_161] : memref<304x32xf32, #tpu.memory_space<vmem>>, vector<64x16xf32>
    %c17_162 = arith.constant 17 : index
    %c0_163 = arith.constant 0 : index
    %228 = vector.load %arg15[%c17_162, %c0_163] : memref<304x32xf32, #tpu.memory_space<vmem>>, vector<64x16xf32>
    %cst_164 = arith.constant 0.000000e+00 : f32
    %229 = vector.broadcast %cst_164 : f32 to vector<64x16xf32>
    %230 = arith.select %188, %228, %229 : vector<64x16xi1>, vector<64x16xf32>
    %c23_165 = arith.constant 23 : index
    %c0_166 = arith.constant 0 : index
    %231 = vector.load %arg15[%c23_165, %c0_166] : memref<304x32xf32, #tpu.memory_space<vmem>>, vector<64x16xf32>
    %cst_167 = arith.constant 0.000000e+00 : f32
    %232 = vector.broadcast %cst_167 : f32 to vector<64x16xf32>
    %233 = arith.select %186, %231, %232 : vector<64x16xi1>, vector<64x16xf32>
    %c24_168 = arith.constant 24 : index
    %c0_169 = arith.constant 0 : index
    %234 = vector.load %arg15[%c24_168, %c0_169] : memref<304x32xf32, #tpu.memory_space<vmem>>, vector<64x16xf32>
    %c25_170 = arith.constant 25 : index
    %c0_171 = arith.constant 0 : index
    %235 = vector.load %arg15[%c25_170, %c0_171] : memref<304x32xf32, #tpu.memory_space<vmem>>, vector<64x16xf32>
    %cst_172 = arith.constant 0.000000e+00 : f32
    %236 = vector.broadcast %cst_172 : f32 to vector<64x16xf32>
    %237 = arith.select %188, %235, %236 : vector<64x16xi1>, vector<64x16xf32>
    %c31_173 = arith.constant 31 : index
    %c0_174 = arith.constant 0 : index
    %238 = vector.load %arg15[%c31_173, %c0_174] : memref<304x32xf32, #tpu.memory_space<vmem>>, vector<64x16xf32>
    %cst_175 = arith.constant 0.000000e+00 : f32
    %239 = vector.broadcast %cst_175 : f32 to vector<64x16xf32>
    %240 = arith.select %186, %238, %239 : vector<64x16xi1>, vector<64x16xf32>
    %c32_176 = arith.constant 32 : index
    %c0_177 = arith.constant 0 : index
    %241 = vector.load %arg15[%c32_176, %c0_177] : memref<304x32xf32, #tpu.memory_space<vmem>>, vector<64x16xf32>
    %c33_178 = arith.constant 33 : index
    %c0_179 = arith.constant 0 : index
    %242 = vector.load %arg15[%c33_178, %c0_179] : memref<304x32xf32, #tpu.memory_space<vmem>>, vector<64x16xf32>
    %cst_180 = arith.constant 0.000000e+00 : f32
    %243 = vector.broadcast %cst_180 : f32 to vector<64x16xf32>
    %244 = arith.select %188, %242, %243 : vector<64x16xi1>, vector<64x16xf32>
    %245 = tpu.concatenate %226, %227, %230, %233, %234, %237, %240, %241, %244 in 1 : vector<64x16xf32>, vector<64x16xf32>, vector<64x16xf32>, vector<64x16xf32>, vector<64x16xf32>, vector<64x16xf32>, vector<64x16xf32>, vector<64x16xf32>, vector<64x16xf32> -> vector<64x144xf32>
    %c0_181 = arith.constant 0 : index
    %c0_182 = arith.constant 0 : index
    %246 = vector.load %arg10[%c0_181, %c0_182] : memref<144x32xf32, #tpu.memory_space<vmem>>, vector<144x32xf32>
    %cst_183 = arith.constant dense<0.000000e+00> : vector<64x32xf32>
    %247 = tpu.matmul %245, %246, %cst_183 {dimension_numbers = #tpu.dot_dimension_numbers<[1], [0], [0], [1], [0, 0, 1, 1], [], []>} : vector<64x144xf32>, vector<144x32xf32>, vector<64x32xf32> -> vector<64x32xf32>
    %c0_184 = arith.constant 0 : index
    %c0_185 = arith.constant 0 : index
    %248 = vector.load %arg11[%c0_184, %c0_185] : memref<1x32xf32, #tpu.memory_space<vmem>>, vector<1x32xf32>
    %249 = vector.broadcast %248 : vector<1x32xf32> to vector<64x32xf32>
    %250 = arith.addf %247, %249 : vector<64x32xf32>
    %cst_186 = arith.constant 0.000000e+00 : f32
    %251 = vector.broadcast %cst_186 : f32 to vector<64x32xf32>
    %252 = arith.cmpf oge, %250, %251 : vector<64x32xf32>
    %cst_187 = arith.constant 0.00999999977 : f32
    %253 = vector.broadcast %cst_187 : f32 to vector<64x32xf32>
    %254 = arith.mulf %253, %250 : vector<64x32xf32>
    %255 = arith.select %252, %250, %254 : vector<64x32xi1>, vector<64x32xf32>
    %c24_188 = arith.constant 24 : index
    %c0_189 = arith.constant 0 : index
    %256 = vector.load %arg15[%c24_188, %c0_189] : memref<304x32xf32, #tpu.memory_space<vmem>>, vector<64x32xf32>
    tpu.vector_store %arg15[%c24_188, %c0_189], %255 {strides = array<i32>} : memref<304x32xf32, #tpu.memory_space<vmem>>, vector<64x32xf32>,
    %c24_190 = arith.constant 24 : index
    %c0_191 = arith.constant 0 : index
    %257 = tpu.strided_load %arg15[%c24_190, %c0_191] {strides = array<i32: 2, 1>} : memref<304x32xf32, #tpu.memory_space<vmem>>, vector<4x32xf32>
    %c25_192 = arith.constant 25 : index
    %c0_193 = arith.constant 0 : index
    %258 = tpu.strided_load %arg15[%c25_192, %c0_193] {strides = array<i32: 2, 1>} : memref<304x32xf32, #tpu.memory_space<vmem>>, vector<4x32xf32>
    %259 = arith.addf %257, %258 : vector<4x32xf32>
    %c32_194 = arith.constant 32 : index
    %c0_195 = arith.constant 0 : index
    %260 = tpu.strided_load %arg15[%c32_194, %c0_195] {strides = array<i32: 2, 1>} : memref<304x32xf32, #tpu.memory_space<vmem>>, vector<4x32xf32>
    %261 = arith.addf %259, %260 : vector<4x32xf32>
    %c33_196 = arith.constant 33 : index
    %c0_197 = arith.constant 0 : index
    %262 = tpu.strided_load %arg15[%c33_196, %c0_197] {strides = array<i32: 2, 1>} : memref<304x32xf32, #tpu.memory_space<vmem>>, vector<4x32xf32>
    %263 = arith.addf %261, %262 : vector<4x32xf32>
    %c40_198 = arith.constant 40 : index
    %c0_199 = arith.constant 0 : index
    %264 = tpu.strided_load %arg15[%c40_198, %c0_199] {strides = array<i32: 2, 1>} : memref<304x32xf32, #tpu.memory_space<vmem>>, vector<4x32xf32>
    %c41_200 = arith.constant 41 : index
    %c0_201 = arith.constant 0 : index
    %265 = tpu.strided_load %arg15[%c41_200, %c0_201] {strides = array<i32: 2, 1>} : memref<304x32xf32, #tpu.memory_space<vmem>>, vector<4x32xf32>
    %266 = arith.addf %264, %265 : vector<4x32xf32>
    %c48 = arith.constant 48 : index
    %c0_202 = arith.constant 0 : index
    %267 = tpu.strided_load %arg15[%c48, %c0_202] {strides = array<i32: 2, 1>} : memref<304x32xf32, #tpu.memory_space<vmem>>, vector<4x32xf32>
    %268 = arith.addf %266, %267 : vector<4x32xf32>
    %c49 = arith.constant 49 : index
    %c0_203 = arith.constant 0 : index
    %269 = tpu.strided_load %arg15[%c49, %c0_203] {strides = array<i32: 2, 1>} : memref<304x32xf32, #tpu.memory_space<vmem>>, vector<4x32xf32>
    %270 = arith.addf %268, %269 : vector<4x32xf32>
    %c56_204 = arith.constant 56 : index
    %c0_205 = arith.constant 0 : index
    %271 = tpu.strided_load %arg15[%c56_204, %c0_205] {strides = array<i32: 2, 1>} : memref<304x32xf32, #tpu.memory_space<vmem>>, vector<4x32xf32>
    %c57_206 = arith.constant 57 : index
    %c0_207 = arith.constant 0 : index
    %272 = tpu.strided_load %arg15[%c57_206, %c0_207] {strides = array<i32: 2, 1>} : memref<304x32xf32, #tpu.memory_space<vmem>>, vector<4x32xf32>
    %273 = arith.addf %271, %272 : vector<4x32xf32>
    %c64 = arith.constant 64 : index
    %c0_208 = arith.constant 0 : index
    %274 = tpu.strided_load %arg15[%c64, %c0_208] {strides = array<i32: 2, 1>} : memref<304x32xf32, #tpu.memory_space<vmem>>, vector<4x32xf32>
    %275 = arith.addf %273, %274 : vector<4x32xf32>
    %c65 = arith.constant 65 : index
    %c0_209 = arith.constant 0 : index
    %276 = tpu.strided_load %arg15[%c65, %c0_209] {strides = array<i32: 2, 1>} : memref<304x32xf32, #tpu.memory_space<vmem>>, vector<4x32xf32>
    %277 = arith.addf %275, %276 : vector<4x32xf32>
    %c72_210 = arith.constant 72 : index
    %c0_211 = arith.constant 0 : index
    %278 = tpu.strided_load %arg15[%c72_210, %c0_211] {strides = array<i32: 2, 1>} : memref<304x32xf32, #tpu.memory_space<vmem>>, vector<4x32xf32>
    %c73_212 = arith.constant 73 : index
    %c0_213 = arith.constant 0 : index
    %279 = tpu.strided_load %arg15[%c73_212, %c0_213] {strides = array<i32: 2, 1>} : memref<304x32xf32, #tpu.memory_space<vmem>>, vector<4x32xf32>
    %280 = arith.addf %278, %279 : vector<4x32xf32>
    %c80 = arith.constant 80 : index
    %c0_214 = arith.constant 0 : index
    %281 = tpu.strided_load %arg15[%c80, %c0_214] {strides = array<i32: 2, 1>} : memref<304x32xf32, #tpu.memory_space<vmem>>, vector<4x32xf32>
    %282 = arith.addf %280, %281 : vector<4x32xf32>
    %c81 = arith.constant 81 : index
    %c0_215 = arith.constant 0 : index
    %283 = tpu.strided_load %arg15[%c81, %c0_215] {strides = array<i32: 2, 1>} : memref<304x32xf32, #tpu.memory_space<vmem>>, vector<4x32xf32>
    %284 = arith.addf %282, %283 : vector<4x32xf32>
    %285 = tpu.concatenate %263, %270, %277, %284 in 0 : vector<4x32xf32>, vector<4x32xf32>, vector<4x32xf32>, vector<4x32xf32> -> vector<16x32xf32>
    %cst_216 = arith.constant 2.500000e-01 : f32
    %286 = vector.broadcast %cst_216 : f32 to vector<16x32xf32>
    %287 = arith.mulf %285, %286 : vector<16x32xf32>
    %cst_217 = arith.constant 0.000000e+00 : f32
    %288 = vector.broadcast %cst_217 : f32 to vector<24x32xf32>
    %c40_218 = arith.constant 40 : index
    %c0_219 = arith.constant 0 : index
    %289 = vector.load %arg15[%c40_218, %c0_219] : memref<304x32xf32, #tpu.memory_space<vmem>>, vector<24x32xf32>
    tpu.vector_store %arg15[%c40_218, %c0_219], %288 {strides = array<i32>} : memref<304x32xf32, #tpu.memory_space<vmem>>, vector<24x32xf32>,
    %c24_220 = arith.constant 24 : index
    %c0_221 = arith.constant 0 : index
    %290 = vector.load %arg15[%c24_220, %c0_221] : memref<304x32xf32, #tpu.memory_space<vmem>>, vector<16x32xf32>
    tpu.vector_store %arg15[%c24_220, %c0_221], %287 {strides = array<i32>} : memref<304x32xf32, #tpu.memory_space<vmem>>, vector<16x32xf32>,
    %291 = tpu.iota {dimensions = array<i32: 0>} : vector<16x32xi32>
    %c4_i32 = arith.constant 4 : i32
    %c0_i32_222 = arith.constant 0 : i32
    %292 = arith.cmpi eq, %c4_i32, %c0_i32_222 : i32
    %c1_i32_223 = arith.constant 1 : i32
    %293 = arith.select %292, %c1_i32_223, %c4_i32 : i32
    %294 = vector.broadcast %293 : i32 to vector<16x32xi32>
    %295 = arith.remsi %291, %294 : vector<16x32xi32>
    %c0_i32_224 = arith.constant 0 : i32
    %296 = vector.broadcast %c0_i32_224 : i32 to vector<16x32xi32>
    %297 = arith.cmpi ne, %295, %296 : vector<16x32xi32>
    %c0_i32_225 = arith.constant 0 : i32
    %298 = vector.broadcast %c0_i32_225 : i32 to vector<16x32xi32>
    %299 = arith.cmpi slt, %295, %298 : vector<16x32xi32>
    %c0_i32_226 = arith.constant 0 : i32
    %300 = arith.cmpi slt, %293, %c0_i32_226 : i32
    %301 = vector.broadcast %300 : i1 to vector<16x32xi1>
    %302 = vector.broadcast %301 : vector<16x32xi1> to vector<16x32xi1>
    %303 = arith.xori %299, %302 : vector<16x32xi1>
    %304 = arith.andi %303, %297 : vector<16x32xi1>
    %305 = vector.broadcast %293 : i32 to vector<16x32xi32>
    %306 = arith.addi %295, %305 : vector<16x32xi32>
    %307 = arith.select %304, %306, %295 : vector<16x32xi1>, vector<16x32xi32>
    %c0_i32_227 = arith.constant 0 : i32
    %308 = vector.broadcast %c0_i32_227 : i32 to vector<16x32xi32>
    %309 = arith.cmpi sgt, %307, %308 : vector<16x32xi32>
    %c3_i32 = arith.constant 3 : i32
    %310 = vector.broadcast %c3_i32 : i32 to vector<16x32xi32>
    %311 = arith.cmpi slt, %307, %310 : vector<16x32xi32>
    %c19 = arith.constant 19 : index
    %c0_228 = arith.constant 0 : index
    %312 = vector.load %arg15[%c19, %c0_228] : memref<304x32xf32, #tpu.memory_space<vmem>>, vector<16x32xf32>
    %cst_229 = arith.constant 0.000000e+00 : f32
    %313 = vector.broadcast %cst_229 : f32 to vector<16x32xf32>
    %314 = arith.select %309, %312, %313 : vector<16x32xi1>, vector<16x32xf32>
    %c20 = arith.constant 20 : index
    %c0_230 = arith.constant 0 : index
    %315 = vector.load %arg15[%c20, %c0_230] : memref<304x32xf32, #tpu.memory_space<vmem>>, vector<16x32xf32>
    %c21 = arith.constant 21 : index
    %c0_231 = arith.constant 0 : index
    %316 = vector.load %arg15[%c21, %c0_231] : memref<304x32xf32, #tpu.memory_space<vmem>>, vector<16x32xf32>
    %cst_232 = arith.constant 0.000000e+00 : f32
    %317 = vector.broadcast %cst_232 : f32 to vector<16x32xf32>
    %318 = arith.select %311, %316, %317 : vector<16x32xi1>, vector<16x32xf32>
    %c23_233 = arith.constant 23 : index
    %c0_234 = arith.constant 0 : index
    %319 = vector.load %arg15[%c23_233, %c0_234] : memref<304x32xf32, #tpu.memory_space<vmem>>, vector<16x32xf32>
    %cst_235 = arith.constant 0.000000e+00 : f32
    %320 = vector.broadcast %cst_235 : f32 to vector<16x32xf32>
    %321 = arith.select %309, %319, %320 : vector<16x32xi1>, vector<16x32xf32>
    %c24_236 = arith.constant 24 : index
    %c0_237 = arith.constant 0 : index
    %322 = vector.load %arg15[%c24_236, %c0_237] : memref<304x32xf32, #tpu.memory_space<vmem>>, vector<16x32xf32>
    %c25_238 = arith.constant 25 : index
    %c0_239 = arith.constant 0 : index
    %323 = vector.load %arg15[%c25_238, %c0_239] : memref<304x32xf32, #tpu.memory_space<vmem>>, vector<16x32xf32>
    %cst_240 = arith.constant 0.000000e+00 : f32
    %324 = vector.broadcast %cst_240 : f32 to vector<16x32xf32>
    %325 = arith.select %311, %323, %324 : vector<16x32xi1>, vector<16x32xf32>
    %c27 = arith.constant 27 : index
    %c0_241 = arith.constant 0 : index
    %326 = vector.load %arg15[%c27, %c0_241] : memref<304x32xf32, #tpu.memory_space<vmem>>, vector<16x32xf32>
    %cst_242 = arith.constant 0.000000e+00 : f32
    %327 = vector.broadcast %cst_242 : f32 to vector<16x32xf32>
    %328 = arith.select %309, %326, %327 : vector<16x32xi1>, vector<16x32xf32>
    %c28 = arith.constant 28 : index
    %c0_243 = arith.constant 0 : index
    %329 = vector.load %arg15[%c28, %c0_243] : memref<304x32xf32, #tpu.memory_space<vmem>>, vector<16x32xf32>
    %c29 = arith.constant 29 : index
    %c0_244 = arith.constant 0 : index
    %330 = vector.load %arg15[%c29, %c0_244] : memref<304x32xf32, #tpu.memory_space<vmem>>, vector<16x32xf32>
    %cst_245 = arith.constant 0.000000e+00 : f32
    %331 = vector.broadcast %cst_245 : f32 to vector<16x32xf32>
    %332 = arith.select %311, %330, %331 : vector<16x32xi1>, vector<16x32xf32>
    %333 = tpu.concatenate %314, %315, %318, %321, %322, %325, %328, %329, %332 in 1 : vector<16x32xf32>, vector<16x32xf32>, vector<16x32xf32>, vector<16x32xf32>, vector<16x32xf32>, vector<16x32xf32>, vector<16x32xf32>, vector<16x32xf32>, vector<16x32xf32> -> vector<16x288xf32>
    %c0_246 = arith.constant 0 : index
    %c0_247 = arith.constant 0 : index
    %334 = vector.load %arg12[%c0_246, %c0_247] : memref<288x128xf32, #tpu.memory_space<vmem>>, vector<288x128xf32>
    %cst_248 = arith.constant dense<0.000000e+00> : vector<16x128xf32>
    %335 = tpu.matmul %333, %334, %cst_248 {dimension_numbers = #tpu.dot_dimension_numbers<[1], [0], [0], [1], [0, 0, 1, 1], [], []>} : vector<16x288xf32>, vector<288x128xf32>, vector<16x128xf32> -> vector<16x128xf32>
    %c0_249 = arith.constant 0 : index
    %c0_250 = arith.constant 0 : index
    %336 = vector.load %arg13[%c0_249, %c0_250] : memref<1x128xf32, #tpu.memory_space<vmem>>, vector<1x128xf32>
    %337 = vector.broadcast %336 : vector<1x128xf32> to vector<16x128xf32>
    %338 = arith.addf %335, %337 : vector<16x128xf32>
    %c0_251 = arith.constant 0 : index
    %c0_252 = arith.constant 0 : index
    %c0_253 = arith.constant 0 : index
    %339 = vector.load %arg14[%c0_251, %c0_252, %c0_253] : memref<1x16x128xf32, #tpu.memory_space<vmem>>, vector<1x16x128xf32>
    %340 = vector.shape_cast %339 : vector<1x16x128xf32> to vector<16x128xf32>
    %341 = vector.shape_cast %338 : vector<16x128xf32> to vector<1x16x128xf32>
    tpu.vector_store %arg14[%c0_251, %c0_252, %c0_253], %341 {strides = array<i32>} : memref<1x16x128xf32, #tpu.memory_space<vmem>>, vector<1x16x128xf32>,
    return
  }
  func.func @transform_0(%arg0: i32) -> (i32, i32, i32) {
    %c0_i32 = arith.constant 0 : i32
    %c0_i32_0 = arith.constant 0 : i32
    %c0_i32_1 = arith.constant 0 : i32
    return %arg0, %c0_i32, %c0_i32_0 : i32, i32, i32
  }
  func.func @transform_1(%arg0: i32) -> (i32, i32) {
    %c0_i32 = arith.constant 0 : i32
    %c0_i32_0 = arith.constant 0 : i32
    %c0_i32_1 = arith.constant 0 : i32
    return %c0_i32, %c0_i32_0 : i32, i32
  }
  func.func @transform_2(%arg0: i32) -> (i32, i32) {
    %c0_i32 = arith.constant 0 : i32
    %c0_i32_0 = arith.constant 0 : i32
    %c0_i32_1 = arith.constant 0 : i32
    return %c0_i32, %c0_i32_0 : i32, i32
  }
  func.func @transform_3(%arg0: i32) -> (i32, i32) {
    %c0_i32 = arith.constant 0 : i32
    %c0_i32_0 = arith.constant 0 : i32
    %c0_i32_1 = arith.constant 0 : i32
    return %c0_i32, %c0_i32_0 : i32, i32
  }
  func.func @transform_4(%arg0: i32) -> (i32, i32) {
    %c0_i32 = arith.constant 0 : i32
    %c0_i32_0 = arith.constant 0 : i32
    %c0_i32_1 = arith.constant 0 : i32
    return %c0_i32, %c0_i32_0 : i32, i32
  }
  func.func @transform_5(%arg0: i32) -> (i32, i32) {
    %c0_i32 = arith.constant 0 : i32
    %c0_i32_0 = arith.constant 0 : i32
    %c0_i32_1 = arith.constant 0 : i32
    return %c0_i32, %c0_i32_0 : i32, i32
  }
  func.func @transform_6(%arg0: i32) -> (i32, i32) {
    %c0_i32 = arith.constant 0 : i32
    %c0_i32_0 = arith.constant 0 : i32
    %c0_i32_1 = arith.constant 0 : i32
    return %c0_i32, %c0_i32_0 : i32, i32
  }
  func.func @transform_7(%arg0: i32) -> (i32, i32) {
    %c0_i32 = arith.constant 0 : i32
    %c0_i32_0 = arith.constant 0 : i32
    %c0_i32_1 = arith.constant 0 : i32
    return %c0_i32, %c0_i32_0 : i32, i32
  }
  func.func @transform_8(%arg0: i32) -> (i32, i32) {
    %c0_i32 = arith.constant 0 : i32
    %c0_i32_0 = arith.constant 0 : i32
    %c0_i32_1 = arith.constant 0 : i32
    return %c0_i32, %c0_i32_0 : i32, i32
  }
  func.func @transform_9(%arg0: i32) -> (i32, i32) {
    %c0_i32 = arith.constant 0 : i32
    %c0_i32_0 = arith.constant 0 : i32
    %c0_i32_1 = arith.constant 0 : i32
    return %c0_i32, %c0_i32_0 : i32, i32
  }
  func.func @transform_10(%arg0: i32) -> (i32, i32) {
    %c0_i32 = arith.constant 0 : i32
    %c0_i32_0 = arith.constant 0 : i32
    %c0_i32_1 = arith.constant 0 : i32
    return %c0_i32, %c0_i32_0 : i32, i32
  }
  func.func @transform_11(%arg0: i32) -> (i32, i32) {
    %c0_i32 = arith.constant 0 : i32
    %c0_i32_0 = arith.constant 0 : i32
    %c0_i32_1 = arith.constant 0 : i32
    return %c0_i32, %c0_i32_0 : i32, i32
  }
  func.func @transform_12(%arg0: i32) -> (i32, i32) {
    %c0_i32 = arith.constant 0 : i32
    %c0_i32_0 = arith.constant 0 : i32
    %c0_i32_1 = arith.constant 0 : i32
    return %c0_i32, %c0_i32_0 : i32, i32
  }
  func.func @transform_13(%arg0: i32) -> (i32, i32, i32) {
    %c0_i32 = arith.constant 0 : i32
    %c0_i32_0 = arith.constant 0 : i32
    %c0_i32_1 = arith.constant 0 : i32
    return %arg0, %c0_i32, %c0_i32_0 : i32, i32, i32
  }
}

</mosaic_0001>

<bundles_post_ra>
// kernel: tpu_custom_call.1
= control target key start
LH: loop header
LB: loop body
LE: loop exit
PB: predicated region body
PF: predicated region fallthrough
CT: control target
= control target key end

     0   :  { %s11903_s0 = inlined_call_operand.vmem [shape: f32[2,256,3], index: 0, kind: input, shape index: {}]   ;;  %s11904_s1 = inlined_call_operand.vmem [shape: f32[3,8], index: 1, kind: input, shape index: {}]   ;;  %s11905_s2 = inlined_call_operand.vmem [shape: f32[1,8], index: 2, kind: input, shape index: {}]   ;;  %s11906_s3 = inlined_call_operand.vmem [shape: f32[72,8], index: 3, kind: input, shape index: {}]   ;;  %s11907_s4 = inlined_call_operand.vmem [shape: f32[1,8], index: 4, kind: input, shape index: {}]   ;;  %s11908_s5 = inlined_call_operand.vmem [shape: f32[72,16], index: 5, kind: input, shape index: {}]   ;;  %s11909_s6 = inlined_call_operand.vmem [shape: f32[1,16], index: 6, kind: input, shape index: {}]   ;;  %s11910_s7 = inlined_call_operand.vmem [shape: f32[144,16], index: 7, kind: input, shape index: {}]   ;;  %s11911_s8 = inlined_call_operand.vmem [shape: f32[1,16], index: 8, kind: input, shape index: {}]   ;;  %s11912_s9 = inlined_call_operand.vmem [shape: f32[144,32], index: 9, kind: input, shape index: {}]   ;;  %s11913_s10 = inlined_call_operand.vmem [shape: f32[1,32], index: 10, kind: input, shape index: {}]   ;;  %s11914_s11 = inlined_call_operand.vmem [shape: f32[288,128], index: 11, kind: input, shape index: {}]   ;;  %s11915_s12 = inlined_call_operand.vmem [shape: f32[1,128], index: 12, kind: input, shape index: {}]   ;;  %s11916_s13 = inlined_call_operand.hbm [shape: f32[2,16,128], index: 13, kind: output, shape index: {}]  }
   0x1   :  { %12093 = sst [smem:[#allocation215_spill]] %s11903_s0 }
   0x2   :  { %12094 = sst [smem:[#allocation216_spill]] %s11904_s1 }
   0x3   :  { %12095 = sst [smem:[#allocation217_spill]] %s11905_s2 }
   0x4   :  { %12096 = sst [smem:[#allocation218_spill]] %s11906_s3 }
   0x5   :  { %18 = vsyncpa [#allocation4], 0 }
   0x6   :  { %20 = vsyncpa [#allocation4 + $0x1], 0  ;;  %s7334_s25 = smov 0   ;;  %s7336_s26 = smov 0  }
   0x7   :  { %s7338_s27 = smov 0   ;;  %s7340_s28 = smov 0  }
   0x8 LB: > { %12097 = sst [smem:[#allocation6_spill]] %s7245_s27  ;;  %s7355_s29 = sadd.s32 4294967295, %s7249_s28   ;;  %s7249_s28 = sphi %s7340_s28, %s13449_s28   ;;  %s7245_s27 = sphi %s7338_s27, %s13446_s27   ;;  %s7241_s26 = sphi %s7336_s26, %s13448_s26   ;;  %s7237_s25 = sphi %s7334_s25, %s13447_s25  }
   0x9   : > { %s6651_s30 = sadd.s32 4294967294, %s7249_s28   ;;  %s7359_s14 = sadd.s32 1, %s7249_s28  }
   0xa   : > { %s311_s15 = sadd.s32 1, %s7245_s27  ;;  %s308_s16 = ssub.s32 %s7249_s28, %s7359_s14 }
   0xb   : > { %p321_p0 = scmp.ne.s32.totalorder %s7245_s27, %s7241_s26  ;;  %p309_p1 = scmp.eq.s32.totalorder %s308_s16, 0 }
   0xc   : > { %p322_p2 = scmp.eq.s32.totalorder %s7355_s29, 1  ;;  %p327_p3 = scmp.ne.s32.totalorder %s7241_s26, %s7237_s25 }
   0xd   : > { %p328_p4 = scmp.eq.s32.totalorder %s6651_s30, 1  ;;  %p6654_p7 = scmp.ge.s32.totalorder %s7249_s28, 1 }
   0xe   : > { %s7370_s17 = scalar_select %p309_p1, %s7245_s27, %s311_s15  }
   0xf   : > { %p7372_p5 = por %p322_p2, %p321_p0  ;;  %p7376_p6 = por %p328_p4, %p327_p3 }
  0x10   : > { %12098 = sst [smem:[#allocation7_spill]] %s7370_s17  ;;  %p390_p8 = scmp.lt.s32.totalorder %s7249_s28, 3 }
  0x12   : > { %p391_p9 = pnand %p6654_p7, %p390_p8 }
  0x14   : > { %394 = sbr.rel (%p391_p9) target bundleno = 2879 (0xb3f), region = 72 }
  0x19   : > { %s12101_s1 = sld [smem:[#allocation216_spill]]  ;;  %vm577_vm0 = vcmask 1042432   ;;  %p434_p10 = scmp.lt.s32.totalorder %s7355_s29, 1  ;;  %vm11922_vm1 = vcmask 23552   ;;  %vm11917_vm2 = vcmask 261120   ;;  %v11920_v8 = vmov 0.0  }
  0x1a   : > { %s12102_s0 = sld [smem:[#allocation215_spill]]  ;;  %441 = vst.msk [vmem:[#allocation2 + $0x8] sm:$0xff] %vm11917_vm2, %v11920_v8  ;;  %s12016_s16 = smov 8   ;;  %vm11926_vm3 = vcmask 64512   ;;  %v826_v22 = vlaneseq  ;;  %v12106_v37 = vmov 0  ;;  %v12109_v40 = vmov 0 }
  0x1b   : > { %s435_s22 = scalar_select %p434_p10, %s7355_s29, 1  ;;  %440 = vst.msk [vmem:[#allocation2] sm:$0xff] %vm11917_vm2, %v11920_v8  ;;  %v12112_v55 = vmov 0 }
  0x1c   : > { %442 = vst.msk [vmem:[#allocation2 + $0x10] sm:$0xff] %vm11917_vm2, %v11920_v8  ;;  %s12014_s20 = smov 16   ;;  %s12103_s2 = sld [smem:[#allocation217_spill]]  ;;  %v7442_v25 = vshrl.u32 %v826_v22, 7 }
  0x1d   : > { %s6778_s23 = sshll.u32 %s435_s22, 8  ;;  %791 = vst.msk [vmem:[#allocation2 + $0x118] sm:$0xff] %vm11926_vm3, %v11920_v8  ;;  %s12010_s24 = smov 24  }
  0x1e   : > { %792 = vst.msk [vmem:[#allocation2 + $0x120] sm:$0xff] %vm11926_vm3, %v11920_v8  ;;  %v7446_v28 = vadd.s32 8, %v7442_v25  ;;  %v863_v33 = vand.u32 15, %v7442_v25  ;;  %v7467_v45 = vadd.s32 16, %v7442_v25  ;;  %s12008_s30 = smov 40   ;;  %s12018_s22 = smov 48  }
  0x1f   : > { %v475_v0 = vld [vmem:[%s12101_s1] sm:$0x7]  ;;  %793 = vst.msk [vmem:[#allocation2 + $0x128] sm:$0xff] %vm11926_vm3, %v11920_v8  ;;  %s12064_s21 = smov 56   ;;  %s12398_s3 = sld [smem:[#allocation218_spill]] }
  0x20   : > { %6658 = vmatpush.msk.msra.mxu0 %vm577_vm0, %v475_v0  ;;  %s7390_s15 = scalar_lea.vmem %s12102_s0, %s6778_s23  ;;  %12104 = vst [vmem:[#allocation8_spill] sm:$0xff] %v7442_v25  ;;  %s12012_s23 = smov 32   ;;  %v870_v32 = vand.u32 15, %v7446_v28  ;;  %vm7460_vm8 = vcmp.gt.s32.totalorder %v863_v33, 0  ;;  %v877_v50 = vand.u32 15, %v7467_v45  ;;  %v7533_v33 = vadd.s32 40, %v7442_v25 }
  0x21   : > { %v443_v1 = vld [vmem:[%s7390_s15] sm:$0xff]  ;;  %v444_v2 = vld [vmem:[%s7390_s15 + $0x8] sm:$0xff]  ;;  %v445_v3 = vld [vmem:[%s7390_s15 + $0x10] sm:$0xff]  ;;  %12105 = vst [vmem:[#allocation9_spill] sm:$0xff] %v7446_v28  ;;  %v12110_v40 = vsel %vm7460_vm8, 4294967295, %v12109_v40  ;;  %s12800_s0 = smov 56  }
  0x22   : > { %6659 = vmatmul.msk.f32.vlgmr.msra.gmra.mxu0 %vm11922_vm1, %v443_v1  ;;  %v446_v4 = vld [vmem:[%s7390_s15 + $0x18] sm:$0xff]  ;;  %v447_v5 = vld [vmem:[%s7390_s15 + $0x20] sm:$0xff]  ;;  %v448_v6 = vld [vmem:[%s7390_s15 + $0x28] sm:$0xff]  ;;  %vm7456_vm6 = vcmp.lt.s32.totalorder %v870_v32, 15  ;;  %12111 = vst [vmem:[#allocation11_spill] sm:$0xff] %v7467_v45  ;;  %vm7479_vm10 = vcmp.gt.s32.totalorder %v877_v50, 0 }
  0x23   : > { %v449_v7 = vld [vmem:[%s7390_s15 + $0x30] sm:$0xff]  ;;  %v450_v9 = vld [vmem:[%s7390_s15 + $0x38] sm:$0xff]  ;;  %v1371_v10 = vld [vmem:[#allocation2 + $0x8] sm:$0xff]  ;;  %v12107_v37 = vsel %vm7456_vm6, 4294967295, %v12106_v37  ;;  %v12113_v55 = vsel %vm7479_vm10, 4294967295, %v12112_v55  ;;  %12120 = vst [vmem:[#allocation16_spill] sm:$0xff] %v7533_v33 }
  0x24   : > { %1639 = vrot.lane.b32.xlu0 %v1371_v10, %s12016_s16  ;;  %v451_v11 = vld [vmem:[%s7390_s15 + $0x40] sm:$0xff]  ;;  %v452_v12 = vld [vmem:[%s7390_s15 + $0x48] sm:$0xff]  ;;  %v453_v13 = vld [vmem:[%s7390_s15 + $0x50] sm:$0xff]  ;;  %12108 = vst [vmem:[#allocation10_spill] sm:$0xff] %v12107_v37  ;;  %s13286_s1 = smov 80   ;;  %s431_s27 = sand.u32 1, %s7241_s26  }
  0x25   : > { %v1372_v14 = vld [vmem:[#allocation2 + $0x10] sm:$0xff]  ;;  %v454_v15 = vld [vmem:[%s7390_s15 + $0x58] sm:$0xff]  ;;  %v455_v17 = vld [vmem:[%s7390_s15 + $0x60] sm:$0xff]  ;;  %12114 = vst [vmem:[#allocation12_spill] sm:$0xff] %v12113_v55 }
  0x26   : > { %v1403_v16 = vld [vmem:[#allocation2 + $0x9] sm:$0xff]  ;;  %v7436_v18 = vld [vmem:[%s12103_s2] ss:$0 sm:$0xff]  ;;  %v458_v47 = vld [vmem:[%s7390_s15 + $0x78] sm:$0xff] }
  0x27   : > { %1767 = vrot.lane.b32.xlu2 %v1403_v16, %s12014_s20  ;;  %v456_v20 = vld [vmem:[%s7390_s15 + $0x68] sm:$0xff]  ;;  %v457_v34 = vld [vmem:[%s7390_s15 + $0x70] sm:$0xff]  ;;  %v459_v1 = vld [vmem:[%s7390_s15 + $0x80] sm:$0xff] }
  0x2a   : > { %6660 = vmatmul.msk.f32.gmra.mxu0 %vm11922_vm1, %v444_v2 }
  0x2c   : > { %1641 = vrot.lane.b32.xlu0 %v1372_v14, %s12016_s16 }
  0x32   : > { %6661 = vmatmul.msk.f32.gmra.mxu0 %vm11922_vm1, %v445_v3 }
  0x3a   : > { %6662 = vmatmul.msk.f32.gmra.mxu0 %vm11922_vm1, %v446_v4  ;;  %v7500_v4 = vadd.s32 24, %v7442_v25 }
  0x3c   : > { %12115 = vst [vmem:[#allocation13_spill] sm:$0xff] %v7500_v4 }
  0x42   : > { %6663 = vmatmul.msk.f32.gmra.mxu0 %vm11922_vm1, %v447_v5 }
  0x4a   : > { %6664 = vmatmul.msk.f32.gmra.mxu0 %vm11922_vm1, %v448_v6 }
  0x52   : > { %6665 = vmatmul.msk.f32.gmra.mxu0 %vm11922_vm1, %v449_v7 }
  0x5a   : > { %6666 = vmatmul.msk.f32.gmra.mxu0 %vm11922_vm1, %v450_v9  ;;  %v884_v9 = vand.u32 15, %v7500_v4 }
  0x5c   : > { %vm7508_vm13 = vcmp.lt.s32.totalorder %v884_v9, 15 }
  0x62   : > { %6667 = vmatmul.msk.f32.gmra.mxu0 %vm11922_vm1, %v451_v11 }
  0x6a   : > { %6668 = vmatmul.msk.f32.gmra.mxu0 %vm11922_vm1, %v452_v12  ;;  %v12116_v12 = vmov 0 }
  0x6b   : > { %v12117_v12 = vsel %vm7508_vm13, 4294967295, %v12116_v12 }
  0x6c   : > { %12118 = vst [vmem:[#allocation14_spill] sm:$0xff] %v12117_v12 }
  0x72   : > { %6669 = vmatmul.msk.f32.gmra.mxu0 %vm11922_vm1, %v453_v13 }
  0x7a   : > { %6670 = vmatmul.msk.f32.gmra.mxu0 %vm11922_vm1, %v454_v15 }
  0x82   : > { %6671 = vmatmul.msk.f32.gmra.mxu0 %vm11922_vm1, %v455_v17 }
  0x8a   : > { %6672 = vmatmul.msk.f32.gmra.mxu0 %vm11922_vm1, %v456_v20 }
  0x92   : > { %6673 = vmatmul.msk.f32.gmra.mxu0 %vm11922_vm1, %v457_v34 }
  0x9a   : > { %6674 = vmatmul.msk.f32.gmra.mxu0 %vm11922_vm1, %v458_v47 }
  0x9f   : > { %v598_v19 = vpop.f32.mrf.mxu0 }
  0xa0   : > { %v599_v21 = vadd.f32 %v7436_v18, %v598_v19  ;;  %v460_v19 = vld [vmem:[%s7390_s15 + $0x88] sm:$0xff] }
  0xa2   : > { %vm694_vm4 = vcmp.ge.f32.partialorder %v599_v21, 0.0  ;;  %v726_v23 = vmul.f32 0.01, %v599_v21  ;;  %6675 = vmatmul.msk.f32.gmra.mxu0 %vm11922_vm1, %v459_v1 }
  0xa4   : > { %v758_v24 = vsel %vm694_vm4, %v599_v21, %v726_v23 }
  0xa5   : > { %794 = vst.msk [vmem:[#allocation2 + $0x18] sm:$0xff] %vm11926_vm3, %v758_v24  ;;  %v7522_v24 = vadd.s32 32, %v7442_v25 }
  0xa7   : > { %v601_v26 = vpop.f32.mrf.mxu0  ;;  %12119 = vst [vmem:[#allocation15_spill] sm:$0xff] %v7522_v24 }
  0xa8   : > { %v602_v27 = vadd.f32 %v7436_v18, %v601_v26 }
  0xaa   : > { %vm695_vm5 = vcmp.ge.f32.partialorder %v602_v27, 0.0  ;;  %v727_v29 = vmul.f32 0.01, %v602_v27  ;;  %6676 = vmatmul.msk.f32.gmra.mxu0 %vm11922_vm1, %v460_v19  ;;  %v464_v19 = vld [vmem:[%s7390_s15 + $0xa8] sm:$0xff] }
  0xac   : > { %v759_v30 = vsel %vm695_vm5, %v602_v27, %v727_v29  ;;  %v1373_v31 = vld [vmem:[#allocation2 + $0x18] sm:$0xff]  ;;  %v461_v27 = vld [vmem:[%s7390_s15 + $0x90] sm:$0xff]  ;;  %v891_v29 = vand.u32 15, %v7522_v24 }
  0xad   : > { %795 = vst.msk [vmem:[#allocation2 + $0x20] sm:$0xff] %vm11926_vm3, %v759_v30  ;;  %1993 = vrot.lane.b32.xlu0 %v1373_v31, %s12012_s23  ;;  %1643 = vrot.lane.b32.xlu1 %v1373_v31, %s12016_s16  ;;  %v1404_v38 = vld [vmem:[#allocation2 + $0x11] sm:$0xff] }
  0xae   : > { %v1309_v41 = vld [vmem:[#allocation2 + $0x17] sm:$0xff]  ;;  %v1436_v44 = vsel %vm7456_vm6, %v1404_v38, 0.0  ;;  %vm7535_vm4 = vcmp.gt.s32.totalorder %v891_v29, 0 }
  0xaf   : > { %v604_v35 = vpop.f32.mrf.mxu0  ;;  %v1469_v46 = vsel %vm7460_vm8, %v1309_v41, 0.0  ;;  %v898_v41 = vand.u32 15, %v7533_v33 }
  0xb0   : > { %v605_v36 = vadd.f32 %v7436_v18, %v604_v35 }
  0xb1   : > { %vm7547_vm5 = vcmp.lt.s32.totalorder %v898_v41, 15 }
  0xb2   : > { %vm696_vm7 = vcmp.ge.f32.partialorder %v605_v36, 0.0  ;;  %v728_v39 = vmul.f32 0.01, %v605_v36  ;;  %6677 = vmatmul.msk.f32.gmra.mxu0 %vm11922_vm1, %v461_v27 }
  0xb4   : > { %v1310_v42 = vld [vmem:[#allocation2 + $0x1f] sm:$0xff]  ;;  %v760_v43 = vsel %vm696_vm7, %v605_v36, %v728_v39 }
  0xb5   : > { %796 = vst.msk [vmem:[#allocation2 + $0x28] sm:$0xff] %vm11926_vm3, %v760_v43  ;;  %1769 = vrot.lane.b32.xlu0 %v1436_v44, %s12014_s20  ;;  %1897 = vrot.lane.b32.xlu2 %v1310_v42, %s12010_s24  ;;  %v1405_v52 = vld [vmem:[#allocation2 + $0x19] sm:$0xff] }
  0xb6   : > { %1895 = vrot.lane.b32.xlu1 %v1469_v46, %s12010_s24  ;;  %v1374_v56 = vld [vmem:[#allocation2 + $0x20] sm:$0xff]  ;;  %v12123_v46 = vmov 0 }
  0xb7   : > { %v607_v48 = vpop.f32.mrf.mxu0  ;;  %v12124_v46 = vsel %vm7547_vm5, 4294967295, %v12123_v46 }
  0xb8   : > { %v608_v49 = vadd.f32 %v7436_v18, %v607_v48  ;;  %12125 = vst [vmem:[#allocation17_spill] sm:$0xff] %v12124_v46 }
  0xba   : > { %vm697_vm9 = vcmp.ge.f32.partialorder %v608_v49, 0.0  ;;  %v729_v51 = vmul.f32 0.01, %v608_v49 }
  0xbc   : > { %v1311_v53 = vld [vmem:[#allocation2 + $0x27] sm:$0xff]  ;;  %v761_v54 = vsel %vm697_vm9, %v608_v49, %v729_v51 }
  0xbd   : > { %797 = vst.msk [vmem:[#allocation2 + $0x30] sm:$0xff] %vm11926_vm3, %v761_v54  ;;  %2121 = vrot.lane.b32.xlu2 %v1405_v52, %s12008_s30  ;;  %v1471_v57 = vsel %vm7479_vm10, %v1311_v53, 0.0  ;;  %v1406_v60 = vld [vmem:[#allocation2 + $0x21] sm:$0xff] }
  0xbe   : > { %1645 = vrot.lane.b32.xlu1 %v1374_v56, %s12016_s16  ;;  %1899 = vrot.lane.b32.xlu0 %v1471_v57, %s12010_s24  ;;  %v1375_v63 = vld [vmem:[#allocation2 + $0x28] sm:$0xff]  ;;  %v1506_v0 = vsel %vm7456_vm6, %v1406_v60, 0.0  ;;  %v1438_v14 = vsel %vm7508_vm13, %v1406_v60, 0.0  ;;  %vm12267_vm6 = vcmask 64512  }
  0xbf   : > { %v610_v58 = vpop.f32.mrf.mxu0 }
  0xc0   : > { %v611_v59 = vadd.f32 %v7436_v18, %v610_v58 }
  0xc2   : > { %vm698_vm11 = vcmp.ge.f32.partialorder %v611_v59, 0.0  ;;  %v730_v61 = vmul.f32 0.01, %v611_v59 }
  0xc4   : > { %v762_v62 = vsel %vm698_vm11, %v611_v59, %v730_v61  ;;  %v1407_v7 = vld [vmem:[#allocation2 + $0x29] sm:$0xff]  ;;  %v7566_v59 = vadd.s32 48, %v7442_v25 }
  0xc5   : > { %798 = vst.msk [vmem:[#allocation2 + $0x38] sm:$0xff] %vm11926_vm3, %v762_v62  ;;  %1647 = vrot.lane.b32.xlu2 %v1375_v63, %s12016_s16  ;;  %v1312_v16 = vld [vmem:[#allocation2 + $0x2f] sm:$0xff] }
  0xc6   : > { %1771 = vrot.lane.b32.xlu1 %v1405_v52, %s12014_s20  ;;  %2123 = vrot.lane.b32.xlu0 %v1506_v0, %s12008_s30  ;;  %v1376_v17 = vld [vmem:[#allocation2 + $0x30] sm:$0xff]  ;;  %v462_v52 = vld [vmem:[%s7390_s15 + $0x98] sm:$0xff]  ;;  %12127 = vst [vmem:[#allocation19_spill] sm:$0xff] %v7566_v59 }
  0xc7   : > { %v613_v2 = vpop.f32.mrf.mxu0  ;;  %6678 = vmatmul.msk.f32.gmra.mxu0 %vm11922_vm1, %v462_v52 }
  0xc8   : > { %v614_v3 = vadd.f32 %v7436_v18, %v613_v2  ;;  %v12128_v2 = vmov 0 }
  0xca   : > { %vm699_vm12 = vcmp.ge.f32.partialorder %v614_v3, 0.0  ;;  %v731_v5 = vmul.f32 0.01, %v614_v3 }
  0xcc   : > { %v763_v6 = vsel %vm699_vm12, %v614_v3, %v731_v5  ;;  %v1377_v23 = vld [vmem:[#allocation2 + $0x38] sm:$0xff] }
  0xcd   : > { %1997 = vrot.lane.b32.xlu2 %v1375_v63, %s12012_s23  ;;  %799 = vst.msk [vmem:[#allocation2 + $0x40] sm:$0xff] %vm11926_vm3, %v763_v6  ;;  %v1313_v32 = vld [vmem:[#allocation2 + $0x37] sm:$0xff]  ;;  %v905_v63 = vand.u32 15, %v7566_v59 }
  0xce   : > { %1995 = vrot.lane.b32.xlu1 %v1374_v56, %s12012_s23  ;;  %1775 = vrot.lane.b32.xlu0 %v1407_v7, %s12014_s20  ;;  %v1473_v36 = vsel %vm7535_vm4, %v1313_v32, 0.0  ;;  %v1408_v44 = vld [vmem:[#allocation2 + $0x31] sm:$0xff]  ;;  %v7563_v56 = vadd.s32 56, %v7442_v25 }
  0xcf   : > { %v616_v10 = vpop.f32.mrf.mxu0  ;;  %v1508_v48 = vsel %vm7508_vm13, %v1408_v44, 0.0  ;;  %v1440_v51 = vsel %vm7547_vm5, %v1408_v44, 0.0  ;;  %vm7578_vm12 = vcmp.gt.s32.totalorder %v905_v63, 0  ;;  %v836_v44 = vadd.s32 72, %v7442_v25 }
  0xd0   : > { %v617_v11 = vadd.f32 %v7436_v18, %v616_v10  ;;  %12126 = vst [vmem:[#allocation18_spill] sm:$0xff] %v7563_v56  ;;  %v912_v62 = vand.u32 15, %v7563_v56  ;;  %v835_v10 = vadd.s32 64, %v7442_v25  ;;  %v472_v56 = vld [vmem:[%s7390_s15 + $0xe8] sm:$0xff]  ;;  %vm12253_vm13 = vcmask 64512  }
  0xd2   : > { %vm700_vm14 = vcmp.ge.f32.partialorder %v617_v11, 0.0  ;;  %v732_v13 = vmul.f32 0.01, %v617_v11  ;;  %vm7574_vm11 = vcmp.lt.s32.totalorder %v912_v62, 15 }
  0xd3   : > { %v12129_v2 = vsel %vm7574_vm11, 4294967295, %v12128_v2 }
  0xd4   : > { %v764_v15 = vsel %vm700_vm14, %v617_v11, %v732_v13  ;;  %v1314_v39 = vld [vmem:[#allocation2 + $0x3f] sm:$0xff]  ;;  %12130 = vst [vmem:[#allocation20_spill] sm:$0xff] %v12129_v2  ;;  %v7595_v13 = vpop.permute.xlu2 %1767 }
  0xd5   : > { %1773 = vrot.lane.b32.xlu2 %v1438_v14, %s12014_s20  ;;  %800 = vst.msk [vmem:[#allocation2 + $0x48] sm:$0xff] %vm11926_vm3, %v764_v15  ;;  %v1409_v50 = vld [vmem:[#allocation2 + $0x39] sm:$0xff] }
  0xd6   : > { %1901 = vrot.lane.b32.xlu1 %v1312_v16, %s12010_s24  ;;  %1999 = vrot.lane.b32.xlu0 %v1376_v17, %s12012_s23  ;;  %v1378_v61 = vld [vmem:[#allocation2 + $0x40] sm:$0xff]  ;;  %12133 = vst [vmem:[#allocation21_spill] sm:$0xff] %v7595_v13  ;;  %v919_v16 = vand.u32 15, %v835_v10  ;;  %v837_v10 = vadd.s32 80, %v7442_v25 }
  0xd7   : > { %v619_v20 = vpop.f32.mrf.mxu0 }
  0xd8   : > { %v620_v21 = vadd.f32 %v7436_v18, %v619_v20 }
  0xda   : > { %vm701_vm15 = vcmp.ge.f32.partialorder %v620_v21, 0.0  ;;  %v733_v22 = vmul.f32 0.01, %v620_v21 }
  0xdc   : > { %v765_v26 = vsel %vm701_vm15, %v620_v21, %v733_v22  ;;  %v1379_v58 = vld [vmem:[#allocation2 + $0x48] sm:$0xff]  ;;  %v7602_v22 = vpop.permute.xlu0 %1639  ;;  %vm7605_vm15 = vcmp.gt.s32.totalorder %v919_v16, 0 }
  0xdd   : > { %1649 = vrot.lane.b32.xlu2 %v1376_v17, %s12016_s16  ;;  %801 = vst.msk [vmem:[#allocation2 + $0x50] sm:$0xff] %vm11926_vm3, %v765_v26  ;;  %v1315_v0 = vld [vmem:[#allocation2 + $0x47] sm:$0xff] }
  0xde   : > { %2125 = vrot.lane.b32.xlu1 %v1407_v7, %s12008_s30  ;;  %1651 = vrot.lane.b32.xlu0 %v1377_v23, %s12016_s16  ;;  %v1410_v1 = vld [vmem:[#allocation2 + $0x41] sm:$0xff]  ;;  %v1475_v5 = vsel %vm7578_vm12, %v1315_v0, 0.0  ;;  %12134 = vst [vmem:[#allocation22_spill] sm:$0xff] %v7602_v22 }
  0xdf   : > { %v622_v30 = vpop.f32.mrf.mxu0  ;;  %v1442_v6 = vsel %vm7574_vm11, %v1410_v1, 0.0  ;;  %v463_v7 = vld [vmem:[%s7390_s15 + $0xa0] sm:$0xff]  ;;  %v1510_v11 = vsel %vm7547_vm5, %v1410_v1, 0.0  ;;  %vm12230_vm5 = vcmask 64512  }
  0xe0   : > { %v623_v31 = vadd.f32 %v7436_v18, %v622_v30  ;;  %6679 = vmatmul.msk.f32.gmra.mxu0 %vm11922_vm1, %v463_v7  ;;  %v467_v7 = vld [vmem:[%s7390_s15 + $0xc0] sm:$0xff] }
  0xe2   : > { %vm702_vm0 = vcmp.ge.f32.partialorder %v623_v31, 0.0  ;;  %v734_v34 = vmul.f32 0.01, %v623_v31 }
  0xe4   : > { %v766_v38 = vsel %vm702_vm0, %v623_v31, %v734_v34  ;;  %v1380_v9 = vld [vmem:[#allocation2 + $0x50] sm:$0xff] }
  0xe5   : > { %1903 = vrot.lane.b32.xlu2 %v1473_v36, %s12010_s24  ;;  %802 = vst.msk [vmem:[#allocation2 + $0x58] sm:$0xff] %vm11926_vm3, %v766_v38  ;;  %v1411_v27 = vld [vmem:[#allocation2 + $0x49] sm:$0xff] }
  0xe6   : > { %2001 = vrot.lane.b32.xlu1 %v1377_v23, %s12012_s23  ;;  %1905 = vrot.lane.b32.xlu0 %v1314_v39, %s12010_s24  ;;  %v1316_v23 = vld [vmem:[#allocation2 + $0x4f] sm:$0xff] }
  0xe7   : > { %v625_v42 = vpop.f32.mrf.mxu0  ;;  %v465_v36 = vld [vmem:[%s7390_s15 + $0xb0] sm:$0xff] }
  0xe8   : > { %v626_v43 = vadd.f32 %v7436_v18, %v625_v42  ;;  %6680 = vmatmul.msk.f32.gmra.mxu0 %vm11922_vm1, %v464_v19  ;;  %v7623_v42 = vpop.permute.xlu0 %1641 }
  0xe9   : > { %12138 = vst [vmem:[#allocation24_spill] sm:$0xff] %v7623_v42 }
  0xea   : > { %vm703_vm7 = vcmp.ge.f32.partialorder %v626_v43, 0.0  ;;  %v735_v47 = vmul.f32 0.01, %v626_v43 }
  0xec   : > { %v767_v49 = vsel %vm703_vm7, %v626_v43, %v735_v47  ;;  %v1317_v20 = vld [vmem:[#allocation2 + $0x57] sm:$0xff] }
  0xed   : > { %2127 = vrot.lane.b32.xlu2 %v1508_v48, %s12008_s30  ;;  %803 = vst.msk [vmem:[#allocation2 + $0x60] sm:$0xff] %vm11926_vm3, %v767_v49  ;;  %v1477_v29 = vsel %vm7605_vm15, %v1317_v20, 0.0  ;;  %v1412_v38 = vld [vmem:[#allocation2 + $0x51] sm:$0xff]  ;;  %v926_v49 = vand.u32 15, %v836_v44 }
  0xee   : > { %1777 = vrot.lane.b32.xlu1 %v1440_v51, %s12014_s20  ;;  %2129 = vrot.lane.b32.xlu0 %v1409_v50, %s12008_s30  ;;  %v1512_v41 = vsel %vm7574_vm11, %v1412_v38, 0.0  ;;  %v1381_v47 = vld [vmem:[#allocation2 + $0x58] sm:$0xff]  ;;  %vm12210_vm11 = vcmask 64512  }
  0xef   : > { %v628_v53 = vpop.f32.mrf.mxu0 }
  0xf0   : > { %v629_v54 = vadd.f32 %v7436_v18, %v628_v53  ;;  %6681 = vmatmul.msk.f32.gmra.mxu0 %vm11922_vm1, %v465_v36 }
  0xf2   : > { %vm704_vm9 = vcmp.ge.f32.partialorder %v629_v54, 0.0  ;;  %v736_v57 = vmul.f32 0.01, %v629_v54 }
  0xf4   : > { %v768_v60 = vsel %vm704_vm9, %v629_v54, %v736_v57  ;;  %v1413_v48 = vld [vmem:[#allocation2 + $0x59] sm:$0xff]  ;;  %vm7641_vm9 = vcmp.lt.s32.totalorder %v926_v49, 15 }
  0xf5   : > { %1779 = vrot.lane.b32.xlu2 %v1409_v50, %s12014_s20  ;;  %804 = vst.msk [vmem:[#allocation2 + $0x68] sm:$0xff] %vm11926_vm3, %v768_v60  ;;  %v12143_v60 = vmov 0  ;;  %v1444_v62 = vsel %vm7641_vm9, %v1412_v38, 0.0  ;;  %v1318_v63 = vld [vmem:[#allocation2 + $0x5f] sm:$0xff] }
  0xf6   : > { %1653 = vrot.lane.b32.xlu1 %v1378_v61, %s12016_s16  ;;  %2005 = vrot.lane.b32.xlu0 %v1379_v58, %s12012_s23  ;;  %v12144_v60 = vsel %vm7641_vm9, 4294967295, %v12143_v60  ;;  %v1382_v0 = vld [vmem:[#allocation2 + $0x60] sm:$0xff] }
  0xf7   : > { %v631_v14 = vpop.f32.mrf.mxu0  ;;  %12145 = vst [vmem:[#allocation29_spill] sm:$0xff] %v12144_v60 }
  0xf8   : > { %v632_v15 = vadd.f32 %v7436_v18, %v631_v14 }
  0xfa   : > { %vm705_vm14 = vcmp.ge.f32.partialorder %v632_v15, 0.0  ;;  %v737_v17 = vmul.f32 0.01, %v632_v15 }
  0xfc   : > { %v769_v21 = vsel %vm705_vm14, %v632_v15, %v737_v17  ;;  %v933_v15 = vand.u32 15, %v837_v10  ;;  %v1414_v49 = vld [vmem:[#allocation2 + $0x61] sm:$0xff] }
  0xfd   : > { %2003 = vrot.lane.b32.xlu2 %v1378_v61, %s12012_s23  ;;  %805 = vst.msk [vmem:[#allocation2 + $0x70] sm:$0xff] %vm11926_vm3, %v769_v21  ;;  %v7671_v21 = vld [vmem:[#allocation2 + $0x67] sm:$0xff] }
  0xfe   : > { %1907 = vrot.lane.b32.xlu1 %v1475_v5, %s12010_s24  ;;  %1781 = vrot.lane.b32.xlu0 %v1442_v6, %s12014_s20 }
  0xff   : > { %v634_v30 = vpop.f32.mrf.mxu0 }
 0x100   : > { %v635_v32 = vadd.f32 %v7436_v18, %v634_v30  ;;  %v12152_v30 = vmov 0 }
 0x102   : > { %vm706_vm0 = vcmp.ge.f32.partialorder %v635_v32, 0.0  ;;  %v738_v34 = vmul.f32 0.01, %v635_v32 }
 0x104   : > { %v770_v39 = vsel %vm706_vm0, %v635_v32, %v738_v34  ;;  %vm7677_vm0 = vcmp.gt.s32.totalorder %v933_v15, 0  ;;  %v1320_v36 = vld [vmem:[#allocation2 + $0x6f] sm:$0xff] }
 0x105   : > { %1655 = vrot.lane.b32.xlu2 %v1379_v58, %s12016_s16  ;;  %806 = vst.msk [vmem:[#allocation2 + $0x78] sm:$0xff] %vm11926_vm3, %v770_v39  ;;  %v466_v58 = vld [vmem:[%s7390_s15 + $0xb8] sm:$0xff]  ;;  %v12153_v30 = vsel %vm7677_vm0, 4294967295, %v12152_v30  ;;  %v1479_v32 = vsel %vm7677_vm0, %v7671_v21, 0.0  ;;  %v1384_v15 = vld [vmem:[#allocation2 + $0x70] sm:$0xff] }
 0x106   : > { %2131 = vrot.lane.b32.xlu1 %v1510_v11, %s12008_s30  ;;  %1657 = vrot.lane.b32.xlu0 %v1380_v9, %s12016_s16 }
 0x107   : > { %v637_v50 = vpop.f32.mrf.mxu0  ;;  %6682 = vmatmul.msk.f32.gmra.mxu0 %vm11922_vm1, %v466_v58 }
 0x108   : > { %v638_v51 = vadd.f32 %v7436_v18, %v637_v50 }
 0x10a   : > { %vm707_vm7 = vcmp.ge.f32.partialorder %v638_v51, 0.0  ;;  %v739_v57 = vmul.f32 0.01, %v638_v51 }
 0x10c   : > { %v771_v61 = vsel %vm707_vm7, %v638_v51, %v739_v57  ;;  %v12157_v51 = vmov 0  ;;  %v1514_v57 = vsel %vm7641_vm9, %v1414_v49, 0.0  ;;  %v1385_v10 = vld [vmem:[#allocation2 + $0x78] sm:$0xff] }
 0x10d   : > { %1909 = vrot.lane.b32.xlu2 %v1316_v23, %s12010_s24  ;;  %807 = vst.msk [vmem:[#allocation2 + $0x80] sm:$0xff] %vm11926_vm3, %v771_v61  ;;  %v1415_v61 = vld [vmem:[#allocation2 + $0x69] sm:$0xff] }
 0x10e   : > { %1783 = vrot.lane.b32.xlu1 %v1411_v27, %s12014_s20  ;;  %1911 = vrot.lane.b32.xlu0 %v1477_v29, %s12010_s24  ;;  %v838_v29 = vadd.s32 88, %v7442_v25 }
 0x10f   : > { %v7614_v31 = vpop.permute.xlu2 %1897  ;;  %6683 = vmatmul.msk.f32.gmra.mxu0 %vm11922_vm1, %v467_v7  ;;  %v640_v11 = vpop.f32.mrf.mxu0 }
 0x110   : > { %12137 = vst [vmem:[#allocation23_spill] sm:$0xff] %v7614_v31  ;;  %v641_v14 = vadd.f32 %v7436_v18, %v640_v11  ;;  %v940_v39 = vand.u32 15, %v838_v29  ;;  %v839_v11 = vadd.s32 96, %v7442_v25 }
 0x112   : > { %vm708_vm14 = vcmp.ge.f32.partialorder %v641_v14, 0.0  ;;  %v740_v16 = vmul.f32 0.01, %v641_v14 }
 0x114   : > { %v772_v23 = vsel %vm708_vm14, %v641_v14, %v740_v16  ;;  %vm7694_vm14 = vcmp.lt.s32.totalorder %v940_v39, 15 }
 0x115   : > { %2133 = vrot.lane.b32.xlu2 %v1411_v27, %s12008_s30  ;;  %v468_v27 = vld [vmem:[%s7390_s15 + $0xc8] sm:$0xff]  ;;  %808 = vst.msk [vmem:[#allocation2 + $0x88] sm:$0xff] %vm11926_vm3, %v772_v23  ;;  %v12158_v51 = vsel %vm7694_vm14, 4294967295, %v12157_v51  ;;  %v1446_v58 = vsel %vm7694_vm14, %v1414_v49, 0.0  ;;  %v12166_v49 = vmov 0 }
 0x116   : > { %2007 = vrot.lane.b32.xlu1 %v1380_v9, %s12012_s23  ;;  %2135 = vrot.lane.b32.xlu0 %v1512_v41, %s12008_s30  ;;  %v1383_v9 = vld [vmem:[#allocation2 + $0x68] sm:$0xff]  ;;  %12159 = vst [vmem:[#allocation39_spill] sm:$0xff] %v12158_v51 }
 0x117   : > { %v7627_v43 = vpop.permute.xlu2 %2121  ;;  %6684 = vmatmul.msk.f32.gmra.mxu0 %vm11922_vm1, %v468_v27  ;;  %v643_v34 = vpop.f32.mrf.mxu0 }
 0x118   : > { %12139 = vst [vmem:[#allocation25_spill] sm:$0xff] %v7627_v43  ;;  %v644_v38 = vadd.f32 %v7436_v18, %v643_v34  ;;  %v947_v34 = vand.u32 15, %v839_v11 }
 0x11a   : > { %vm709_vm7 = vcmp.ge.f32.partialorder %v644_v38, 0.0  ;;  %v741_v41 = vmul.f32 0.01, %v644_v38  ;;  %vm7735_vm9 = vcmp.gt.s32.totalorder %v947_v34, 0 }
 0x11c   : > { %v773_v50 = vsel %vm709_vm7, %v644_v38, %v741_v41  ;;  %v7728_v41 = vld [vmem:[#allocation2 + $0x77] sm:$0xff]  ;;  %v7768_v8 = vld [vmem:[#allocation2 + $0x87] sm:$0xff] }
 0x11d   : > { %2009 = vrot.lane.b32.xlu2 %v1381_v47, %s12012_s23  ;;  %809 = vst.msk [vmem:[#allocation2 + $0x90] sm:$0xff] %vm11926_vm3, %v773_v50  ;;  %v1416_v50 = vld [vmem:[#allocation2 + $0x71] sm:$0xff]  ;;  %v1418_v24 = vld [vmem:[#allocation2 + $0x81] sm:$0xff] }
 0x11e   : > { %1659 = vrot.lane.b32.xlu1 %v1381_v47, %s12016_s16  ;;  %1787 = vrot.lane.b32.xlu0 %v1413_v48, %s12014_s20 }
 0x11f   : > { %v7634_v52 = vpop.permute.xlu0 %1993  ;;  %v7636_v53 = vpop.permute.xlu1 %1643 }
 0x120   : > { %12140 = vst [vmem:[#allocation26_spill] sm:$0xff] %v7634_v52  ;;  %v7638_v54 = vpop.permute.xlu2 %1647  ;;  %v646_v14 = vpop.f32.mrf.mxu0 }
 0x121   : > { %12141 = vst [vmem:[#allocation27_spill] sm:$0xff] %v7636_v53  ;;  %v647_v16 = vadd.f32 %v7436_v18, %v646_v14  ;;  %v471_v14 = vld [vmem:[%s7390_s15 + $0xe0] sm:$0xff] }
 0x122   : > { %12142 = vst [vmem:[#allocation28_spill] sm:$0xff] %v7638_v54 }
 0x123   : > { %vm710_vm7 = vcmp.ge.f32.partialorder %v647_v16, 0.0  ;;  %v742_v27 = vmul.f32 0.01, %v647_v16 }
 0x125   : > { %1785 = vrot.lane.b32.xlu2 %v1444_v62, %s12014_s20  ;;  %v774_v39 = vsel %vm710_vm7, %v647_v16, %v742_v27  ;;  %v841_v16 = vadd.s32 112, %v7442_v25  ;;  %v1516_v27 = vsel %vm7694_vm14, %v1416_v50, 0.0  ;;  %vm12183_vm14 = vcmask 64512  }
 0x126   : > { %1913 = vrot.lane.b32.xlu1 %v1318_v63, %s12010_s24  ;;  %2011 = vrot.lane.b32.xlu0 %v1382_v0, %s12012_s23  ;;  %810 = vst.msk [vmem:[#allocation2 + $0x98] sm:$0xff] %vm11926_vm3, %v774_v39 }
 0x127   : > { %v7652_v1 = vpop.permute.xlu0 %1769 }
 0x128   : > { %12146 = vst [vmem:[#allocation30_spill] sm:$0xff] %v7652_v1  ;;  %v7654_v5 = vpop.permute.xlu2 %1997  ;;  %v7656_v6 = vpop.permute.xlu1 %1895 }
 0x129   : > { %12147 = vst [vmem:[#allocation31_spill] sm:$0xff] %v7654_v5 }
 0x12a   : > { %12148 = vst [vmem:[#allocation32_spill] sm:$0xff] %v7656_v6  ;;  %v855_v6 = vadd.s32 224, %v7442_v25 }
 0x12c   : > { %v1059_v13 = vand.u32 15, %v855_v6 }
 0x12d   : > { %1661 = vrot.lane.b32.xlu2 %v1382_v0, %s12016_s16  ;;  %v469_v0 = vld [vmem:[%s7390_s15 + $0xd0] sm:$0xff] }
 0x12e   : > { %2137 = vrot.lane.b32.xlu1 %v1413_v48, %s12008_s30  ;;  %1663 = vrot.lane.b32.xlu0 %v1383_v9, %s12016_s16 }
 0x12f   : > { %6685 = vmatmul.msk.f32.gmra.mxu0 %vm11922_vm1, %v469_v0 }
 0x130   : > { %v7665_v17 = vpop.permute.xlu2 %1773  ;;  %v7667_v19 = vpop.permute.xlu1 %1645 }
 0x131   : > { %12149 = vst [vmem:[#allocation33_spill] sm:$0xff] %v7665_v17  ;;  %v7669_v20 = vpop.permute.xlu0 %1899 }
 0x132   : > { %12150 = vst [vmem:[#allocation34_spill] sm:$0xff] %v7667_v19 }
 0x133   : > { %12151 = vst [vmem:[#allocation35_spill] sm:$0xff] %v7669_v20  ;;  %v849_v20 = vadd.s32 176, %v7442_v25 }
 0x135   : > { %1915 = vrot.lane.b32.xlu2 %v1479_v32, %s12010_s24 }
 0x136   : > { %2013 = vrot.lane.b32.xlu1 %v1383_v9, %s12012_s23  ;;  %1917 = vrot.lane.b32.xlu0 %v1320_v36, %s12010_s24  ;;  %v840_v9 = vadd.s32 104, %v7442_v25  ;;  %v470_v36 = vld [vmem:[%s7390_s15 + $0xd8] sm:$0xff] }
 0x137   : > { %6686 = vmatmul.msk.f32.gmra.mxu0 %vm11922_vm1, %v470_v36 }
 0x138   : > { %v7688_v44 = vpop.permute.xlu2 %1649  ;;  %v7690_v47 = vpop.permute.xlu1 %1771  ;;  %v954_v23 = vand.u32 15, %v840_v9 }
 0x139   : > { %12154 = vst [vmem:[#allocation36_spill] sm:$0xff] %v7688_v44  ;;  %v7692_v48 = vpop.permute.xlu0 %2123 }
 0x13a   : > { %12155 = vst [vmem:[#allocation37_spill] sm:$0xff] %v7690_v47  ;;  %vm7730_vm2 = vcmp.lt.s32.totalorder %v954_v23, 15  ;;  %v649_v23 = vpop.f32.mrf.mxu0  ;;  %v12441_v55 = vld [vmem:[#allocation35_spill] sm:$0xff] }
 0x13b   : > { %12156 = vst [vmem:[#allocation38_spill] sm:$0xff] %v7692_v48  ;;  %v12167_v49 = vsel %vm7730_vm2, 4294967295, %v12166_v49  ;;  %v650_v34 = vadd.f32 %v7436_v18, %v649_v23  ;;  %v12177_v23 = vmov 0 }
 0x13c   : > { %12168 = vst [vmem:[#allocation46_spill] sm:$0xff] %v12167_v49 }
 0x13d   : > { %2139 = vrot.lane.b32.xlu2 %v1514_v57, %s12008_s30  ;;  %v12169_v57 = vmov 0  ;;  %vm711_vm7 = vcmp.ge.f32.partialorder %v650_v34, 0.0  ;;  %v743_v36 = vmul.f32 0.01, %v650_v34 }
 0x13e   : > { %1789 = vrot.lane.b32.xlu1 %v1446_v58, %s12014_s20  ;;  %2141 = vrot.lane.b32.xlu0 %v1415_v61, %s12008_s30  ;;  %v12170_v57 = vsel %vm7735_vm9, 4294967295, %v12169_v57  ;;  %v1481_v58 = vsel %vm7735_vm9, %v7728_v41, 0.0 }
 0x13f   : > { %6687 = vmatmul.msk.f32.gmra.mxu0 %vm11922_vm1, %v471_v14 }
 0x140   : > { %v7706_v62 = vpop.permute.xlu2 %1903  ;;  %v7708_v63 = vpop.permute.xlu1 %1995 }
 0x141   : > { %12160 = vst [vmem:[#allocation40_spill] sm:$0xff] %v7706_v62  ;;  %v7711_v7 = vpop.permute.xlu0 %1775  ;;  %v12224_v62 = vmov 0 }
 0x142   : > { %12161 = vst [vmem:[#allocation41_spill] sm:$0xff] %v7708_v63 }
 0x143   : > { %12162 = vst [vmem:[#allocation42_spill] sm:$0xff] %v7711_v7 }
 0x145   : > { %1791 = vrot.lane.b32.xlu2 %v1415_v61, %s12014_s20  ;;  %v1448_v61 = vsel %vm7730_vm2, %v1416_v50, 0.0  ;;  %v7771_v50 = vld [vmem:[#allocation2 + $0x7f] sm:$0xff] }
 0x146   : > { %1665 = vrot.lane.b32.xlu1 %v1384_v15, %s12016_s16  ;;  %2017 = vrot.lane.b32.xlu0 %v1385_v10, %s12012_s23 }
 0x148   : > { %v7720_v29 = vpop.permute.xlu2 %2127  ;;  %v7722_v32 = vpop.permute.xlu1 %1901 }
 0x149   : > { %12163 = vst [vmem:[#allocation43_spill] sm:$0xff] %v7720_v29  ;;  %v7725_v38 = vpop.permute.xlu0 %1999 }
 0x14a   : > { %12164 = vst [vmem:[#allocation44_spill] sm:$0xff] %v7722_v32 }
 0x14b   : > { %12165 = vst [vmem:[#allocation45_spill] sm:$0xff] %v7725_v38  ;;  %v847_v38 = vadd.s32 160, %v7442_v25 }
 0x14d   : > { %2015 = vrot.lane.b32.xlu2 %v1384_v15, %s12012_s23  ;;  %v1386_v15 = vld [vmem:[#allocation2 + $0x80] sm:$0xff] }
 0x14e   : > { %1919 = vrot.lane.b32.xlu1 %v1481_v58, %s12010_s24  ;;  %1793 = vrot.lane.b32.xlu0 %v1448_v61, %s12014_s20  ;;  %v961_v61 = vand.u32 15, %v841_v16 }
 0x150   : > { %v7747_v0 = vpop.permute.xlu2 %1779  ;;  %v7749_v9 = vpop.permute.xlu1 %2125  ;;  %vm7773_vm1 = vcmp.gt.s32.totalorder %v961_v61, 0 }
 0x151   : > { %12171 = vst [vmem:[#allocation47_spill] sm:$0xff] %v7747_v0  ;;  %v7751_v11 = vpop.permute.xlu0 %1651  ;;  %v12178_v23 = vsel %vm7773_vm1, 4294967295, %v12177_v23  ;;  %v1483_v16 = vsel %vm7773_vm1, %v7768_v8, 0.0 }
 0x152   : > { %12172 = vst [vmem:[#allocation48_spill] sm:$0xff] %v7749_v9 }
 0x153   : > { %12173 = vst [vmem:[#allocation49_spill] sm:$0xff] %v7751_v11 }
 0x155   : > { %1667 = vrot.lane.b32.xlu2 %v1385_v10, %s12016_s16  ;;  %v775_v10 = vsel %vm711_vm7, %v650_v34, %v743_v36  ;;  %v652_v34 = vpop.f32.mrf.mxu0 }
 0x156   : > { %2143 = vrot.lane.b32.xlu1 %v1516_v27, %s12008_s30  ;;  %1669 = vrot.lane.b32.xlu0 %v1386_v15, %s12016_s16  ;;  %811 = vst.msk [vmem:[#allocation2 + $0xa0] sm:$0xff] %vm11926_vm3, %v775_v10  ;;  %v1417_v27 = vld [vmem:[#allocation2 + $0x79] sm:$0xff]  ;;  %v653_v36 = vadd.f32 %v7436_v18, %v652_v34  ;;  %vm12182_vm3 = vcmask 23552  }
 0x157   : > { %6688 = vmatmul.msk.f32.gmra.mxu0 %vm12182_vm3, %v472_v56  ;;  %v842_v56 = vadd.s32 120, %v7442_v25 }
 0x158   : > { %v7762_v39 = vpop.permute.xlu2 %2003  ;;  %v7764_v58 = vpop.permute.xlu1 %2001  ;;  %vm712_vm7 = vcmp.ge.f32.partialorder %v653_v36, 0.0  ;;  %v744_v33 = vmul.f32 0.01, %v653_v36 }
 0x159   : > { %12174 = vst [vmem:[#allocation50_spill] sm:$0xff] %v7762_v39  ;;  %v7766_v14 = vpop.permute.xlu0 %1905 }
 0x15a   : > { %12175 = vst [vmem:[#allocation51_spill] sm:$0xff] %v7764_v58  ;;  %v776_v45 = vsel %vm712_vm7, %v653_v36, %v744_v33  ;;  %v473_v33 = vld [vmem:[%s7390_s15 + $0xf0] sm:$0xff]  ;;  %v12221_v58 = vmov 0 }
 0x15b   : > { %12176 = vst [vmem:[#allocation52_spill] sm:$0xff] %v7766_v14  ;;  %v1419_v36 = vld [vmem:[#allocation2 + $0x89] sm:$0xff]  ;;  %v12207_v14 = vmov 0 }
 0x15c   : > { %812 = vst.msk [vmem:[#allocation2 + $0xa8] sm:$0xff] %vm12183_vm14, %v776_v45  ;;  %v1387_v45 = vld [vmem:[#allocation2 + $0x88] sm:$0xff] }
 0x15d   : > { %1921 = vrot.lane.b32.xlu2 %v7771_v50, %s12010_s24  ;;  %v7906_v44 = vld [vmem:[#allocation2 + $0xa0] sm:$0xff] }
 0x15e   : > { %1795 = vrot.lane.b32.xlu1 %v1417_v27, %s12014_s20  ;;  %1923 = vrot.lane.b32.xlu0 %v1483_v16, %s12010_s24  ;;  %v1518_v16 = vsel %vm7730_vm2, %v1418_v24, 0.0  ;;  %vm12194_vm2 = vcmask 23552   ;;  %12216 = vst [vmem:[#allocation79_spill] sm:$0xff] %v7906_v44 }
 0x15f   : > { %6689 = vmatmul.msk.f32.gmra.mxu0 %vm12182_vm3, %v473_v33  ;;  %vm12193_vm3 = vcmask 64512  }
 0x160   : > { %v7785_v10 = vpop.permute.xlu2 %1655  ;;  %v7787_v61 = vpop.permute.xlu1 %1777 }
 0x161   : > { %12179 = vst [vmem:[#allocation53_spill] sm:$0xff] %v7785_v10  ;;  %v7790_v59 = vpop.permute.xlu0 %2129 }
 0x162   : > { %12180 = vst [vmem:[#allocation54_spill] sm:$0xff] %v7787_v61 }
 0x163   : > { %12181 = vst [vmem:[#allocation55_spill] sm:$0xff] %v7790_v59  ;;  %v7901_v61 = vld [vmem:[#allocation2 + $0xa8] sm:$0xff] }
 0x164   : > { %12215 = vst [vmem:[#allocation78_spill] sm:$0xff] %v7901_v61 }
 0x165   : > { %2145 = vrot.lane.b32.xlu2 %v1417_v27, %s12008_s30  ;;  %v655_v27 = vpop.f32.mrf.mxu0 }
 0x166   : > { %2019 = vrot.lane.b32.xlu1 %v1386_v15, %s12012_s23  ;;  %2147 = vrot.lane.b32.xlu0 %v1518_v16, %s12008_s30  ;;  %v968_v15 = vand.u32 15, %v842_v56  ;;  %v656_v16 = vadd.f32 %v7436_v18, %v655_v27  ;;  %v474_v56 = vld [vmem:[%s7390_s15 + $0xf8] sm:$0xff]  ;;  %v7828_v27 = vld [vmem:[#allocation2 + $0x8f] sm:$0xff]  ;;  %s12022_s15 = smov 64  }
 0x167   : > { %6690 = vmatmul.msk.f32.gmra.mxu0 %vm12194_vm2, %v474_v56  ;;  %v843_v56 = vadd.s32 128, %v7442_v25 }
 0x168   : > { %v7799_v34 = vpop.permute.xlu2 %1909  ;;  %v7801_v4 = vpop.permute.xlu1 %1653  ;;  %vm713_vm14 = vcmp.ge.f32.partialorder %v656_v16, 0.0  ;;  %v745_v10 = vmul.f32 0.01, %v656_v16  ;;  %vm7818_vm7 = vcmp.lt.s32.totalorder %v968_v15, 15 }
 0x169   : > { %12184 = vst [vmem:[#allocation56_spill] sm:$0xff] %v7799_v34  ;;  %v7803_v28 = vpop.permute.xlu0 %2005 }
 0x16a   : > { %12185 = vst [vmem:[#allocation57_spill] sm:$0xff] %v7801_v4  ;;  %v777_v0 = vsel %vm713_vm14, %v656_v16, %v745_v10  ;;  %v1389_v16 = vld [vmem:[#allocation2 + $0x98] sm:$0xff] }
 0x16b   : > { %12186 = vst [vmem:[#allocation58_spill] sm:$0xff] %v7803_v28  ;;  %v12190_v28 = vmov 0 }
 0x16c   : > { %v12191_v28 = vsel %vm7818_vm7, 4294967295, %v12190_v28  ;;  %813 = vst.msk [vmem:[#allocation2 + $0xb0] sm:$0xff] %vm12193_vm3, %v777_v0 }
 0x16d   : > { %2021 = vrot.lane.b32.xlu2 %v1387_v45, %s12012_s23  ;;  %12192 = vst [vmem:[#allocation62_spill] sm:$0xff] %v12191_v28 }
 0x16e   : > { %1671 = vrot.lane.b32.xlu1 %v1387_v45, %s12016_s16  ;;  %1799 = vrot.lane.b32.xlu0 %v1419_v36, %s12014_s20  ;;  %v1450_v45 = vsel %vm7818_vm7, %v1418_v24, 0.0  ;;  %v658_v24 = vpop.f32.mrf.mxu0 }
 0x170   : > { %v7812_v34 = vpop.permute.xlu2 %2133  ;;  %v7814_v4 = vpop.permute.xlu1 %1907 }
 0x171   : > { %12187 = vst [vmem:[#allocation59_spill] sm:$0xff] %v7812_v34  ;;  %v7816_v33 = vpop.permute.xlu0 %1781  ;;  %v1388_v34 = vld [vmem:[#allocation2 + $0x90] sm:$0xff] }
 0x172   : > { %12188 = vst [vmem:[#allocation60_spill] sm:$0xff] %v7814_v4 }
 0x173   : > { %12189 = vst [vmem:[#allocation61_spill] sm:$0xff] %v7816_v33  ;;  %v659_v33 = vadd.f32 %v7436_v18, %v658_v24  ;;  %v7862_v24 = vld [vmem:[#allocation2 + $0x9f] sm:$0xff]  ;;  %v7948_v54 = vld [vmem:[#allocation2 + $0xb0] sm:$0xff] }
 0x174   : > { %12229 = vst [vmem:[#allocation87_spill] sm:$0xff] %v7948_v54  ;;  %v7969_v32 = vld [vmem:[#allocation2 + $0xaf] sm:$0xff] }
 0x175   : > { %1797 = vrot.lane.b32.xlu2 %v1450_v45, %s12014_s20  ;;  %v975_v45 = vand.u32 15, %v843_v56  ;;  %vm714_vm2 = vcmp.ge.f32.partialorder %v659_v33, 0.0  ;;  %v746_v39 = vmul.f32 0.01, %v659_v33 }
 0x176   : > { %1925 = vrot.lane.b32.xlu1 %v7828_v27, %s12010_s24  ;;  %2023 = vrot.lane.b32.xlu0 %v1388_v34, %s12012_s23 }
 0x177   : > { %vm7853_vm14 = vcmp.gt.s32.totalorder %v975_v45, 0  ;;  %v778_v11 = vsel %vm714_vm2, %v659_v33, %v746_v39 }
 0x178   : > { %v7833_v15 = vpop.permute.xlu2 %2009  ;;  %v7835_v10 = vpop.permute.xlu1 %2131  ;;  %814 = vst.msk [vmem:[#allocation2 + $0xb8] sm:$0xff] %vm12193_vm3, %v778_v11  ;;  %v7874_v11 = vld [vmem:[#allocation2 + $0x91] sm:$0xff] }
 0x179   : > { %12195 = vst [vmem:[#allocation63_spill] sm:$0xff] %v7833_v15  ;;  %v7837_v0 = vpop.permute.xlu0 %1657 }
 0x17a   : > { %12196 = vst [vmem:[#allocation64_spill] sm:$0xff] %v7835_v10 }
 0x17b   : > { %12197 = vst [vmem:[#allocation65_spill] sm:$0xff] %v7837_v0  ;;  %v7850_v0 = vld [vmem:[#allocation2 + $0x97] sm:$0xff] }
 0x17c   : > { %v1485_v56 = vsel %vm7853_vm14, %v7850_v0, 0.0  ;;  %12206 = vst [vmem:[#allocation72_spill] sm:$0xff] %v7874_v11 }
 0x17d   : > { %1673 = vrot.lane.b32.xlu2 %v1388_v34, %s12016_s16  ;;  %v844_v34 = vadd.s32 136, %v7442_v25 }
 0x17e   : > { %2149 = vrot.lane.b32.xlu1 %v1419_v36, %s12008_s30  ;;  %1675 = vrot.lane.b32.xlu0 %v1389_v16, %s12016_s16  ;;  %v12201_v36 = vmov 0 }
 0x17f   : > { %v12202_v36 = vsel %vm7853_vm14, 4294967295, %v12201_v36  ;;  %v982_v45 = vand.u32 15, %v844_v34  ;;  %v1520_v34 = vsel %vm7818_vm7, %v7874_v11, 0.0 }
 0x180   : > { %v7844_v4 = vpop.permute.xlu2 %1785  ;;  %v7846_v15 = vpop.permute.xlu1 %1783 }
 0x181   : > { %12198 = vst [vmem:[#allocation66_spill] sm:$0xff] %v7844_v4  ;;  %v7848_v10 = vpop.permute.xlu0 %1911  ;;  %v661_v4 = vpop.f32.mrf.mxu0  ;;  %vm7876_vm3 = vcmp.lt.s32.totalorder %v982_v45, 15 }
 0x182   : > { %12199 = vst [vmem:[#allocation67_spill] sm:$0xff] %v7846_v15  ;;  %v12208_v14 = vsel %vm7876_vm3, 4294967295, %v12207_v14 }
 0x183   : > { %12200 = vst [vmem:[#allocation68_spill] sm:$0xff] %v7848_v10  ;;  %v662_v10 = vadd.f32 %v7436_v18, %v661_v4  ;;  %v1452_v4 = vsel %vm7876_vm3, %v7874_v11, 0.0  ;;  %v12315_v11 = vmov 0 }
 0x184   : > { %12209 = vst [vmem:[#allocation73_spill] sm:$0xff] %v12208_v14 }
 0x185   : > { %1927 = vrot.lane.b32.xlu2 %v1485_v56, %s12010_s24  ;;  %vm715_vm2 = vcmp.ge.f32.partialorder %v662_v10, 0.0  ;;  %v747_v56 = vmul.f32 0.01, %v662_v10 }
 0x186   : > { %2025 = vrot.lane.b32.xlu1 %v1389_v16, %s12012_s23  ;;  %1929 = vrot.lane.b32.xlu0 %v7862_v24, %s12010_s24 }
 0x187   : > { %v779_v16 = vsel %vm715_vm2, %v662_v10, %v747_v56  ;;  %vm12217_vm2 = vcmask 64512  }
 0x188   : > { %v7868_v39 = vpop.permute.xlu2 %1661  ;;  %v7870_v33 = vpop.permute.xlu1 %2007  ;;  %815 = vst.msk [vmem:[#allocation2 + $0xc0] sm:$0xff] %vm12210_vm11, %v779_v16 }
 0x189   : > { %12203 = vst [vmem:[#allocation69_spill] sm:$0xff] %v7868_v39  ;;  %v7872_v15 = vpop.permute.xlu0 %2135  ;;  %v7888_v39 = vld [vmem:[#allocation2 + $0x99] sm:$0xff]  ;;  %v664_v10 = vpop.f32.mrf.mxu0 }
 0x18a   : > { %12204 = vst [vmem:[#allocation70_spill] sm:$0xff] %v7870_v33  ;;  %v665_v16 = vadd.f32 %v7436_v18, %v664_v10 }
 0x18b   : > { %12205 = vst [vmem:[#allocation71_spill] sm:$0xff] %v7872_v15 }
 0x18c   : > { %12211 = vst [vmem:[#allocation74_spill] sm:$0xff] %v7888_v39  ;;  %vm716_vm11 = vcmp.ge.f32.partialorder %v665_v16, 0.0  ;;  %v748_v33 = vmul.f32 0.01, %v665_v16 }
 0x18d   : > { %2151 = vrot.lane.b32.xlu2 %v1520_v34, %s12008_s30  ;;  %v846_v34 = vadd.s32 152, %v7442_v25 }
 0x18e   : > { %1801 = vrot.lane.b32.xlu1 %v1452_v4, %s12014_s20  ;;  %2153 = vrot.lane.b32.xlu0 %v7888_v39, %s12008_s30  ;;  %v845_v4 = vadd.s32 144, %v7442_v25  ;;  %v780_v59 = vsel %vm716_vm11, %v665_v16, %v748_v33  ;;  %v7919_v16 = vld [vmem:[#allocation2 + $0xa7] sm:$0xff] }
 0x18f   : > { %816 = vst.msk [vmem:[#allocation2 + $0xc8] sm:$0xff] %vm12217_vm2, %v780_v59  ;;  %v996_v10 = vand.u32 15, %v846_v34  ;;  %v7925_v59 = vld [vmem:[#allocation2 + $0xa1] sm:$0xff] }
 0x190   : > { %v7893_v45 = vpop.permute.xlu2 %1915  ;;  %v7895_v56 = vpop.permute.xlu1 %1659  ;;  %12223 = vst [vmem:[#allocation83_spill] sm:$0xff] %v7925_v59 }
 0x191   : > { %12212 = vst [vmem:[#allocation75_spill] sm:$0xff] %v7893_v45  ;;  %v7898_v15 = vpop.permute.xlu0 %1787  ;;  %vm7921_vm11 = vcmp.lt.s32.totalorder %v996_v10, 15  ;;  %v667_v10 = vpop.f32.mrf.mxu0 }
 0x192   : > { %12213 = vst [vmem:[#allocation76_spill] sm:$0xff] %v7895_v56  ;;  %v989_v56 = vand.u32 15, %v845_v4  ;;  %v12222_v58 = vsel %vm7921_vm11, 4294967295, %v12221_v58  ;;  %v1454_v4 = vsel %vm7921_vm11, %v7925_v59, 0.0 }
 0x193   : > { %12214 = vst [vmem:[#allocation77_spill] sm:$0xff] %v7898_v15 }
 0x194   : > { %vm7927_vm2 = vcmp.gt.s32.totalorder %v989_v56, 0  ;;  %v668_v56 = vadd.f32 %v7436_v18, %v667_v10 }
 0x195   : > { %1803 = vrot.lane.b32.xlu2 %v7888_v39, %s12014_s20  ;;  %v12225_v62 = vsel %vm7927_vm2, 4294967295, %v12224_v62  ;;  %v1487_v34 = vsel %vm7927_vm2, %v7919_v16, 0.0  ;;  %v12279_v39 = vmov 0  ;;  %vm12282_vm2 = vcmask 64512  }
 0x196   : > { %1677 = vrot.lane.b32.xlu1 %v7906_v44, %s12016_s16  ;;  %2029 = vrot.lane.b32.xlu0 %v7901_v61, %s12012_s23  ;;  %vm717_vm7 = vcmp.ge.f32.partialorder %v668_v56, 0.0  ;;  %v749_v7 = vmul.f32 0.01, %v668_v56 }
 0x198   : > { %v7913_v45 = vpop.permute.xlu2 %2139  ;;  %v7915_v15 = vpop.permute.xlu1 %1913  ;;  %v781_v29 = vsel %vm717_vm7, %v668_v56, %v749_v7  ;;  %v1003_v56 = vand.u32 15, %v847_v38 }
 0x199   : > { %12218 = vst [vmem:[#allocation80_spill] sm:$0xff] %v7913_v45  ;;  %v7917_v33 = vpop.permute.xlu0 %2011 }
 0x19a   : > { %12219 = vst [vmem:[#allocation81_spill] sm:$0xff] %v7915_v15  ;;  %vm7971_vm7 = vcmp.gt.s32.totalorder %v1003_v56, 0 }
 0x19b   : > { %12220 = vst [vmem:[#allocation82_spill] sm:$0xff] %v7917_v33 }
 0x19c   : > { %817 = vst.msk [vmem:[#allocation2 + $0xd0] sm:$0xff] %vm12230_vm5, %v781_v29 }
 0x19d   : > { %2027 = vrot.lane.b32.xlu2 %v7906_v44, %s12012_s23 }
 0x19e   : > { %1931 = vrot.lane.b32.xlu1 %v1487_v34, %s12010_s24  ;;  %1805 = vrot.lane.b32.xlu0 %v1454_v4, %s12014_s20  ;;  %v1522_v34 = vsel %vm7876_vm3, %v7925_v59, 0.0  ;;  %v670_v4 = vpop.f32.mrf.mxu0  ;;  %vm12238_vm3 = vcmask 64512  }
 0x19f   : > { %v671_v29 = vadd.f32 %v7436_v18, %v670_v4 }
 0x1a0   : > { %v7942_v45 = vpop.permute.xlu2 %1791  ;;  %v7944_v33 = vpop.permute.xlu1 %2137 }
 0x1a1   : > { %12226 = vst [vmem:[#allocation84_spill] sm:$0xff] %v7942_v45  ;;  %v7946_v15 = vpop.permute.xlu0 %1663  ;;  %vm718_vm5 = vcmp.ge.f32.partialorder %v671_v29, 0.0 }
 0x1a2   : > { %12227 = vst [vmem:[#allocation85_spill] sm:$0xff] %v7944_v33  ;;  %v750_v33 = vmul.f32 0.01, %v671_v29 }
 0x1a3   : > { %12228 = vst [vmem:[#allocation86_spill] sm:$0xff] %v7946_v15  ;;  %v7967_v15 = vld [vmem:[#allocation2 + $0xb7] sm:$0xff]  ;;  %v8062_v48 = vld [vmem:[#allocation2 + $0xcf] sm:$0xff] }
 0x1a4   : > { %v782_v17 = vsel %vm718_vm5, %v671_v29, %v750_v33  ;;  %v1489_v38 = vsel %vm7971_vm7, %v7967_v15, 0.0 }
 0x1a5   : > { %1679 = vrot.lane.b32.xlu2 %v7901_v61, %s12016_s16  ;;  %818 = vst.msk [vmem:[#allocation2 + $0xd8] sm:$0xff] %vm12238_vm3, %v782_v17  ;;  %v7995_v17 = vld [vmem:[#allocation2 + $0xb9] sm:$0xff] }
 0x1a6   : > { %2155 = vrot.lane.b32.xlu1 %v1522_v34, %s12008_s30  ;;  %1681 = vrot.lane.b32.xlu0 %v7948_v54, %s12016_s16  ;;  %v12234_v34 = vmov 0  ;;  %v673_v4 = vpop.f32.mrf.mxu0 }
 0x1a7   : > { %v12235_v34 = vsel %vm7971_vm7, 4294967295, %v12234_v34  ;;  %v674_v29 = vadd.f32 %v7436_v18, %v673_v4 }
 0x1a8   : > { %v7960_v10 = vpop.permute.xlu2 %2015  ;;  %v7962_v7 = vpop.permute.xlu1 %2013  ;;  %12236 = vst [vmem:[#allocation91_spill] sm:$0xff] %v12235_v34 }
 0x1a9   : > { %12231 = vst [vmem:[#allocation88_spill] sm:$0xff] %v7960_v10  ;;  %v7965_v45 = vpop.permute.xlu0 %1917  ;;  %v7977_v10 = vld [vmem:[#allocation2 + $0xa9] sm:$0xff]  ;;  %vm719_vm5 = vcmp.ge.f32.partialorder %v674_v29, 0.0 }
 0x1aa   : > { %12232 = vst [vmem:[#allocation89_spill] sm:$0xff] %v7962_v7  ;;  %v751_v7 = vmul.f32 0.01, %v674_v29 }
 0x1ab   : > { %12233 = vst [vmem:[#allocation90_spill] sm:$0xff] %v7965_v45 }
 0x1ac   : > { %12237 = vst [vmem:[#allocation92_spill] sm:$0xff] %v7977_v10  ;;  %v783_v14 = vsel %vm719_vm5, %v674_v29, %v751_v7  ;;  %v848_v7 = vadd.s32 168, %v7442_v25  ;;  %v8009_v29 = vld [vmem:[#allocation2 + $0xb8] sm:$0xff] }
 0x1ad   : > { %1933 = vrot.lane.b32.xlu2 %v7969_v32, %s12010_s24  ;;  %819 = vst.msk [vmem:[#allocation2 + $0xe0] sm:$0xff] %vm12238_vm3, %v783_v14  ;;  %v8013_v14 = vld [vmem:[#allocation2 + $0xc0] sm:$0xff]  ;;  %v8133_v43 = vld [vmem:[#allocation2 + $0xd7] sm:$0xff] }
 0x1ae   : > { %1807 = vrot.lane.b32.xlu1 %v7977_v10, %s12014_s20  ;;  %1935 = vrot.lane.b32.xlu0 %v1489_v38, %s12010_s24  ;;  %12245 = vst [vmem:[#allocation99_spill] sm:$0xff] %v8009_v29 }
 0x1af   : > { %12246 = vst [vmem:[#allocation100_spill] sm:$0xff] %v8013_v14 }
 0x1b0   : > { %v7986_v56 = vpop.permute.xlu2 %1667  ;;  %v7988_v33 = vpop.permute.xlu1 %1789 }
 0x1b1   : > { %12239 = vst [vmem:[#allocation93_spill] sm:$0xff] %v7986_v56  ;;  %v7991_v45 = vpop.permute.xlu0 %2141  ;;  %v1010_v56 = vand.u32 15, %v848_v7  ;;  %v12250_v7 = vmov 0 }
 0x1b2   : > { %12240 = vst [vmem:[#allocation94_spill] sm:$0xff] %v7988_v33 }
 0x1b3   : > { %12241 = vst [vmem:[#allocation95_spill] sm:$0xff] %v7991_v45  ;;  %vm8031_vm5 = vcmp.lt.s32.totalorder %v1010_v56, 15 }
 0x1b4   : > { %v12251_v7 = vsel %vm8031_vm5, 4294967295, %v12250_v7  ;;  %v8135_v42 = vld [vmem:[#allocation2 + $0xe0] sm:$0xff] }
 0x1b5   : > { %2157 = vrot.lane.b32.xlu2 %v7977_v10, %s12008_s30  ;;  %v8037_v10 = vld [vmem:[#allocation2 + $0xc8] sm:$0xff]  ;;  %12278 = vst [vmem:[#allocation121_spill] sm:$0xff] %v8135_v42 }
 0x1b6   : > { %2031 = vrot.lane.b32.xlu1 %v7948_v54, %s12012_s23  ;;  %1811 = vrot.lane.b32.xlu0 %v7995_v17, %s12014_s20  ;;  %12252 = vst [vmem:[#allocation104_spill] sm:$0xff] %v8037_v10 }
 0x1b8   : > { %v8002_v38 = vpop.permute.xlu2 %1921  ;;  %v8004_v18 = vpop.permute.xlu1 %1665 }
 0x1b9   : > { %12242 = vst [vmem:[#allocation96_spill] sm:$0xff] %v8002_v38  ;;  %v8006_v4 = vpop.permute.xlu0 %2017  ;;  %v676_v38 = vpop.f32.mrf.mxu0 }
 0x1ba   : > { %12243 = vst [vmem:[#allocation97_spill] sm:$0xff] %v8004_v18  ;;  %v8022_v18 = vld [vmem:[%s12103_s2] ss:$0 sm:$0xff] }
 0x1bb   : > { %12244 = vst [vmem:[#allocation98_spill] sm:$0xff] %v8006_v4  ;;  %v677_v4 = vadd.f32 %v8022_v18, %v676_v38 }
 0x1bd   : > { %2033 = vrot.lane.b32.xlu2 %v8009_v29, %s12012_s23  ;;  %vm720_vm3 = vcmp.ge.f32.partialorder %v677_v4, 0.0  ;;  %v752_v9 = vmul.f32 0.01, %v677_v4 }
 0x1be   : > { %1683 = vrot.lane.b32.xlu1 %v8009_v29, %s12016_s16  ;;  %2035 = vrot.lane.b32.xlu0 %v8013_v14, %s12012_s23  ;;  %v8035_v29 = vld [vmem:[#allocation2 + $0xb1] sm:$0xff] }
 0x1bf   : > { %v784_v5 = vsel %vm720_vm3, %v677_v4, %v752_v9  ;;  %v1456_v38 = vsel %vm8031_vm5, %v8035_v29, 0.0  ;;  %vm12257_vm3 = vcmask 64512  }
 0x1c0   : > { %v8025_v33 = vpop.permute.xlu2 %2145  ;;  %v8027_v45 = vpop.permute.xlu1 %1919  ;;  %820 = vst.msk [vmem:[#allocation2 + $0xe8] sm:$0xff] %vm12253_vm13, %v784_v5 }
 0x1c1   : > { %12247 = vst [vmem:[#allocation101_spill] sm:$0xff] %v8025_v33  ;;  %v8029_v19 = vpop.permute.xlu0 %1793  ;;  %v679_v56 = vpop.f32.mrf.mxu0 }
 0x1c2   : > { %12248 = vst [vmem:[#allocation102_spill] sm:$0xff] %v8027_v45  ;;  %v680_v33 = vadd.f32 %v8022_v18, %v679_v56 }
 0x1c3   : > { %12249 = vst [vmem:[#allocation103_spill] sm:$0xff] %v8029_v19  ;;  %v8044_v19 = vld [vmem:[#allocation2 + $0xbf] sm:$0xff] }
 0x1c4   : > { %vm721_vm13 = vcmp.ge.f32.partialorder %v680_v33, 0.0  ;;  %v753_v5 = vmul.f32 0.01, %v680_v33 }
 0x1c5   : > { %1809 = vrot.lane.b32.xlu2 %v1456_v38, %s12014_s20  ;;  %v850_v38 = vadd.s32 184, %v7442_v25 }
 0x1c6   : > { %1937 = vrot.lane.b32.xlu1 %v8044_v19, %s12010_s24  ;;  %1687 = vrot.lane.b32.xlu0 %v8037_v10, %s12016_s16  ;;  %v785_v47 = vsel %vm721_vm13, %v680_v33, %v753_v5  ;;  %v8075_v5 = vld [vmem:[#allocation2 + $0xc7] sm:$0xff] }
 0x1c7   : > { %821 = vst.msk [vmem:[#allocation2 + $0xf0] sm:$0xff] %vm12257_vm3, %v785_v47  ;;  %v1024_v56 = vand.u32 15, %v850_v38  ;;  %v852_v38 = vadd.s32 200, %v7442_v25 }
 0x1c8   : > { %v8051_v9 = vpop.permute.xlu2 %2021  ;;  %v8053_v4 = vpop.permute.xlu1 %2143 }
 0x1c9   : > { %12254 = vst [vmem:[#allocation105_spill] sm:$0xff] %v8051_v9  ;;  %v8055_v45 = vpop.permute.xlu0 %1669  ;;  %v682_v9 = vpop.f32.mrf.mxu0  ;;  %vm8077_vm13 = vcmp.lt.s32.totalorder %v1024_v56, 15 }
 0x1ca   : > { %12255 = vst [vmem:[#allocation106_spill] sm:$0xff] %v8053_v4  ;;  %v683_v47 = vadd.f32 %v8022_v18, %v682_v9 }
 0x1cb   : > { %12256 = vst [vmem:[#allocation107_spill] sm:$0xff] %v8055_v45  ;;  %v1017_v45 = vand.u32 15, %v849_v20 }
 0x1cc   : > { %vm722_vm3 = vcmp.ge.f32.partialorder %v683_v47, 0.0  ;;  %v754_v20 = vmul.f32 0.01, %v683_v47 }
 0x1cd   : > { %1685 = vrot.lane.b32.xlu2 %v8013_v14, %s12016_s16  ;;  %v12261_v14 = vmov 0  ;;  %vm8084_vm7 = vcmp.gt.s32.totalorder %v1017_v45, 0  ;;  %v1038_v45 = vand.u32 15, %v852_v38  ;;  %v8118_v38 = vld [vmem:[#allocation2 + $0xd0] sm:$0xff] }
 0x1ce   : > { %2037 = vrot.lane.b32.xlu1 %v8037_v10, %s12012_s23  ;;  %1941 = vrot.lane.b32.xlu0 %v8062_v48, %s12010_s24  ;;  %v12262_v14 = vsel %vm8077_vm13, 4294967295, %v12261_v14  ;;  %v8081_v10 = vld [vmem:[#allocation2 + $0xc1] sm:$0xff]  ;;  %v1491_v9 = vsel %vm8084_vm7, %v8075_v5, 0.0  ;;  %v786_v56 = vsel %vm722_vm3, %v683_v47, %v754_v20  ;;  %v12271_v47 = vmov 0  ;;  %v8111_v20 = vld [vmem:[#allocation2 + $0xd1] sm:$0xff]  ;;  %12274 = vst [vmem:[#allocation117_spill] sm:$0xff] %v8118_v38 }
 0x1cf   : > { %822 = vst.msk [vmem:[#allocation2 + $0xf8] sm:$0xff] %vm12267_vm6, %v786_v56  ;;  %vm8107_vm3 = vcmp.lt.s32.totalorder %v1038_v45, 15 }
 0x1d0   : > { %v8068_v4 = vpop.permute.xlu2 %1797  ;;  %v8070_v53 = vpop.permute.xlu1 %1795  ;;  %v12272_v47 = vsel %vm8107_vm3, 4294967295, %v12271_v47  ;;  %v1460_v56 = vsel %vm8107_vm3, %v8111_v20, 0.0 }
 0x1d1   : > { %12258 = vst [vmem:[#allocation108_spill] sm:$0xff] %v8068_v4  ;;  %v8073_v33 = vpop.permute.xlu0 %1923  ;;  %v12263_v4 = vmov 0 }
 0x1d2   : > { %12259 = vst [vmem:[#allocation109_spill] sm:$0xff] %v8070_v53  ;;  %v12264_v4 = vsel %vm8084_vm7, 4294967295, %v12263_v4  ;;  %v8088_v53 = vld [vmem:[#allocation2 + $0xd8] sm:$0xff] }
 0x1d3   : > { %12260 = vst [vmem:[#allocation110_spill] sm:$0xff] %v8073_v33  ;;  %v1458_v33 = vsel %vm8077_vm13, %v8081_v10, 0.0 }
 0x1d4   : > { %12265 = vst [vmem:[#allocation111_spill] sm:$0xff] %v12264_v4  ;;  %v685_v45 = vpop.f32.mrf.mxu0 }
 0x1d5   : > { %12266 = vst [vmem:[#allocation112_spill] sm:$0xff] %v8088_v53  ;;  %1939 = vrot.lane.b32.xlu2 %v1491_v9, %s12010_s24  ;;  %v8113_v9 = vld [vmem:[#allocation2 + $0xc9] sm:$0xff] }
 0x1d6   : > { %1813 = vrot.lane.b32.xlu1 %v1458_v33, %s12014_s20  ;;  %2041 = vrot.lane.b32.xlu0 %v8088_v53, %s12012_s23  ;;  %12273 = vst [vmem:[#allocation116_spill] sm:$0xff] %v12272_v47  ;;  %v851_v33 = vadd.s32 192, %v7442_v25  ;;  %v8256_v22 = vld [vmem:[#allocation2 + $0xf7] sm:$0xff]  ;;  %v8441_v47 = vld [vmem:[#allocation2 + $0x5f] sm:$0xff] }
 0x1d7   : > { %v8262_v49 = vld [vmem:[#allocation2 + $0xf1] sm:$0xff]  ;;  %12355 = vst [vmem:[#allocation182_spill] sm:$0xff] %v8441_v47 }
 0x1d8   : > { %v8101_v54 = vpop.permute.xlu2 %1673  ;;  %v8103_v28 = vpop.permute.xlu1 %2019  ;;  %v1031_v63 = vand.u32 15, %v851_v33 }
 0x1d9   : > { %12268 = vst [vmem:[#allocation113_spill] sm:$0xff] %v8101_v54  ;;  %v8105_v59 = vpop.permute.xlu0 %2147  ;;  %v686_v54 = vadd.f32 %v8022_v18, %v685_v45 }
 0x1da   : > { %12269 = vst [vmem:[#allocation114_spill] sm:$0xff] %v8103_v28  ;;  %vm8137_vm7 = vcmp.gt.s32.totalorder %v1031_v63, 0 }
 0x1db   : > { %12270 = vst [vmem:[#allocation115_spill] sm:$0xff] %v8105_v59  ;;  %vm723_vm6 = vcmp.ge.f32.partialorder %v686_v54, 0.0  ;;  %v755_v1 = vmul.f32 0.01, %v686_v54  ;;  %v12280_v39 = vsel %vm8137_vm7, 4294967295, %v12279_v39  ;;  %v1493_v33 = vsel %vm8137_vm7, %v8133_v43, 0.0 }
 0x1dc   : > { %12281 = vst [vmem:[#allocation122_spill] sm:$0xff] %v12280_v39  ;;  %vm12289_vm7 = vcmask 64512  }
 0x1dd   : > { %1815 = vrot.lane.b32.xlu2 %v8113_v9, %s12014_s20  ;;  %v787_v61 = vsel %vm723_vm6, %v686_v54, %v755_v1  ;;  %v688_v54 = vpop.f32.mrf.mxu0 }
 0x1de   : > { %1689 = vrot.lane.b32.xlu1 %v8118_v38, %s12016_s16  ;;  %1817 = vrot.lane.b32.xlu0 %v1460_v56, %s12014_s20  ;;  %v853_v56 = vadd.s32 208, %v7442_v25  ;;  %823 = vst.msk [vmem:[#allocation2 + $0x100] sm:$0xff] %vm12282_vm2, %v787_v61  ;;  %v689_v61 = vadd.f32 %v8022_v18, %v688_v54 }
 0x1e0   : > { %v8127_v59 = vpop.permute.xlu2 %1927  ;;  %v8129_v28 = vpop.permute.xlu1 %1671  ;;  %v1045_v45 = vand.u32 15, %v853_v56  ;;  %vm724_vm2 = vcmp.ge.f32.partialorder %v689_v61, 0.0 }
 0x1e1   : > { %12275 = vst [vmem:[#allocation118_spill] sm:$0xff] %v8127_v59  ;;  %v8131_v31 = vpop.permute.xlu0 %1799 }
 0x1e2   : > { %12276 = vst [vmem:[#allocation119_spill] sm:$0xff] %v8129_v28  ;;  %v756_v28 = vmul.f32 0.01, %v689_v61  ;;  %vm8160_vm6 = vcmp.gt.s32.totalorder %v1045_v45, 0 }
 0x1e3   : > { %12277 = vst [vmem:[#allocation120_spill] sm:$0xff] %v8131_v31  ;;  %v8158_v31 = vld [vmem:[#allocation2 + $0xe7] sm:$0xff] }
 0x1e4   : > { %v1495_v56 = vsel %vm8160_vm6, %v8158_v31, 0.0 }
 0x1e5   : > { %2039 = vrot.lane.b32.xlu2 %v8118_v38, %s12012_s23  ;;  %v12286_v38 = vmov 0  ;;  %v691_v54 = vpop.f32.mrf.mxu0 }
 0x1e6   : > { %1943 = vrot.lane.b32.xlu1 %v1493_v33, %s12010_s24  ;;  %1693 = vrot.lane.b32.xlu0 %v8135_v42, %s12016_s16  ;;  %v12287_v38 = vsel %vm8160_vm6, 4294967295, %v12286_v38  ;;  %v788_v33 = vsel %vm724_vm2, %v689_v61, %v756_v28  ;;  %v692_v61 = vadd.f32 %v8022_v18, %v691_v54  ;;  %vm8265_vm6 = vcmp.gt.s32.totalorder %v1059_v13, 0 }
 0x1e7   : > { %12288 = vst [vmem:[#allocation126_spill] sm:$0xff] %v12287_v38  ;;  %v12316_v11 = vsel %vm8265_vm6, 4294967295, %v12315_v11  ;;  %v8289_v38 = vld [vmem:[#allocation2 + $0x100] sm:$0xff] }
 0x1e8   : > { %v8151_v1 = vpop.permute.xlu2 %2151  ;;  %v8153_v63 = vpop.permute.xlu1 %1925  ;;  %824 = vst.msk [vmem:[#allocation2 + $0x108] sm:$0xff] %vm12289_vm7, %v788_v33  ;;  %vm725_vm2 = vcmp.ge.f32.partialorder %v692_v61, 0.0  ;;  %v8186_v33 = vld [vmem:[#allocation2 + $0xe9] sm:$0xff] }
 0x1e9   : > { %12283 = vst [vmem:[#allocation123_spill] sm:$0xff] %v8151_v1  ;;  %v8156_v59 = vpop.permute.xlu0 %2023  ;;  %v8166_v1 = vld [vmem:[#allocation2 + $0xd9] sm:$0xff] }
 0x1ea   : > { %12284 = vst [vmem:[#allocation124_spill] sm:$0xff] %v8153_v63  ;;  %v757_v63 = vmul.f32 0.01, %v692_v61 }
 0x1eb   : > { %12285 = vst [vmem:[#allocation125_spill] sm:$0xff] %v8156_v59 }
 0x1ec   : > { %v789_v52 = vsel %vm725_vm2, %v692_v61, %v757_v63  ;;  %v854_v63 = vadd.s32 216, %v7442_v25  ;;  %v8200_v61 = vld [vmem:[#allocation2 + $0xe8] sm:$0xff]  ;;  %12317 = vst [vmem:[#allocation148_spill] sm:$0xff] %v12316_v11  ;;  %v12321_v11 = vmov 0 }
 0x1ed   : > { %1691 = vrot.lane.b32.xlu2 %v8088_v53, %s12016_s16  ;;  %v8182_v53 = vld [vmem:[#allocation2 + $0xdf] sm:$0xff]  ;;  %825 = vst.msk [vmem:[#allocation2 + $0x110] sm:$0xff] %vm12289_vm7, %v789_v52  ;;  %v8204_v52 = vld [vmem:[#allocation2 + $0xf0] sm:$0xff] }
 0x1ee   : > { %1819 = vrot.lane.b32.xlu1 %v8166_v1, %s12014_s20  ;;  %1947 = vrot.lane.b32.xlu0 %v1495_v56, %s12010_s24  ;;  %12296 = vst [vmem:[#allocation133_spill] sm:$0xff] %v8200_v61 }
 0x1ef   : > { %12297 = vst [vmem:[#allocation134_spill] sm:$0xff] %v8204_v52  ;;  %v1501_v6 = vld [vmem:[#allocation2 + $0x108] sm:$0xff] }
 0x1f0   : > { %v8175_v45 = vpop.permute.xlu2 %1803  ;;  %v8177_v28 = vpop.permute.xlu1 %2149  ;;  %12324 = vst [vmem:[#allocation153_spill] sm:$0xff] %v8289_v38 }
 0x1f1   : > { %12290 = vst [vmem:[#allocation127_spill] sm:$0xff] %v8175_v45  ;;  %v8180_v59 = vpop.permute.xlu0 %1675  ;;  %v1052_v45 = vand.u32 15, %v854_v63 }
 0x1f2   : > { %12291 = vst [vmem:[#allocation128_spill] sm:$0xff] %v8177_v28  ;;  %v8220_v28 = vld [vmem:[#allocation2 + $0xe1] sm:$0xff] }
 0x1f3   : > { %12292 = vst [vmem:[#allocation129_spill] sm:$0xff] %v8180_v59  ;;  %vm8216_vm2 = vcmp.lt.s32.totalorder %v1052_v45, 15 }
 0x1f4   : > { %v1462_v63 = vsel %vm8216_vm2, %v8220_v28, 0.0 }
 0x1f5   : > { %1945 = vrot.lane.b32.xlu2 %v8182_v53, %s12010_s24 }
 0x1f6   : > { %2043 = vrot.lane.b32.xlu1 %v8135_v42, %s12012_s23  ;;  %1823 = vrot.lane.b32.xlu0 %v8186_v33, %s12014_s20  ;;  %v8222_v42 = vld [vmem:[#allocation2 + $0xf8] sm:$0xff] }
 0x1f7   : > { %12304 = vst [vmem:[#allocation139_spill] sm:$0xff] %v8222_v42 }
 0x1f8   : > { %v8193_v18 = vpop.permute.xlu2 %2027  ;;  %v8195_v56 = vpop.permute.xlu1 %2025 }
 0x1f9   : > { %12293 = vst [vmem:[#allocation130_spill] sm:$0xff] %v8193_v18  ;;  %v8197_v54 = vpop.permute.xlu0 %1929 }
 0x1fa   : > { %12294 = vst [vmem:[#allocation131_spill] sm:$0xff] %v8195_v56  ;;  %v12301_v56 = vmov 0 }
 0x1fb   : > { %12295 = vst [vmem:[#allocation132_spill] sm:$0xff] %v8197_v54  ;;  %v12302_v56 = vsel %vm8216_vm2, 4294967295, %v12301_v56 }
 0x1fc   : > { %12303 = vst [vmem:[#allocation138_spill] sm:$0xff] %v12302_v56  ;;  %v8388_v56 = vld [vmem:[#allocation2 + $0x37] sm:$0xff] }
 0x1fd   : > { %2045 = vrot.lane.b32.xlu2 %v8200_v61, %s12012_s23 }
 0x1fe   : > { %1695 = vrot.lane.b32.xlu1 %v8200_v61, %s12016_s16  ;;  %2047 = vrot.lane.b32.xlu0 %v8204_v52, %s12012_s23  ;;  %v8228_v61 = vld [vmem:[#allocation2 + $0xef] sm:$0xff] }
 0x200   : > { %v8210_v18 = vpop.permute.xlu2 %1679  ;;  %v8212_v59 = vpop.permute.xlu1 %1801 }
 0x201   : > { %12298 = vst [vmem:[#allocation135_spill] sm:$0xff] %v8210_v18  ;;  %v8214_v54 = vpop.permute.xlu0 %2153 }
 0x202   : > { %12299 = vst [vmem:[#allocation136_spill] sm:$0xff] %v8212_v59 }
 0x203   : > { %12300 = vst [vmem:[#allocation137_spill] sm:$0xff] %v8214_v54  ;;  %v856_v54 = vadd.s32 232, %v7442_v25 }
 0x205   : > { %1821 = vrot.lane.b32.xlu2 %v1462_v63, %s12014_s20  ;;  %v8244_v63 = vld [vmem:[#allocation2 + $0xff] sm:$0xff] }
 0x206   : > { %1949 = vrot.lane.b32.xlu1 %v8228_v61, %s12010_s24  ;;  %1699 = vrot.lane.b32.xlu0 %v8222_v42, %s12016_s16  ;;  %12308 = vst [vmem:[#allocation143_spill] sm:$0xff] %v8244_v63 }
 0x208   : > { %v8234_v45 = vpop.permute.xlu2 %1933  ;;  %v8236_v18 = vpop.permute.xlu1 %1677 }
 0x209   : > { %12305 = vst [vmem:[#allocation140_spill] sm:$0xff] %v8234_v45  ;;  %v8238_v59 = vpop.permute.xlu0 %2029  ;;  %v1066_v45 = vand.u32 15, %v856_v54  ;;  %v1497_v54 = vsel %vm8265_vm6, %v8256_v22, 0.0 }
 0x20a   : > { %12306 = vst [vmem:[#allocation141_spill] sm:$0xff] %v8236_v18 }
 0x20b   : > { %12307 = vst [vmem:[#allocation142_spill] sm:$0xff] %v8238_v59  ;;  %vm8258_vm7 = vcmp.lt.s32.totalorder %v1066_v45, 15 }
 0x20c   : > { %v1464_v45 = vsel %vm8258_vm7, %v8262_v49, 0.0 }
 0x20d   : > { %1697 = vrot.lane.b32.xlu2 %v8204_v52, %s12016_s16  ;;  %v12312_v52 = vmov 0 }
 0x20e   : > { %2049 = vrot.lane.b32.xlu1 %v8222_v42, %s12012_s23  ;;  %1953 = vrot.lane.b32.xlu0 %v8244_v63, %s12010_s24  ;;  %v12313_v52 = vsel %vm8258_vm7, 4294967295, %v12312_v52  ;;  %v858_v42 = vadd.s32 248, %v7442_v25  ;;  %v1433_v63 = vld [vmem:[#allocation2 + $0xf9] sm:$0xff] }
 0x20f   : > { %12314 = vst [vmem:[#allocation147_spill] sm:$0xff] %v12313_v52 }
 0x210   : > { %v8250_v18 = vpop.permute.xlu2 %2157  ;;  %v8252_v59 = vpop.permute.xlu1 %1931 }
 0x211   : > { %12309 = vst [vmem:[#allocation144_spill] sm:$0xff] %v8250_v18  ;;  %v8254_v44 = vpop.permute.xlu0 %1805 }
 0x212   : > { %12310 = vst [vmem:[#allocation145_spill] sm:$0xff] %v8252_v59 }
 0x213   : > { %12311 = vst [vmem:[#allocation146_spill] sm:$0xff] %v8254_v44  ;;  %v1080_v44 = vand.u32 15, %v858_v42 }
 0x215   : > { %1951 = vrot.lane.b32.xlu2 %v1497_v54, %s12010_s24  ;;  %vm8284_vm14 = vcmp.lt.s32.totalorder %v1080_v44, 15  ;;  %v1434_v54 = vld [vmem:[#allocation2 + $0x101] sm:$0xff] }
 0x216   : > { %1825 = vrot.lane.b32.xlu1 %v1464_v45, %s12014_s20  ;;  %2053 = vrot.lane.b32.xlu0 %v1501_v6, %s12012_s23  ;;  %v12322_v11 = vsel %vm8284_vm14, 4294967295, %v12321_v11  ;;  %v1466_v6 = vsel %vm8284_vm14, %v1434_v54, 0.0 }
 0x217   : > { %12323 = vst [vmem:[#allocation152_spill] sm:$0xff] %v12322_v11  ;;  %v1541_v11 = vsel %vm7479_vm10, %v8388_v56, 0.0 }
 0x218   : > { %v8278_v13 = vpop.permute.xlu2 %2033  ;;  %v8280_v18 = vpop.permute.xlu1 %2155 }
 0x219   : > { %12318 = vst [vmem:[#allocation149_spill] sm:$0xff] %v8278_v13  ;;  %v8282_v59 = vpop.permute.xlu0 %1681  ;;  %v1524_v13 = vsel %vm7921_vm11, %v8035_v29, 0.0 }
 0x21a   : > { %12319 = vst [vmem:[#allocation150_spill] sm:$0xff] %v8280_v18  ;;  %v1526_v18 = vsel %vm8031_vm5, %v8081_v10, 0.0 }
 0x21b   : > { %12320 = vst [vmem:[#allocation151_spill] sm:$0xff] %v8282_v59  ;;  %v857_v59 = vadd.s32 240, %v7442_v25  ;;  %v8317_v25 = vld [vmem:[#allocation2 + $0x107] sm:$0xff] }
 0x21d   : > { %1827 = vrot.lane.b32.xlu2 %v1433_v63, %s12014_s20 }
 0x21e   : > { %1701 = vrot.lane.b32.xlu1 %v8289_v38, %s12016_s16  ;;  %1829 = vrot.lane.b32.xlu0 %v1466_v6, %s12014_s20  ;;  %s12401_s16 = smov 64   ;;  %s12588_s20 = smov 16  }
 0x220   : > { %v8296_v42 = vpop.permute.xlu2 %1809  ;;  %v8298_v44 = vpop.permute.xlu1 %1807 }
 0x221   : > { %12325 = vst [vmem:[#allocation154_spill] sm:$0xff] %v8296_v42  ;;  %v8300_v45 = vpop.permute.xlu0 %1935 }
 0x222   : > { %12326 = vst [vmem:[#allocation155_spill] sm:$0xff] %v8298_v44  ;;  %v1073_v44 = vand.u32 15, %v857_v59 }
 0x223   : > { %12327 = vst [vmem:[#allocation156_spill] sm:$0xff] %v8300_v45 }
 0x224   : > { %vm8322_vm6 = vcmp.gt.s32.totalorder %v1073_v44, 0  ;;  %v8339_v44 = vld [vmem:[#allocation2 + $0x10f] sm:$0xff] }
 0x225   : > { %2051 = vrot.lane.b32.xlu2 %v8289_v38, %s12012_s23  ;;  %v5634_v38 = vld [vmem:[%s11910_s7 + $0x58] sm:$0xff] }
 0x226   : > { %2161 = vrot.lane.b32.xlu1 %v7995_v17, %s12008_s30  ;;  %2159 = vrot.lane.b32.xlu0 %v1524_v13, %s12008_s30  ;;  %v1499_v13 = vsel %vm8322_vm6, %v8317_v25, 0.0 }
 0x228   : > { %v8311_v6 = vpop.permute.xlu2 %1685  ;;  %v8313_v42 = vpop.permute.xlu1 %2031 }
 0x229   : > { %12328 = vst [vmem:[#allocation157_spill] sm:$0xff] %v8311_v6  ;;  %v8315_v45 = vpop.permute.xlu0 %1811 }
 0x22a   : > { %12329 = vst [vmem:[#allocation158_spill] sm:$0xff] %v8313_v42  ;;  %v1530_v42 = vsel %vm8107_vm3, %v8220_v28, 0.0 }
 0x22b   : > { %12330 = vst [vmem:[#allocation159_spill] sm:$0xff] %v8315_v45 }
 0x22d   : > { %2163 = vrot.lane.b32.xlu2 %v1526_v18, %s12008_s30  ;;  %v1502_v18 = vld [vmem:[#allocation2 + $0x110] sm:$0xff] }
 0x22e   : > { %1955 = vrot.lane.b32.xlu1 %v1499_v13, %s12010_s24  ;;  %2165 = vrot.lane.b32.xlu0 %v8113_v9, %s12008_s30 }
 0x230   : > { %v8333_v59 = vpop.permute.xlu2 %1939  ;;  %v8335_v6 = vpop.permute.xlu1 %1683 }
 0x231   : > { %12333 = vst [vmem:[#allocation160_spill] sm:$0xff] %v8333_v59  ;;  %v8337_v45 = vpop.permute.xlu0 %2035 }
 0x232   : > { %12334 = vst [vmem:[#allocation161_spill] sm:$0xff] %v8335_v6 }
 0x233   : > { %12335 = vst [vmem:[#allocation162_spill] sm:$0xff] %v8337_v45  ;;  %v1528_v45 = vsel %vm8077_vm13, %v8111_v20, 0.0 }
 0x235   : > { %1957 = vrot.lane.b32.xlu2 %v8339_v44, %s12010_s24  ;;  %s12529_s24 = smov 8  }
 0x236   : > { %2055 = vrot.lane.b32.xlu1 %v1502_v18, %s12012_s23  ;;  %2171 = vrot.lane.b32.xlu0 %v1530_v42, %s12008_s30  ;;  %s12658_s23 = smov 24  }
 0x238   : > { %v8348_v13 = vpop.permute.xlu2 %1815  ;;  %v8350_v59 = vpop.permute.xlu1 %1937 }
 0x239   : > { %12336 = vst [vmem:[#allocation163_spill] sm:$0xff] %v8348_v13  ;;  %v8352_v6 = vpop.permute.xlu0 %1687 }
 0x23a   : > { %12337 = vst [vmem:[#allocation164_spill] sm:$0xff] %v8350_v59  ;;  %v8367_v59 = vld [vmem:[#allocation2 + $0x111] sm:$0xff] }
 0x23b   : > { %12338 = vst [vmem:[#allocation165_spill] sm:$0xff] %v8352_v6  ;;  %v1532_v6 = vsel %vm8216_vm2, %v8262_v49, 0.0  ;;  %vm12370_vm2 = vnez %v12107_v37 }
 0x23c   : > { %12342 = vst [vmem:[#allocation169_spill] sm:$0xff] %v8367_v59 }
 0x23d   : > { %2169 = vrot.lane.b32.xlu2 %v8166_v1, %s12008_s30 }
 0x23e   : > { %2167 = vrot.lane.b32.xlu1 %v1528_v45, %s12008_s30  ;;  %2177 = vrot.lane.b32.xlu0 %v1433_v63, %s12008_s30  ;;  %v1536_v45 = vsel %vm8284_vm14, %v8367_v59, 0.0  ;;  %vm12365_vm14 = vnez %v12202_v36 }
 0x240   : > { %v8361_v18 = vpop.permute.xlu2 %2039  ;;  %v8363_v42 = vpop.permute.xlu1 %2037 }
 0x241   : > { %12339 = vst [vmem:[#allocation166_spill] sm:$0xff] %v8361_v18  ;;  %v8365_v13 = vpop.permute.xlu0 %1941 }
 0x242   : > { %12340 = vst [vmem:[#allocation167_spill] sm:$0xff] %v8363_v42  ;;  %v1503_v42 = vld [vmem:[#allocation2 + $0x109] sm:$0xff] }
 0x243   : > { %12341 = vst [vmem:[#allocation168_spill] sm:$0xff] %v8365_v13 }
 0x245   : > { %2175 = vrot.lane.b32.xlu2 %v1532_v6, %s12008_s30  ;;  %v1534_v6 = vsel %vm8258_vm7, %v1434_v54, 0.0  ;;  %v8405_v54 = vld [vmem:[#allocation2 + $0x27] sm:$0xff]  ;;  %vm12369_vm7 = vnez %v12225_v62 }
 0x246   : > { %2173 = vrot.lane.b32.xlu1 %v8186_v33, %s12008_s30  ;;  %2183 = vrot.lane.b32.xlu0 %v1536_v45, %s12008_s30 }
 0x248   : > { %v8379_v63 = vpop.permute.xlu2 %1691  ;;  %v8381_v18 = vpop.permute.xlu1 %1813 }
 0x249   : > { %12343 = vst [vmem:[#allocation170_spill] sm:$0xff] %v8379_v63  ;;  %v8383_v13 = vpop.permute.xlu0 %2041 }
 0x24a   : > { %12344 = vst [vmem:[#allocation171_spill] sm:$0xff] %v8381_v18  ;;  %v8430_v18 = vld [vmem:[#allocation2 + $0x3f] sm:$0xff] }
 0x24b   : > { %12345 = vst [vmem:[#allocation172_spill] sm:$0xff] %v8383_v13 }
 0x24d   : > { %2181 = vrot.lane.b32.xlu2 %v1503_v42, %s12008_s30  ;;  %v8401_v42 = vld [vmem:[#allocation2 + $0x2f] sm:$0xff] }
 0x24e   : > { %2179 = vrot.lane.b32.xlu1 %v1534_v6, %s12008_s30  ;;  %2253 = vrot.lane.b32.xlu0 %v1541_v11, %s12018_s22  ;;  %v1539_v6 = vsel %vm7460_vm8, %v8405_v54, 0.0  ;;  %v8411_v11 = vld [vmem:[#allocation2 + $0x4f] sm:$0xff]  ;;  %s12400_s30 = smov 48  }
 0x250   : > { %v8395_v45 = vpop.permute.xlu2 %1945  ;;  %v8397_v59 = vpop.permute.xlu1 %1689 }
 0x251   : > { %12346 = vst [vmem:[#allocation173_spill] sm:$0xff] %v8395_v45  ;;  %v8399_v63 = vpop.permute.xlu0 %1817 }
 0x252   : > { %12347 = vst [vmem:[#allocation174_spill] sm:$0xff] %v8397_v59  ;;  %v8421_v59 = vld [vmem:[#allocation2 + $0x47] sm:$0xff] }
 0x253   : > { %12348 = vst [vmem:[#allocation175_spill] sm:$0xff] %v8399_v63  ;;  %v1543_v13 = vsel %vm7535_vm4, %v8421_v59, 0.0 }
 0x255   : > { %2251 = vrot.lane.b32.xlu2 %v8401_v42, %s12018_s22 }
 0x256   : > { %2249 = vrot.lane.b32.xlu1 %v1539_v6, %s12018_s22  ;;  %2259 = vrot.lane.b32.xlu0 %v8411_v11, %s12018_s22  ;;  %v1547_v6 = vsel %vm7605_vm15, %v7671_v21, 0.0 }
 0x258   : > { %v8415_v52 = vpop.permute.xlu2 %2045  ;;  %v8417_v45 = vpop.permute.xlu1 %1943 }
 0x259   : > { %12349 = vst [vmem:[#allocation176_spill] sm:$0xff] %v8415_v52  ;;  %v8419_v63 = vpop.permute.xlu0 %1693 }
 0x25a   : > { %12350 = vst [vmem:[#allocation177_spill] sm:$0xff] %v8417_v45 }
 0x25b   : > { %12351 = vst [vmem:[#allocation178_spill] sm:$0xff] %v8419_v63 }
 0x25d   : > { %2257 = vrot.lane.b32.xlu2 %v1543_v13, %s12018_s22  ;;  %v8445_v13 = vld [vmem:[#allocation2 + $0x57] sm:$0xff] }
 0x25e   : > { %2255 = vrot.lane.b32.xlu1 %v8430_v18, %s12018_s22  ;;  %2265 = vrot.lane.b32.xlu0 %v1547_v6, %s12018_s22  ;;  %v1545_v21 = vsel %vm7578_vm12, %v8445_v13, 0.0 }
 0x260   : > { %v8435_v63 = vpop.permute.xlu2 %1821  ;;  %v8437_v52 = vpop.permute.xlu1 %1819 }
 0x261   : > { %12352 = vst [vmem:[#allocation179_spill] sm:$0xff] %v8435_v63  ;;  %v8439_v45 = vpop.permute.xlu0 %1947 }
 0x262   : > { %12353 = vst [vmem:[#allocation180_spill] sm:$0xff] %v8437_v52  ;;  %v1549_v52 = vsel %vm7677_vm0, %v7728_v41, 0.0  ;;  %v1551_v41 = vsel %vm7735_vm9, %v7768_v8, 0.0  ;;  %v7129_v8 = vld [vmem:[#allocation2 + $0x29] sm:$0xff]  ;;  %vm12063_vm9 = vcmask 523264   ;;  %vm12425_vm0 = vcmask 457728  }
 0x263   : > { %12354 = vst [vmem:[#allocation181_spill] sm:$0xff] %v8439_v45 }
 0x265   : > { %2263 = vrot.lane.b32.xlu2 %v8441_v47, %s12018_s22  ;;  %v1553_v47 = vsel %vm7773_vm1, %v7850_v0, 0.0  ;;  %vm12043_vm1 = vcmask 195584  }
 0x266   : > { %2261 = vrot.lane.b32.xlu1 %v1545_v21, %s12018_s22  ;;  %2271 = vrot.lane.b32.xlu0 %v7771_v50, %s12018_s22  ;;  %v8466_v21 = vld [vmem:[#allocation2 + $0x6f] sm:$0xff] }
 0x268   : > { %v8453_v6 = vpop.permute.xlu2 %1697  ;;  %v8455_v63 = vpop.permute.xlu1 %2043 }
 0x269   : > { %12356 = vst [vmem:[#allocation183_spill] sm:$0xff] %v8453_v6  ;;  %v8457_v45 = vpop.permute.xlu0 %1823 }
 0x26a   : > { %12357 = vst [vmem:[#allocation184_spill] sm:$0xff] %v8455_v63 }
 0x26b   : > { %12358 = vst [vmem:[#allocation185_spill] sm:$0xff] %v8457_v45 }
 0x26d   : > { %2269 = vrot.lane.b32.xlu2 %v1549_v52, %s12018_s22 }
 0x26e   : > { %2267 = vrot.lane.b32.xlu1 %v8466_v21, %s12018_s22  ;;  %2277 = vrot.lane.b32.xlu0 %v1553_v47, %s12018_s22 }
 0x270   : > { %v8471_v50 = vpop.permute.xlu2 %1951  ;;  %v8473_v6 = vpop.permute.xlu1 %1695 }
 0x271   : > { %12359 = vst [vmem:[#allocation186_spill] sm:$0xff] %v8471_v50  ;;  %v8475_v45 = vpop.permute.xlu0 %2047  ;;  %v1555_v50 = vsel %vm12365_vm14, %v7919_v16, 0.0  ;;  %v1557_v16 = vsel %vm12369_vm7, %v7967_v15, 0.0  ;;  %v7133_v15 = vld [vmem:[#allocation2 + $0x39] sm:$0xff]  ;;  %vm12381_vm7 = vnez %v12117_v12  ;;  %vm12396_vm14 = vnez %v12144_v60 }
 0x272   : > { %12360 = vst [vmem:[#allocation187_spill] sm:$0xff] %v8473_v6  ;;  %v7141_v6 = vld [vmem:[#allocation2 + $0x50] sm:$0xff] }
 0x273   : > { %12361 = vst [vmem:[#allocation188_spill] sm:$0xff] %v8475_v45 }
 0x275   : > { %2275 = vrot.lane.b32.xlu2 %v7828_v27, %s12018_s22 }
 0x276   : > { %2273 = vrot.lane.b32.xlu1 %v1551_v41, %s12018_s22  ;;  %2283 = vrot.lane.b32.xlu0 %v7969_v32, %s12018_s22 }
 0x278   : > { %v8485_v0 = vpop.permute.xlu2 %1827  ;;  %v8487_v47 = vpop.permute.xlu1 %1949 }
 0x279   : > { %12362 = vst [vmem:[#allocation189_spill] sm:$0xff] %v8485_v0  ;;  %v8489_v52 = vpop.permute.xlu0 %1699  ;;  %v7130_v0 = vld [vmem:[#allocation2 + $0x28] sm:$0xff] }
 0x27a   : > { %12363 = vst [vmem:[#allocation190_spill] sm:$0xff] %v8487_v47 }
 0x27b   : > { %12364 = vst [vmem:[#allocation191_spill] sm:$0xff] %v8489_v52 }
 0x27d   : > { %2281 = vrot.lane.b32.xlu2 %v1555_v50, %s12018_s22  ;;  %v7131_v50 = vld [vmem:[#allocation2 + $0x31] sm:$0xff] }
 0x27e   : > { %2279 = vrot.lane.b32.xlu1 %v7862_v24, %s12018_s22  ;;  %2475 = vrot.lane.b32.xlu0 %v7129_v8, %s12022_s15  ;;  %v1576_v24 = vsel %vm12370_vm2, %v7131_v50, 0.0  ;;  %vm12377_vm2 = vnez %v12235_v34 }
 0x280   : > { %v8498_v32 = vpop.permute.xlu2 %2051  ;;  %v8500_v27 = vpop.permute.xlu1 %2049 }
 0x281   : > { %12366 = vst [vmem:[#allocation192_spill] sm:$0xff] %v8498_v32  ;;  %v8502_v41 = vpop.permute.xlu0 %1953 }
 0x282   : > { %12367 = vst [vmem:[#allocation193_spill] sm:$0xff] %v8500_v27  ;;  %v7140_v27 = vld [vmem:[#allocation2 + $0x51] sm:$0xff] }
 0x283   : > { %12368 = vst [vmem:[#allocation194_spill] sm:$0xff] %v8502_v41  ;;  %v7132_v41 = vld [vmem:[#allocation2 + $0x30] sm:$0xff] }
 0x285   : > { %2347 = vrot.lane.b32.xlu2 %v7130_v0, %s12064_s21 }
 0x286   : > { %2285 = vrot.lane.b32.xlu1 %v1557_v16, %s12018_s22  ;;  %2477 = vrot.lane.b32.xlu0 %v1576_v24, %s12022_s15  ;;  %v7134_v24 = vld [vmem:[#allocation2 + $0x38] sm:$0xff] }
 0x288   : > { %v8512_v8 = vpop.permute.xlu2 %2163  ;;  %v8514_v52 = vpop.permute.xlu1 %1825 }
 0x289   : > { %12371 = vst [vmem:[#allocation195_spill] sm:$0xff] %v8512_v8  ;;  %v8516_v32 = vpop.permute.xlu0 %2053 }
 0x28a   : > { %12372 = vst [vmem:[#allocation196_spill] sm:$0xff] %v8514_v52  ;;  %v7137_v52 = vld [vmem:[#allocation2 + $0x49] sm:$0xff] }
 0x28b   : > { %12373 = vst [vmem:[#allocation197_spill] sm:$0xff] %v8516_v32  ;;  %v1559_v32 = vsel %vm12377_vm2, %v8075_v5, 0.0  ;;  %vm12382_vm2 = vnez %v12264_v4 }
 0x28c   : > { %v1561_v5 = vsel %vm12382_vm2, %v8133_v43, 0.0  ;;  %vm12395_vm2 = vnez %v12129_v2  ;;  %v7151_v2 = vld [vmem:[#allocation2 + $0x81] sm:$0xff] }
 0x28d   : > { %2349 = vrot.lane.b32.xlu2 %v7132_v41, %s12064_s21 }
 0x28e   : > { %2287 = vrot.lane.b32.xlu1 %v8044_v19, %s12018_s22  ;;  %2479 = vrot.lane.b32.xlu0 %v7133_v15, %s12022_s15 }
 0x290   : > { %v8522_v0 = vpop.permute.xlu2 %1957  ;;  %v8524_v16 = vpop.permute.xlu1 %1701 }
 0x291   : > { %12374 = vst [vmem:[#allocation198_spill] sm:$0xff] %v8522_v0  ;;  %v8526_v50 = vpop.permute.xlu0 %1829  ;;  %v7135_v0 = vld [vmem:[#allocation2 + $0x41] sm:$0xff] }
 0x292   : > { %12375 = vst [vmem:[#allocation199_spill] sm:$0xff] %v8524_v16 }
 0x293   : > { %12376 = vst [vmem:[#allocation200_spill] sm:$0xff] %v8526_v50  ;;  %v1578_v50 = vsel %vm12381_vm7, %v7135_v0, 0.0  ;;  %v7138_v0 = vld [vmem:[#allocation2 + $0x48] sm:$0xff]  ;;  %vm12389_vm7 = vnez %v12124_v46 }
 0x295   : > { %2351 = vrot.lane.b32.xlu2 %v7134_v24, %s12064_s21 }
 0x296   : > { %2289 = vrot.lane.b32.xlu1 %v1559_v32, %s12018_s22  ;;  %2291 = vrot.lane.b32.xlu0 %v8062_v48, %s12018_s22  ;;  %v7136_v32 = vld [vmem:[#allocation2 + $0x40] sm:$0xff] }
 0x298   : > { %v8535_v19 = vpop.permute.xlu2 %2169  ;;  %v8537_v41 = vpop.permute.xlu1 %2161 }
 0x299   : > { %12378 = vst [vmem:[#allocation201_spill] sm:$0xff] %v8535_v19  ;;  %v8539_v15 = vpop.permute.xlu0 %2159 }
 0x29a   : > { %12379 = vst [vmem:[#allocation202_spill] sm:$0xff] %v8537_v41 }
 0x29b   : > { %12380 = vst [vmem:[#allocation203_spill] sm:$0xff] %v8539_v15 }
 0x29d   : > { %2481 = vrot.lane.b32.xlu2 %v1578_v50, %s12022_s15  ;;  %v7139_v50 = vld [vmem:[#allocation2 + $0x58] sm:$0xff] }
 0x29e   : > { %2353 = vrot.lane.b32.xlu1 %v7136_v32, %s12064_s21  ;;  %2293 = vrot.lane.b32.xlu0 %v1561_v5, %s12018_s22 }
 0x2a0   : > { %v8549_v48 = vpop.permute.xlu2 %2175  ;;  %v8551_v24 = vpop.permute.xlu1 %1955 }
 0x2a1   : > { %12383 = vst [vmem:[#allocation204_spill] sm:$0xff] %v8549_v48  ;;  %v8553_v16 = vpop.permute.xlu0 %2165 }
 0x2a2   : > { %12384 = vst [vmem:[#allocation205_spill] sm:$0xff] %v8551_v24  ;;  %v1580_v24 = vsel %vm12389_vm7, %v7140_v27, 0.0  ;;  %v7144_v27 = vld [vmem:[#allocation2 + $0x68] sm:$0xff]  ;;  %vm12394_vm7 = vnez %v12280_v39 }
 0x2a3   : > { %12385 = vst [vmem:[#allocation206_spill] sm:$0xff] %v8553_v16  ;;  %v1563_v48 = vsel %vm12394_vm7, %v8158_v31, 0.0  ;;  %v2841_v31 = vld [vmem:[%s12398_s3 + $0x40] sm:$0xff]  ;;  %vm12042_vm7 = vcmask 130048   ;;  %v12413_v16 = vld [vmem:[#allocation21_spill] sm:$0xff] }
 0x2a4   : > { %2950 = vmatpush.msra.mxu1 %v2841_v31  ;;  %v2838_v31 = vld [vmem:[%s12398_s3 + $0x28] sm:$0xff] }
 0x2a5   : > { %2483 = vrot.lane.b32.xlu2 %v7137_v52, %s12022_s15  ;;  %v7142_v52 = vld [vmem:[#allocation2 + $0x60] sm:$0xff] }
 0x2a6   : > { %2355 = vrot.lane.b32.xlu1 %v7138_v0, %s12064_s21  ;;  %2359 = vrot.lane.b32.xlu0 %v7139_v50, %s12064_s21 }
 0x2a8   : > { %v8558_v43 = vpop.permute.xlu2 %2181  ;;  %v8560_v32 = vpop.permute.xlu1 %2055 }
 0x2a9   : > { %12386 = vst [vmem:[#allocation207_spill] sm:$0xff] %v8558_v43  ;;  %v8562_v5 = vpop.permute.xlu0 %2171 }
 0x2aa   : > { %12387 = vst [vmem:[#allocation208_spill] sm:$0xff] %v8560_v32  ;;  %v7143_v32 = vld [vmem:[#allocation2 + $0x59] sm:$0xff] }
 0x2ab   : > { %12388 = vst [vmem:[#allocation209_spill] sm:$0xff] %v8562_v5  ;;  %v7153_v5 = vld [vmem:[#allocation2 + $0x89] sm:$0xff] }
 0x2ad   : > { %2485 = vrot.lane.b32.xlu2 %v1580_v24, %s12022_s15 }
 0x2ae   : > { %2357 = vrot.lane.b32.xlu1 %v7141_v6, %s12064_s21  ;;  %2361 = vrot.lane.b32.xlu0 %v7142_v52, %s12064_s21 }
 0x2b0   : > { %v8569_v0 = vpop.permute.xlu2 %2251  ;;  %v8571_v50 = vpop.permute.xlu1 %2167 }
 0x2b1   : > { %12390 = vst [vmem:[#allocation210_spill] sm:$0xff] %v8571_v50  ;;  %v8573_v43 = vpop.permute.xlu0 %2177  ;;  %v12407_v50 = vld [vmem:[#allocation72_spill] sm:$0xff] }
 0x2b2   : > { %12391 = vst [vmem:[#allocation211_spill] sm:$0xff] %v8573_v43  ;;  %v7145_v43 = vld [vmem:[#allocation2 + $0x61] sm:$0xff] }
 0x2b5   : > { %2295 = vrot.lane.b32.xlu2 %v8182_v53, %s12018_s22  ;;  %v1582_v53 = vsel %vm12395_vm2, %v7145_v43, 0.0  ;;  %v2839_v43 = vld [vmem:[%s12398_s3 + $0x30] sm:$0xff] }
 0x2b6   : > { %2487 = vrot.lane.b32.xlu1 %v7143_v32, %s12022_s15  ;;  %2363 = vrot.lane.b32.xlu0 %v7144_v27, %s12064_s21  ;;  %v7146_v32 = vld [vmem:[#allocation2 + $0x71] sm:$0xff] }
 0x2b7   : > { %v1584_v27 = vsel %vm12396_vm14, %v7146_v32, 0.0  ;;  %v7148_v32 = vld [vmem:[#allocation2 + $0x69] sm:$0xff]  ;;  %vm12399_vm14 = vnez %v12158_v51 }
 0x2b8   : > { %v8579_v24 = vpop.permute.xlu2 %2257  ;;  %v8581_v6 = vpop.permute.xlu1 %2173 }
 0x2b9   : > { %12392 = vst [vmem:[#allocation212_spill] sm:$0xff] %v8581_v6  ;;  %v8583_v52 = vpop.permute.xlu0 %2183 }
 0x2ba   : > { %12393 = vst [vmem:[#allocation213_spill] sm:$0xff] %v8583_v52 }
 0x2bd   : > { %2297 = vrot.lane.b32.xlu2 %v1563_v48, %s12018_s22  ;;  %v2840_v48 = vld [vmem:[%s12398_s3 + $0x38] sm:$0xff]  ;;  %s12654_s22 = smov 32  }
 0x2be   : > { %2489 = vrot.lane.b32.xlu1 %v1582_v53, %s12022_s15  ;;  %2493 = vrot.lane.b32.xlu0 %v1584_v27, %s12022_s15  ;;  %v7147_v53 = vld [vmem:[#allocation2 + $0x70] sm:$0xff]  ;;  %v7149_v27 = vld [vmem:[#allocation2 + $0x79] sm:$0xff] }
 0x2bf   : > { %2951 = vmatpush.msra.mxu1 %v2840_v48 }
 0x2c0   : > { %v8595_v45 = vpop.permute.xlu2 %2263  ;;  %v8597_v52 = vpop.permute.xlu1 %2179 }
 0x2c1   : > { %12397 = vst [vmem:[#allocation214_spill] sm:$0xff] %v8597_v52  ;;  %v8599_v47 = vpop.permute.xlu0 %2253  ;;  %2952 = vmatpush.msra.mxu1 %v2839_v43  ;;  %v2835_v43 = vld [vmem:[%s12398_s3 + $0x10] sm:$0xff] }
 0x2c3   : > { %2953 = vmatpush.msra.mxu1 %v2838_v31  ;;  %v1586_v31 = vsel %vm12399_vm14, %v7151_v2, 0.0  ;;  %v2833_v2 = vld [vmem:[%s12398_s3] sm:$0xff] }
 0x2c5   : > { %2365 = vrot.lane.b32.xlu2 %v7147_v53, %s12064_s21  ;;  %v2837_v53 = vld [vmem:[%s12398_s3 + $0x20] sm:$0xff] }
 0x2c6   : > { %2491 = vrot.lane.b32.xlu1 %v7148_v32, %s12022_s15  ;;  %2495 = vrot.lane.b32.xlu0 %v7149_v27, %s12022_s15  ;;  %v2836_v32 = vld [vmem:[%s12398_s3 + $0x18] sm:$0xff]  ;;  %s12673_s15 = smov 40  }
 0x2c7   : > { %2954 = vmatpush.msra.mxu1 %v2837_v53  ;;  %v7150_v27 = vld [vmem:[#allocation2 + $0x78] sm:$0xff]  ;;  %v2834_v53 = vld [vmem:[%s12398_s3 + $0x8] sm:$0xff] }
 0x2c8   : > { %v8616_v52 = vpop.permute.xlu2 %2269  ;;  %v8618_v48 = vpop.permute.xlu1 %2249 }
 0x2c9   : > { %v8620_v60 = vpop.permute.xlu0 %2259  ;;  %2955 = vmatpush.msra.mxu1 %v2836_v32  ;;  %v12402_v32 = vld [vmem:[#allocation126_spill] sm:$0xff] }
 0x2ca   : > { %vm12403_vm14 = vnez %v12402_v32  ;;  %v7154_v32 = vld [vmem:[#allocation2 + $0x88] sm:$0xff] }
 0x2cb   : > { %2956 = vmatpush.msra.mxu1 %v2835_v43  ;;  %v12404_v43 = vld [vmem:[#allocation143_spill] sm:$0xff] }
 0x2cd   : > { %2367 = vrot.lane.b32.xlu2 %v7150_v27, %s12064_s21  ;;  %2957 = vmatpush.msra.mxu1 %v2834_v53 }
 0x2ce   : > { %2299 = vrot.lane.b32.xlu1 %v8228_v61, %s12400_s30  ;;  %2497 = vrot.lane.b32.xlu0 %v1586_v31, %s12401_s16  ;;  %v7152_v61 = vld [vmem:[#allocation2 + $0x80] sm:$0xff]  ;;  %v1565_v31 = vsel %vm12403_vm14, %v8256_v22, 0.0 }
 0x2cf   : > { %2958 = vmatpush.msra.mxu1 %v2833_v2  ;;  %v12405_v2 = vld [vmem:[#allocation148_spill] sm:$0xff]  ;;  %v1307_v22 = vld [vmem:[#allocation2 + $0x7] sm:$0xff] }
 0x2d0   : > { %v8640_v46 = vpop.permute.xlu2 %2275  ;;  %v8642_v6 = vpop.permute.xlu1 %2255  ;;  %vm12406_vm2 = vnez %v12405_v2  ;;  %v1339_v19 = vsel %vm7460_vm8, %v1307_v22, 0.0  ;;  %v12410_v2 = vld [vmem:[#allocation22_spill] sm:$0xff]  ;;  %vm12051_vm8 = vcmask 588800  }
 0x2d1   : > { %v8644_v27 = vpop.permute.xlu0 %2265 }
 0x2d5   : > { %2369 = vrot.lane.b32.xlu2 %v7152_v61, %s12064_s21  ;;  %v1567_v61 = vsel %vm12406_vm2, %v8317_v25, 0.0  ;;  %vm12411_vm2 = vcmask 64512  }
 0x2d6   : > { %2301 = vrot.lane.b32.xlu1 %v1565_v31, %s12400_s30  ;;  %2303 = vrot.lane.b32.xlu0 %v12404_v43, %s12400_s30  ;;  %v2571_v25 = vsel %vm12411_vm2, %v1339_v19, %v12410_v2  ;;  %v1308_v2 = vld [vmem:[#allocation2 + $0xf] sm:$0xff]  ;;  %vm12417_vm2 = vcmask 261120  }
 0x2d7   : > { %v2604_v22 = vsel %vm12042_vm7, %v2571_v25, %v12413_v16  ;;  %v12419_v16 = vld [vmem:[#allocation78_spill] sm:$0xff]  ;;  %v12420_v25 = vld [vmem:[#allocation24_spill] sm:$0xff]  ;;  %vm12421_vm7 = vcmask 64512  }
 0x2d8   : > { %v8656_v51 = vpop.permute.xlu2 %2281  ;;  %v8658_v53 = vpop.permute.xlu1 %2261 }
 0x2d9   : > { %v8660_v12 = vpop.permute.xlu0 %2271 }
 0x2dd   : > { %2499 = vrot.lane.b32.xlu2 %v7153_v5, %s12401_s16  ;;  %v12408_v5 = vld [vmem:[#allocation46_spill] sm:$0xff] }
 0x2de   : > { %2371 = vrot.lane.b32.xlu1 %v7154_v32, %s12064_s21  ;;  %2305 = vrot.lane.b32.xlu0 %v1567_v61, %s12400_s30  ;;  %vm12409_vm14 = vnez %v12408_v5  ;;  %v7155_v32 = vld [vmem:[#allocation2 + $0x90] sm:$0xff]  ;;  %v12412_v61 = vld [vmem:[#allocation79_spill] sm:$0xff] }
 0x2df   : > { %v1588_v39 = vsel %vm12409_vm14, %v12407_v50, 0.0  ;;  %v12414_v50 = vld [vmem:[#allocation32_spill] sm:$0xff]  ;;  %vm12050_vm14 = vcmask 326656  }
 0x2e0   : > { %v2348_v31 = vpop.permute.xlu2 %2347  ;;  %v8668_v43 = vpop.permute.xlu1 %2267  ;;  %v2637_v5 = vsel %vm12043_vm1, %v2604_v22, %v12414_v50  ;;  %v2572_v22 = vsel %vm12421_vm7, %v1308_v2, %v12420_v25  ;;  %vm12058_vm1 = vcmask 392192   ;;  %v12422_v50 = vld [vmem:[#allocation25_spill] sm:$0xff]  ;;  %v12426_v25 = vld [vmem:[#allocation23_spill] sm:$0xff]  ;;  %vm12427_vm7 = vcmask 195584  }
 0x2e1   : > { %v8670_v63 = vpop.permute.xlu0 %2277 }
 0x2e5   : > { %2501 = vrot.lane.b32.xlu2 %v1588_v39, %s12401_s16  ;;  %v12416_v39 = vld [vmem:[#allocation26_spill] sm:$0xff] }
 0x2e6   : > { %2373 = vrot.lane.b32.xlu1 %v7155_v32, %s12064_s21  ;;  %2377 = vrot.lane.b32.xlu0 %v12412_v61, %s12064_s21  ;;  %v2669_v37 = vsel %vm12417_vm2, %v2637_v5, %v12416_v39  ;;  %v12418_v32 = vld [vmem:[#allocation74_spill] sm:$0xff]  ;;  %v7156_v61 = vld [vmem:[#allocation2 + $0x98] sm:$0xff]  ;;  %vm12424_vm2 = vcmask 130048  }
 0x2e7   : > { %v2702_v41 = vsel %vm12050_vm14, %v2669_v37, %v12422_v50  ;;  %v12423_v5 = vld [vmem:[#allocation30_spill] sm:$0xff]  ;;  %v12428_v37 = vld [vmem:[#allocation41_spill] sm:$0xff]  ;;  %vm12429_vm14 = vcmask 261120  }
 0x2e8   : > { %v2350_v4 = vpop.permute.xlu2 %2349  ;;  %v8685_v8 = vpop.permute.xlu1 %2273  ;;  %v2605_v39 = vsel %vm12424_vm2, %v2572_v22, %v12423_v5  ;;  %v7157_v5 = vld [vmem:[#allocation2 + $0x17] sm:$0xff] }
 0x2e9   : > { %v8689_v19 = vpop.permute.xlu0 %2283 }
 0x2ea   : > { %12415 = vst [vmem:[#allocation143_spill] sm:$0xff] %v8689_v19  ;;  %v2638_v19 = vsel %vm12427_vm7, %v2605_v39, %v12426_v25  ;;  %v12433_v39 = vld [vmem:[#allocation87_spill] sm:$0xff]  ;;  %vm12439_vm7 = vcmask 130048  }
 0x2eb   : > { %v2670_v22 = vsel %vm12429_vm14, %v2638_v19, %v12428_v37  ;;  %v12436_v19 = vld [vmem:[#allocation38_spill] sm:$0xff]  ;;  %vm12437_vm14 = vcmask 326656  }
 0x2ed   : > { %2503 = vrot.lane.b32.xlu2 %v12418_v32, %s12401_s16  ;;  %v2735_v32 = vsel %vm12058_vm1, %v2702_v41, %v8618_v48  ;;  %v12430_v41 = vld [vmem:[#allocation83_spill] sm:$0xff]  ;;  %v12431_v48 = vld [vmem:[#allocation62_spill] sm:$0xff] }
 0x2ee   : > { %2375 = vrot.lane.b32.xlu1 %v7156_v61, %s12064_s21  ;;  %2379 = vrot.lane.b32.xlu0 %v12419_v16, %s12064_s21  ;;  %v2768_v61 = vsel %vm12425_vm0, %v2735_v32, %v2348_v31  ;;  %vm12432_vm2 = vnez %v12431_v48  ;;  %v1341_v31 = vsel %vm7479_vm10, %v7157_v5, 0.0  ;;  %v12434_v32 = vld [vmem:[#allocation27_spill] sm:$0xff]  ;;  %vm12435_vm0 = vcmask 64512   ;;  %v1537_v48 = vld [vmem:[#allocation2 + $0x117] sm:$0xff] }
 0x2ef   : > { %v1590_v50 = vsel %vm12432_vm2, %v12430_v41, 0.0  ;;  %vm12443_vm2 = vcmask 588800  }
 0x2f0   : > { %v2352_v15 = vpop.permute.xlu2 %2351  ;;  %v8706_v34 = vpop.permute.xlu1 %2279 }
 0x2f1   : > { %v2476_v16 = vpop.permute.xlu0 %2475 }
 0x2f2   : > { %v2801_v2 = vsel %vm12063_vm9, %v2768_v61, %v2476_v16  ;;  %v2573_v61 = vsel %vm12435_vm0, %v1341_v31, %v12434_v32  ;;  %v2703_v16 = vsel %vm12437_vm14, %v2670_v22, %v12436_v19  ;;  %vm12442_vm0 = vcmask 195584  }
 0x2f3   : > { %6691 = vmatmul.msk.f32.vlgmr.msra.gmra.mxu1 %vm12051_vm8, %v2801_v2  ;;  %v2736_v25 = vsel %vm12058_vm1, %v2703_v16, %v8569_v0  ;;  %vm12440_vm8 = vcmask 457728   ;;  %v1569_v22 = vsel %vm8322_vm6, %v1537_v48, 0.0  ;;  %v12444_v0 = vld [vmem:[#allocation31_spill] sm:$0xff]  ;;  %vm12445_vm14 = vcmask 261120  }
 0x2f5   : > { %2307 = vrot.lane.b32.xlu2 %v8339_v44, %s12400_s30  ;;  %v12438_v44 = vld [vmem:[#allocation37_spill] sm:$0xff] }
 0x2f6   : > { %2505 = vrot.lane.b32.xlu1 %v1590_v50, %s12401_s16  ;;  %2381 = vrot.lane.b32.xlu0 %v12433_v39, %s12064_s21  ;;  %v2606_v2 = vsel %vm12439_vm7, %v2573_v61, %v12438_v44  ;;  %v2769_v50 = vsel %vm12440_vm8, %v2736_v25, %v2350_v4  ;;  %v12446_v61 = vld [vmem:[#allocation92_spill] sm:$0xff]  ;;  %vm12448_vm8 = vcmask 326656   ;;  %vm12450_vm7 = vcmask 588800  }
 0x2f7   : > { %v2639_v31 = vsel %vm12442_vm0, %v2606_v2, %v12441_v55  ;;  %v12447_v4 = vld [vmem:[#allocation48_spill] sm:$0xff]  ;;  %vm12452_vm0 = vcmask 64512  }
 0x2f8   : > { %v2482_v37 = vpop.permute.xlu2 %2481  ;;  %v8733_v41 = vpop.permute.xlu1 %2285  ;;  %v2671_v32 = vsel %vm12445_vm14, %v2639_v31, %v12444_v0  ;;  %v12454_v31 = vld [vmem:[#allocation73_spill] sm:$0xff] }
 0x2f9   : > { %v2478_v5 = vpop.permute.xlu0 %2477  ;;  %v2704_v19 = vsel %vm12448_vm8, %v2671_v32, %v12447_v4  ;;  %vm12455_vm14 = vnez %v12454_v31  ;;  %vm12457_vm8 = vcmask 130048  }
 0x2fa   : > { %v2802_v39 = vsel %vm12063_vm9, %v2769_v50, %v2478_v5  ;;  %v2737_v55 = vsel %vm12058_vm1, %v2704_v19, %v8599_v47  ;;  %v7158_v50 = vld [vmem:[#allocation2 + $0x1f] sm:$0xff]  ;;  %v1592_v47 = vsel %vm12455_vm14, %v8035_v29, 0.0  ;;  %vm12611_vm14 = vcmask 326656  }
 0x2fb   : > { %6692 = vmatmul.msk.f32.gmra.mxu1 %vm12443_vm2, %v2802_v39  ;;  %vm12449_vm2 = vcmask 457728   ;;  %v12451_v5 = vld [vmem:[#allocation34_spill] sm:$0xff]  ;;  %v12453_v39 = vld [vmem:[#allocation99_spill] sm:$0xff] }
 0x2fc   : > { %v2770_v48 = vsel %vm12449_vm2, %v2737_v55, %v2352_v15  ;;  %v1594_v15 = vsel %vm7921_vm11, %v8081_v10, 0.0  ;;  %vm12459_vm2 = vcmask 195584   ;;  %v1538_v29 = vld [vmem:[#allocation2 + $0x11f] sm:$0xff]  ;;  %v12462_v10 = vld [vmem:[#allocation100_spill] sm:$0xff]  ;;  %vm12473_vm11 = vcmask 195584  }
 0x2fd   : > { %2309 = vrot.lane.b32.xlu2 %v1569_v22, %s12400_s30  ;;  %v12456_v22 = vld [vmem:[#allocation33_spill] sm:$0xff] }
 0x2fe   : > { %2507 = vrot.lane.b32.xlu1 %v12446_v61, %s12401_s16  ;;  %2511 = vrot.lane.b32.xlu0 %v7995_v17, %s12401_s16  ;;  %v2574_v17 = vsel %vm12452_vm0, %v7158_v50, %v12451_v5  ;;  %v12458_v61 = vld [vmem:[#allocation44_spill] sm:$0xff]  ;;  %v12464_v50 = vld [vmem:[#allocation43_spill] sm:$0xff]  ;;  %vm12465_vm0 = vcmask 326656  }
 0x2ff   : > { %v2607_v0 = vsel %vm12457_vm8, %v2574_v17, %v12456_v22  ;;  %v1343_v17 = vsel %vm7535_vm4, %v8405_v54, 0.0  ;;  %vm12467_vm8 = vcmask 64512  }
 0x300   : > { %v8753_v16 = vpop.permute.xlu1 %2287  ;;  %v2484_v44 = vpop.permute.xlu2 %2483  ;;  %v2640_v4 = vsel %vm12459_vm2, %v2607_v0, %v12458_v61  ;;  %vm12468_vm2 = vcmask 457728  }
 0x301   : > { %v2480_v2 = vpop.permute.xlu0 %2479 }
 0x302   : > { %v2803_v25 = vsel %vm12063_vm9, %v2770_v48, %v2480_v2  ;;  %v12460_v48 = vld [vmem:[#allocation45_spill] sm:$0xff] }
 0x303   : > { %6693 = vmatmul.msk.f32.gmra.mxu1 %vm12450_vm7, %v2803_v25  ;;  %vm12461_vm7 = vcmask 261120   ;;  %v12463_v25 = vld [vmem:[#allocation117_spill] sm:$0xff] }
 0x304   : > { %v2672_v2 = vsel %vm12461_vm7, %v2640_v4, %v12460_v48  ;;  %v12469_v4 = vld [vmem:[#allocation42_spill] sm:$0xff]  ;;  %vm12470_vm7 = vcmask 130048  }
 0x305   : > { %2383 = vrot.lane.b32.xlu2 %v12453_v39, %s12064_s21  ;;  %v2705_v5 = vsel %vm12465_vm0, %v2672_v2, %v12464_v50  ;;  %vm12471_vm0 = vcmask 588800   ;;  %v12472_v2 = vld [vmem:[#allocation40_spill] sm:$0xff] }
 0x306   : > { %2509 = vrot.lane.b32.xlu1 %v1592_v47, %s12401_s16  ;;  %2513 = vrot.lane.b32.xlu0 %v1594_v15, %s12401_s16  ;;  %v2738_v39 = vsel %vm12058_vm1, %v2705_v5, %v8642_v6  ;;  %v12466_v15 = vld [vmem:[#allocation28_spill] sm:$0xff]  ;;  %v12474_v6 = vld [vmem:[#allocation51_spill] sm:$0xff]  ;;  %v12477_v5 = vld [vmem:[#allocation121_spill] sm:$0xff] }
 0x307   : > { %v2575_v22 = vsel %vm12467_vm8, %v1343_v17, %v12466_v15  ;;  %vm12475_vm8 = vcmask 261120   ;;  %v12476_v50 = vld [vmem:[#allocation104_spill] sm:$0xff]  ;;  %v12482_v15 = vld [vmem:[#allocation54_spill] sm:$0xff] }
 0x308   : > { %v8772_v32 = vpop.permute.xlu1 %2289  ;;  %v2486_v55 = vpop.permute.xlu2 %2485 }
 0x309   : > { %v8776_v19 = vpop.permute.xlu0 %2291 }
 0x30d   : > { %2385 = vrot.lane.b32.xlu2 %v12462_v10, %s12064_s21 }
 0x30e   : > { %2311 = vrot.lane.b32.xlu1 %v1538_v29, %s12400_s30  ;;  %2389 = vrot.lane.b32.xlu0 %v12463_v25, %s12064_s21  ;;  %v2608_v29 = vsel %vm12470_vm7, %v2575_v22, %v12469_v4 }
 0x30f   : > { %v2641_v54 = vsel %vm12473_vm11, %v2608_v29, %v12472_v2  ;;  %vm12481_vm11 = vcmask 326656   ;;  %v1345_v2 = vsel %vm7578_vm12, %v8388_v56, 0.0  ;;  %v12492_v56 = vld [vmem:[#allocation134_spill] sm:$0xff] }
 0x310   : > { %v2354_v47 = vpop.permute.xlu1 %2353  ;;  %v8803_v10 = vpop.permute.xlu2 %2295  ;;  %v2673_v25 = vsel %vm12475_vm8, %v2641_v54, %v12474_v6  ;;  %vm12485_vm8 = vcmask 195584   ;;  %v12487_v6 = vld [vmem:[#allocation49_spill] sm:$0xff] }
 0x311   : > { %v2771_v0 = vsel %vm12468_vm2, %v2738_v39, %v2354_v47  ;;  %v8795_v61 = vpop.permute.xlu0 %2293  ;;  %vm12479_vm2 = vcmask 64512   ;;  %v12480_v39 = vld [vmem:[#allocation55_spill] sm:$0xff] }
 0x312   : > { %v2804_v48 = vsel %vm12063_vm9, %v2771_v0, %v2482_v37  ;;  %v12478_v37 = vld [vmem:[#allocation36_spill] sm:$0xff]  ;;  %v2706_v47 = vsel %vm12481_vm11, %v2673_v25, %v12480_v39  ;;  %vm12488_vm11 = vcmask 64512  }
 0x313   : > { %6694 = vmatmul.msk.f32.gmra.mxu1 %vm12471_vm0, %v2804_v48  ;;  %v2576_v17 = vsel %vm12479_vm2, %v8401_v42, %v12478_v37  ;;  %vm12483_vm0 = vcmask 457728   ;;  %v12484_v42 = vld [vmem:[#allocation52_spill] sm:$0xff]  ;;  %vm12486_vm2 = vcmask 588800   ;;  %v2577_v25 = vsel %vm12488_vm11, %v1345_v2, %v12487_v6  ;;  %v12493_v37 = vld [vmem:[#allocation47_spill] sm:$0xff]  ;;  %v12502_v6 = vld [vmem:[#allocation133_spill] sm:$0xff] }
 0x314   : > { %v2609_v22 = vsel %vm12470_vm7, %v2576_v17, %v12482_v15  ;;  %vm12490_vm7 = vcmask 261120   ;;  %v12495_v39 = vld [vmem:[#allocation64_spill] sm:$0xff]  ;;  %vm12499_vm11 = vcmask 457728  }
 0x315   : > { %2515 = vrot.lane.b32.xlu2 %v8113_v9, %s12401_s16  ;;  %v2739_v9 = vsel %vm12058_vm1, %v2706_v47, %v8579_v24  ;;  %v2642_v54 = vsel %vm12485_vm8, %v2609_v22, %v12484_v42  ;;  %v1596_v24 = vsel %vm8031_vm5, %v8111_v20, 0.0  ;;  %vm12496_vm8 = vcmask 326656   ;;  %v12497_v20 = vld [vmem:[#allocation60_spill] sm:$0xff]  ;;  %v12500_v42 = vld [vmem:[#allocation58_spill] sm:$0xff] }
 0x316   : > { %2387 = vrot.lane.b32.xlu1 %v12476_v50, %s12064_s21  ;;  %2393 = vrot.lane.b32.xlu0 %v12477_v5, %s12064_s21  ;;  %v12489_v50 = vld [vmem:[#allocation50_spill] sm:$0xff]  ;;  %v12491_v5 = vld [vmem:[#allocation112_spill] sm:$0xff]  ;;  %vm12575_vm5 = vcmask 326656  }
 0x318   : > { %v2356_v0 = vpop.permute.xlu1 %2355  ;;  %v8846_v15 = vpop.permute.xlu2 %2297 }
 0x319   : > { %v2772_v4 = vsel %vm12483_vm0, %v2739_v9, %v2356_v0  ;;  %v2360_v29 = vpop.permute.xlu0 %2359  ;;  %vm12494_vm0 = vcmask 130048  }
 0x31a   : > { %v2805_v48 = vsel %vm12063_vm9, %v2772_v4, %v2484_v44  ;;  %v2674_v44 = vsel %vm12490_vm7, %v2642_v54, %v12489_v50  ;;  %v2610_v17 = vsel %vm12494_vm0, %v2577_v25, %v12493_v37  ;;  %vm12501_vm0 = vcmask 588800   ;;  %v12503_v25 = vld [vmem:[#allocation57_spill] sm:$0xff]  ;;  %v12505_v50 = vld [vmem:[#allocation59_spill] sm:$0xff] }
 0x31b   : > { %6695 = vmatmul.msk.f32.gmra.mxu1 %vm12486_vm2, %v2805_v48  ;;  %v2707_v47 = vsel %vm12496_vm8, %v2674_v44, %v12495_v39  ;;  %vm12498_vm2 = vcmask 195584   ;;  %vm12504_vm8 = vcmask 64512   ;;  %v12508_v44 = vld [vmem:[#allocation61_spill] sm:$0xff] }
 0x31c   : > { %v2643_v22 = vsel %vm12498_vm2, %v2610_v17, %v12497_v20  ;;  %v2740_v9 = vsel %vm12058_vm1, %v2707_v47, %v8620_v60  ;;  %vm12506_vm2 = vcmask 326656   ;;  %v12511_v47 = vld [vmem:[#allocation56_spill] sm:$0xff] }
 0x31d   : > { %2517 = vrot.lane.b32.xlu2 %v1596_v24, %s12401_s16  ;;  %v2675_v54 = vsel %vm12490_vm7, %v2643_v22, %v12500_v42  ;;  %v2578_v24 = vsel %vm12504_vm8, %v8430_v18, %v12503_v25  ;;  %vm12510_vm7 = vcmask 457728   ;;  %v12513_v22 = vld [vmem:[#allocation70_spill] sm:$0xff]  ;;  %vm12514_vm8 = vcmask 261120   ;;  %v12519_v42 = vld [vmem:[#allocation71_spill] sm:$0xff] }
 0x31e   : > { %2391 = vrot.lane.b32.xlu1 %v12491_v5, %s12064_s21  ;;  %2397 = vrot.lane.b32.xlu0 %v12492_v56, %s12064_s21  ;;  %v2708_v60 = vsel %vm12506_vm2, %v2675_v54, %v12505_v50  ;;  %vm12515_vm2 = vcmask 588800  }
 0x31f   : > { %v2741_v56 = vsel %vm12058_vm1, %v2708_v60, %v8658_v53  ;;  %v12516_v53 = vld [vmem:[#allocation139_spill] sm:$0xff] }
 0x320   : > { %v2358_v0 = vpop.permute.xlu1 %2357  ;;  %v2774_v37 = vsel %vm12510_vm7, %v2741_v56, %v2360_v29  ;;  %v2366_v39 = vpop.permute.xlu2 %2365  ;;  %v1598_v29 = vsel %vm8077_vm13, %v8220_v28, 0.0  ;;  %vm12520_vm7 = vcmask 326656   ;;  %v12524_v28 = vld [vmem:[#allocation68_spill] sm:$0xff]  ;;  %v12527_v56 = vld [vmem:[#allocation63_spill] sm:$0xff]  ;;  %vm12541_vm13 = vcmask 261120  }
 0x321   : > { %v2773_v4 = vsel %vm12499_vm11, %v2740_v9, %v2358_v0  ;;  %v2362_v48 = vpop.permute.xlu0 %2361  ;;  %vm12509_vm11 = vcmask 130048   ;;  %v1347_v0 = vsel %vm7605_vm15, %v8421_v59, 0.0 }
 0x322   : > { %v2806_v2 = vsel %vm12063_vm9, %v2773_v4, %v2486_v55  ;;  %v12507_v55 = vld [vmem:[#allocation153_spill] sm:$0xff]  ;;  %v2611_v5 = vsel %vm12509_vm11, %v2578_v24, %v12508_v44  ;;  %vm12518_vm11 = vcmask 64512   ;;  %v3251_v44 = vld [vmem:[#allocation2 + $0x8] sm:$0xff] }
 0x323   : > { %6696 = vmatmul.msk.f32.gmra.mxu1 %vm12501_vm0, %v2806_v2  ;;  %vm12512_vm0 = vcmask 195584   ;;  %v12517_v4 = vld [vmem:[#allocation53_spill] sm:$0xff] }
 0x324   : > { %v2644_v20 = vsel %vm12512_vm0, %v2611_v5, %v12511_v47  ;;  %v2579_v2 = vsel %vm12518_vm11, %v1347_v0, %v12517_v4  ;;  %vm12522_vm0 = vcmask 130048   ;;  %vm12526_vm11 = vcmask 588800  }
 0x325   : > { %2395 = vrot.lane.b32.xlu2 %v12502_v6, %s12064_s21  ;;  %v12521_v6 = vld [vmem:[#allocation67_spill] sm:$0xff] }
 0x326   : > { %2519 = vrot.lane.b32.xlu1 %v8166_v1, %s12401_s16  ;;  %2401 = vrot.lane.b32.xlu0 %v12507_v55, %s12064_s21  ;;  %v2676_v1 = vsel %vm12514_vm8, %v2644_v20, %v12513_v22  ;;  %v2612_v25 = vsel %vm12522_vm0, %v2579_v2, %v12521_v6  ;;  %vm12523_vm8 = vcmask 457728   ;;  %vm12531_vm0 = vcmask 326656   ;;  %v12534_v22 = vld [vmem:[#allocation66_spill] sm:$0xff]  ;;  %v12544_v6 = vld [vmem:[#allocation76_spill] sm:$0xff] }
 0x327   : > { %v2709_v54 = vsel %vm12520_vm7, %v2676_v1, %v12519_v42  ;;  %vm12528_vm7 = vcmask 261120  }
 0x328   : > { %v2488_v17 = vpop.permute.xlu1 %2487  ;;  %v2742_v59 = vsel %vm12058_vm1, %v2709_v54, %v8595_v45  ;;  %v2368_v5 = vpop.permute.xlu2 %2367 }
 0x329   : > { %v2807_v18 = vsel %vm12063_vm9, %v2774_v37, %v2488_v17  ;;  %v2364_v9 = vpop.permute.xlu0 %2363  ;;  %v2775_v24 = vsel %vm12523_vm8, %v2742_v59, %v2362_v48  ;;  %v12532_v48 = vld [vmem:[#allocation65_spill] sm:$0xff]  ;;  %vm12533_vm8 = vcmask 64512   ;;  %v12546_v59 = vld [vmem:[#allocation80_spill] sm:$0xff] }
 0x32a   : > { %v2580_v47 = vsel %vm12533_vm8, %v8411_v11, %v12532_v48  ;;  %v12542_v11 = vld [vmem:[#allocation116_spill] sm:$0xff]  ;;  %vm12543_vm8 = vnez %v12153_v30  ;;  %v12555_v48 = vld [vmem:[#allocation69_spill] sm:$0xff] }
 0x32b   : > { %6697 = vmatmul.msk.f32.gmra.mxu1 %vm12515_vm2, %v2807_v18  ;;  %vm12525_vm2 = vcmask 195584   ;;  %v12530_v18 = vld [vmem:[#allocation85_spill] sm:$0xff] }
 0x32c   : > { %v2645_v55 = vsel %vm12525_vm2, %v2612_v25, %v12524_v28  ;;  %vm12535_vm2 = vcmask 130048  }
 0x32d   : > { %2399 = vrot.lane.b32.xlu2 %v12516_v53, %s12064_s21  ;;  %v2677_v37 = vsel %vm12528_vm7, %v2645_v55, %v12527_v56  ;;  %v2613_v1 = vsel %vm12535_vm2, %v2580_v47, %v12534_v22  ;;  %vm12538_vm7 = vcmask 195584   ;;  %vm12545_vm2 = vcmask 64512   ;;  %v12549_v55 = vld [vmem:[#allocation77_spill] sm:$0xff]  ;;  %v12556_v47 = vld [vmem:[#allocation182_spill] sm:$0xff] }
 0x32e   : > { %2521 = vrot.lane.b32.xlu1 %v1598_v29, %s12401_s16  ;;  %v2710_v45 = vsel %vm12531_vm0, %v2677_v37, %v12530_v18  ;;  %v12537_v29 = vld [vmem:[#allocation81_spill] sm:$0xff]  ;;  %vm12539_vm0 = vcmask 588800  }
 0x32f   : > { %v2743_v20 = vsel %vm12058_vm1, %v2710_v45, %v8644_v27  ;;  %v2646_v4 = vsel %vm12538_vm7, %v2613_v1, %v12537_v29  ;;  %v1600_v27 = vsel %vm8107_vm3, %v8262_v49, 0.0  ;;  %vm12550_vm7 = vcmask 130048   ;;  %v12553_v18 = vld [vmem:[#allocation89_spill] sm:$0xff]  ;;  %v12560_v1 = vld [vmem:[#allocation94_spill] sm:$0xff] }
 0x330   : > { %v2490_v50 = vpop.permute.xlu1 %2489  ;;  %v2370_v54 = vpop.permute.xlu2 %2369  ;;  %vm12559_vm3 = vcmask 326656  }
 0x331   : > { %v2808_v60 = vsel %vm12063_vm9, %v2775_v24, %v2490_v50  ;;  %v2494_v17 = vpop.permute.xlu0 %2493 }
 0x333   : > { %6698 = vmatmul.msk.f32.gmra.mxu1 %vm12526_vm11, %v2808_v60  ;;  %vm12536_vm11 = vcmask 457728  }
 0x334   : > { %v2776_v0 = vsel %vm12536_vm11, %v2743_v20, %v2364_v9  ;;  %v1349_v9 = vsel %vm12543_vm8, %v8445_v13, 0.0  ;;  %vm12547_vm11 = vcmask 326656   ;;  %v12551_v13 = vld [vmem:[#allocation75_spill] sm:$0xff] }
 0x335   : > { %3519 = vrot.lane.b32.xlu2 %v3251_v44, %s12529_s24  ;;  %v2581_v25 = vsel %vm12545_vm2, %v1349_v9, %v12544_v6  ;;  %vm12552_vm2 = vcmask 195584   ;;  %v12558_v20 = vld [vmem:[#allocation95_spill] sm:$0xff]  ;;  %v12566_v6 = vld [vmem:[#allocation90_spill] sm:$0xff] }
 0x336   : > { %2523 = vrot.lane.b32.xlu1 %v8186_v33, %s12401_s16  ;;  %v12540_v33 = vld [vmem:[#allocation82_spill] sm:$0xff]  ;;  %v2614_v44 = vsel %vm12550_vm7, %v2581_v25, %v12549_v55 }
 0x337   : > { %v2678_v42 = vsel %vm12541_vm13, %v2646_v4, %v12540_v33  ;;  %vm12548_vm13 = vcmask 457728   ;;  %v2647_v37 = vsel %vm12552_vm2, %v2614_v44, %v12551_v13  ;;  %vm12564_vm2 = vnez %v12170_v57  ;;  %v12574_v55 = vld [vmem:[#allocation106_spill] sm:$0xff] }
 0x338   : > { %v2492_v53 = vpop.permute.xlu1 %2491  ;;  %v2711_v24 = vsel %vm12547_vm11, %v2678_v42, %v12546_v59  ;;  %vm12554_vm11 = vcmask 261120   ;;  %v2500_v22 = vpop.permute.xlu2 %2499 }
 0x339   : > { %v2809_v2 = vsel %vm12063_vm9, %v2776_v0, %v2492_v53  ;;  %v2496_v50 = vpop.permute.xlu0 %2495  ;;  %v2744_v60 = vsel %vm12058_vm1, %v2711_v24, %v8668_v43  ;;  %v2679_v45 = vsel %vm12554_vm11, %v2647_v37, %v12553_v18  ;;  %vm12557_vm1 = vcmask 64512   ;;  %v12570_v24 = vld [vmem:[#allocation88_spill] sm:$0xff]  ;;  %v12578_v18 = vld [vmem:[#allocation98_spill] sm:$0xff] }
 0x33a   : > { %v2777_v49 = vsel %vm12548_vm13, %v2744_v60, %v2366_v39  ;;  %v2582_v43 = vsel %vm12557_vm1, %v12556_v47, %v12555_v48  ;;  %v2712_v39 = vsel %vm12559_vm3, %v2679_v45, %v12558_v20  ;;  %vm12561_vm13 = vmmov %vm12550_vm7  ;;  %vm12562_vm7 = vcmask 392192   ;;  %v12572_v60 = vld [vmem:[#allocation102_spill] sm:$0xff] }
 0x33b   : > { %6699 = vmatmul.msk.f32.gmra.mxu1 %vm12539_vm0, %v2809_v2  ;;  %v2810_v56 = vsel %vm12063_vm9, %v2777_v49, %v2494_v17  ;;  %v2615_v0 = vsel %vm12561_vm13, %v2582_v43, %v12560_v1  ;;  %v2745_v17 = vsel %vm12562_vm7, %v2712_v39, %v8616_v52  ;;  %v7159_v2 = vld [vmem:[#allocation2 + $0x67] sm:$0xff]  ;;  %vm12567_vm3 = vcmask 195584   ;;  %v12569_v52 = vld [vmem:[#allocation84_spill] sm:$0xff]  ;;  %v12582_v43 = vld [vmem:[#allocation97_spill] sm:$0xff] }
 0x33c   : > { %v1351_v33 = vsel %vm12564_vm2, %v7159_v2, 0.0  ;;  %v2648_v25 = vsel %vm12567_vm3, %v2615_v0, %v12566_v6  ;;  %vm12568_vm11 = vcmask 588800   ;;  %vm12571_vm7 = vcmask 261120   ;;  %v12584_v39 = vld [vmem:[#allocation101_spill] sm:$0xff]  ;;  %v12585_v1 = vld [vmem:[#allocation103_spill] sm:$0xff]  ;;  %v12589_v2 = vld [vmem:[#allocation96_spill] sm:$0xff] }
 0x33d   : > { %2525 = vrot.lane.b32.xlu2 %v1600_v27, %s12401_s16  ;;  %v12565_v27 = vld [vmem:[#allocation86_spill] sm:$0xff]  ;;  %v7160_v6 = vld [vmem:[#allocation2 + $0x77] sm:$0xff] }
 0x33e   : > { %v2583_v9 = vsel %vm12557_vm1, %v1351_v33, %v12565_v27  ;;  %vm12577_vm1 = vcmask 457728  }
 0x33f   : > { %v2616_v59 = vsel %vm12561_vm13, %v2583_v9, %v12569_v52  ;;  %vm12581_vm13 = vcmask 588800  }
 0x340   : > { %v8935_v28 = vpop.permute.xlu1 %2299  ;;  %v2502_v37 = vpop.permute.xlu2 %2501 }
 0x341   : > { %v2498_v4 = vpop.permute.xlu0 %2497 }
 0x343   : > { %6700 = vmatmul.msk.f32.gmra.mxu1 %vm12539_vm0, %v2810_v56  ;;  %vm12563_vm0 = vcmask 457728  }
 0x344   : > { %v2778_v29 = vsel %vm12563_vm0, %v2745_v17, %v2368_v5  ;;  %v2680_v5 = vsel %vm12571_vm7, %v2648_v25, %v12570_v24  ;;  %vm12573_vm0 = vmmov %vm12567_vm3  ;;  %v3283_v17 = vld [vmem:[#allocation2 + $0x9] sm:$0xff]  ;;  %v12596_v25 = vld [vmem:[#allocation93_spill] sm:$0xff] }
 0x345   : > { %v2811_v42 = vsel %vm12063_vm9, %v2778_v29, %v2496_v50  ;;  %v2649_v49 = vsel %vm12573_vm0, %v2616_v59, %v12572_v60  ;;  %v2713_v50 = vsel %vm12575_vm5, %v2680_v5, %v12574_v55  ;;  %vm12576_vm9 = vcmask 392192   ;;  %vm12579_vm3 = vmmov %vm12571_vm7  ;;  %3647 = vrot.lane.b32.xlu0 %v3283_v17, %s12588_s20  ;;  %v12598_v59 = vld [vmem:[#allocation115_spill] sm:$0xff]  ;;  %v12600_v60 = vld [vmem:[#allocation109_spill] sm:$0xff] }
 0x346   : > { %v2746_v44 = vsel %vm12576_vm9, %v2713_v50, %v8660_v12  ;;  %v2681_v45 = vsel %vm12579_vm3, %v2649_v49, %v12578_v18  ;;  %vm12583_vm7 = vcmask 64512   ;;  %vm12586_vm9 = vcmask 130048   ;;  %v12608_v18 = vld [vmem:[#allocation105_spill] sm:$0xff] }
 0x347   : > { %v2779_v13 = vsel %vm12577_vm1, %v2746_v44, %v2370_v54  ;;  %v2584_v20 = vsel %vm12583_vm7, %v8466_v21, %v12582_v43  ;;  %v2714_v12 = vsel %vm12575_vm5, %v2681_v45, %v12584_v39  ;;  %vm12587_vm0 = vcmask 392192   ;;  %v12604_v44 = vld [vmem:[#allocation110_spill] sm:$0xff] }
 0x348   : > { %v8955_v53 = vpop.permute.xlu1 %2301  ;;  %v2617_v54 = vsel %vm12586_vm9, %v2584_v20, %v12585_v1  ;;  %v2747_v0 = vsel %vm12587_vm0, %v2714_v12, %v8685_v8  ;;  %vm12590_vm3 = vcmask 195584   ;;  %v2504_v9 = vpop.permute.xlu2 %2503  ;;  %vm12594_vm7 = vcmask 588800   ;;  %v7161_v39 = vld [vmem:[#allocation2 + $0x7f] sm:$0xff]  ;;  %v12613_v12 = vld [vmem:[#allocation107_spill] sm:$0xff] }
 0x349   : > { %v8980_v47 = vpop.permute.xlu0 %2303  ;;  %v2650_v33 = vsel %vm12590_vm3, %v2617_v54, %v12589_v2  ;;  %vm12595_vm5 = vnez %v12178_v23  ;;  %vm12597_vm9 = vcmask 64512   ;;  %vm12599_vm0 = vcmask 326656  }
 0x34a   : > { %v1353_v8 = vsel %vm12595_vm5, %v7160_v6, 0.0  ;;  %vm12602_vm3 = vcmask 392192  }
 0x34b   : > { %6701 = vmatmul.msk.f32.gmra.mxu1 %vm12568_vm11, %v2811_v42  ;;  %vm12580_vm11 = vcmask 523264   ;;  %v12591_v42 = vld [vmem:[#allocation114_spill] sm:$0xff]  ;;  %v2585_v52 = vsel %vm12597_vm9, %v1353_v8, %v12596_v25  ;;  %vm12607_vm9 = vcmask 588800   ;;  %v12622_v8 = vld [vmem:[#allocation119_spill] sm:$0xff] }
 0x34c   : > { %v2812_v48 = vsel %vm12580_vm11, %v2779_v13, %v2498_v4  ;;  %vm12592_vm11 = vcmask 261120  }
 0x34d   : > { %v2682_v21 = vsel %vm12592_vm11, %v2650_v33, %v12591_v42  ;;  %vm12603_vm11 = vcmask 457728   ;;  %v12620_v42 = vld [vmem:[#allocation125_spill] sm:$0xff] }
 0x34e   : > { %v2715_v24 = vsel %vm12599_vm0, %v2682_v21, %v12598_v59  ;;  %vm12609_vm0 = vcmask 261120   ;;  %v9039_v21 = vld [vmem:[%s11907_s4] ss:$0 sm:$0xff] }
 0x350   : > { %v2372_v56 = vpop.permute.xlu1 %2371  ;;  %v9021_v20 = vpop.permute.xlu2 %2307 }
 0x351   : > { %v2780_v29 = vsel %vm12577_vm1, %v2747_v0, %v2372_v56  ;;  %v9006_v5 = vpop.permute.xlu0 %2305  ;;  %vm12601_vm1 = vcmask 130048   ;;  %v12615_v0 = vld [vmem:[#allocation108_spill] sm:$0xff] }
 0x352   : > { %v2618_v49 = vsel %vm12601_vm1, %v2585_v52, %v12600_v60  ;;  %vm12612_vm1 = vmmov %vm12602_vm3  ;;  %v12623_v52 = vld [vmem:[#allocation123_spill] sm:$0xff] }
 0x353   : > { %6702 = vmatmul.msk.f32.gmra.mxu1 %vm12581_vm13, %v2812_v48  ;;  %vm12593_vm13 = vcmask 523264   ;;  %v12610_v48 = vld [vmem:[#allocation128_spill] sm:$0xff] }
 0x354   : > { %v2813_v27 = vsel %vm12593_vm13, %v2780_v29, %v2500_v22  ;;  %v2748_v22 = vsel %vm12602_vm3, %v2715_v24, %v8640_v46  ;;  %vm12605_vm13 = vcmask 195584   ;;  %vm12614_vm3 = vcmask 64512  }
 0x355   : > { %v2651_v56 = vsel %vm12605_vm13, %v2618_v49, %v12604_v44  ;;  %v2586_v1 = vsel %vm12614_vm3, %v7161_v39, %v12613_v12  ;;  %vm12616_vm13 = vcmask 130048   ;;  %v12627_v44 = vld [vmem:[#allocation120_spill] sm:$0xff]  ;;  %v12636_v12 = vld [vmem:[#allocation113_spill] sm:$0xff] }
 0x356   : > { %v2683_v45 = vsel %vm12609_vm0, %v2651_v56, %v12608_v18  ;;  %v2619_v17 = vsel %vm12616_vm13, %v2586_v1, %v12615_v0  ;;  %vm12625_vm13 = vcmask 392192   ;;  %v7163_v39 = vld [vmem:[#allocation2 + $0x8f] sm:$0xff] }
 0x357   : > { %v2716_v43 = vsel %vm12611_vm14, %v2683_v45, %v12610_v48  ;;  %vm12619_vm14 = vcmask 523264   ;;  %v12631_v45 = vld [vmem:[#allocation118_spill] sm:$0xff]  ;;  %v12640_v0 = vld [vmem:[#allocation136_spill] sm:$0xff] }
 0x358   : > { %v2374_v4 = vpop.permute.xlu1 %2373  ;;  %v2749_v46 = vsel %vm12612_vm1, %v2716_v43, %v8670_v63  ;;  %vm12621_vm1 = vnez %v12202_v36  ;;  %v9047_v59 = vpop.permute.xlu2 %2309  ;;  %v12633_v43 = vld [vmem:[#allocation131_spill] sm:$0xff] }
 0x359   : > { %v2781_v55 = vsel %vm12603_vm11, %v2748_v22, %v2374_v4  ;;  %v2378_v54 = vpop.permute.xlu0 %2377  ;;  %v12617_v4 = vld [vmem:[#allocation124_spill] sm:$0xff] }
 0x35b   : > { %6703 = vmatmul.msk.f32.gmra.mxu1 %vm12594_vm7, %v2813_v27  ;;  %vm12606_vm7 = vcmask 523264   ;;  %v7162_v27 = vld [vmem:[#allocation2 + $0x87] sm:$0xff] }
 0x35c   : > { %v2814_v13 = vsel %vm12606_vm7, %v2781_v55, %v2502_v37  ;;  %vm12618_vm7 = vcmask 195584   ;;  %v1355_v6 = vsel %vm12621_vm1, %v7162_v27, 0.0  ;;  %v12645_v27 = vld [vmem:[#allocation132_spill] sm:$0xff] }
 0x35d   : > { %v2652_v2 = vsel %vm12618_vm7, %v2619_v17, %v12617_v4  ;;  %v2587_v25 = vsel %vm12614_vm3, %v1355_v6, %v12622_v8  ;;  %vm12626_vm7 = vcmask 457728   ;;  %vm12630_vm3 = vcmask 588800  }
 0x35e   : > { %v2684_v63 = vsel %vm12609_vm0, %v2652_v2, %v12620_v42 }
 0x360   : > { %v2376_v50 = vpop.permute.xlu1 %2375  ;;  %v2384_v2 = vpop.permute.xlu2 %2383 }
 0x361   : > { %v2782_v37 = vsel %vm12603_vm11, %v2749_v46, %v2376_v50  ;;  %vm12624_vm11 = vcmask 326656   ;;  %v2380_v22 = vpop.permute.xlu0 %2379 }
 0x362   : > { %v2815_v33 = vsel %vm12619_vm14, %v2782_v37, %v2504_v9  ;;  %v2717_v9 = vsel %vm12624_vm11, %v2684_v63, %v12623_v52  ;;  %vm12628_vm14 = vcmask 130048   ;;  %vm12632_vm11 = vcmask 195584  }
 0x363   : > { %6704 = vmatmul.msk.f32.gmra.mxu1 %vm12607_vm9, %v2814_v13  ;;  %v2750_v24 = vsel %vm12625_vm13, %v2717_v9, %v8706_v34  ;;  %v2620_v56 = vsel %vm12628_vm14, %v2587_v25, %v12627_v44  ;;  %vm12634_vm13 = vcmask 261120   ;;  %vm12639_vm14 = vcmask 326656   ;;  %v7164_v9 = vld [vmem:[#allocation2 + $0x97] sm:$0xff] }
 0x364   : > { %v2783_v49 = vsel %vm12626_vm7, %v2750_v24, %v2378_v54  ;;  %v2653_v48 = vsel %vm12632_vm11, %v2620_v56, %v12631_v45  ;;  %vm12635_vm7 = vcmask 64512   ;;  %v12638_v54 = vld [vmem:[#allocation137_spill] sm:$0xff]  ;;  %vm12644_vm11 = vcmask 523264   ;;  %v12659_v45 = vld [vmem:[#allocation127_spill] sm:$0xff] }
 0x365   : > { %v2685_v46 = vsel %vm12634_vm13, %v2653_v48, %v12633_v43  ;;  %vm12637_vm1 = vmmov %vm12635_vm7  ;;  %vm12646_vm13 = vcmask 195584   ;;  %v12649_v24 = vld [vmem:[#allocation129_spill] sm:$0xff] }
 0x366   : > { %v2588_v1 = vsel %vm12637_vm1, %v7163_v39, %v12636_v12  ;;  %v2718_v37 = vsel %vm12639_vm14, %v2685_v46, %v12638_v54  ;;  %vm12648_vm14 = vnez %v12225_v62  ;;  %v12663_v39 = vld [vmem:[#allocation145_spill] sm:$0xff] }
 0x368   : > { %v2506_v29 = vpop.permute.xlu1 %2505 }
 0x369   : > { %v2382_v8 = vpop.permute.xlu0 %2381 }
 0x36b   : > { %6705 = vmatmul.msk.f32.gmra.mxu1 %vm12607_vm9, %v2815_v33  ;;  %vm12629_vm9 = vcmask 523264  }
 0x36c   : > { %v2816_v13 = vsel %vm12629_vm9, %v2783_v49, %v2506_v29  ;;  %vm12641_vm9 = vcmask 130048  }
 0x36d   : > { %v2621_v17 = vsel %vm12641_vm9, %v2588_v1, %v12640_v0  ;;  %vm12650_vm9 = vcmask 64512   ;;  %v2386_v0 = vpop.permute.xlu2 %2385 }
 0x36e   : > { %v2654_v6 = vsel %vm12646_vm13, %v2621_v17, %v12645_v27  ;;  %vm12657_vm13 = vcmask 326656  }
 0x370   : > { %v2960_v60 = vpop.f32.mrf.mxu1  ;;  %v2508_v50 = vpop.permute.xlu1 %2507 }
 0x371   : > { %v2961_v55 = vadd.f32 %v9039_v21, %v2960_v60 }
 0x373   : > { %vm3056_vm0 = vcmp.ge.f32.partialorder %v2961_v55, 0.0  ;;  %v3088_v18 = vmul.f32 0.01, %v2961_v55  ;;  %6706 = vmatmul.msk.f32.gmra.mxu1 %vm12630_vm3, %v2816_v13  ;;  %vm12642_vm3 = vcmask 392192   ;;  %v12656_v13 = vld [vmem:[#allocation150_spill] sm:$0xff] }
 0x374   : > { %v2751_v29 = vsel %vm12642_vm3, %v2718_v37, %v8656_v51  ;;  %v1357_v51 = vsel %vm12648_vm14, %v7164_v9, 0.0  ;;  %vm12652_vm3 = vcmask 261120   ;;  %vm12667_vm14 = vcmask 588800   ;;  %v12675_v9 = vld [vmem:[#allocation141_spill] sm:$0xff] }
 0x375   : > { %v3120_v34 = vsel %vm3056_vm0, %v2961_v55, %v3088_v18  ;;  %vm12643_vm0 = vcmask 457728   ;;  %v2589_v60 = vsel %vm12650_vm9, %v1357_v51, %v12649_v24 }
 0x376   : > { %3155 = vst.msk [vmem:[#allocation2 + $0x18] sm:$0xff] %vm12635_vm7, %v3120_v34  ;;  %v2784_v33 = vsel %vm12643_vm0, %v2751_v29, %v2380_v22  ;;  %vm12647_vm7 = vcmask 588800   ;;  %vm12653_vm0 = vmmov %vm12650_vm9  ;;  %v12661_v34 = vld [vmem:[#allocation143_spill] sm:$0xff]  ;;  %vm12664_vm9 = vcmask 195584   ;;  %v12668_v29 = vld [vmem:[#allocation142_spill] sm:$0xff] }
 0x377   : > { %v2817_v63 = vsel %vm12644_vm11, %v2784_v33, %v2508_v50  ;;  %v12651_v50 = vld [vmem:[#allocation130_spill] sm:$0xff]  ;;  %vm12655_vm11 = vnez %v12110_v40  ;;  %v2512_v33 = vpop.permute.xlu0 %2511 }
 0x378   : > { %v2963_v4 = vpop.f32.mrf.mxu1  ;;  %v2510_v52 = vpop.permute.xlu1 %2509  ;;  %v2686_v44 = vsel %vm12652_vm3, %v2654_v6, %v12651_v50  ;;  %vm12665_vm3 = vcmask 457728   ;;  %v12671_v6 = vld [vmem:[#allocation144_spill] sm:$0xff] }
 0x379   : > { %v2964_v42 = vadd.f32 %v9039_v21, %v2963_v4  ;;  %v2719_v18 = vsel %vm12657_vm13, %v2686_v44, %v12656_v13  ;;  %v7166_v44 = vld [vmem:[#allocation2 + $0xa7] sm:$0xff] }
 0x37b   : > { %vm3057_vm1 = vcmp.ge.f32.partialorder %v2964_v42, 0.0  ;;  %v3089_v25 = vmul.f32 0.01, %v2964_v42  ;;  %6707 = vmatmul.msk.f32.gmra.mxu1 %vm12647_vm7, %v2817_v63  ;;  %vm12662_vm7 = vcmask 392192  }
 0x37c   : > { %v2752_v43 = vsel %vm12662_vm7, %v2719_v18, %v12661_v34  ;;  %vm12670_vm7 = vcmask 64512   ;;  %v12684_v18 = vld [vmem:[#allocation135_spill] sm:$0xff]  ;;  %v2516_v34 = vpop.permute.xlu2 %2515 }
 0x37d   : > { %v3121_v49 = vsel %vm3057_vm1, %v2964_v42, %v3089_v25  ;;  %v9080_v22 = vld [vmem:[#allocation2 + $0x18] sm:$0xff]  ;;  %vm12660_vm1 = vcmask 130048   ;;  %v2785_v1 = vsel %vm12665_vm3, %v2752_v43, %v2382_v8  ;;  %vm12674_vm3 = vcmask 392192  }
 0x37e   : > { %v9082_v55 = vld [vmem:[#allocation2 + $0x17] sm:$0xff]  ;;  %3156 = vst.msk [vmem:[#allocation2 + $0x20] sm:$0xff] %vm12653_vm0, %v3121_v49  ;;  %3873 = vrot.lane.b32.xlu0 %v9080_v22, %s12654_s22  ;;  %v2622_v48 = vsel %vm12660_vm1, %v2589_v60, %v12659_v45  ;;  %vm12666_vm0 = vcmask 523264   ;;  %vm12669_vm1 = vcmask 261120   ;;  %v12678_v60 = vld [vmem:[#allocation146_spill] sm:$0xff] }
 0x37f   : > { %v3349_v56 = vsel %vm12655_vm11, %v9082_v55, 0.0  ;;  %v2655_v12 = vsel %vm12664_vm9, %v2622_v48, %v12663_v39  ;;  %v2818_v37 = vsel %vm12666_vm0, %v2785_v1, %v2510_v52  ;;  %vm12672_vm9 = vcmask 326656   ;;  %v7165_v52 = vld [vmem:[#allocation2 + $0x9f] sm:$0xff]  ;;  %v12686_v45 = vld [vmem:[#allocation140_spill] sm:$0xff] }
 0x380   : > { %3775 = vrot.lane.b32.xlu1 %v3349_v56, %s12658_s23  ;;  %v2966_v46 = vpop.f32.mrf.mxu1  ;;  %v2687_v4 = vsel %vm12669_vm1, %v2655_v12, %v12668_v29  ;;  %v9107_v42 = vpop.permute.xlu1 %2311  ;;  %vm12677_vm0 = vcmask 457728   ;;  %vm12680_vm1 = vcmask 523264   ;;  %v12682_v56 = vld [vmem:[#allocation91_spill] sm:$0xff]  ;;  %v12690_v12 = vld [vmem:[#allocation158_spill] sm:$0xff] }
 0x381   : > { %v2967_v54 = vadd.f32 %v9039_v21, %v2966_v46  ;;  %v2720_v8 = vsel %vm12672_vm9, %v2687_v4, %v12671_v6  ;;  %vm12683_vm9 = vnez %v12682_v56  ;;  %v12688_v46 = vld [vmem:[#allocation155_spill] sm:$0xff]  ;;  %v2514_v29 = vpop.permute.xlu0 %2513  ;;  %v12695_v6 = vld [vmem:[#allocation156_spill] sm:$0xff] }
 0x382   : > { %v2753_v25 = vsel %vm12674_vm3, %v2720_v8, %v8733_v41  ;;  %v1359_v13 = vsel %vm12683_vm9, %v7166_v44, 0.0  ;;  %vm12687_vm3 = vcmask 195584   ;;  %vm12720_vm9 = vcmask 326656  }
 0x383   : > { %vm3058_vm13 = vcmp.ge.f32.partialorder %v2967_v54, 0.0  ;;  %v3090_v17 = vmul.f32 0.01, %v2967_v54  ;;  %6708 = vmatmul.msk.f32.gmra.mxu1 %vm12667_vm14, %v2818_v37  ;;  %vm12676_vm14 = vmmov %vm12670_vm7  ;;  %v2786_v24 = vsel %vm12677_vm0, %v2753_v25, %v2384_v2  ;;  %vm12691_vm0 = vcmask 261120   ;;  %v12692_v37 = vld [vmem:[#allocation203_spill] sm:$0xff] }
 0x384   : > { %v2590_v51 = vsel %vm12676_vm14, %v7165_v52, %v12675_v9  ;;  %v2819_v50 = vsel %vm12680_vm1, %v2786_v24, %v2512_v33  ;;  %vm12685_vm5 = vmmov %vm12676_vm14 }
 0x385   : > { %v3122_v63 = vsel %vm3058_vm13, %v2967_v54, %v3090_v17  ;;  %v9109_v27 = vld [vmem:[#allocation2 + $0x19] sm:$0xff]  ;;  %vm12679_vm13 = vcmask 130048   ;;  %v2591_v41 = vsel %vm12685_vm5, %v1359_v13, %v12684_v18  ;;  %vm12693_vm5 = vcmask 326656   ;;  %vm12696_vm1 = vmmov %vm12687_vm3 }
 0x386   : > { %3157 = vst.msk [vmem:[#allocation2 + $0x28] sm:$0xff] %vm12670_vm7, %v3122_v63  ;;  %v2623_v49 = vsel %vm12679_vm13, %v2590_v51, %v12678_v60  ;;  %vm12681_vm7 = vcmask 588800   ;;  %vm12689_vm14 = vmmov %vm12679_vm13  ;;  %vm12694_vm13 = vcmask 392192   ;;  %v3284_v51 = vld [vmem:[#allocation2 + $0x11] sm:$0xff]  ;;  %v12704_v18 = vld [vmem:[#allocation10_spill] sm:$0xff] }
 0x387   : > { %v2656_v48 = vsel %vm12687_vm3, %v2623_v49, %v12686_v45  ;;  %v2624_v39 = vsel %vm12689_vm14, %v2591_v41, %v12688_v46  ;;  %vm12698_vm3 = vcmask 523264   ;;  %v12700_v60 = vld [vmem:[#allocation149_spill] sm:$0xff]  ;;  %v7167_v45 = vld [vmem:[#allocation2 + $0xaf] sm:$0xff] }
 0x388   : > { %4001 = vrot.lane.b32.xlu1 %v9109_v27, %s12673_s15  ;;  %v2688_v1 = vsel %vm12691_vm0, %v2656_v48, %v12690_v12  ;;  %v2388_v4 = vpop.permute.xlu1 %2387  ;;  %v2657_v8 = vsel %vm12696_vm1, %v2624_v39, %v12695_v6  ;;  %vm12699_vm0 = vcmask 588800   ;;  %vm12705_vm1 = vnez %v12704_v18  ;;  %v12708_v48 = vld [vmem:[#allocation151_spill] sm:$0xff]  ;;  %v2518_v39 = vpop.permute.xlu2 %2517  ;;  %v12773_v18 = vld [vmem:[#allocation201_spill] sm:$0xff] }
 0x389   : > { %v2721_v17 = vsel %vm12693_vm5, %v2688_v1, %v12692_v37  ;;  %vm12701_vm5 = vcmask 261120   ;;  %v12711_v1 = vld [vmem:[#allocation154_spill] sm:$0xff] }
 0x38a   : > { %v2754_v33 = vsel %vm12694_vm13, %v2721_v17, %v8753_v16  ;;  %v2689_v49 = vsel %vm12701_vm5, %v2657_v8, %v12700_v60  ;;  %v12702_v16 = vld [vmem:[#allocation202_spill] sm:$0xff]  ;;  %vm12703_vm13 = vcmask 326656   ;;  %vm12710_vm5 = vcmask 457728   ;;  %v12713_v17 = vld [vmem:[#allocation164_spill] sm:$0xff] }
 0x38b   : > { %6709 = vmatmul.msk.f32.gmra.mxu1 %vm12681_vm7, %v2819_v50  ;;  %vm12697_vm7 = vcmask 457728   ;;  %v3252_v50 = vld [vmem:[#allocation2 + $0x10] sm:$0xff]  ;;  %v2722_v44 = vsel %vm12703_vm13, %v2689_v49, %v12702_v16  ;;  %vm12714_vm13 = vcmask 195584   ;;  %v12717_v8 = vld [vmem:[#allocation162_spill] sm:$0xff] }
 0x38c   : > { %v2787_v25 = vsel %vm12697_vm7, %v2754_v33, %v2386_v0  ;;  %v3316_v0 = vsel %vm12705_vm1, %v3284_v51, 0.0  ;;  %vm12706_vm7 = vcmask 392192   ;;  %v9182_v60 = vld [vmem:[#allocation2 + $0x20] sm:$0xff]  ;;  %v7168_v49 = vld [vmem:[#allocation2 + $0xb7] sm:$0xff] }
 0x38d   : > { %v9131_v43 = vld [vmem:[#allocation2 + $0x28] sm:$0xff]  ;;  %v2820_v9 = vsel %vm12698_vm3, %v2787_v25, %v2514_v29  ;;  %v2755_v41 = vsel %vm12706_vm7, %v2722_v44, %v8772_v32  ;;  %vm12707_vm3 = vcmask 64512   ;;  %vm12715_vm7 = vcmask 523264   ;;  %v2390_v25 = vpop.permute.xlu0 %2389  ;;  %v12725_v44 = vld [vmem:[#allocation161_spill] sm:$0xff] }
 0x38e   : > { %v9133_v2 = vld [vmem:[#allocation2 + $0x27] sm:$0xff]  ;;  %4227 = vrot.lane.b32.xlu0 %v9131_v43, %s12064_s21  ;;  %v2788_v12 = vsel %vm12710_vm5, %v2755_v41, %v2388_v4  ;;  %vm12718_vm5 = vcmask 261120   ;;  %v7169_v41 = vld [vmem:[#allocation2 + $0xf9] sm:$0xff] }
 0x38f   : > { %v3419_v54 = vsel %vm12655_vm11, %v9133_v2, 0.0 }
 0x390   : > { %4129 = vrot.lane.b32.xlu2 %v3419_v54, %s12400_s30  ;;  %v2969_v63 = vpop.f32.mrf.mxu1  ;;  %v2392_v29 = vpop.permute.xlu1 %2391 }
 0x391   : > { %v2970_v52 = vadd.f32 %v9039_v21, %v2969_v63  ;;  %v2821_v63 = vsel %vm12715_vm7, %v2788_v12, %v2516_v34  ;;  %vm12724_vm7 = vcmask 64512  }
 0x393   : > { %vm3059_vm14 = vcmp.ge.f32.partialorder %v2970_v52, 0.0  ;;  %v3091_v24 = vmul.f32 0.01, %v2970_v52  ;;  %6710 = vmatmul.msk.f32.gmra.mxu1 %vm12699_vm0, %v2820_v9  ;;  %vm12709_vm0 = vmmov %vm12707_vm3 }
 0x394   : > { %v2592_v46 = vsel %vm12709_vm0, %v7167_v45, %v12708_v48  ;;  %vm12716_vm0 = vcmask 588800   ;;  %v9197_v48 = vpop.permute.xlu2 %2395 }
 0x395   : > { %v3123_v13 = vsel %vm3059_vm14, %v2970_v52, %v3091_v24  ;;  %vm12712_vm14 = vcmask 130048   ;;  %v12719_v52 = vld [vmem:[#allocation195_spill] sm:$0xff] }
 0x396   : > { %3158 = vst.msk [vmem:[#allocation2 + $0x30] sm:$0xff] %vm12707_vm3, %v3123_v13  ;;  %3649 = vrot.lane.b32.xlu0 %v3316_v0, %s12588_s20  ;;  %v2625_v54 = vsel %vm12712_vm14, %v2592_v46, %v12711_v1  ;;  %v12728_v46 = vld [vmem:[#allocation159_spill] sm:$0xff] }
 0x397   : > { %v2658_v32 = vsel %vm12714_vm13, %v2625_v54, %v12713_v17  ;;  %vm12723_vm13 = vcmask 392192   ;;  %v12732_v17 = vld [vmem:[#allocation160_spill] sm:$0xff] }
 0x398   : > { %3521 = vrot.lane.b32.xlu2 %v3252_v50, %s12529_s24  ;;  %v2972_v37 = vpop.f32.mrf.mxu1  ;;  %v2690_v4 = vsel %vm12718_vm5, %v2658_v32, %v12717_v8  ;;  %v12721_v50 = vld [vmem:[#allocation111_spill] sm:$0xff]  ;;  %vm12730_vm5 = vcmask 523264   ;;  %v2520_v54 = vpop.permute.xlu1 %2519 }
 0x399   : > { %v2973_v33 = vadd.f32 %v9039_v21, %v2972_v37  ;;  %v2723_v9 = vsel %vm12720_vm9, %v2690_v4, %v12719_v52  ;;  %vm12722_vm14 = vnez %v12721_v50  ;;  %vm12726_vm9 = vmmov %vm12724_vm7  ;;  %v12734_v8 = vld [vmem:[#allocation167_spill] sm:$0xff]  ;;  %v12737_v52 = vld [vmem:[#allocation157_spill] sm:$0xff] }
 0x39a   : > { %v1361_v34 = vsel %vm12722_vm14, %v7168_v49, 0.0  ;;  %v2756_v16 = vsel %vm12723_vm13, %v2723_v9, %v8776_v19  ;;  %vm12736_vm14 = vcmask 64512  }
 0x39b   : > { %vm3060_vm3 = vcmp.ge.f32.partialorder %v2973_v33, 0.0  ;;  %v3092_v6 = vmul.f32 0.01, %v2973_v33  ;;  %6711 = vmatmul.msk.f32.gmra.mxu1 %vm12716_vm0, %v2821_v63  ;;  %v2593_v13 = vsel %vm12726_vm9, %v1361_v34, %v12725_v44  ;;  %vm12729_vm0 = vcmask 130048   ;;  %v9206_v63 = vld [vmem:[#allocation2 + $0x1f] sm:$0xff]  ;;  %v12741_v34 = vld [vmem:[#allocation171_spill] sm:$0xff] }
 0x39c   : > { %v2626_v12 = vsel %vm12729_vm0, %v2593_v13, %v12728_v46  ;;  %vm12733_vm9 = vcmask 195584   ;;  %vm12738_vm0 = vmmov %vm12736_vm14  ;;  %v12746_v46 = vld [vmem:[#allocation168_spill] sm:$0xff] }
 0x39d   : > { %v3124_v51 = vsel %vm3060_vm3, %v2973_v33, %v3092_v6  ;;  %v9180_v24 = vld [vmem:[#allocation2 + $0x29] sm:$0xff]  ;;  %vm12727_vm3 = vcmask 457728   ;;  %v2659_v32 = vsel %vm12733_vm9, %v2626_v12, %v12732_v17  ;;  %vm12745_vm9 = vcmask 523264  }
 0x39e   : > { %3159 = vst.msk [vmem:[#allocation2 + $0x38] sm:$0xff] %vm12724_vm7, %v3124_v51  ;;  %4355 = vrot.lane.b32.xlu1 %v9180_v24, %s12401_s16  ;;  %3875 = vrot.lane.b32.xlu0 %v9182_v60, %s12654_s22  ;;  %v2789_v0 = vsel %vm12727_vm3, %v2756_v16, %v2390_v25  ;;  %vm12731_vm7 = vcmask 588800   ;;  %v9208_v6 = vld [vmem:[#allocation2 + $0x30] sm:$0xff]  ;;  %vm12735_vm3 = vcmask 261120   ;;  %v7170_v25 = vld [vmem:[#allocation2 + $0xbf] sm:$0xff] }
 0x39f   : > { %v2822_v1 = vsel %vm12730_vm5, %v2789_v0, %v2518_v39  ;;  %v2691_v4 = vsel %vm12735_vm3, %v2659_v32, %v12734_v8  ;;  %v9217_v39 = vld [vmem:[#allocation2 + $0x2f] sm:$0xff]  ;;  %v2594_v9 = vsel %vm12738_vm0, %v7170_v25, %v12737_v52  ;;  %v12739_v51 = vld [vmem:[#allocation206_spill] sm:$0xff]  ;;  %vm12740_vm5 = vcmask 326656   ;;  %v2394_v25 = vpop.permute.xlu0 %2393  ;;  %v12754_v52 = vld [vmem:[#allocation165_spill] sm:$0xff] }
 0x3a0   : > { %2527 = vrot.lane.b32.xlu2 %v7169_v41, %s12401_s16  ;;  %v2975_v45 = vpop.f32.mrf.mxu1  ;;  %v2724_v49 = vsel %vm12740_vm5, %v2691_v4, %v12739_v51  ;;  %vm12747_vm3 = vcmask 195584   ;;  %vm12748_vm5 = vcmask 588800   ;;  %v2522_v17 = vpop.permute.xlu1 %2521  ;;  %v7171_v32 = vld [vmem:[#allocation2 + $0xc7] sm:$0xff] }
 0x3a1   : > { %v2976_v19 = vadd.f32 %v9039_v21, %v2975_v45  ;;  %v12751_v8 = vld [vmem:[#allocation166_spill] sm:$0xff] }
 0x3a2   : > { %v12756_v51 = vld [vmem:[#allocation210_spill] sm:$0xff] }
 0x3a3   : > { %vm3061_vm13 = vcmp.ge.f32.partialorder %v2976_v19, 0.0  ;;  %v3093_v37 = vmul.f32 0.01, %v2976_v19  ;;  %6712 = vmatmul.msk.f32.gmra.mxu1 %vm12731_vm7, %v2822_v1  ;;  %vm12744_vm7 = vcmask 457728   ;;  %v9236_v1 = vpop.permute.xlu2 %2399 }
 0x3a5   : > { %v3125_v33 = vsel %vm3061_vm13, %v2976_v19, %v3093_v37  ;;  %vm12743_vm13 = vcmask 392192   ;;  %v9232_v19 = vld [vmem:[#allocation2 + $0x21] sm:$0xff] }
 0x3a6   : > { %3160 = vst.msk [vmem:[#allocation2 + $0x40] sm:$0xff] %vm12736_vm14, %v3125_v33  ;;  %3777 = vrot.lane.b32.xlu1 %v9206_v63, %s12658_s23  ;;  %4229 = vrot.lane.b32.xlu0 %v9208_v6, %s12064_s21  ;;  %vm12742_vm14 = vcmask 130048   ;;  %v2757_v44 = vsel %vm12743_vm13, %v2724_v49, %v8795_v61  ;;  %v12749_v33 = vld [vmem:[#allocation122_spill] sm:$0xff]  ;;  %vm12752_vm13 = vcmask 261120  }
 0x3a7   : > { %v2627_v16 = vsel %vm12742_vm14, %v2594_v9, %v12741_v34  ;;  %v2790_v0 = vsel %vm12744_vm7, %v2757_v44, %v2392_v29  ;;  %v3386_v29 = vsel %vm12705_vm1, %v9232_v19, 0.0  ;;  %vm12750_vm14 = vnez %v12749_v33 }
 0x3a8   : > { %4131 = vrot.lane.b32.xlu2 %v9217_v39, %s12400_s30  ;;  %v2978_v13 = vpop.f32.mrf.mxu1  ;;  %v2823_v45 = vsel %vm12745_vm9, %v2790_v0, %v2520_v54  ;;  %v2660_v12 = vsel %vm12747_vm3, %v2627_v16, %v12746_v46  ;;  %v1363_v54 = vsel %vm12750_vm14, %v7171_v32, 0.0  ;;  %vm12753_vm7 = vcmask 64512   ;;  %v12760_v0 = vld [vmem:[#allocation163_spill] sm:$0xff]  ;;  %v12763_v46 = vld [vmem:[#allocation177_spill] sm:$0xff] }
 0x3a9   : > { %v2979_v41 = vadd.f32 %v9039_v21, %v2978_v13  ;;  %v2692_v4 = vsel %vm12752_vm13, %v2660_v12, %v12751_v8  ;;  %vm12755_vm9 = vmmov %vm12753_vm7  ;;  %vm12757_vm3 = vcmask 326656   ;;  %vm12761_vm13 = vcmask 130048  }
 0x3aa   : > { %v2595_v9 = vsel %vm12755_vm9, %v1363_v54, %v12754_v52  ;;  %v2725_v49 = vsel %vm12757_vm3, %v2692_v4, %v12756_v51  ;;  %vm12764_vm9 = vcmask 195584   ;;  %vm12765_vm14 = vcmask 588800   ;;  %v12769_v54 = vld [vmem:[#allocation138_spill] sm:$0xff]  ;;  %v7173_v4 = vld [vmem:[#allocation2 + $0xcf] sm:$0xff]  ;;  %v2524_v51 = vpop.permute.xlu1 %2523 }
 0x3ab   : > { %vm3062_vm0 = vcmp.ge.f32.partialorder %v2979_v41, 0.0  ;;  %v3094_v37 = vmul.f32 0.01, %v2979_v41  ;;  %6713 = vmatmul.msk.f32.gmra.mxu1 %vm12748_vm5, %v2823_v45  ;;  %vm12759_vm5 = vcmask 457728   ;;  %v9263_v45 = vld [vmem:[#allocation2 + $0x31] sm:$0xff] }
 0x3ad   : > { %v3126_v61 = vsel %vm3062_vm0, %v2979_v41, %v3094_v37  ;;  %vm12758_vm0 = vcmask 392192  }
 0x3ae   : > { %3161 = vst.msk [vmem:[#allocation2 + $0x48] sm:$0xff] %vm12753_vm7, %v3126_v61  ;;  %4003 = vrot.lane.b32.xlu1 %v3386_v29, %s12673_s15  ;;  %3651 = vrot.lane.b32.xlu0 %v9109_v27, %s12588_s20  ;;  %v2758_v34 = vsel %vm12758_vm0, %v2725_v49, %v8803_v10  ;;  %v2628_v27 = vsel %vm12761_vm13, %v2595_v9, %v12760_v0  ;;  %vm12762_vm7 = vcmask 523264   ;;  %v9268_v10 = vpop.permute.xlu2 %3519  ;;  %v3456_v61 = vsel %vm12705_vm1, %v9263_v45, 0.0  ;;  %v12766_v29 = vld [vmem:[#allocation172_spill] sm:$0xff] }
 0x3af   : > { %v2791_v44 = vsel %vm12759_vm5, %v2758_v34, %v2394_v25  ;;  %v2661_v12 = vsel %vm12764_vm9, %v2628_v27, %v12763_v46  ;;  %vm12767_vm0 = vcmask 261120   ;;  %vm12768_vm5 = vcmask 64512   ;;  %v12771_v25 = vld [vmem:[#allocation174_spill] sm:$0xff]  ;;  %v9295_v46 = vld [vmem:[#allocation2 + $0x37] sm:$0xff] }
 0x3b0   : > { %3523 = vrot.lane.b32.xlu2 %v9080_v22, %s12529_s24  ;;  %v2981_v16 = vpop.f32.mrf.mxu1  ;;  %v2824_v41 = vsel %vm12762_vm7, %v2791_v44, %v2522_v17  ;;  %v2693_v32 = vsel %vm12767_vm0, %v2661_v12, %v12766_v29  ;;  %v7172_v17 = vld [vmem:[#allocation2 + $0x101] sm:$0xff]  ;;  %vm12772_vm13 = vmmov %vm12768_vm5  ;;  %vm12774_vm1 = vcmask 326656   ;;  %vm12775_vm7 = vcmask 392192   ;;  %v12781_v12 = vld [vmem:[#allocation173_spill] sm:$0xff] }
 0x3b1   : > { %v2982_v13 = vadd.f32 %v9039_v21, %v2981_v16  ;;  %v2596_v52 = vsel %vm12772_vm13, %v7173_v4, %v12771_v25  ;;  %v2726_v9 = vsel %vm12774_vm1, %v2693_v32, %v12773_v18  ;;  %vm12776_vm9 = vcmask 457728   ;;  %v12784_v29 = vld [vmem:[#allocation184_spill] sm:$0xff]  ;;  %v12787_v4 = vld [vmem:[#allocation209_spill] sm:$0xff] }
 0x3b2   : > { %v2759_v49 = vsel %vm12775_vm7, %v2726_v9, %v8846_v15  ;;  %vm12779_vm0 = vcmask 523264   ;;  %vm12780_vm13 = vcmask 588800   ;;  %vm12782_vm1 = vcmask 195584  }
 0x3b3   : > { %vm3063_vm3 = vcmp.ge.f32.partialorder %v2982_v13, 0.0  ;;  %v3095_v22 = vmul.f32 0.01, %v2982_v13  ;;  %6714 = vmatmul.msk.f32.gmra.mxu1 %vm12765_vm14, %v2824_v41  ;;  %vm12770_vm14 = vnez %v12769_v54  ;;  %v2792_v16 = vsel %vm12776_vm9, %v2759_v49, %v9197_v48 }
 0x3b4   : > { %v1602_v8 = vsel %vm12770_vm14, %v7172_v17, 0.0  ;;  %v2825_v27 = vsel %vm12779_vm0, %v2792_v16, %v2524_v51  ;;  %vm12785_vm7 = vcmask 261120   ;;  %v2398_v17 = vpop.permute.xlu0 %2397  ;;  %vm12786_vm9 = vcmask 64512  }
 0x3b5   : > { %v3127_v37 = vsel %vm3063_vm3, %v2982_v13, %v3095_v22  ;;  %v12777_v13 = vld [vmem:[#allocation175_spill] sm:$0xff]  ;;  %vm12778_vm3 = vcmask 130048   ;;  %vm12789_vm0 = vcmask 392192   ;;  %vm12838_vm14 = vcmask 64512  }
 0x3b6   : > { %3162 = vst.msk [vmem:[#allocation2 + $0x50] sm:$0xff] %vm12768_vm5, %v3127_v37  ;;  %4357 = vrot.lane.b32.xlu1 %v3456_v61, %s12401_s16  ;;  %3877 = vrot.lane.b32.xlu0 %v9131_v43, %s12654_s22  ;;  %v2629_v0 = vsel %vm12778_vm3, %v2596_v52, %v12777_v13  ;;  %v9299_v37 = vld [vmem:[#allocation2 + $0x38] sm:$0xff]  ;;  %v3351_v61 = vsel %vm7479_vm10, %v9133_v2, 0.0  ;;  %vm12788_vm3 = vcmask 326656   ;;  %v2526_v52 = vpop.permute.xlu2 %2525  ;;  %v12793_v13 = vld [vmem:[#allocation14_spill] sm:$0xff] }
 0x3b7   : > { %v2662_v15 = vsel %vm12782_vm1, %v2629_v0, %v12781_v12 }
 0x3b8   : > { %2529 = vrot.lane.b32.xlu2 %v1602_v8, %s12401_s16  ;;  %v2984_v34 = vpop.f32.mrf.mxu1  ;;  %v2694_v32 = vsel %vm12785_vm7, %v2662_v15, %v12784_v29  ;;  %v3421_v8 = vsel %vm7479_vm10, %v9295_v46, 0.0  ;;  %vm12792_vm7 = vcmask 588800   ;;  %v9332_v15 = vld [vmem:[#allocation2 + $0x39] sm:$0xff] }
 0x3b9   : > { %v2985_v44 = vadd.f32 %v9039_v21, %v2984_v34  ;;  %v2727_v25 = vsel %vm12788_vm3, %v2694_v32, %v12787_v4  ;;  %vm12795_vm3 = vcmask 64512   ;;  %v9341_v32 = vld [vmem:[#allocation2 + $0x3f] sm:$0xff] }
 0x3ba   : > { %v2760_v18 = vsel %vm12789_vm0, %v2727_v25, %v8935_v28 }
 0x3bb   : > { %vm3064_vm5 = vcmp.ge.f32.partialorder %v2985_v44, 0.0  ;;  %v3096_v41 = vmul.f32 0.01, %v2985_v44  ;;  %6715 = vmatmul.msk.f32.gmra.mxu1 %vm12780_vm13, %v2825_v27  ;;  %vm12791_vm13 = vcmask 523264  }
 0x3bd   : > { %v3128_v22 = vsel %vm3064_vm5, %v2985_v44, %v3096_v41  ;;  %vm12790_vm5 = vcmask 457728   ;;  %v9494_v54 = vld [vmem:[#allocation2 + $0x50] sm:$0xff] }
 0x3be   : > { %3163 = vst.msk [vmem:[#allocation2 + $0x58] sm:$0xff] %vm12786_vm9, %v3128_v22  ;;  %4231 = vrot.lane.b32.xlu0 %v9299_v37, %s12064_s21  ;;  %3779 = vrot.lane.b32.xlu1 %v3351_v61, %s12658_s23  ;;  %v2793_v51 = vsel %vm12790_vm5, %v2760_v18, %v2398_v17  ;;  %vm12794_vm9 = vnez %v12793_v13  ;;  %vm12796_vm5 = vmmov %vm12795_vm3  ;;  %v7175_v17 = vld [vmem:[#allocation2 + $0x108] sm:$0xff]  ;;  %v3353_v13 = vsel %vm7535_vm4, %v9295_v46, 0.0 }
 0x3bf   : > { %v2826_v34 = vsel %vm12791_vm13, %v2793_v51, %v2526_v52  ;;  %v3318_v0 = vsel %vm12794_vm9, %v9232_v19, 0.0  ;;  %v7174_v19 = vld [vmem:[#allocation2 + $0x109] sm:$0xff]  ;;  %v9352_v18 = vld [vmem:[#allocation2 + $0x41] sm:$0xff] }
 0x3c0   : > { %4133 = vrot.lane.b32.xlu2 %v3421_v8, %s12400_s30  ;;  %v2987_v9 = vpop.f32.mrf.mxu1  ;;  %v3388_v8 = vsel %vm12794_vm9, %v9263_v45, 0.0  ;;  %v3458_v51 = vsel %vm12794_vm9, %v9352_v18, 0.0 }
 0x3c1   : > { %v2988_v49 = vadd.f32 %v9039_v21, %v2987_v9 }
 0x3c3   : > { %vm3065_vm1 = vcmp.ge.f32.partialorder %v2988_v49, 0.0  ;;  %v3097_v16 = vmul.f32 0.01, %v2988_v49  ;;  %6716 = vmatmul.msk.f32.gmra.mxu1 %vm12792_vm7, %v2826_v34 }
 0x3c5   : > { %v3129_v44 = vsel %vm3065_vm1, %v2988_v49, %v3097_v16  ;;  %vm12797_vm1 = vmmov %vm12795_vm3  ;;  %v4715_v16 = vld [vmem:[%s11908_s5 + $0x40] sm:$0xff] }
 0x3c6   : > { %3164 = vst.msk [vmem:[#allocation2 + $0x60] sm:$0xff] %vm12795_vm3, %v3129_v44  ;;  %3653 = vrot.lane.b32.xlu0 %v3318_v0, %s12588_s20  ;;  %4005 = vrot.lane.b32.xlu1 %v9180_v24, %s12673_s15  ;;  %vm12798_vm3 = vmmov %vm12797_vm1 }
 0x3c7   : > { %4823 = vmatpush.msra.mxu2 %v4715_v16  ;;  %vm12799_vm9 = vmmov %vm12797_vm1 }
 0x3c8   : > { %3525 = vrot.lane.b32.xlu2 %v9182_v60, %s12529_s24  ;;  %v2990_v28 = vpop.f32.mrf.mxu1 }
 0x3c9   : > { %v2991_v27 = vadd.f32 %v9039_v21, %v2990_v28  ;;  %v9373_v28 = vld [vmem:[#allocation2 + $0x40] sm:$0xff] }
 0x3cb   : > { %vm3066_vm0 = vcmp.ge.f32.partialorder %v2991_v27, 0.0  ;;  %v3098_v41 = vmul.f32 0.01, %v2991_v27 }
 0x3cd   : > { %v3130_v12 = vsel %vm3066_vm0, %v2991_v27, %v3098_v41  ;;  %v4713_v27 = vld [vmem:[%s11908_s5 + $0x30] sm:$0xff]  ;;  %v9378_v41 = vpop.permute.xlu0 %2401 }
 0x3ce   : > { %3165 = vst.msk [vmem:[#allocation2 + $0x68] sm:$0xff] %vm12796_vm5, %v3130_v12  ;;  %2531 = vrot.lane.b32.xlu0 %v7174_v19, %s12401_s16  ;;  %4359 = vrot.lane.b32.xlu1 %v9332_v15, %s12401_s16  ;;  %v9384_v12 = vld [vmem:[#allocation2 + $0x118] sm:$0xff]  ;;  %v4712_v19 = vld [vmem:[%s11908_s5 + $0x28] sm:$0xff]  ;;  %vm12802_vm5 = vmmov %vm12797_vm1 }
 0x3d0   : > { %3781 = vrot.lane.b32.xlu2 %v9217_v39, %s12658_s23  ;;  %v2993_v60 = vpop.f32.mrf.mxu1 }
 0x3d1   : > { %v2994_v22 = vadd.f32 %v9039_v21, %v2993_v60  ;;  %v9389_v60 = vld [vmem:[#allocation2 + $0x119] sm:$0xff] }
 0x3d3   : > { %vm3067_vm13 = vcmp.ge.f32.partialorder %v2994_v22, 0.0  ;;  %v3099_v61 = vmul.f32 0.01, %v2994_v22 }
 0x3d5   : > { %v3131_v29 = vsel %vm3067_vm13, %v2994_v22, %v3099_v61  ;;  %v7176_v22 = vld [vmem:[#allocation2 + $0x110] sm:$0xff]  ;;  %v12801_v61 = vmov 0.0  }
 0x3d6   : > { %3166 = vst.msk [vmem:[#allocation2 + $0x70] sm:$0xff] %vm12797_vm1, %v3131_v29  ;;  %4135 = vrot.lane.b32.xlu0 %v9341_v32, %s12400_s30  ;;  %2403 = vrot.lane.b32.xlu1 %v7175_v17, %s12064_s21  ;;  %s6779_s21 = sshll.u32 %s7355_s29, 4  ;;  %s6574_s29 = scalar_lea.sflag [#allocation4], %s431_s27 }
 0x3d7   : > { %3152 = vst.msk [vmem:[#allocation2 + $0x118] sm:$0xff] %vm12802_vm5, %v12801_v61 }
 0x3d8   : > { %4007 = vrot.lane.b32.xlu2 %v3388_v8, %s12673_s15  ;;  %v2996_v4 = vpop.f32.mrf.mxu1 }
 0x3d9   : > { %v2997_v25 = vadd.f32 %v9039_v21, %v2996_v4  ;;  %v4711_v4 = vld [vmem:[%s11908_s5 + $0x20] sm:$0xff] }
 0x3db   : > { %vm3068_vm7 = vcmp.ge.f32.partialorder %v2997_v25, 0.0  ;;  %v3100_v52 = vmul.f32 0.01, %v2997_v25 }
 0x3dd   : > { %v3132_v9 = vsel %vm3068_vm7, %v2997_v25, %v3100_v52  ;;  %v4710_v52 = vld [vmem:[%s11908_s5 + $0x18] sm:$0xff]  ;;  %vm12805_vm7 = vmmov %vm12798_vm3 }
 0x3de   : > { %3167 = vst.msk [vmem:[#allocation2 + $0x78] sm:$0xff] %vm12798_vm3, %v3132_v9  ;;  %3527 = vrot.lane.b32.xlu0 %v9131_v43, %s12529_s24  ;;  %3879 = vrot.lane.b32.xlu1 %v9208_v6, %s12654_s22  ;;  %v4714_v43 = vld [vmem:[%s11908_s5 + $0x38] sm:$0xff] }
 0x3df   : > { %4824 = vmatpush.msra.mxu2 %v4714_v43  ;;  %v4708_v43 = vld [vmem:[%s11908_s5 + $0x8] sm:$0xff] }
 0x3e0   : > { %4361 = vrot.lane.b32.xlu2 %v3458_v51, %s12401_s16  ;;  %v2999_v49 = vpop.f32.mrf.mxu1  ;;  %v4709_v51 = vld [vmem:[%s11908_s5 + $0x10] sm:$0xff] }
 0x3e1   : > { %v3000_v34 = vadd.f32 %v9039_v21, %v2999_v49  ;;  %4825 = vmatpush.msra.mxu2 %v4713_v27  ;;  %v7177_v49 = vld [vmem:[#allocation2 + $0xd7] sm:$0xff] }
 0x3e2   : > { %v12807_v27 = vld [vmem:[#allocation180_spill] sm:$0xff] }
 0x3e3   : > { %vm3069_vm0 = vcmp.ge.f32.partialorder %v3000_v34, 0.0  ;;  %v3101_v44 = vmul.f32 0.01, %v3000_v34  ;;  %4826 = vmatpush.msra.mxu2 %v4712_v19 }
 0x3e5   : > { %v3133_v0 = vsel %vm3069_vm0, %v3000_v34, %v3101_v44  ;;  %4827 = vmatpush.msra.mxu2 %v4711_v4  ;;  %v12803_v34 = vld [vmem:[#allocation126_spill] sm:$0xff]  ;;  %v3648_v44 = vpop.permute.xlu0 %3647  ;;  %vm12808_vm0 = vcmask 130048   ;;  %v12809_v4 = vld [vmem:[#allocation181_spill] sm:$0xff] }
 0x3e6   : > { %3168 = vst.msk [vmem:[#allocation2 + $0x80] sm:$0xff] %vm12799_vm9, %v3133_v0  ;;  %3783 = vrot.lane.b32.xlu0 %v3353_v13, %s12658_s23  ;;  %4233 = vrot.lane.b32.xlu1 %v9373_v28, %s12800_s0  ;;  %vm12804_vm1 = vnez %v12803_v34  ;;  %v12806_v0 = vld [vmem:[#allocation170_spill] sm:$0xff]  ;;  %vm12810_vm9 = vcmask 195584  }
 0x3e7   : > { %4828 = vmatpush.msra.mxu2 %v4710_v52  ;;  %v1365_v16 = vsel %vm12804_vm1, %v7177_v49, 0.0  ;;  %v12811_v49 = vld [vmem:[#allocation169_spill] sm:$0xff] }
 0x3e8   : > { %2405 = vrot.lane.b32.xlu2 %v7176_v22, %s12800_s0  ;;  %v3002_v29 = vpop.f32.mrf.mxu1  ;;  %v2597_v13 = vsel %vm12798_vm3, %v1365_v16, %v12806_v0  ;;  %v12812_v16 = vld [vmem:[#allocation147_spill] sm:$0xff] }
 0x3e9   : > { %v3003_v17 = vadd.f32 %v9039_v21, %v3002_v29  ;;  %4829 = vmatpush.msra.mxu2 %v4709_v51  ;;  %v2630_v19 = vsel %vm12808_vm0, %v2597_v13, %v12807_v27  ;;  %v9430_v51 = vld [vmem:[#allocation2 + $0x49] sm:$0xff]  ;;  %vm12817_vm0 = vcmask 326656  }
 0x3ea   : > { %v9395_v8 = vpop.permute.xlu2 %4129  ;;  %v12814_v13 = vld [vmem:[#allocation176_spill] sm:$0xff]  ;;  %v9441_v27 = vld [vmem:[#allocation2 + $0x48] sm:$0xff] }
 0x3eb   : > { %vm3070_vm13 = vcmp.ge.f32.partialorder %v3003_v17, 0.0  ;;  %v3102_v25 = vmul.f32 0.01, %v3003_v17  ;;  %4830 = vmatpush.msra.mxu2 %v4708_v43 }
 0x3ed   : > { %v3134_v9 = vsel %vm3070_vm13, %v3003_v17, %v3102_v25  ;;  %v2663_v25 = vsel %vm12810_vm9, %v2630_v19, %v12809_v4  ;;  %vm12813_vm13 = vnez %v12812_v16  ;;  %v12816_v19 = vld [vmem:[#allocation212_spill] sm:$0xff]  ;;  %vm12818_vm9 = vcmask 392192  }
 0x3ee   : > { %3169 = vst.msk [vmem:[#allocation2 + $0x88] sm:$0xff] %vm12805_vm7, %v3134_v9  ;;  %4009 = vrot.lane.b32.xlu0 %v9332_v15, %s12673_s15  ;;  %3655 = vrot.lane.b32.xlu1 %v9180_v24, %s12588_s20  ;;  %v4707_v24 = vld [vmem:[%s11908_s5] sm:$0xff]  ;;  %v1604_v0 = vsel %vm12813_vm13, %v12811_v49, 0.0  ;;  %vm12815_vm7 = vcmask 261120  }
 0x3ef   : > { %4831 = vmatpush.msra.mxu2 %v4707_v24  ;;  %v2695_v43 = vsel %vm12815_vm7, %v2663_v25, %v12814_v13  ;;  %vm12820_vm7 = vcmask 523264  }
 0x3f0   : > { %3881 = vrot.lane.b32.xlu2 %v9299_v37, %s12654_s22  ;;  %v3005_v22 = vpop.f32.mrf.mxu1  ;;  %v3874_v24 = vpop.permute.xlu0 %3873 }
 0x3f1   : > { %v3006_v29 = vadd.f32 %v9039_v21, %v3005_v22  ;;  %v2728_v22 = vsel %vm12817_vm0, %v2695_v43, %v12816_v19  ;;  %vm12821_vm0 = vcmask 588800   ;;  %v3187_v43 = vld [vmem:[#allocation2 + $0x7] sm:$0xff] }
 0x3f2   : > { %v9423_v17 = vpop.permute.xlu2 %3521  ;;  %v3776_v19 = vpop.permute.xlu1 %3775 }
 0x3f3   : > { %vm3071_vm5 = vcmp.ge.f32.partialorder %v3006_v29, 0.0  ;;  %v3103_v52 = vmul.f32 0.01, %v3006_v29 }
 0x3f5   : > { %v3135_v9 = vsel %vm3071_vm5, %v3006_v29, %v3103_v52  ;;  %v2761_v29 = vsel %vm12818_vm9, %v2728_v22, %v8955_v53  ;;  %vm12819_vm5 = vcmask 457728   ;;  %vm12822_vm9 = vcmask 64512  }
 0x3f6   : > { %3170 = vst.msk [vmem:[#allocation2 + $0x90] sm:$0xff] %vm12798_vm3, %v3135_v9  ;;  %4363 = vrot.lane.b32.xlu0 %v9430_v51, %s12401_s16  ;;  %2533 = vrot.lane.b32.xlu1 %v1604_v0, %s12401_s16  ;;  %v2794_v25 = vsel %vm12819_vm5, %v2761_v29, %v9236_v1  ;;  %v9453_v0 = vld [vmem:[#allocation2 + $0x47] sm:$0xff]  ;;  %v12823_v1 = vld [vmem:[#allocation17_spill] sm:$0xff]  ;;  %v3219_v29 = vsel %vm12655_vm11, %v3187_v43, 0.0  ;;  %vm12828_vm11 = vcmask 195584  }
 0x3f7   : > { %v3423_v53 = vsel %vm7535_vm4, %v9453_v0, 0.0  ;;  %vm12824_vm5 = vnez %v12823_v1 }
 0x3f8   : > { %4235 = vrot.lane.b32.xlu2 %v9441_v27, %s12800_s0  ;;  %v3008_v4 = vpop.f32.mrf.mxu1  ;;  %v3320_v22 = vsel %vm12824_vm5, %v9263_v45, 0.0 }
 0x3f9   : > { %v3009_v52 = vadd.f32 %v9039_v21, %v3008_v4 }
 0x3fa   : > { %v2528_v9 = vpop.permute.xlu2 %2527  ;;  %v4002_v40 = vpop.permute.xlu1 %4001 }
 0x3fb   : > { %v2827_v49 = vsel %vm12820_vm7, %v2794_v25, %v2528_v9  ;;  %vm3072_vm3 = vcmp.ge.f32.partialorder %v3009_v52, 0.0  ;;  %v3104_v13 = vmul.f32 0.01, %v3009_v52  ;;  %vm12825_vm7 = vmmov %vm12822_vm9 }
 0x3fc   : > { %6717 = vmatmul.msk.f32.gmra.mxu1 %vm12821_vm0, %v2827_v49  ;;  %vm12826_vm0 = vcmask 130048  }
 0x3fd   : > { %v3136_v16 = vsel %vm3072_vm3, %v3009_v52, %v3104_v13 }
 0x3fe   : > { %3171 = vst.msk [vmem:[#allocation2 + $0x98] sm:$0xff] %vm12822_vm9, %v3136_v16  ;;  %2407 = vrot.lane.b32.xlu0 %v9384_v12, %s12800_s0  ;;  %4137 = vrot.lane.b32.xlu1 %v3423_v53, %s12400_s30  ;;  %v4451_v12 = vsel %vm12825_vm7, %v3219_v29, %v9268_v10  ;;  %vm12827_vm9 = vmmov %vm12825_vm7  ;;  %v7178_v53 = vld [vmem:[#allocation2 + $0xdf] sm:$0xff] }
 0x3ff   : > { %v4483_v49 = vsel %vm12826_vm0, %v4451_v12, %v3648_v44 }
 0x400   : > { %3657 = vrot.lane.b32.xlu2 %v3320_v22, %s12588_s20  ;;  %v3011_v4 = vpop.f32.mrf.mxu1  ;;  %v4228_v25 = vpop.permute.xlu0 %4227  ;;  %v4515_v45 = vsel %vm12828_vm11, %v4483_v49, %v3776_v19  ;;  %v12829_v22 = vld [vmem:[#allocation178_spill] sm:$0xff] }
 0x401   : > { %v3012_v52 = vadd.f32 %v9039_v21, %v3011_v4  ;;  %v2598_v44 = vsel %vm12825_vm7, %v7178_v53, %v12829_v22  ;;  %v12836_v53 = vld [vmem:[#allocation188_spill] sm:$0xff] }
 0x402   : > { %v9470_v9 = vpop.permute.xlu2 %4131  ;;  %v9503_v22 = vld [vmem:[#allocation2 + $0x4f] sm:$0xff] }
 0x403   : > { %vm3073_vm3 = vcmp.ge.f32.partialorder %v3012_v52, 0.0  ;;  %v3105_v16 = vmul.f32 0.01, %v3012_v52 }
 0x405   : > { %v3137_v13 = vsel %vm3073_vm3, %v3012_v52, %v3105_v16  ;;  %v12830_v52 = vld [vmem:[#allocation179_spill] sm:$0xff]  ;;  %vm12831_vm3 = vmmov %vm12826_vm0 }
 0x406   : > { %3172 = vst.msk [vmem:[#allocation2 + $0xa0] sm:$0xff] %vm12827_vm9, %v3137_v13  ;;  %3883 = vrot.lane.b32.xlu0 %v9373_v28, %s12654_s22  ;;  %3529 = vrot.lane.b32.xlu1 %v9208_v6, %s12529_s24  ;;  %v2631_v12 = vsel %vm12831_vm3, %v2598_v44, %v12830_v52  ;;  %v12832_v6 = vld [vmem:[#allocation190_spill] sm:$0xff]  ;;  %vm12833_vm0 = vmmov %vm12828_vm11  ;;  %vm12834_vm9 = vcmask 261120   ;;  %vm12835_vm11 = vcmask 326656   ;;  %vm12841_vm3 = vcmask 392192  }
 0x407   : > { %v2664_v16 = vsel %vm12833_vm0, %v2631_v12, %v12832_v6  ;;  %vm12837_vm7 = vmmov %vm12834_vm9 }
 0x408   : > { %2535 = vrot.lane.b32.xlu2 %v9389_v60, %s12401_s16  ;;  %v3014_v10 = vpop.f32.mrf.mxu1  ;;  %v3650_v43 = vpop.permute.xlu0 %3649  ;;  %v4547_v60 = vsel %vm12834_vm9, %v4515_v45, %v3874_v24  ;;  %v1572_v24 = vld [vmem:[#allocation2 + $0x120] sm:$0xff]  ;;  %vm12842_vm0 = vmmov %vm12841_vm3  ;;  %vm12843_vm9 = vcmask 457728  }
 0x409   : > { %v3015_v29 = vadd.f32 %v9039_v21, %v3014_v10  ;;  %v4579_v49 = vsel %vm12835_vm11, %v4547_v60, %v4002_v40  ;;  %v2696_v10 = vsel %vm12837_vm7, %v2664_v16, %v12836_v53  ;;  %v9505_v45 = vld [vmem:[#allocation2 + $0x121] sm:$0xff]  ;;  %v12839_v40 = vld [vmem:[#allocation204_spill] sm:$0xff]  ;;  %vm12845_vm7 = vmmov %vm12843_vm9 }
 0x40a   : > { %v9486_v4 = vpop.permute.xlu2 %3523  ;;  %3153 = vst.msk [vmem:[#allocation2 + $0x120] sm:$0xff] %vm12838_vm14, %v12801_v61 }
 0x40b   : > { %vm3074_vm13 = vcmp.ge.f32.partialorder %v3015_v29, 0.0  ;;  %v3106_v19 = vmul.f32 0.01, %v3015_v29 }
 0x40d   : > { %v3138_v13 = vsel %vm3074_vm13, %v3015_v29, %v3106_v19  ;;  %vm12840_vm13 = vmmov %vm12835_vm11  ;;  %v4611_v29 = vsel %vm12841_vm3, %v4579_v49, %v9395_v8 }
 0x40e   : > { %3173 = vst.msk [vmem:[#allocation2 + $0xa8] sm:$0xff] %vm12838_vm14, %v3138_v13  ;;  %4237 = vrot.lane.b32.xlu0 %v9494_v54, %s12800_s0  ;;  %3785 = vrot.lane.b32.xlu1 %v9341_v32, %s12658_s23  ;;  %v2729_v44 = vsel %vm12840_vm13, %v2696_v10, %v12839_v40  ;;  %v4643_v12 = vsel %vm12843_vm9, %v4611_v29, %v4228_v25  ;;  %vm12844_vm11 = vmmov %vm12838_vm14  ;;  %vm12846_vm13 = vcmask 523264   ;;  %vm12848_vm14 = vcmask 588800  }
 0x40f   : > { %v2762_v52 = vsel %vm12842_vm0, %v2729_v44, %v8980_v47  ;;  %3154 = vst.msk [vmem:[#allocation2 + $0x128] sm:$0xff] %vm12844_vm11, %v12801_v61  ;;  %vm12847_vm3 = vmmov %vm12846_vm13  ;;  %v3390_v10 = vsel %vm12824_vm5, %v9352_v18, 0.0 }
 0x410   : > { %4139 = vrot.lane.b32.xlu2 %v9503_v22, %s12400_s30  ;;  %v3017_v6 = vpop.f32.mrf.mxu1  ;;  %v4356_v16 = vpop.permute.xlu1 %4355  ;;  %v2795_v60 = vsel %vm12845_vm7, %v2762_v52, %v9378_v41  ;;  %vm12849_vm9 = vmmov %vm12848_vm14  ;;  %v3188_v41 = vld [vmem:[#allocation2 + $0xf] sm:$0xff] }
 0x411   : > { %v3018_v8 = vadd.f32 %v9039_v21, %v3017_v6  ;;  %v3876_v19 = vpop.permute.xlu0 %3875  ;;  %v4675_v13 = vsel %vm12846_vm13, %v4643_v12, %v4356_v16  ;;  %vm12850_vm7 = vmmov %vm12844_vm11  ;;  %v9541_v16 = vld [vmem:[#allocation2 + $0x51] sm:$0xff] }
 0x412   : > { %v2530_v49 = vpop.permute.xlu2 %2529  ;;  %6723 = vmatmul.msk.f32.vlgmr.msra.gmra.mxu2 %vm12848_vm14, %v4675_v13  ;;  %v4452_v6 = vsel %vm12850_vm7, %v3188_v41, %v9423_v17  ;;  %vm12852_vm14 = vmmov %vm12850_vm7  ;;  %vm12856_vm7 = vcmask 392192  }
 0x413   : > { %v2828_v53 = vsel %vm12847_vm3, %v2795_v60, %v2530_v49  ;;  %vm3075_vm0 = vcmp.ge.f32.partialorder %v3018_v8, 0.0  ;;  %v3107_v47 = vmul.f32 0.01, %v3018_v8  ;;  %vm12851_vm3 = vcmask 130048  }
 0x414   : > { %6718 = vmatmul.msk.f32.gmra.mxu1 %vm12849_vm9, %v2828_v53  ;;  %v4484_v60 = vsel %vm12851_vm3, %v4452_v6, %v3650_v43  ;;  %vm12854_vm9 = vcmask 261120   ;;  %vm12858_vm3 = vcmask 457728  }
 0x415   : > { %v3139_v25 = vsel %vm3075_vm0, %v3018_v8, %v3107_v47  ;;  %vm12853_vm0 = vcmask 195584  }
 0x416   : > { %3174 = vst.msk [vmem:[#allocation2 + $0xb0] sm:$0xff] %vm12844_vm11, %v3139_v25  ;;  %3659 = vrot.lane.b32.xlu0 %v9332_v15, %s12588_s20  ;;  %4011 = vrot.lane.b32.xlu1 %v3390_v10, %s12673_s15  ;;  %v9558_v10 = vld [vmem:[#allocation2 + $0x57] sm:$0xff] }
 0x418   : > { %3531 = vrot.lane.b32.xlu2 %v9299_v37, %s12529_s24  ;;  %v3020_v40 = vpop.f32.mrf.mxu1  ;;  %v3778_v44 = vpop.permute.xlu1 %3777  ;;  %v3460_v37 = vsel %vm12824_vm5, %v9541_v16, 0.0  ;;  %vm12855_vm5 = vcmask 326656  }
 0x419   : > { %v3021_v29 = vadd.f32 %v9039_v21, %v3020_v40  ;;  %v4230_v52 = vpop.permute.xlu0 %4229  ;;  %v4516_v49 = vsel %vm12853_vm0, %v4484_v60, %v3778_v44  ;;  %vm12860_vm0 = vcmask 588800  }
 0x41a   : > { %v9537_v12 = vpop.permute.xlu2 %4133  ;;  %v4548_v53 = vsel %vm12854_vm9, %v4516_v49, %v3876_v19  ;;  %v3355_v19 = vsel %vm7578_vm12, %v9453_v0, 0.0 }
 0x41b   : > { %vm3076_vm13 = vcmp.ge.f32.partialorder %v3021_v29, 0.0  ;;  %v3108_v15 = vmul.f32 0.01, %v3021_v29 }
 0x41d   : > { %v3140_v8 = vsel %vm3076_vm13, %v3021_v29, %v3108_v15  ;;  %vm12857_vm13 = vmmov %vm12852_vm14 }
 0x41e   : > { %3175 = vst.msk [vmem:[#allocation2 + $0xb8] sm:$0xff] %vm12852_vm14, %v3140_v8  ;;  %3885 = vrot.lane.b32.xlu0 %v9441_v27, %s12654_s22  ;;  %4365 = vrot.lane.b32.xlu1 %v3460_v37, %s12401_s16  ;;  %vm12859_vm14 = vcmask 523264  }
 0x420   : > { %2409 = vrot.lane.b32.xlu2 %v1572_v24, %s12800_s0  ;;  %v3023_v17 = vpop.f32.mrf.mxu1  ;;  %v4004_v13 = vpop.permute.xlu1 %4003  ;;  %v3425_v24 = vsel %vm7578_vm12, %v9558_v10, 0.0 }
 0x421   : > { %v3024_v43 = vadd.f32 %v9039_v21, %v3023_v17  ;;  %v3652_v47 = vpop.permute.xlu0 %3651  ;;  %v4580_v25 = vsel %vm12855_vm5, %v4548_v53, %v4004_v13  ;;  %v12861_v17 = vld [vmem:[#allocation152_spill] sm:$0xff] }
 0x422   : > { %v9555_v1 = vpop.permute.xlu2 %3525  ;;  %v4612_v44 = vsel %vm12856_vm7, %v4580_v25, %v9470_v9  ;;  %vm12862_vm5 = vnez %v12861_v17 }
 0x423   : > { %vm3077_vm11 = vcmp.ge.f32.partialorder %v3024_v43, 0.0  ;;  %v3109_v41 = vmul.f32 0.01, %v3024_v43  ;;  %v4644_v9 = vsel %vm12858_vm3, %v4612_v44, %v4230_v52  ;;  %v1606_v13 = vsel %vm12862_vm5, %v9505_v45, 0.0  ;;  %v9586_v52 = vld [vmem:[#allocation2 + $0x59] sm:$0xff] }
 0x424   : > { %v3221_v45 = vsel %vm7479_vm10, %v9082_v55, 0.0  ;;  %vm12865_vm3 = vcmask 130048   ;;  %vm12868_vm10 = vcmask 261120   ;;  %vm12886_vm5 = vcmask 64512  }
 0x425   : > { %v3141_v40 = vsel %vm3077_vm11, %v3024_v43, %v3109_v41  ;;  %vm12863_vm11 = vmmov %vm12857_vm13 }
 0x426   : > { %3176 = vst.msk [vmem:[#allocation2 + $0xc0] sm:$0xff] %vm12857_vm13, %v3141_v40  ;;  %4141 = vrot.lane.b32.xlu0 %v3425_v24, %s12400_s30  ;;  %3787 = vrot.lane.b32.xlu1 %v3355_v19, %s12658_s23  ;;  %vm12864_vm13 = vmmov %vm12863_vm11 }
 0x427   : > { %v4453_v24 = vsel %vm12864_vm13, %v3221_v45, %v9486_v4 }
 0x428   : > { %4013 = vrot.lane.b32.xlu2 %v9430_v51, %s12673_s15  ;;  %v3026_v29 = vpop.f32.mrf.mxu1  ;;  %v4358_v6 = vpop.permute.xlu1 %4357  ;;  %v4485_v19 = vsel %vm12865_vm3, %v4453_v24, %v3652_v47  ;;  %v12873_v24 = vld [vmem:[#allocation148_spill] sm:$0xff] }
 0x429   : > { %v3027_v15 = vadd.f32 %v9039_v21, %v3026_v29  ;;  %v3878_v60 = vpop.permute.xlu0 %3877  ;;  %v4676_v37 = vsel %vm12859_vm14, %v4644_v9, %v4358_v6  ;;  %v9599_v6 = vld [vmem:[#allocation2 + $0x58] sm:$0xff]  ;;  %vm12866_vm14 = vmmov %vm12863_vm11  ;;  %vm12874_vm3 = vnez %v12873_v24 }
 0x42a   : > { %v9575_v8 = vpop.permute.xlu2 %3781  ;;  %6724 = vmatmul.msk.f32.gmra.mxu2 %vm12860_vm0, %v4676_v37  ;;  %vm12867_vm0 = vcmask 195584  }
 0x42b   : > { %vm3078_vm9 = vcmp.ge.f32.partialorder %v3027_v15, 0.0  ;;  %v3110_v49 = vmul.f32 0.01, %v3027_v15 }
 0x42d   : > { %v3142_v43 = vsel %vm3078_vm9, %v3027_v15, %v3110_v49  ;;  %vm12869_vm9 = vcmask 326656  }
 0x42e   : > { %3177 = vst.msk [vmem:[#allocation2 + $0xc8] sm:$0xff] %vm12863_vm11, %v3142_v43  ;;  %3533 = vrot.lane.b32.xlu0 %v9373_v28, %s12529_s24  ;;  %2537 = vrot.lane.b32.xlu1 %v1606_v13, %s12401_s16 }
 0x430   : > { %4367 = vrot.lane.b32.xlu2 %v9586_v52, %s12401_s16  ;;  %v3029_v53 = vpop.f32.mrf.mxu1  ;;  %v3780_v25 = vpop.permute.xlu1 %3779 }
 0x431   : > { %v3030_v41 = vadd.f32 %v9039_v21, %v3029_v53  ;;  %v4232_v40 = vpop.permute.xlu0 %4231  ;;  %v4517_v9 = vsel %vm12867_vm0, %v4485_v19, %v3780_v25  ;;  %v9616_v25 = vld [vmem:[#allocation2 + $0x60] sm:$0xff]  ;;  %vm12876_vm0 = vmmov %vm12866_vm14 }
 0x432   : > { %v9591_v44 = vpop.permute.xlu2 %4007  ;;  %v4549_v15 = vsel %vm12868_vm10, %v4517_v9, %v3878_v60  ;;  %v9627_v19 = vld [vmem:[#allocation2 + $0x5f] sm:$0xff]  ;;  %vm12877_vm10 = vcmask 457728  }
 0x433   : > { %vm3079_vm7 = vcmp.ge.f32.partialorder %v3030_v41, 0.0  ;;  %v3111_v28 = vmul.f32 0.01, %v3030_v41 }
 0x435   : > { %v3143_v29 = vsel %vm3079_vm7, %v3030_v41, %v3111_v28  ;;  %vm12870_vm7 = vcmask 392192   ;;  %v12871_v41 = vld [vmem:[#allocation20_spill] sm:$0xff]  ;;  %v7179_v28 = vld [vmem:[#allocation2 + $0xe7] sm:$0xff] }
 0x436   : > { %3178 = vst.msk [vmem:[#allocation2 + $0xd0] sm:$0xff] %vm12866_vm14, %v3143_v29  ;;  %3887 = vrot.lane.b32.xlu0 %v9494_v54, %s12654_s22  ;;  %4239 = vrot.lane.b32.xlu1 %v9599_v6, %s12800_s0  ;;  %vm12872_vm13 = vnez %v12871_v41  ;;  %v1367_v60 = vsel %vm12874_vm3, %v7179_v28, 0.0  ;;  %v12882_v28 = vld [vmem:[#allocation186_spill] sm:$0xff]  ;;  %v9684_v41 = vld [vmem:[#allocation2 + $0x69] sm:$0xff] }
 0x437   : > { %v3322_v45 = vsel %vm12872_vm13, %v9352_v18, 0.0 }
 0x438   : > { %3789 = vrot.lane.b32.xlu2 %v9503_v22, %s12658_s23  ;;  %v3032_v55 = vpop.f32.mrf.mxu1  ;;  %v4006_v48 = vpop.permute.xlu1 %4005 }
 0x439   : > { %v3033_v4 = vadd.f32 %v9039_v21, %v3032_v55  ;;  %v3654_v47 = vpop.permute.xlu0 %3653  ;;  %v4581_v49 = vsel %vm12869_vm9, %v4549_v15, %v4006_v48  ;;  %vm12878_vm9 = vcmask 523264  }
 0x43a   : > { %v9611_v37 = vpop.permute.xlu2 %4361  ;;  %v4613_v53 = vsel %vm12870_vm7, %v4581_v49, %v9537_v12  ;;  %v12875_v12 = vld [vmem:[#allocation187_spill] sm:$0xff]  ;;  %vm12881_vm7 = vcmask 588800  }
 0x43b   : > { %vm3080_vm11 = vcmp.ge.f32.partialorder %v3033_v4, 0.0  ;;  %v3112_v13 = vmul.f32 0.01, %v3033_v4  ;;  %v2599_v29 = vsel %vm12876_vm0, %v1367_v60, %v12875_v12  ;;  %v4645_v55 = vsel %vm12877_vm10, %v4613_v53, %v4232_v40  ;;  %v12884_v40 = vld [vmem:[#allocation193_spill] sm:$0xff] }
 0x43c   : > { %vm12883_vm0 = vcmask 195584   ;;  %vm12885_vm10 = vcmask 261120  }
 0x43d   : > { %v3144_v43 = vsel %vm3080_vm11, %v3033_v4, %v3112_v13  ;;  %v12879_v13 = vld [vmem:[#allocation185_spill] sm:$0xff]  ;;  %vm12880_vm11 = vcmask 130048  }
 0x43e   : > { %3179 = vst.msk [vmem:[#allocation2 + $0xd8] sm:$0xff] %vm12866_vm14, %v3144_v43  ;;  %4241 = vrot.lane.b32.xlu0 %v9616_v25, %s12800_s0  ;;  %3661 = vrot.lane.b32.xlu1 %v3322_v45, %s12588_s20  ;;  %v2632_v43 = vsel %vm12880_vm11, %v2599_v29, %v12879_v13  ;;  %v12887_v29 = vld [vmem:[#allocation211_spill] sm:$0xff]  ;;  %vm12889_vm11 = vcmask 392192  }
 0x43f   : > { %v2665_v60 = vsel %vm12883_vm0, %v2632_v43, %v12882_v28  ;;  %vm12893_vm0 = vcmask 64512  }
 0x440   : > { %4143 = vrot.lane.b32.xlu2 %v9627_v19, %s12400_s30  ;;  %v3035_v18 = vpop.f32.mrf.mxu1  ;;  %v4360_v9 = vpop.permute.xlu1 %4359  ;;  %v2697_v53 = vsel %vm12885_vm10, %v2665_v60, %v12884_v40  ;;  %vm12894_vm10 = vcmask 130048  }
 0x441   : > { %v3036_v48 = vadd.f32 %v9039_v21, %v3035_v18  ;;  %v2532_v4 = vpop.permute.xlu0 %2531  ;;  %v4677_v49 = vsel %vm12878_vm9, %v4645_v55, %v4360_v9  ;;  %v3392_v21 = vsel %vm12872_vm13, %v9541_v16, 0.0  ;;  %vm12888_vm9 = vcmask 326656  }
 0x442   : > { %v9635_v15 = vpop.permute.xlu2 %2405  ;;  %6725 = vmatmul.msk.f32.gmra.mxu2 %vm12881_vm7, %v4677_v49  ;;  %v2730_v18 = vsel %vm12888_vm9, %v2697_v53, %v12887_v29  ;;  %vm12890_vm7 = vcmask 457728   ;;  %vm12895_vm9 = vcmask 195584  }
 0x443   : > { %vm3081_vm14 = vcmp.ge.f32.partialorder %v3036_v48, 0.0  ;;  %v3113_v45 = vmul.f32 0.01, %v3036_v48  ;;  %v2763_v9 = vsel %vm12889_vm11, %v2730_v18, %v9006_v5  ;;  %vm12896_vm11 = vcmask 261120  }
 0x445   : > { %v3145_v12 = vsel %vm3081_vm14, %v3036_v48, %v3113_v45  ;;  %vm12892_vm14 = vcmask 588800   ;;  %v4454_v45 = vsel %vm12893_vm0, %v9206_v63, %v9555_v1  ;;  %vm12901_vm0 = vcmask 588800  }
 0x446   : > { %3180 = vst.msk [vmem:[#allocation2 + $0xe0] sm:$0xff] %vm12886_vm5, %v3145_v12  ;;  %3663 = vrot.lane.b32.xlu0 %v9430_v51, %s12588_s20  ;;  %4015 = vrot.lane.b32.xlu1 %v3392_v21, %s12673_s15  ;;  %vm12891_vm5 = vcmask 523264   ;;  %v9662_v51 = vld [vmem:[#allocation2 + $0x61] sm:$0xff]  ;;  %v3357_v12 = vsel %vm7605_vm15, %v9558_v10, 0.0 }
 0x447   : > { %v3462_v5 = vsel %vm12872_vm13, %v9662_v51, 0.0  ;;  %vm12897_vm13 = vcmask 326656   ;;  %v9692_v21 = vld [vmem:[#allocation2 + $0x68] sm:$0xff] }
 0x448   : > { %3535 = vrot.lane.b32.xlu2 %v9441_v27, %s12529_s24  ;;  %v2404_v55 = vpop.permute.xlu1 %2403  ;;  %v4486_v27 = vsel %vm12894_vm10, %v4454_v45, %v3654_v47  ;;  %vm12903_vm10 = vcmask 64512   ;;  %v12904_v45 = vld [vmem:[#allocation29_spill] sm:$0xff] }
 0x449   : > { %v4136_v48 = vpop.permute.xlu0 %4135  ;;  %v2796_v49 = vsel %vm12890_vm7, %v2763_v9, %v2404_v55  ;;  %v4518_v60 = vsel %vm12895_vm9, %v4486_v27, %v9575_v8  ;;  %vm12898_vm7 = vcmask 392192   ;;  %v9702_v9 = vld [vmem:[#allocation2 + $0x67] sm:$0xff]  ;;  %vm12905_vm9 = vnez %v12904_v45 }
 0x44a   : > { %v9659_v13 = vpop.permute.xlu2 %3881  ;;  %v2829_v43 = vsel %vm12891_vm5, %v2796_v49, %v2532_v4  ;;  %vm12899_vm5 = vcmask 457728   ;;  %v3427_v55 = vsel %vm7605_vm15, %v9702_v9, 0.0  ;;  %v7180_v49 = vld [vmem:[#allocation2 + $0xef] sm:$0xff] }
 0x44b   : > { %6719 = vmatmul.msk.f32.gmra.mxu1 %vm12892_vm14, %v2829_v43  ;;  %vm12900_vm14 = vcmask 523264   ;;  %v12902_v43 = vld [vmem:[#allocation183_spill] sm:$0xff] }
 0x44e   : > { %4017 = vrot.lane.b32.xlu0 %v9586_v52, %s12673_s15  ;;  %4369 = vrot.lane.b32.xlu1 %v3462_v5, %s12401_s16  ;;  %v12906_v5 = vld [vmem:[#allocation196_spill] sm:$0xff] }
 0x450   : > { %3889 = vrot.lane.b32.xlu2 %v9599_v6, %s12654_s22  ;;  %v3880_v4 = vpop.permute.xlu1 %3879 }
 0x451   : > { %v3528_v28 = vpop.permute.xlu0 %3527  ;;  %v4550_v1 = vsel %vm12896_vm11, %v4518_v60, %v3880_v4  ;;  %vm12907_vm11 = vcmask 130048  }
 0x452   : > { %v9679_v63 = vpop.permute.xlu2 %4235  ;;  %v4582_v47 = vsel %vm12897_vm13, %v4550_v1, %v9591_v44  ;;  %vm12909_vm13 = vcmask 195584  }
 0x453   : > { %v4614_v8 = vsel %vm12898_vm7, %v4582_v47, %v4136_v48  ;;  %v2600_v48 = vsel %vm12903_vm10, %v7180_v49, %v12902_v43  ;;  %v12908_v47 = vld [vmem:[#allocation194_spill] sm:$0xff]  ;;  %vm12911_vm7 = vcmask 261120   ;;  %v3394_v43 = vsel %vm12905_vm9, %v9662_v51, 0.0 }
 0x454   : > { %v2633_v27 = vsel %vm12907_vm11, %v2600_v48, %v12906_v5  ;;  %v7181_v48 = vld [vmem:[#allocation2 + $0xf7] sm:$0xff] }
 0x455   : > { %v1369_v35 = vsel %vm8322_vm6, %v7181_v48, 0.0  ;;  %v12929_v48 = vld [vmem:[#allocation207_spill] sm:$0xff] }
 0x456   : > { %4371 = vrot.lane.b32.xlu0 %v9684_v41, %s12401_s16  ;;  %3791 = vrot.lane.b32.xlu1 %v3357_v12, %s12658_s23  ;;  %v2666_v12 = vsel %vm12909_vm13, %v2633_v27, %v12908_v47  ;;  %vm12919_vm13 = vcmask 523264  }
 0x458   : > { %4243 = vrot.lane.b32.xlu2 %v9692_v21, %s12800_s0  ;;  %v4234_v40 = vpop.permute.xlu1 %4233 }
 0x459   : > { %v3784_v44 = vpop.permute.xlu0 %3783  ;;  %v4646_v53 = vsel %vm12899_vm5, %v4614_v8, %v4234_v40  ;;  %v12910_v8 = vld [vmem:[#allocation192_spill] sm:$0xff]  ;;  %vm12913_vm5 = vcmask 326656  }
 0x45a   : > { %v9698_v29 = vpop.permute.xlu2 %3657  ;;  %v4678_v18 = vsel %vm12900_vm14, %v4646_v53, %v9611_v37  ;;  %v3324_v37 = vsel %vm12905_vm9, %v9541_v16, 0.0  ;;  %v2698_v40 = vsel %vm12911_vm7, %v2666_v12, %v12910_v8  ;;  %v3223_v53 = vsel %vm7535_vm4, %v9133_v2, 0.0  ;;  %v12912_v16 = vld [vmem:[#allocation214_spill] sm:$0xff]  ;;  %vm12914_vm14 = vmmov %vm12903_vm10 }
 0x45b   : > { %6726 = vmatmul.msk.f32.gmra.mxu2 %vm12901_vm0, %v4678_v18  ;;  %v9726_v18 = vld [vmem:[#allocation2 + $0x6f] sm:$0xff]  ;;  %v4455_v49 = vsel %vm12914_vm14, %v3223_v53, %v3528_v28  ;;  %vm12915_vm4 = vcmask 392192   ;;  %vm12916_vm0 = vmmov %vm12907_vm11  ;;  %vm12918_vm11 = vcmask 457728   ;;  %vm12920_vm7 = vcmask 195584  }
 0x45c   : > { %v12917_v28 = vld [vmem:[#allocation191_spill] sm:$0xff]  ;;  %vm12923_vm14 = vmmov %vm12916_vm0  ;;  %v9753_v53 = vld [vmem:[#allocation2 + $0x71] sm:$0xff] }
 0x45d   : > { %v2601_v5 = vsel %vm12903_vm10, %v1369_v35, %v12917_v28 }
 0x45e   : > { %3793 = vrot.lane.b32.xlu0 %v9627_v19, %s12658_s23  ;;  %4145 = vrot.lane.b32.xlu1 %v3427_v55, %s12400_s30  ;;  %v2731_v55 = vsel %vm12913_vm5, %v2698_v40, %v12912_v16  ;;  %vm12921_vm5 = vcmask 588800   ;;  %v12924_v16 = vld [vmem:[#allocation205_spill] sm:$0xff] }
 0x45f   : > { %v2764_v2 = vsel %vm12915_vm4, %v2731_v55, %v9021_v20  ;;  %v12922_v20 = vld [vmem:[#allocation189_spill] sm:$0xff]  ;;  %vm12925_vm4 = vmmov %vm12920_vm7 }
 0x460   : > { %3665 = vrot.lane.b32.xlu2 %v3324_v37, %s12588_s20  ;;  %v3656_v4 = vpop.permute.xlu1 %3655 }
 0x461   : > { %v4010_v60 = vpop.permute.xlu0 %4009  ;;  %v4487_v37 = vsel %vm12916_vm0, %v4455_v49, %v3656_v4  ;;  %v2634_v4 = vsel %vm12923_vm14, %v2601_v5, %v12922_v20  ;;  %vm12926_vm0 = vcmask 261120   ;;  %v12927_v49 = vld [vmem:[#allocation197_spill] sm:$0xff] }
 0x462   : > { %v2536_v1 = vpop.permute.xlu2 %2535  ;;  %v4519_v40 = vsel %vm12920_vm7, %v4487_v37, %v3784_v44  ;;  %v2667_v55 = vsel %vm12925_vm4, %v2634_v4, %v12924_v16  ;;  %v3464_v44 = vsel %vm12905_vm9, %v9753_v53, 0.0  ;;  %vm12928_vm10 = vmmov %vm12926_vm0  ;;  %vm12932_vm7 = vcmask 392192  }
 0x463   : > { %vm12934_vm9 = vcmask 457728   ;;  %vm12936_vm4 = vcmask 523264  }
 0x464   : > { %vm12935_vm14 = vmmov %vm12934_vm9 }
 0x466   : > { %4147 = vrot.lane.b32.xlu0 %v9726_v18, %s12400_s30  ;;  %3537 = vrot.lane.b32.xlu1 %v9494_v54, %s12529_s24  ;;  %v2797_v54 = vsel %vm12918_vm11, %v2764_v2, %v9635_v15  ;;  %v4551_v15 = vsel %vm12926_vm0, %v4519_v40, %v9659_v13  ;;  %vm12930_vm11 = vcmask 326656   ;;  %vm12937_vm0 = vmmov %vm12936_vm4  ;;  %v9797_v40 = vld [vmem:[%s11907_s4] ss:$0 sm:$0xff] }
 0x468   : > { %4019 = vrot.lane.b32.xlu2 %v3394_v43, %s12673_s15  ;;  %v2534_v27 = vpop.permute.xlu1 %2533  ;;  %v2699_v43 = vsel %vm12928_vm10, %v2667_v55, %v12927_v49  ;;  %vm12938_vm10 = vcmask 588800   ;;  %v9802_v55 = vld [vmem:[#allocation2 + $0x77] sm:$0xff] }
 0x469   : > { %v4364_v47 = vpop.permute.xlu0 %4363  ;;  %v2830_v12 = vsel %vm12919_vm13, %v2797_v54, %v2534_v27  ;;  %v2732_v35 = vsel %vm12930_vm11, %v2699_v43, %v12929_v48  ;;  %vm12931_vm13 = vmmov %vm12930_vm11  ;;  %v3429_v49 = vsel %vm12543_vm8, %v9802_v55, 0.0 }
 0x46a   : > { %v4140_v8 = vpop.permute.xlu2 %4139  ;;  %6720 = vmatmul.msk.f32.gmra.mxu1 %vm12921_vm5, %v2830_v12  ;;  %v4583_v13 = vsel %vm12931_vm13, %v4551_v15, %v4010_v60  ;;  %vm12933_vm5 = vmmov %vm12932_vm7  ;;  %v9784_v60 = vld [vmem:[#allocation2 + $0x70] sm:$0xff] }
 0x46b   : > { %vm12939_vm11 = vmmov %vm12938_vm10 }
 0x46e   : > { %3539 = vrot.lane.b32.xlu0 %v9599_v6, %s12529_s24  ;;  %3891 = vrot.lane.b32.xlu1 %v9616_v25, %s12654_s22  ;;  %v2765_v6 = vsel %vm12932_vm7, %v2732_v35, %v9047_v59  ;;  %v3359_v59 = vsel %vm12543_vm8, %v9702_v9, 0.0  ;;  %vm12940_vm7 = vcmask 64512  }
 0x470   : > { %4373 = vrot.lane.b32.xlu2 %v3464_v44, %s12401_s16  ;;  %v4138_v2 = vpop.permute.xlu1 %4137  ;;  %v9804_v44 = vld [vmem:[#allocation2 + $0x78] sm:$0xff] }
 0x471   : > { %v2408_v37 = vpop.permute.xlu0 %2407  ;;  %v4615_v28 = vsel %vm12933_vm5, %v4583_v13, %v4138_v2  ;;  %vm12941_vm5 = vmmov %vm12940_vm7 }
 0x472   : > { %v9775_v5 = vpop.permute.xlu2 %3531  ;;  %v2798_v45 = vsel %vm12934_vm9, %v2765_v6, %v2408_v37  ;;  %v4647_v54 = vsel %vm12935_vm14, %v4615_v28, %v9679_v63  ;;  %vm12942_vm9 = vcmask 130048   ;;  %v12943_v6 = vld [vmem:[#allocation39_spill] sm:$0xff] }
 0x473   : > { %v2831_v27 = vsel %vm12936_vm4, %v2798_v45, %v2536_v1  ;;  %v4679_v12 = vsel %vm12937_vm0, %v4647_v54, %v4364_v47  ;;  %vm12944_vm14 = vnez %v12943_v6  ;;  %vm12945_vm4 = vcmask 195584  }
 0x474   : > { %6721 = vmatmul.msk.f32.gmra.mxu1 %vm12938_vm10, %v2831_v27  ;;  %6727 = vmatmul.msk.f32.gmra.mxu2 %vm12939_vm11, %v4679_v12  ;;  %vm12946_vm0 = vcmask 261120   ;;  %vm12947_vm10 = vcmask 326656   ;;  %vm12948_vm11 = vcmask 392192   ;;  %v3396_v27 = vsel %vm12944_vm14, %v9753_v53, 0.0  ;;  %v9838_v12 = vld [vmem:[#allocation2 + $0x79] sm:$0xff] }
 0x476   : > { %3893 = vrot.lane.b32.xlu0 %v9692_v21, %s12654_s22  ;;  %4245 = vrot.lane.b32.xlu1 %v9784_v60, %s12800_s0 }
 0x478   : > { %3795 = vrot.lane.b32.xlu2 %v3359_v59, %s12658_s23  ;;  %v3530_v1 = vpop.permute.xlu1 %3529 }
 0x479   : > { %v3038_v63 = vpop.f32.mrf.mxu1  ;;  %v3884_v47 = vpop.permute.xlu0 %3883  ;;  %v4456_v2 = vsel %vm12941_vm5, %v9217_v39, %v3530_v1  ;;  %vm12951_vm5 = vcmask 588800  }
 0x47a   : > { %v3039_v20 = vadd.f32 %v9797_v40, %v3038_v63  ;;  %v9800_v4 = vpop.permute.xlu2 %2409  ;;  %v4488_v13 = vsel %vm12942_vm9, %v4456_v2, %v9698_v29 }
 0x47c   : > { %vm3082_vm13 = vcmp.ge.f32.partialorder %v3039_v20, 0.0  ;;  %v3114_v16 = vmul.f32 0.01, %v3039_v20 }
 0x47e   : > { %v3146_v15 = vsel %vm3082_vm13, %v3039_v20, %v3114_v16  ;;  %4247 = vrot.lane.b32.xlu0 %v9804_v44, %s12800_s0  ;;  %3667 = vrot.lane.b32.xlu1 %v9586_v52, %s12588_s20  ;;  %v3326_v52 = vsel %vm12944_vm14, %v9662_v51, 0.0  ;;  %vm12949_vm13 = vcmask 457728   ;;  %v9854_v16 = vld [vmem:[%s11909_s6] ss:$0 sm:$0xff] }
 0x47f   : > { %3181 = vst.msk [vmem:[#allocation2 + $0xe8] sm:$0xff] %vm12940_vm7, %v3146_v15  ;;  %vm12950_vm7 = vcmask 523264   ;;  %v9856_v15 = vld [vmem:[#allocation2 + $0x81] sm:$0xff] }
 0x480   : > { %4149 = vrot.lane.b32.xlu2 %v3429_v49, %s12400_s30  ;;  %v3786_v43 = vpop.permute.xlu1 %3785  ;;  %v3466_v2 = vsel %vm12944_vm14, %v9856_v15, 0.0  ;;  %vm12956_vm14 = vcmask 130048  }
 0x481   : > { %v4238_v48 = vpop.permute.xlu0 %4237  ;;  %v4520_v37 = vsel %vm12945_vm4, %v4488_v13, %v3786_v43  ;;  %v7183_v13 = vld [vmem:[#allocation2 + $0xff] sm:$0xff]  ;;  %vm12953_vm4 = vcmask 64512  }
 0x482   : > { %v9815_v35 = vpop.permute.xlu2 %4013  ;;  %v4552_v39 = vsel %vm12946_vm0, %v4520_v37, %v3884_v47  ;;  %vm12954_vm0 = vmmov %vm12953_vm4 }
 0x486   : > { %3669 = vrot.lane.b32.xlu0 %v3326_v52, %s12588_s20  ;;  %4021 = vrot.lane.b32.xlu1 %v9684_v41, %s12673_s15  ;;  %v12952_v52 = vld [vmem:[#allocation199_spill] sm:$0xff] }
 0x487   : > { %v2602_v37 = vsel %vm12953_vm4, %v7183_v13, %v12952_v52  ;;  %v3361_v13 = vsel %vm12564_vm2, %v9802_v55, 0.0  ;;  %v9887_v52 = vld [vmem:[#allocation2 + $0x7f] sm:$0xff] }
 0x488   : > { %3541 = vrot.lane.b32.xlu2 %v9616_v25, %s12529_s24  ;;  %v4012_v28 = vpop.permute.xlu1 %4011 }
 0x489   : > { %v3660_v45 = vpop.permute.xlu0 %3659  ;;  %v4584_v29 = vsel %vm12947_vm10, %v4552_v39, %v4012_v28  ;;  %v9868_v39 = vld [vmem:[#allocation2 + $0x80] sm:$0xff] }
 0x48a   : > { %v9831_v54 = vpop.permute.xlu2 %4367  ;;  %v4616_v51 = vsel %vm12948_vm11, %v4584_v29, %v4140_v8  ;;  %vm12957_vm11 = vmmov %vm12956_vm14 }
 0x48b   : > { %v4648_v63 = vsel %vm12949_vm13, %v4616_v51, %v4238_v48  ;;  %v12955_v51 = vld [vmem:[#allocation200_spill] sm:$0xff]  ;;  %vm12959_vm13 = vcmask 195584   ;;  %vm12965_vm4 = vmmov %vm12957_vm11 }
 0x48e   : > { %4023 = vrot.lane.b32.xlu0 %v3396_v27, %s12673_s15  ;;  %4375 = vrot.lane.b32.xlu1 %v9838_v12, %s12401_s16  ;;  %v2635_v27 = vsel %vm12956_vm14, %v2602_v37, %v12955_v51  ;;  %v12963_v37 = vld [vmem:[#allocation213_spill] sm:$0xff]  ;;  %vm12969_vm14 = vcmask 523264  }
 0x490   : > { %3895 = vrot.lane.b32.xlu2 %v9784_v60, %s12654_s22  ;;  %v4366_v59 = vpop.permute.xlu1 %4365 }
 0x491   : > { %v3041_v25 = vpop.f32.mrf.mxu1  ;;  %v3886_v1 = vpop.permute.xlu0 %3885  ;;  %v4680_v20 = vsel %vm12950_vm7, %v4648_v63, %v4366_v59  ;;  %vm12961_vm7 = vcmask 261120  }
 0x492   : > { %v3042_v8 = vadd.f32 %v9797_v40, %v3041_v25  ;;  %v9847_v47 = vpop.permute.xlu2 %3789  ;;  %6728 = vmatmul.msk.f32.gmra.mxu2 %vm12951_vm5, %v4680_v20  ;;  %vm12962_vm5 = vmmov %vm12954_vm0 }
 0x494   : > { %vm3083_vm9 = vcmp.ge.f32.partialorder %v3042_v8, 0.0  ;;  %v3115_v49 = vmul.f32 0.01, %v3042_v8 }
 0x495   : > { %v4833_v48 = vpop.f32.mrf.mxu2 }
 0x496   : > { %v3147_v43 = vsel %vm3083_vm9, %v3042_v8, %v3115_v49  ;;  %v4834_v28 = vadd.f32 %v9854_v16, %v4833_v48  ;;  %4377 = vrot.lane.b32.xlu0 %v3466_v2, %s12401_s16  ;;  %3797 = vrot.lane.b32.xlu1 %v9726_v18, %s12658_s23  ;;  %v12958_v8 = vld [vmem:[#allocation198_spill] sm:$0xff]  ;;  %v3225_v49 = vsel %vm7578_vm12, %v9295_v46, 0.0  ;;  %vm12964_vm9 = vcmask 326656  }
 0x497   : > { %3182 = vst.msk [vmem:[#allocation2 + $0xf0] sm:$0xff] %vm12954_vm0, %v3147_v43  ;;  %v2668_v20 = vsel %vm12959_vm13, %v2635_v27, %v12958_v8  ;;  %v12960_v43 = vld [vmem:[#allocation208_spill] sm:$0xff]  ;;  %v4457_v2 = vsel %vm12962_vm5, %v3225_v49, %v9775_v5  ;;  %vm12966_vm12 = vcmask 392192   ;;  %vm12967_vm0 = vmmov %vm12959_vm13  ;;  %vm12971_vm13 = vcmask 588800  }
 0x498   : > { %4249 = vrot.lane.b32.xlu2 %v9868_v39, %s12800_s0  ;;  %vm4929_vm10 = vcmp.ge.f32.partialorder %v4834_v28, 0.0  ;;  %v4961_v6 = vmul.f32 0.01, %v4834_v28  ;;  %v3788_v29 = vpop.permute.xlu1 %3787  ;;  %v2700_v48 = vsel %vm12961_vm7, %v2668_v20, %v12960_v43  ;;  %v9905_v20 = vld [vmem:[#allocation2 + $0x87] sm:$0xff]  ;;  %vm12973_vm5 = vmmov %vm12966_vm12 }
 0x499   : > { %v4142_v25 = vpop.permute.xlu0 %4141 }
 0x49a   : > { %v4144_v59 = vpop.permute.xlu2 %4143  ;;  %v4993_v63 = vsel %vm4929_vm10, %v4834_v28, %v4961_v6  ;;  %v2733_v28 = vsel %vm12964_vm9, %v2700_v48, %v12963_v37  ;;  %v4489_v6 = vsel %vm12965_vm4, %v4457_v2, %v3660_v45  ;;  %vm12968_vm10 = vcmask 457728   ;;  %vm12975_vm4 = vmmov %vm12969_vm14 }
 0x49b   : > { %5025 = vst.msk [vmem:[#allocation2 + $0x18] sm:$0xff] %vm12957_vm11, %v4993_v63  ;;  %v2766_v3 = vsel %vm12966_vm12, %v2733_v28, %v9107_v42  ;;  %v4521_v46 = vsel %vm12967_vm0, %v4489_v6, %v3788_v29  ;;  %vm12970_vm11 = vmmov %vm12961_vm7  ;;  %v3431_v42 = vsel %vm12564_vm2, %v9905_v20, 0.0 }
 0x49c   : > { %v2799_v5 = vsel %vm12968_vm10, %v2766_v3, %v9800_v4  ;;  %v4553_v8 = vsel %vm12970_vm11, %v4521_v46, %v3886_v1  ;;  %vm12972_vm7 = vmmov %vm12964_vm9  ;;  %v9939_v3 = vld [vmem:[#allocation2 + $0x88] sm:$0xff] }
 0x49d   : > { %vm12974_vm9 = vmmov %vm12968_vm10  ;;  %vm12977_vm10 = vcmask 64512  }
 0x49e   : > { %3799 = vrot.lane.b32.xlu0 %v3361_v13, %s12658_s23  ;;  %4151 = vrot.lane.b32.xlu1 %v9887_v52, %s12400_s30  ;;  %vm12976_vm12 = vmmov %vm12971_vm13 }
 0x4a0   : > { %3671 = vrot.lane.b32.xlu2 %v9684_v41, %s12588_s20  ;;  %v2538_v51 = vpop.permute.xlu1 %2537  ;;  %v4585_v41 = vsel %vm12972_vm7, %v4553_v8, %v9815_v35  ;;  %vm12981_vm7 = vcmask 261120  }
 0x4a1   : > { %v3534_v27 = vpop.permute.xlu0 %3533  ;;  %v2832_v45 = vsel %vm12969_vm14, %v2799_v5, %v2538_v51  ;;  %v4617_v4 = vsel %vm12973_vm5, %v4585_v41, %v4142_v25  ;;  %vm12978_vm14 = vcmask 130048   ;;  %vm12982_vm5 = vcmask 326656  }
 0x4a2   : > { %v3536_v63 = vpop.permute.xlu2 %3535  ;;  %6722 = vmatmul.msk.f32.gmra.mxu1 %vm12971_vm13, %v2832_v45  ;;  %v4458_v28 = vsel %vm12977_vm10, %v9341_v32, %v3534_v27  ;;  %vm12979_vm11 = vmmov %vm12978_vm14  ;;  %vm12980_vm13 = vcmask 195584   ;;  %vm12988_vm10 = vcmask 588800  }
 0x4a6   : > { %4153 = vrot.lane.b32.xlu0 %v3431_v42, %s12400_s30  ;;  %3543 = vrot.lane.b32.xlu1 %v9692_v21, %s12529_s24  ;;  %v9929_v21 = vld [vmem:[#allocation2 + $0x89] sm:$0xff]  ;;  %v12984_v42 = vld [vmem:[#allocation46_spill] sm:$0xff] }
 0x4a8   : > { %4025 = vrot.lane.b32.xlu2 %v9838_v12, %s12673_s15  ;;  %v4240_v1 = vpop.permute.xlu1 %4239 }
 0x4a9   : > { %v3888_v29 = vpop.permute.xlu0 %3887  ;;  %v4649_v49 = vsel %vm12974_vm9, %v4617_v4, %v4240_v1  ;;  %vm12983_vm9 = vcmask 392192   ;;  %v9962_v4 = vld [vmem:[#allocation2 + $0x8f] sm:$0xff] }
 0x4aa   : > { %v9919_v43 = vpop.permute.xlu2 %3889  ;;  %v4681_v48 = vsel %vm12975_vm4, %v4649_v49, %v9831_v54  ;;  %vm12985_vm4 = vnez %v12984_v42 }
 0x4ab   : > { %6729 = vmatmul.msk.f32.gmra.mxu2 %vm12976_vm12, %v4681_v48  ;;  %v3328_v41 = vsel %vm12985_vm4, %v9753_v53, 0.0  ;;  %vm12986_vm12 = vcmask 457728  }
 0x4ad   : > { %v4836_v35 = vpop.f32.mrf.mxu2 }
 0x4ae   : > { %v4837_v2 = vadd.f32 %v9854_v16, %v4836_v35  ;;  %3545 = vrot.lane.b32.xlu0 %v9784_v60, %s12529_s24  ;;  %3897 = vrot.lane.b32.xlu1 %v9804_v44, %s12654_s22  ;;  %v3398_v35 = vsel %vm12985_vm4, %v9856_v15, 0.0 }
 0x4b0   : > { %4379 = vrot.lane.b32.xlu2 %v9929_v21, %s12401_s16  ;;  %vm4930_vm0 = vcmp.ge.f32.partialorder %v4837_v2, 0.0  ;;  %v4962_v25 = vmul.f32 0.01, %v4837_v2  ;;  %v3662_v13 = vpop.permute.xlu1 %3661 }
 0x4b1   : > { %v4242_v54 = vpop.permute.xlu0 %4241  ;;  %v4490_v60 = vsel %vm12979_vm11, %v4458_v28, %v3662_v13 }
 0x4b2   : > { %v9933_v37 = vpop.permute.xlu2 %4243  ;;  %v4994_v6 = vsel %vm4930_vm0, %v4837_v2, %v4962_v25  ;;  %v4522_v46 = vsel %vm12980_vm13, %v4490_v60, %v9847_v47  ;;  %v9954_v47 = vld [vmem:[#allocation2 + $0x90] sm:$0xff]  ;;  %vm12987_vm0 = vcmask 523264   ;;  %v3227_v25 = vsel %vm7605_vm15, %v9453_v0, 0.0 }
 0x4b3   : > { %5026 = vst.msk [vmem:[#allocation2 + $0x20] sm:$0xff] %vm12978_vm14, %v4994_v6  ;;  %v4554_v51 = vsel %vm12981_vm7, %v4522_v46, %v3888_v29  ;;  %vm12989_vm14 = vcmask 64512   ;;  %vm12990_vm13 = vcmask 130048   ;;  %vm12991_vm7 = vcmask 195584   ;;  %v9989_v0 = vld [vmem:[#allocation2 + $0x91] sm:$0xff] }
 0x4b4   : > { %v4459_v13 = vsel %vm12989_vm14, %v3227_v25, %v3536_v63  ;;  %vm12992_vm15 = vmmov %vm12990_vm13 }
 0x4b6   : > { %3899 = vrot.lane.b32.xlu0 %v9868_v39, %s12654_s22  ;;  %4251 = vrot.lane.b32.xlu1 %v9939_v3, %s12800_s0 }
 0x4b8   : > { %3801 = vrot.lane.b32.xlu2 %v9887_v52, %s12658_s23  ;;  %v4016_v32 = vpop.permute.xlu1 %4015 }
 0x4b9   : > { %v3664_v5 = vpop.permute.xlu0 %3663  ;;  %v4586_v45 = vsel %vm12982_vm5, %v4554_v51, %v4016_v32 }
 0x4ba   : > { %v9950_v27 = vpop.permute.xlu2 %3665  ;;  %v4618_v8 = vsel %vm12983_vm9, %v4586_v45, %v4144_v59  ;;  %v4491_v60 = vsel %vm12990_vm13, %v4459_v13, %v3664_v5  ;;  %vm12993_vm9 = vcmask 261120   ;;  %v3468_v5 = vsel %vm12985_vm4, %v9989_v0, 0.0  ;;  %v10025_v13 = vld [vmem:[#allocation2 + $0x97] sm:$0xff] }
 0x4bb   : > { %v4650_v29 = vsel %vm12986_vm12, %v4618_v8, %v4242_v54  ;;  %vm12994_vm12 = vmmov %vm12989_vm14  ;;  %vm12997_vm4 = vcmask 457728   ;;  %vm12998_vm14 = vcmask 523264   ;;  %vm13000_vm13 = vnez %v12178_v23 }
 0x4be   : > { %4253 = vrot.lane.b32.xlu0 %v9954_v47, %s12800_s0  ;;  %3673 = vrot.lane.b32.xlu1 %v3328_v41, %s12588_s20 }
 0x4c0   : > { %4155 = vrot.lane.b32.xlu2 %v9962_v4, %s12400_s30  ;;  %v4370_v1 = vpop.permute.xlu1 %4369 }
 0x4c1   : > { %v4018_v59 = vpop.permute.xlu0 %4017  ;;  %v4682_v48 = vsel %vm12987_vm0, %v4650_v29, %v4370_v1  ;;  %vm12995_vm0 = vcmask 326656  }
 0x4c2   : > { %v9967_v49 = vpop.permute.xlu2 %4019  ;;  %6730 = vmatmul.msk.f32.gmra.mxu2 %vm12988_vm10, %v4682_v48  ;;  %vm12996_vm10 = vcmask 392192  }
 0x4c5   : > { %v4839_v53 = vpop.f32.mrf.mxu2 }
 0x4c6   : > { %v4840_v2 = vadd.f32 %v9854_v16, %v4839_v53  ;;  %3675 = vrot.lane.b32.xlu0 %v9838_v12, %s12588_s20  ;;  %4027 = vrot.lane.b32.xlu1 %v3398_v35, %s12673_s15  ;;  %v10011_v53 = vld [vmem:[#allocation2 + $0x99] sm:$0xff]  ;;  %v3363_v35 = vsel %vm13000_vm13, %v9905_v20, 0.0 }
 0x4c8   : > { %3547 = vrot.lane.b32.xlu2 %v9804_v44, %s12529_s24  ;;  %vm4931_vm11 = vcmp.ge.f32.partialorder %v4840_v2, 0.0  ;;  %v4963_v54 = vmul.f32 0.01, %v4840_v2  ;;  %v3044_v28 = vpop.f32.mrf.mxu1  ;;  %v3792_v6 = vpop.permute.xlu1 %3791 }
 0x4c9   : > { %v4372_v46 = vpop.permute.xlu0 %4371  ;;  %v3045_v12 = vadd.f32 %v9797_v40, %v3044_v28  ;;  %v4523_v26 = vsel %vm12991_vm7, %v4491_v60, %v3792_v6  ;;  %vm13001_vm7 = vmmov %vm12994_vm12  ;;  %v3433_v28 = vsel %vm13000_vm13, %v10025_v13, 0.0 }
 0x4ca   : > { %v9986_v32 = vpop.permute.xlu2 %4373  ;;  %v4995_v51 = vsel %vm4931_vm11, %v4840_v2, %v4963_v54  ;;  %v4555_v45 = vsel %vm12993_vm9, %v4523_v26, %v9919_v43  ;;  %vm12999_vm11 = vcmask 588800  }
 0x4cb   : > { %5027 = vst.msk [vmem:[#allocation2 + $0x28] sm:$0xff] %vm12992_vm15, %v4995_v51  ;;  %vm3084_vm5 = vcmp.ge.f32.partialorder %v3045_v12, 0.0  ;;  %v3116_v44 = vmul.f32 0.01, %v3045_v12  ;;  %v4587_v8 = vsel %vm12995_vm0, %v4555_v45, %v4018_v59  ;;  %v10019_v59 = vld [vmem:[#allocation2 + $0x98] sm:$0xff]  ;;  %vm13005_vm0 = vcmask 261120  }
 0x4cd   : > { %v3148_v63 = vsel %vm3084_vm5, %v3045_v12, %v3116_v44 }
 0x4ce   : > { %3183 = vst.msk [vmem:[#allocation2 + $0xf8] sm:$0xff] %vm12994_vm12, %v3148_v63  ;;  %4029 = vrot.lane.b32.xlu0 %v9929_v21, %s12673_s15  ;;  %4381 = vrot.lane.b32.xlu1 %v3468_v5, %s12401_s16  ;;  %vm13004_vm12 = vcmask 195584  }
 0x4d0   : > { %3901 = vrot.lane.b32.xlu2 %v9939_v3, %s12654_s22  ;;  %v4146_v41 = vpop.permute.xlu1 %4145 }
 0x4d1   : > { %v3794_v1 = vpop.permute.xlu0 %3793  ;;  %v4619_v43 = vsel %vm12996_vm10, %v4587_v8, %v4146_v41  ;;  %vm13006_vm10 = vmmov %vm12992_vm15  ;;  %v10049_v8 = vld [vmem:[#allocation2 + $0x9f] sm:$0xff] }
 0x4d2   : > { %v10005_v29 = vpop.permute.xlu2 %3795  ;;  %v4651_v42 = vsel %vm12997_vm4, %v4619_v43, %v9933_v37  ;;  %vm13007_vm4 = vcmask 326656   ;;  %v5060_v43 = vld [vmem:[#allocation2 + $0x19] ss:$2 sm:$0xff] }
 0x4d3   : > { %v4683_v48 = vsel %vm12998_vm14, %v4651_v42, %v4372_v46  ;;  %v13002_v46 = vld [vmem:[#allocation62_spill] sm:$0xff]  ;;  %vm13008_vm14 = vcmask 392192  }
 0x4d4   : > { %6731 = vmatmul.msk.f32.gmra.mxu2 %vm12999_vm11, %v4683_v48  ;;  %vm13003_vm5 = vnez %v13002_v46  ;;  %vm13009_vm11 = vcmask 457728  }
 0x4d5   : > { %v3330_v12 = vsel %vm13003_vm5, %v9856_v15, 0.0  ;;  %v3400_v41 = vsel %vm13003_vm5, %v9989_v0, 0.0 }
 0x4d6   : > { %4383 = vrot.lane.b32.xlu0 %v10011_v53, %s12401_s16  ;;  %3803 = vrot.lane.b32.xlu1 %v3363_v35, %s12658_s23 }
 0x4d8   : > { %4255 = vrot.lane.b32.xlu2 %v10019_v59, %s12800_s0  ;;  %v3538_v37 = vpop.permute.xlu1 %3537 }
 0x4d9   : > { %v4148_v2 = vpop.permute.xlu0 %4147  ;;  %v4460_v54 = vsel %vm13001_vm7, %v9503_v22, %v3538_v37 }
 0x4da   : > { %v10023_v25 = vpop.permute.xlu2 %4149  ;;  %v4492_v6 = vsel %vm12992_vm15, %v4460_v54, %v9950_v27  ;;  %vm13010_vm15 = vcmask 523264  }
 0x4db   : > { %v4524_v27 = vsel %vm13004_vm12, %v4492_v6, %v3794_v1  ;;  %v5058_v1 = vld [vmem:[#allocation2 + $0x18] ss:$2 sm:$0xff]  ;;  %vm13012_vm12 = vcmask 64512  }
 0x4de   : > { %3805 = vrot.lane.b32.xlu0 %v9962_v4, %s12658_s23  ;;  %4157 = vrot.lane.b32.xlu1 %v3433_v28, %s12400_s30  ;;  %v4842_v60 = vpop.f32.mrf.mxu2 }
 0x4df   : > { %v4843_v51 = vadd.f32 %v9854_v16, %v4842_v60 }
 0x4e0   : > { %3677 = vrot.lane.b32.xlu2 %v3330_v12, %s12588_s20  ;;  %v3892_v22 = vpop.permute.xlu1 %3891 }
 0x4e1   : > { %vm4932_vm9 = vcmp.ge.f32.partialorder %v4843_v51, 0.0  ;;  %v4964_v26 = vmul.f32 0.01, %v4843_v51  ;;  %v3540_v44 = vpop.permute.xlu0 %3539  ;;  %v4556_v45 = vsel %vm13005_vm0, %v4524_v27, %v3892_v22  ;;  %vm13013_vm0 = vmmov %vm13006_vm10 }
 0x4e2   : > { %v10043_v63 = vpop.permute.xlu2 %3541  ;;  %v4588_v15 = vsel %vm13007_vm4, %v4556_v45, %v9967_v49  ;;  %vm13015_vm4 = vmmov %vm13013_vm0 }
 0x4e3   : > { %v4996_v5 = vsel %vm4932_vm9, %v4843_v51, %v4964_v26  ;;  %v4620_v49 = vsel %vm13008_vm14, %v4588_v15, %v4148_v2  ;;  %vm13011_vm9 = vcmask 588800   ;;  %v10067_v51 = vld [vmem:[#allocation2 + $0xa1] sm:$0xff]  ;;  %v3229_v15 = vsel %vm12543_vm8, %v9558_v10, 0.0 }
 0x4e4   : > { %5028 = vst.msk [vmem:[#allocation2 + $0x30] sm:$0xff] %vm13006_vm10, %v4996_v5  ;;  %vm13014_vm10 = vmmov %vm13012_vm12  ;;  %vm13016_vm14 = vcmask 195584   ;;  %vm13017_vm8 = vnez %v12202_v36 }
 0x4e5   : > { %v3365_v10 = vsel %vm13017_vm8, %v10025_v13, 0.0 }
 0x4e6   : > { %4159 = vrot.lane.b32.xlu0 %v10049_v8, %s12400_s30  ;;  %3549 = vrot.lane.b32.xlu1 %v9868_v39, %s12529_s24  ;;  %v5061_v39 = vadd.f32 %v5060_v43, %v5058_v1 }
 0x4e7   : > { %v3047_v42 = vpop.f32.mrf.mxu1 }
 0x4e8   : > { %4031 = vrot.lane.b32.xlu2 %v3400_v41, %s12673_s15  ;;  %v3048_v48 = vadd.f32 %v9797_v40, %v3047_v42  ;;  %v4246_v35 = vpop.permute.xlu1 %4245 }
 0x4e9   : > { %v3894_v37 = vpop.permute.xlu0 %3893  ;;  %v4652_v54 = vsel %vm13009_vm11, %v4620_v49, %v4246_v35  ;;  %v10085_v49 = vld [vmem:[#allocation2 + $0xa0] sm:$0xff]  ;;  %vm13018_vm11 = vmmov %vm13014_vm10 }
 0x4ea   : > { %v10062_v28 = vpop.permute.xlu2 %3895  ;;  %vm3085_vm7 = vcmp.ge.f32.partialorder %v3048_v48, 0.0  ;;  %v3117_v6 = vmul.f32 0.01, %v3048_v48  ;;  %v4684_v60 = vsel %vm13010_vm15, %v4652_v54, %v9986_v32  ;;  %v3470_v32 = vsel %vm13003_vm5, %v10067_v51, 0.0 }
 0x4eb   : > { %v5063_v12 = vld [vmem:[#allocation2 + $0x28] ss:$2 sm:$0xff]  ;;  %6732 = vmatmul.msk.f32.gmra.mxu2 %vm13011_vm9, %v4684_v60  ;;  %v5066_v2 = vld [vmem:[#allocation2 + $0x29] ss:$2 sm:$0xff]  ;;  %vm13020_vm9 = vcmask 326656  }
 0x4ec   : > { %v5064_v22 = vadd.f32 %v5063_v12, %v5061_v39  ;;  %v3149_v26 = vsel %vm3085_vm7, %v3048_v48, %v3117_v6  ;;  %vm13019_vm7 = vcmask 261120  }
 0x4ed   : > { %3184 = vst.msk [vmem:[#allocation2 + $0x100] sm:$0xff] %vm13012_vm12, %v3149_v26  ;;  %v10101_v26 = vld [vmem:[#allocation2 + $0xa7] sm:$0xff]  ;;  %vm13021_vm12 = vmmov %vm13013_vm0 }
 0x4ee   : > { %v5067_v27 = vadd.f32 %v5066_v2, %v5064_v22  ;;  %3551 = vrot.lane.b32.xlu0 %v9939_v3, %s12529_s24  ;;  %3903 = vrot.lane.b32.xlu1 %v9954_v47, %s12654_s22  ;;  %v4461_v3 = vsel %vm13014_vm10, %v3229_v15, %v3540_v44  ;;  %vm13023_vm10 = vcmask 457728  }
 0x4f0   : > { %4385 = vrot.lane.b32.xlu2 %v3470_v32, %s12401_s16  ;;  %v5145_v45 = vmul.f32 0.25, %v5067_v27  ;;  %v3668_v5 = vpop.permute.xlu1 %3667  ;;  %v10106_v32 = vld [vmem:[#allocation2 + $0xa8] sm:$0xff] }
 0x4f1   : > { %v4248_v41 = vpop.permute.xlu0 %4247  ;;  %v3050_v1 = vpop.f32.mrf.mxu1  ;;  %v4493_v46 = vsel %vm13015_vm4, %v4461_v3, %v3668_v5  ;;  %vm13024_vm4 = vcmask 523264  }
 0x4f2   : > { %5156 = vst.msk [vmem:[#allocation2 + $0x18] sm:$0xff] %vm13013_vm0, %v5145_v45  ;;  %v3051_v43 = vadd.f32 %v9797_v40, %v3050_v1  ;;  %v4250_v42 = vpop.permute.xlu2 %4249  ;;  %v4525_v30 = vsel %vm13016_vm14, %v4493_v46, %v10005_v29  ;;  %vm13022_vm0 = vcmask 392192   ;;  %vm13026_vm14 = vnez %v12454_v31 }
 0x4f3   : > { %v4557_v29 = vsel %vm13019_vm7, %v4525_v30, %v3894_v37  ;;  %v3435_v37 = vsel %vm13017_vm8, %v10101_v26, 0.0  ;;  %v3332_v3 = vsel %vm13026_vm14, %v9989_v0, 0.0  ;;  %vm13027_vm7 = vmmov %vm13021_vm12  ;;  %v3402_v30 = vsel %vm13026_vm14, %v10067_v51, 0.0 }
 0x4f4   : > { %vm3086_vm5 = vcmp.ge.f32.partialorder %v3051_v43, 0.0  ;;  %v3118_v48 = vmul.f32 0.01, %v3051_v43  ;;  %v3231_v31 = vsel %vm12564_vm2, %v9702_v9, 0.0  ;;  %vm13035_vm2 = vcmask 195584  }
 0x4f6   : > { %v3150_v35 = vsel %vm3086_vm5, %v3051_v43, %v3118_v48  ;;  %3905 = vrot.lane.b32.xlu0 %v10019_v59, %s12654_s22  ;;  %4257 = vrot.lane.b32.xlu1 %v10085_v49, %s12800_s0  ;;  %vm13025_vm5 = vcmask 588800  }
 0x4f7   : > { %3185 = vst.msk [vmem:[#allocation2 + $0x108] sm:$0xff] %vm13018_vm11, %v3150_v35  ;;  %v4845_v44 = vpop.f32.mrf.mxu2 }
 0x4f8   : > { %3807 = vrot.lane.b32.xlu2 %v3365_v10, %s12658_s23  ;;  %v4846_v54 = vadd.f32 %v9854_v16, %v4845_v44  ;;  %v4022_v39 = vpop.permute.xlu1 %4021  ;;  %v10137_v10 = vld [vmem:[#allocation2 + $0xa9] sm:$0xff] }
 0x4f9   : > { %v3670_v6 = vpop.permute.xlu0 %3669  ;;  %v4589_v12 = vsel %vm13020_vm9, %v4557_v29, %v4022_v39  ;;  %vm13029_vm9 = vcmask 261120   ;;  %v10149_v39 = vld [vmem:[#allocation2 + $0xb1] sm:$0xff] }
 0x4fa   : > { %vm4933_vm15 = vcmp.ge.f32.partialorder %v4846_v54, 0.0  ;;  %v4965_v60 = vmul.f32 0.01, %v4846_v54  ;;  %v3672_v22 = vpop.permute.xlu2 %3671  ;;  %v4621_v27 = vsel %vm13022_vm0, %v4589_v12, %v10023_v25 }
 0x4fb   : > { %v4653_v5 = vsel %vm13023_vm10, %v4621_v27, %v4248_v41 }
 0x4fc   : > { %v4997_v2 = vsel %vm4933_vm15, %v4846_v54, %v4965_v60  ;;  %vm13028_vm15 = vcmask 195584   ;;  %v3472_v60 = vsel %vm13026_vm14, %v10149_v39, 0.0  ;;  %vm13031_vm14 = vmmov %vm13027_vm7 }
 0x4fd   : > { %5029 = vst.msk [vmem:[#allocation2 + $0x38] sm:$0xff] %vm13021_vm12, %v4997_v2  ;;  %vm13030_vm12 = vcmask 326656   ;;  %v10160_v2 = vld [vmem:[#allocation2 + $0xb0] sm:$0xff] }
 0x4fe   : > { %4259 = vrot.lane.b32.xlu0 %v10106_v32, %s12800_s0  ;;  %3679 = vrot.lane.b32.xlu1 %v9929_v21, %s12588_s20  ;;  %v4462_v21 = vsel %vm13018_vm11, %v9627_v19, %v10043_v63 }
 0x4ff   : > { %v4494_v43 = vsel %vm13027_vm7, %v4462_v21, %v3670_v6  ;;  %vm13032_vm7 = vcmask 64512  }
 0x500   : > { %4161 = vrot.lane.b32.xlu2 %v3435_v37, %s12400_s30  ;;  %v4376_v45 = vpop.permute.xlu1 %4375 }
 0x501   : > { %v4024_v15 = vpop.permute.xlu0 %4023  ;;  %v4685_v25 = vsel %vm13024_vm4, %v4653_v5, %v4376_v45 }
 0x502   : > { %v4026_v1 = vpop.permute.xlu2 %4025  ;;  %6733 = vmatmul.msk.f32.gmra.mxu2 %vm13025_vm5, %v4685_v25 }
 0x506   : > { %3681 = vrot.lane.b32.xlu0 %v3332_v3, %s12588_s20  ;;  %4033 = vrot.lane.b32.xlu1 %v10011_v53, %s12673_s15  ;;  %v10172_v3 = vld [vmem:[#allocation2 + $0xaf] sm:$0xff] }
 0x508   : > { %3553 = vrot.lane.b32.xlu2 %v9954_v47, %s12529_s24  ;;  %v3798_v41 = vpop.permute.xlu1 %3797 }
 0x509   : > { %v4378_v46 = vpop.permute.xlu0 %4377  ;;  %v4526_v48 = vsel %vm13028_vm15, %v4494_v43, %v3798_v41  ;;  %vm13033_vm15 = vnez %v12225_v62 }
 0x50a   : > { %v4380_v35 = vpop.permute.xlu2 %4379  ;;  %v4558_v0 = vsel %vm13029_vm9, %v4526_v48, %v10062_v28  ;;  %v3367_v25 = vsel %vm13033_vm15, %v10101_v26, 0.0  ;;  %vm13034_vm9 = vmmov %vm13031_vm14 }
 0x50b   : > { %v4590_v19 = vsel %vm13030_vm12, %v4558_v0, %v4024_v15 }
 0x50e   : > { %4035 = vrot.lane.b32.xlu0 %v3402_v30, %s12673_s15  ;;  %4387 = vrot.lane.b32.xlu1 %v10137_v10, %s12401_s16 }
 0x510   : > { %3907 = vrot.lane.b32.xlu2 %v10085_v49, %s12654_s22  ;;  %v4152_v47 = vpop.permute.xlu1 %4151 }
 0x511   : > { %v3800_v63 = vpop.permute.xlu0 %3799  ;;  %v4622_v28 = vsel %vm13022_vm0, %v4590_v19, %v4152_v47  ;;  %vm13036_vm0 = vcmask 261120  }
 0x512   : > { %v10146_v44 = vpop.permute.xlu2 %3801  ;;  %v4654_v54 = vsel %vm13023_vm10, %v4622_v28, %v4250_v42  ;;  %vm13037_vm10 = vcmask 326656  }
 0x513   : > { %v4686_v6 = vsel %vm13024_vm4, %v4654_v54, %v4378_v46  ;;  %vm13038_vm4 = vmmov %vm13032_vm7 }
 0x514   : > { %6734 = vmatmul.msk.f32.gmra.mxu2 %vm13025_vm5, %v4686_v6  ;;  %vm13039_vm5 = vcmask 392192  }
 0x515   : > { %v4848_v29 = vpop.f32.mrf.mxu2 }
 0x516   : > { %v4849_v12 = vadd.f32 %v9854_v16, %v4848_v29  ;;  %4389 = vrot.lane.b32.xlu0 %v3472_v60, %s12401_s16  ;;  %3809 = vrot.lane.b32.xlu1 %v10049_v8, %s12658_s23  ;;  %v10205_v29 = vld [vmem:[#allocation2 + $0xb9] sm:$0xff] }
 0x518   : > { %4261 = vrot.lane.b32.xlu2 %v10160_v2, %s12800_s0  ;;  %vm4934_vm11 = vcmp.ge.f32.partialorder %v4849_v12, 0.0  ;;  %v4966_v42 = vmul.f32 0.01, %v4849_v12  ;;  %v3544_v27 = vpop.permute.xlu1 %3543 }
 0x519   : > { %v4154_v37 = vpop.permute.xlu0 %4153  ;;  %v4463_v15 = vsel %vm13032_vm7, %v3231_v31, %v3544_v27  ;;  %vm13042_vm7 = vcmask 588800   ;;  %v10214_v31 = vld [vmem:[#allocation2 + $0xb8] sm:$0xff] }
 0x51a   : > { %v4998_v45 = vsel %vm4934_vm11, %v4849_v12, %v4966_v42  ;;  %v4156_v5 = vpop.permute.xlu2 %4155  ;;  %v4495_v21 = vsel %vm13034_vm9, %v4463_v15, %v3672_v22  ;;  %v10185_v22 = vld [vmem:[#allocation2 + $0xb7] sm:$0xff]  ;;  %vm13040_vm11 = vcmask 457728  }
 0x51b   : > { %5030 = vst.msk [vmem:[#allocation2 + $0x40] sm:$0xff] %vm13031_vm14, %v4998_v45  ;;  %v4527_v46 = vsel %vm13035_vm2, %v4495_v21, %v3800_v63  ;;  %vm13041_vm14 = vcmask 523264   ;;  %vm13043_vm2 = vmmov %vm13038_vm4 }
 0x51e   : > { %3811 = vrot.lane.b32.xlu0 %v3367_v25, %s12658_s23  ;;  %4163 = vrot.lane.b32.xlu1 %v10172_v3, %s12400_s30 }
 0x51f   : > { %v3053_v57 = vpop.f32.mrf.mxu1 }
 0x520   : > { %3683 = vrot.lane.b32.xlu2 %v10011_v53, %s12588_s20  ;;  %v3054_v9 = vadd.f32 %v9797_v40, %v3053_v57  ;;  %v3898_v41 = vpop.permute.xlu1 %3897  ;;  %v3437_v53 = vsel %vm13033_vm15, %v10185_v22, 0.0 }
 0x521   : > { %v3546_v43 = vpop.permute.xlu0 %3545  ;;  %v4559_v48 = vsel %vm13036_vm0, %v4527_v46, %v3898_v41  ;;  %v10237_v46 = vld [vmem:[#allocation2 + $0xbf] sm:$0xff] }
 0x522   : > { %vm3087_vm12 = vcmp.ge.f32.partialorder %v3054_v9, 0.0  ;;  %v10183_v0 = vpop.permute.xlu2 %3547  ;;  %v3119_v30 = vmul.f32 0.01, %v3054_v9  ;;  %v4591_v47 = vsel %vm13037_vm10, %v4559_v48, %v4026_v1  ;;  %v4464_v27 = vsel %vm13043_vm2, %v9726_v18, %v3546_v43 }
 0x523   : > { %v4623_v40 = vsel %vm13039_vm5, %v4591_v47, %v4154_v37  ;;  %vm13046_vm10 = vcmask 195584   ;;  %vm13048_vm5 = vcmask 326656   ;;  %vm13053_vm2 = vcmask 588800  }
 0x524   : > { %v3151_v19 = vsel %vm3087_vm12, %v3054_v9, %v3119_v30  ;;  %vm13044_vm12 = vcmask 130048  }
 0x525   : > { %3186 = vst.msk [vmem:[#allocation2 + $0x110] sm:$0xff] %vm13038_vm4, %v3151_v19  ;;  %vm13045_vm0 = vmmov %vm13044_vm12  ;;  %vm13047_vm4 = vcmask 261120  }
 0x526   : > { %4165 = vrot.lane.b32.xlu0 %v3437_v53, %s12400_s30  ;;  %3555 = vrot.lane.b32.xlu1 %v10019_v59, %s12529_s24 }
 0x528   : > { %4037 = vrot.lane.b32.xlu2 %v10137_v10, %s12673_s15  ;;  %v4252_v63 = vpop.permute.xlu1 %4251 }
 0x529   : > { %v3900_v28 = vpop.permute.xlu0 %3899  ;;  %v4655_v1 = vsel %vm13040_vm11, %v4623_v40, %v4252_v63  ;;  %vm13049_vm11 = vcmask 392192   ;;  %v3233_v63 = vsel %vm13000_vm13, %v9802_v55, 0.0 }
 0x52a   : > { %v3902_v54 = vpop.permute.xlu2 %3901  ;;  %v4687_v6 = vsel %vm13041_vm14, %v4655_v1, %v4380_v35  ;;  %vm13050_vm14 = vnez %v12222_v58 }
 0x52b   : > { %6735 = vmatmul.msk.f32.gmra.mxu2 %vm13042_vm7, %v4687_v6  ;;  %v3334_v43 = vsel %vm13050_vm14, %v10067_v51, 0.0  ;;  %vm13051_vm7 = vcmask 457728   ;;  %v3404_v53 = vsel %vm13050_vm14, %v10149_v39, 0.0 }
 0x52e   : > { %3557 = vrot.lane.b32.xlu0 %v10085_v49, %s12529_s24  ;;  %3909 = vrot.lane.b32.xlu1 %v10106_v32, %s12654_s22  ;;  %v4851_v59 = vpop.f32.mrf.mxu2 }
 0x52f   : > { %v4852_v60 = vadd.f32 %v9854_v16, %v4851_v59 }
 0x530   : > { %4391 = vrot.lane.b32.xlu2 %v10205_v29, %s12401_s16  ;;  %v3674_v12 = vpop.permute.xlu1 %3673 }
 0x531   : > { %vm4935_vm9 = vcmp.ge.f32.partialorder %v4852_v60, 0.0  ;;  %v4967_v42 = vmul.f32 0.01, %v4852_v60  ;;  %v4254_v35 = vpop.permute.xlu0 %4253  ;;  %v4496_v45 = vsel %vm13044_vm12, %v4464_v27, %v3674_v12  ;;  %vm13054_vm12 = vcmask 64512  }
 0x532   : > { %v4256_v37 = vpop.permute.xlu2 %4255  ;;  %v4528_v15 = vsel %vm13046_vm10, %v4496_v45, %v10146_v44  ;;  %v10229_v44 = vld [vmem:[#allocation2 + $0xc0] sm:$0xff]  ;;  %vm13055_vm10 = vcmask 130048  }
 0x533   : > { %v4999_v49 = vsel %vm4935_vm9, %v4852_v60, %v4967_v42  ;;  %v4560_v21 = vsel %vm13047_vm4, %v4528_v15, %v3900_v28  ;;  %vm13052_vm9 = vcmask 523264   ;;  %v4465_v28 = vsel %vm13054_vm12, %v3233_v63, %v10183_v0  ;;  %vm13057_vm13 = vmmov %vm13055_vm10  ;;  %v5071_v0 = vld [vmem:[#allocation2 + $0x39] ss:$2 sm:$0xff] }
 0x534   : > { %5031 = vst.msk [vmem:[#allocation2 + $0x48] sm:$0xff] %vm13045_vm0, %v4999_v49  ;;  %vm13056_vm4 = vcmask 195584   ;;  %vm13062_vm12 = vnez %v12682_v56 }
 0x536   : > { %3911 = vrot.lane.b32.xlu0 %v10160_v2, %s12654_s22  ;;  %4263 = vrot.lane.b32.xlu1 %v10214_v31, %s12800_s0 }
 0x538   : > { %3813 = vrot.lane.b32.xlu2 %v10172_v3, %s12658_s23  ;;  %v4028_v18 = vpop.permute.xlu1 %4027 }
 0x539   : > { %v3676_v25 = vpop.permute.xlu0 %3675  ;;  %v4592_v57 = vsel %vm13048_vm5, %v4560_v21, %v4028_v18  ;;  %vm13058_vm5 = vcmask 261120  }
 0x53a   : > { %v10226_v9 = vpop.permute.xlu2 %3677  ;;  %v4624_v41 = vsel %vm13049_vm11, %v4592_v57, %v4156_v5  ;;  %v4497_v59 = vsel %vm13055_vm10, %v4465_v28, %v3676_v25  ;;  %vm13059_vm11 = vcmask 326656  }
 0x53b   : > { %v4656_v30 = vsel %vm13051_vm7, %v4624_v41, %v4254_v35  ;;  %v10264_v35 = vld [vmem:[#allocation2 + $0xc1] sm:$0xff]  ;;  %vm13060_vm7 = vcmask 392192  }
 0x53c   : > { %v3474_v55 = vsel %vm13050_vm14, %v10264_v35, 0.0  ;;  %vm13061_vm14 = vcmask 457728  }
 0x53e   : > { %4265 = vrot.lane.b32.xlu0 %v10229_v44, %s12800_s0  ;;  %3685 = vrot.lane.b32.xlu1 %v3334_v43, %s12588_s20 }
 0x540   : > { %4167 = vrot.lane.b32.xlu2 %v10237_v46, %s12400_s30  ;;  %v4382_v48 = vpop.permute.xlu1 %4381 }
 0x541   : > { %v4030_v5 = vpop.permute.xlu0 %4029  ;;  %v4688_v19 = vsel %vm13052_vm9, %v4656_v30, %v4382_v48  ;;  %v10283_v48 = vld [vmem:[#allocation2 + $0xc9] sm:$0xff]  ;;  %v3369_v30 = vsel %vm13062_vm12, %v10185_v22, 0.0 }
 0x542   : > { %v10243_v47 = vpop.permute.xlu2 %4031  ;;  %6736 = vmatmul.msk.f32.gmra.mxu2 %vm13053_vm2, %v4688_v19 }
 0x545   : > { %v4854_v51 = vpop.f32.mrf.mxu2 }
 0x546   : > { %v4855_v40 = vadd.f32 %v9854_v16, %v4854_v51  ;;  %3687 = vrot.lane.b32.xlu0 %v10137_v10, %s12588_s20  ;;  %4039 = vrot.lane.b32.xlu1 %v3404_v53, %s12673_s15 }
 0x548   : > { %3559 = vrot.lane.b32.xlu2 %v10106_v32, %s12529_s24  ;;  %vm4936_vm0 = vcmp.ge.f32.partialorder %v4855_v40, 0.0  ;;  %v4968_v1 = vmul.f32 0.01, %v4855_v40  ;;  %v3804_v6 = vpop.permute.xlu1 %3803  ;;  %v5069_v32 = vld [vmem:[#allocation2 + $0x38] ss:$2 sm:$0xff] }
 0x549   : > { %v4384_v60 = vpop.permute.xlu0 %4383  ;;  %v4529_v10 = vsel %vm13056_vm4, %v4497_v59, %v3804_v6  ;;  %v5072_v45 = vadd.f32 %v5071_v0, %v5069_v32  ;;  %vm13064_vm4 = vcmask 64512  }
 0x54a   : > { %v5000_v12 = vsel %vm4936_vm0, %v4855_v40, %v4968_v1  ;;  %v10262_v42 = vpop.permute.xlu2 %4385  ;;  %v4561_v23 = vsel %vm13058_vm5, %v4529_v10, %v3902_v54  ;;  %vm13063_vm0 = vmmov %vm13055_vm10  ;;  %v10299_v1 = vld [vmem:[#allocation2 + $0xc7] sm:$0xff] }
 0x54b   : > { %5032 = vst.msk [vmem:[#allocation2 + $0x50] sm:$0xff] %vm13057_vm13, %v5000_v12  ;;  %v4593_v27 = vsel %vm13059_vm11, %v4561_v23, %v4030_v5  ;;  %v10291_v5 = vld [vmem:[#allocation2 + $0xc8] sm:$0xff]  ;;  %vm13065_vm13 = vmmov %vm13063_vm0  ;;  %vm13067_vm11 = vnez %v12251_v7  ;;  %v10356_v7 = vld [vmem:[#allocation2 + $0xd0] sm:$0xff] }
 0x54c   : > { %vm13066_vm5 = vmmov %vm13063_vm0  ;;  %v3336_v10 = vsel %vm13067_vm11, %v10149_v39, 0.0  ;;  %v3406_v39 = vsel %vm13067_vm11, %v10264_v35, 0.0 }
 0x54e   : > { %4041 = vrot.lane.b32.xlu0 %v10205_v29, %s12673_s15  ;;  %4393 = vrot.lane.b32.xlu1 %v3474_v55, %s12401_s16 }
 0x550   : > { %3913 = vrot.lane.b32.xlu2 %v10214_v31, %s12654_s22  ;;  %v4158_v49 = vpop.permute.xlu1 %4157 }
 0x551   : > { %v3806_v15 = vpop.permute.xlu0 %3805  ;;  %v4625_v54 = vsel %vm13060_vm7, %v4593_v27, %v4158_v49  ;;  %vm13068_vm7 = vcmask 195584   ;;  %v10322_v27 = vld [vmem:[#allocation2 + $0xcf] sm:$0xff] }
 0x552   : > { %v5074_v18 = vld [vmem:[#allocation2 + $0x48] ss:$2 sm:$0xff]  ;;  %v10278_v58 = vpop.permute.xlu2 %3807  ;;  %v4657_v25 = vsel %vm13061_vm14, %v4625_v54, %v4256_v37  ;;  %v5077_v41 = vld [vmem:[#allocation2 + $0x49] ss:$2 sm:$0xff]  ;;  %vm13069_vm14 = vcmask 261120  }
 0x553   : > { %v5075_v21 = vadd.f32 %v5074_v18, %v5072_v45  ;;  %v4689_v57 = vsel %vm13052_vm9, %v4657_v25, %v4384_v60  ;;  %v3439_v60 = vsel %vm13062_vm12, %v10299_v1, 0.0  ;;  %vm13070_vm9 = vcmask 326656  }
 0x554   : > { %6737 = vmatmul.msk.f32.gmra.mxu2 %vm13053_vm2, %v4689_v57  ;;  %vm13071_vm2 = vcmask 392192  }
 0x555   : > { %v5078_v43 = vadd.f32 %v5077_v41, %v5075_v21  ;;  %v3235_v41 = vsel %vm13017_vm8, %v9905_v20, 0.0  ;;  %vm13079_vm8 = vnez %v12721_v50 }
 0x556   : > { %4395 = vrot.lane.b32.xlu0 %v10283_v48, %s12401_s16  ;;  %3815 = vrot.lane.b32.xlu1 %v3369_v30, %s12658_s23  ;;  %v3371_v36 = vsel %vm13079_vm8, %v10299_v1, 0.0 }
 0x557   : > { %v5146_v37 = vmul.f32 0.25, %v5078_v43  ;;  %v4857_v19 = vpop.f32.mrf.mxu2 }
 0x558   : > { %4267 = vrot.lane.b32.xlu2 %v10291_v5, %s12800_s0  ;;  %v4858_v51 = vadd.f32 %v9854_v16, %v4857_v19  ;;  %v3550_v53 = vpop.permute.xlu1 %3549 }
 0x559   : > { %5157 = vst.msk [vmem:[#allocation2 + $0x20] sm:$0xff] %vm13063_vm0, %v5146_v37  ;;  %v4160_v40 = vpop.permute.xlu0 %4159  ;;  %v4466_v6 = vsel %vm13064_vm4, %v9887_v52, %v3550_v53  ;;  %vm13072_vm0 = vcmask 457728   ;;  %vm13074_vm4 = vcmask 588800  }
 0x55a   : > { %vm4937_vm10 = vcmp.ge.f32.partialorder %v4858_v51, 0.0  ;;  %v4969_v63 = vmul.f32 0.01, %v4858_v51  ;;  %v10297_v28 = vpop.permute.xlu2 %4161  ;;  %v4498_v12 = vsel %vm13066_vm5, %v4466_v6, %v10226_v9  ;;  %vm13075_vm5 = vcmask 64512  }
 0x55b   : > { %v4530_v55 = vsel %vm13068_vm7, %v4498_v12, %v3806_v15  ;;  %vm13076_vm7 = vcmask 130048   ;;  %v10376_v12 = vld [vmem:[#allocation2 + $0xd7] sm:$0xff] }
 0x55c   : > { %v5001_v59 = vsel %vm4937_vm10, %v4858_v51, %v4969_v63  ;;  %vm13073_vm10 = vcmask 523264  }
 0x55d   : > { %5033 = vst.msk [vmem:[#allocation2 + $0x58] sm:$0xff] %vm13065_vm13, %v5001_v59 }
 0x55e   : > { %3817 = vrot.lane.b32.xlu0 %v10237_v46, %s12658_s23  ;;  %4169 = vrot.lane.b32.xlu1 %v3439_v60, %s12400_s30 }
 0x560   : > { %3689 = vrot.lane.b32.xlu2 %v3336_v10, %s12588_s20  ;;  %v3904_v52 = vpop.permute.xlu1 %3903 }
 0x561   : > { %v3552_v23 = vpop.permute.xlu0 %3551  ;;  %v4562_v32 = vsel %vm13069_vm14, %v4530_v55, %v3904_v52  ;;  %vm13077_vm14 = vmmov %vm13076_vm7  ;;  %v10384_v52 = vld [vmem:[#allocation2 + $0xd8] sm:$0xff] }
 0x562   : > { %v10318_v0 = vpop.permute.xlu2 %3553  ;;  %v4594_v9 = vsel %vm13070_vm9, %v4562_v32, %v10243_v47  ;;  %v4467_v30 = vsel %vm13075_vm5, %v3235_v41, %v3552_v23  ;;  %vm13080_vm9 = vcmask 261120   ;;  %v3441_v23 = vsel %vm13079_vm8, %v10376_v12, 0.0 }
 0x563   : > { %v4626_v49 = vsel %vm13071_vm2, %v4594_v9, %v4160_v40  ;;  %vm13081_vm2 = vcmask 326656   ;;  %vm13086_vm5 = vcmask 523264  }
 0x566   : > { %4171 = vrot.lane.b32.xlu0 %v10322_v27, %s12400_s30  ;;  %3561 = vrot.lane.b32.xlu1 %v10160_v2, %s12529_s24  ;;  %v10339_v2 = vld [vmem:[#allocation2 + $0xd1] sm:$0xff] }
 0x567   : > { %v3476_v21 = vsel %vm13067_vm11, %v10339_v2, 0.0  ;;  %vm13078_vm11 = vcmask 195584  }
 0x568   : > { %4043 = vrot.lane.b32.xlu2 %v3406_v39, %s12673_s15  ;;  %v4258_v45 = vpop.permute.xlu1 %4257 }
 0x569   : > { %v3906_v15 = vpop.permute.xlu0 %3905  ;;  %v4658_v47 = vsel %vm13072_vm0, %v4626_v49, %v4258_v45  ;;  %vm13082_vm0 = vmmov %vm13076_vm7 }
 0x56a   : > { %v10334_v54 = vpop.permute.xlu2 %3907  ;;  %v4690_v18 = vsel %vm13073_vm10, %v4658_v47, %v10262_v42  ;;  %vm13083_vm10 = vmmov %vm13082_vm0 }
 0x56b   : > { %6738 = vmatmul.msk.f32.gmra.mxu2 %vm13074_vm4, %v4690_v18  ;;  %vm13084_vm4 = vcmask 392192  }
 0x56e   : > { %3563 = vrot.lane.b32.xlu0 %v10214_v31, %s12529_s24  ;;  %3915 = vrot.lane.b32.xlu1 %v10229_v44, %s12654_s22  ;;  %v4860_v25 = vpop.f32.mrf.mxu2 }
 0x56f   : > { %v4861_v57 = vadd.f32 %v9854_v16, %v4860_v25 }
 0x570   : > { %4397 = vrot.lane.b32.xlu2 %v3476_v21, %s12401_s16  ;;  %v3680_v42 = vpop.permute.xlu1 %3679 }
 0x571   : > { %vm4938_vm13 = vcmp.ge.f32.partialorder %v4861_v57, 0.0  ;;  %v4970_v43 = vmul.f32 0.01, %v4861_v57  ;;  %v4260_v31 = vpop.permute.xlu0 %4259  ;;  %v4499_v51 = vsel %vm13076_vm7, %v4467_v30, %v3680_v42  ;;  %vm13087_vm7 = vcmask 588800  }
 0x572   : > { %v4262_v37 = vpop.permute.xlu2 %4261  ;;  %v4531_v53 = vsel %vm13078_vm11, %v4499_v51, %v10278_v58  ;;  %vm13089_vm11 = vcmask 64512   ;;  %v10433_v51 = vld [vmem:[#allocation2 + $0xe1] sm:$0xff] }
 0x573   : > { %v5002_v19 = vsel %vm4938_vm13, %v4861_v57, %v4970_v43  ;;  %v4563_v63 = vsel %vm13080_vm9, %v4531_v53, %v3906_v15  ;;  %vm13085_vm13 = vcmask 457728   ;;  %v4468_v15 = vsel %vm13089_vm11, %v9962_v4, %v10318_v0  ;;  %v10421_v0 = vld [vmem:[#allocation2 + $0xd9] sm:$0xff] }
 0x574   : > { %5034 = vst.msk [vmem:[#allocation2 + $0x60] sm:$0xff] %vm13077_vm14, %v5002_v19  ;;  %vm13088_vm14 = vnez %v12262_v14  ;;  %vm13097_vm11 = vcmask 523264   ;;  %v3237_v14 = vsel %vm13033_vm15, %v10025_v13, 0.0  ;;  %vm13103_vm15 = vcmask 195584  }
 0x575   : > { %v3408_v4 = vsel %vm13088_vm14, %v10339_v2, 0.0 }
 0x576   : > { %3917 = vrot.lane.b32.xlu0 %v10291_v5, %s12654_s22  ;;  %4269 = vrot.lane.b32.xlu1 %v10356_v7, %s12800_s0 }
 0x578   : > { %3819 = vrot.lane.b32.xlu2 %v3371_v36, %s12658_s23  ;;  %v4034_v20 = vpop.permute.xlu1 %4033  ;;  %v3478_v36 = vsel %vm13088_vm14, %v10433_v51, 0.0 }
 0x579   : > { %v3682_v40 = vpop.permute.xlu0 %3681  ;;  %v4595_v6 = vsel %vm13081_vm2, %v4563_v63, %v4034_v20  ;;  %vm13090_vm2 = vmmov %vm13082_vm0  ;;  %v10443_v20 = vld [vmem:[#allocation2 + $0xe0] sm:$0xff] }
 0x57a   : > { %v10370_v59 = vpop.permute.xlu2 %3683  ;;  %v4627_v10 = vsel %vm13084_vm4, %v4595_v6, %v10297_v28  ;;  %v4500_v25 = vsel %vm13090_vm2, %v4468_v15, %v3682_v40  ;;  %vm13093_vm4 = vcmask 261120   ;;  %v10471_v15 = vld [vmem:[#allocation2 + $0xe7] sm:$0xff] }
 0x57b   : > { %v10372_v58 = vld [vmem:[#allocation2 + $0x58] ss:$2 sm:$0xff]  ;;  %v10374_v60 = vld [vmem:[#allocation2 + $0x59] ss:$2 sm:$0xff]  ;;  %v4659_v32 = vsel %vm13085_vm13, %v4627_v10, %v4260_v31  ;;  %vm13094_vm13 = vcmask 326656  }
 0x57c   : > { %5153 = vst.msk [vmem:[#allocation2 + $0x58] sm:$0xff] %vm13082_vm0, %v12801_v61  ;;  %vm13091_vm0 = vcmask 195584  }
 0x57d   : > { %5154 = vst.msk [vmem:[#allocation2 + $0x60] sm:$0xff] %vm13083_vm10, %v12801_v61  ;;  %vm13092_vm10 = vmmov %vm13090_vm2 }
 0x57e   : > { %4271 = vrot.lane.b32.xlu0 %v10384_v52, %s12800_s0  ;;  %3691 = vrot.lane.b32.xlu1 %v10205_v29, %s12588_s20  ;;  %v3338_v29 = vsel %vm13088_vm14, %v10264_v35, 0.0  ;;  %vm13099_vm14 = vcmask 64512  }
 0x580   : > { %4173 = vrot.lane.b32.xlu2 %v3441_v23, %s12400_s30  ;;  %v4388_v55 = vpop.permute.xlu1 %4387 }
 0x581   : > { %v4036_v9 = vpop.permute.xlu0 %4035  ;;  %v4691_v28 = vsel %vm13086_vm5, %v4659_v32, %v4388_v55  ;;  %vm13095_vm5 = vcmask 392192  }
 0x582   : > { %v10396_v39 = vpop.permute.xlu2 %4037  ;;  %6739 = vmatmul.msk.f32.gmra.mxu2 %vm13087_vm7, %v4691_v28  ;;  %vm13096_vm7 = vcmask 457728  }
 0x585   : > { %v4863_v49 = vpop.f32.mrf.mxu2 }
 0x586   : > { %v4864_v45 = vadd.f32 %v9854_v16, %v4863_v49  ;;  %3693 = vrot.lane.b32.xlu0 %v3338_v29, %s12588_s20  ;;  %4045 = vrot.lane.b32.xlu1 %v10283_v48, %s12673_s15 }
 0x588   : > { %3565 = vrot.lane.b32.xlu2 %v10229_v44, %s12529_s24  ;;  %vm4939_vm9 = vcmp.ge.f32.partialorder %v4864_v45, 0.0  ;;  %v4971_v47 = vmul.f32 0.01, %v4864_v45  ;;  %v3810_v18 = vpop.permute.xlu1 %3809 }
 0x589   : > { %v4390_v35 = vpop.permute.xlu0 %4389  ;;  %v4532_v57 = vsel %vm13091_vm0, %v4500_v25, %v3810_v18  ;;  %vm13100_vm0 = vmmov %vm13092_vm10 }
 0x58a   : > { %v5003_v21 = vsel %vm4939_vm9, %v4864_v45, %v4971_v47  ;;  %v10413_v42 = vpop.permute.xlu2 %4391  ;;  %v4564_v44 = vsel %vm13093_vm4, %v4532_v57, %v10334_v54  ;;  %vm13098_vm9 = vcmask 588800   ;;  %vm13102_vm4 = vmmov %vm13100_vm0 }
 0x58b   : > { %5035 = vst.msk [vmem:[#allocation2 + $0x68] sm:$0xff] %vm13092_vm10, %v5003_v21  ;;  %v4596_v41 = vsel %vm13094_vm13, %v4564_v44, %v4036_v9  ;;  %vm13101_vm10 = vnez %v12749_v33  ;;  %vm13104_vm13 = vcmask 261120  }
 0x58c   : > { %v3373_v9 = vsel %vm13101_vm10, %v10376_v12, 0.0 }
 0x58e   : > { %4047 = vrot.lane.b32.xlu0 %v3408_v4, %s12673_s15  ;;  %4399 = vrot.lane.b32.xlu1 %v10421_v0, %s12401_s16 }
 0x590   : > { %3919 = vrot.lane.b32.xlu2 %v10356_v7, %s12654_s22  ;;  %v4164_v43 = vpop.permute.xlu1 %4163 }
 0x591   : > { %v3812_v31 = vpop.permute.xlu0 %3811  ;;  %v4628_v54 = vsel %vm13095_vm5, %v4596_v41, %v4164_v43  ;;  %vm13105_vm5 = vmmov %vm13100_vm0  ;;  %v10499_v43 = vld [vmem:[#allocation2 + $0xe9] sm:$0xff] }
 0x592   : > { %v10430_v30 = vpop.permute.xlu2 %3813  ;;  %v4660_v19 = vsel %vm13096_vm7, %v4628_v54, %v4262_v37  ;;  %vm13106_vm7 = vcmask 326656  }
 0x593   : > { %v4692_v53 = vsel %vm13097_vm11, %v4660_v19, %v4390_v35  ;;  %v3443_v35 = vsel %vm13101_vm10, %v10471_v15, 0.0  ;;  %vm13107_vm11 = vmmov %vm13100_vm0 }
 0x594   : > { %6740 = vmatmul.msk.f32.gmra.mxu2 %vm13098_vm9, %v4692_v53  ;;  %vm13108_vm9 = vcmask 392192  }
 0x596   : > { %4401 = vrot.lane.b32.xlu0 %v3478_v36, %s12401_s16  ;;  %3821 = vrot.lane.b32.xlu1 %v10322_v27, %s12658_s23 }
 0x597   : > { %v4866_v37 = vpop.f32.mrf.mxu2 }
 0x598   : > { %4273 = vrot.lane.b32.xlu2 %v10443_v20, %s12800_s0  ;;  %v4867_v40 = vadd.f32 %v9854_v16, %v4866_v37  ;;  %v3556_v63 = vpop.permute.xlu1 %3555  ;;  %v10458_v16 = vld [vmem:[#allocation2 + $0xdf] sm:$0xff] }
 0x599   : > { %v4166_v6 = vpop.permute.xlu0 %4165  ;;  %v4469_v55 = vsel %vm13099_vm14, %v3237_v14, %v3556_v63  ;;  %vm13110_vm14 = vcmask 523264   ;;  %v10513_v63 = vld [vmem:[#allocation2 + $0xe8] sm:$0xff] }
 0x59a   : > { %vm4940_vm2 = vcmp.ge.f32.partialorder %v4867_v40, 0.0  ;;  %v4972_v10 = vmul.f32 0.01, %v4867_v40  ;;  %v10451_v23 = vpop.permute.xlu2 %4167  ;;  %v4501_v28 = vsel %vm13102_vm4, %v4469_v55, %v10370_v59  ;;  %v5083_v59 = vadd.f32 %v10374_v60, %v10372_v58 }
 0x59b   : > { %v4533_v49 = vsel %vm13103_vm15, %v4501_v28, %v3812_v31  ;;  %vm13111_vm4 = vcmask 588800   ;;  %v10504_v31 = vld [vmem:[%s11909_s6] ss:$0 sm:$0xff] }
 0x59c   : > { %v5004_v32 = vsel %vm4940_vm2, %v4867_v40, %v4972_v10  ;;  %vm13109_vm2 = vcmask 457728  }
 0x59d   : > { %5036 = vst.msk [vmem:[#allocation2 + $0x70] sm:$0xff] %vm13100_vm0, %v5004_v32 }
 0x59e   : > { %3823 = vrot.lane.b32.xlu0 %v3373_v9, %s12658_s23  ;;  %4175 = vrot.lane.b32.xlu1 %v10458_v16, %s12400_s30  ;;  %v10529_v9 = vld [vmem:[#allocation2 + $0xf0] sm:$0xff] }
 0x5a0   : > { %3695 = vrot.lane.b32.xlu2 %v10283_v48, %s12588_s20  ;;  %v3910_v62 = vpop.permute.xlu1 %3909 }
 0x5a1   : > { %v3558_v13 = vpop.permute.xlu0 %3557  ;;  %v4565_v29 = vsel %vm13104_vm13, %v4533_v49, %v3910_v62  ;;  %vm13112_vm13 = vcmask 64512   ;;  %v10537_v62 = vld [vmem:[#allocation2 + $0xef] sm:$0xff] }
 0x5a2   : > { %v10469_v45 = vpop.permute.xlu2 %3559  ;;  %v4597_v48 = vsel %vm13106_vm7, %v4565_v29, %v10396_v39  ;;  %v4470_v53 = vsel %vm13112_vm13, %v10049_v8, %v3558_v13  ;;  %vm13114_vm7 = vmmov %vm13100_vm0  ;;  %vm13122_vm13 = vcmask 588800  }
 0x5a3   : > { %v4629_v60 = vsel %vm13108_vm9, %v4597_v48, %v4166_v6  ;;  %vm13116_vm9 = vcmask 261120  }
 0x5a4   : > { %v5085_v47 = vld [vmem:[#allocation2 + $0x68] ss:$2 sm:$0xff]  ;;  %v5088_v18 = vld [vmem:[#allocation2 + $0x69] ss:$2 sm:$0xff] }
 0x5a5   : > { %v5086_v25 = vadd.f32 %v5085_v47, %v5083_v59  ;;  %5155 = vst.msk [vmem:[#allocation2 + $0x68] sm:$0xff] %vm13105_vm5, %v12801_v61  ;;  %vm13113_vm5 = vmmov %vm13100_vm0 }
 0x5a6   : > { %5777 = vst.msk [vmem:[#allocation2 + $0x68] sm:$0xff] %vm13107_vm11, %v12801_v61  ;;  %4177 = vrot.lane.b32.xlu0 %v3443_v35, %s12400_s30  ;;  %3567 = vrot.lane.b32.xlu1 %v10291_v5, %s12529_s24  ;;  %vm13115_vm11 = vcmask 195584  }
 0x5a7   : > { %v5089_v58 = vadd.f32 %v5088_v18, %v5086_v25  ;;  %v3239_v25 = vsel %vm13062_vm12, %v10101_v26, 0.0  ;;  %vm13127_vm12 = vcmask 261120  }
 0x5a8   : > { %4049 = vrot.lane.b32.xlu2 %v10421_v0, %s12673_s15  ;;  %v4264_v21 = vpop.permute.xlu1 %4263 }
 0x5a9   : > { %v5147_v39 = vmul.f32 0.25, %v5089_v58  ;;  %v3912_v57 = vpop.permute.xlu0 %3911  ;;  %v4661_v44 = vsel %vm13109_vm2, %v4629_v60, %v4264_v21  ;;  %vm13117_vm2 = vcmask 326656  }
 0x5aa   : > { %v3914_v4 = vpop.permute.xlu2 %3913  ;;  %v4693_v41 = vsel %vm13110_vm14, %v4661_v44, %v10413_v42  ;;  %vm13118_vm14 = vcmask 392192   ;;  %v10560_v44 = vld [vmem:[#allocation2 + $0xf1] sm:$0xff] }
 0x5ab   : > { %5158 = vst.msk [vmem:[#allocation2 + $0x28] sm:$0xff] %vm13100_vm0, %v5147_v39  ;;  %6741 = vmatmul.msk.f32.gmra.mxu2 %vm13111_vm4, %v4693_v41  ;;  %vm13119_vm0 = vnez %v12542_v11  ;;  %vm13120_vm4 = vcmask 457728  }
 0x5ac   : > { %v3340_v28 = vsel %vm13119_vm0, %v10339_v2, 0.0  ;;  %v3410_v47 = vsel %vm13119_vm0, %v10433_v51, 0.0  ;;  %v3480_v26 = vsel %vm13119_vm0, %v10560_v44, 0.0  ;;  %vm13132_vm0 = vcmask 588800  }
 0x5ae   : > { %3569 = vrot.lane.b32.xlu0 %v10356_v7, %s12529_s24  ;;  %3921 = vrot.lane.b32.xlu1 %v10384_v52, %s12654_s22  ;;  %v4869_v5 = vpop.f32.mrf.mxu2 }
 0x5af   : > { %v4870_v42 = vadd.f32 %v10504_v31, %v4869_v5 }
 0x5b0   : > { %4403 = vrot.lane.b32.xlu2 %v10499_v43, %s12401_s16  ;;  %v3686_v54 = vpop.permute.xlu1 %3685 }
 0x5b1   : > { %vm4941_vm15 = vcmp.ge.f32.partialorder %v4870_v42, 0.0  ;;  %v4973_v19 = vmul.f32 0.01, %v4870_v42  ;;  %v4266_v7 = vpop.permute.xlu0 %4265  ;;  %v4502_v40 = vsel %vm13113_vm5, %v4470_v53, %v3686_v54  ;;  %vm13123_vm5 = vcmask 64512   ;;  %v10579_v54 = vld [vmem:[#allocation2 + $0xf9] sm:$0xff] }
 0x5b2   : > { %v4268_v36 = vpop.permute.xlu2 %4267  ;;  %v4534_v6 = vsel %vm13115_vm11, %v4502_v40, %v10430_v30  ;;  %v4471_v48 = vsel %vm13123_vm5, %v3239_v25, %v10469_v45  ;;  %vm13124_vm11 = vcmask 130048  }
 0x5b3   : > { %v5005_v37 = vsel %vm4941_vm15, %v4870_v42, %v4973_v19  ;;  %v4566_v14 = vsel %vm13116_vm9, %v4534_v6, %v3912_v57  ;;  %vm13121_vm15 = vcmask 523264   ;;  %vm13125_vm9 = vcmask 195584  }
 0x5b4   : > { %5037 = vst.msk [vmem:[#allocation2 + $0x78] sm:$0xff] %vm13114_vm7, %v5005_v37  ;;  %v3375_v19 = vsel %vm12804_vm1, %v10471_v15, 0.0 }
 0x5b6   : > { %3923 = vrot.lane.b32.xlu0 %v10443_v20, %s12654_s22  ;;  %4275 = vrot.lane.b32.xlu1 %v10513_v63, %s12800_s0 }
 0x5b8   : > { %3825 = vrot.lane.b32.xlu2 %v10458_v16, %s12658_s23  ;;  %v4040_v8 = vpop.permute.xlu1 %4039 }
 0x5b9   : > { %v3688_v10 = vpop.permute.xlu0 %3687  ;;  %v4598_v55 = vsel %vm13117_vm2, %v4566_v14, %v4040_v8  ;;  %vm13126_vm2 = vmmov %vm13124_vm11 }
 0x5ba   : > { %v10525_v32 = vpop.permute.xlu2 %3689  ;;  %v4630_v30 = vsel %vm13118_vm14, %v4598_v55, %v10451_v23  ;;  %v4503_v60 = vsel %vm13124_vm11, %v4471_v48, %v3688_v10  ;;  %vm13128_vm14 = vcmask 326656   ;;  %v10594_v10 = vld [vmem:[#allocation2 + $0xf7] sm:$0xff]  ;;  %vm13134_vm11 = vmmov %vm13126_vm2 }
 0x5bb   : > { %v4662_v49 = vsel %vm13120_vm4, %v4630_v30, %v4266_v7  ;;  %vm13129_vm4 = vcmask 392192   ;;  %v10587_v7 = vld [vmem:[#allocation2 + $0xf8] sm:$0xff]  ;;  %v3445_v30 = vsel %vm12804_vm1, %v10594_v10, 0.0  ;;  %v3377_v50 = vsel %vm12874_vm3, %v10594_v10, 0.0 }
 0x5be   : > { %4277 = vrot.lane.b32.xlu0 %v10529_v9, %s12800_s0  ;;  %3697 = vrot.lane.b32.xlu1 %v3340_v28, %s12588_s20 }
 0x5c0   : > { %4179 = vrot.lane.b32.xlu2 %v10537_v62, %s12400_s30  ;;  %v4394_v13 = vpop.permute.xlu1 %4393 }
 0x5c1   : > { %v4042_v23 = vpop.permute.xlu0 %4041  ;;  %v4694_v29 = vsel %vm13121_vm15, %v4662_v49, %v4394_v13  ;;  %vm13130_vm15 = vcmask 457728   ;;  %v13136_v13 = vld [vmem:[#allocation138_spill] sm:$0xff] }
 0x5c2   : > { %v4044_v59 = vpop.permute.xlu2 %4043  ;;  %6742 = vmatmul.msk.f32.gmra.mxu2 %vm13122_vm13, %v4694_v29  ;;  %vm13131_vm13 = vcmask 523264  }
 0x5c5   : > { %v4872_v2 = vpop.f32.mrf.mxu2 }
 0x5c6   : > { %v4873_v18 = vadd.f32 %v10504_v31, %v4872_v2  ;;  %3699 = vrot.lane.b32.xlu0 %v10421_v0, %s12588_s20  ;;  %4051 = vrot.lane.b32.xlu1 %v3410_v47, %s12673_s15 }
 0x5c8   : > { %3571 = vrot.lane.b32.xlu2 %v10384_v52, %s12529_s24  ;;  %vm4942_vm7 = vcmp.ge.f32.partialorder %v4873_v18, 0.0  ;;  %v4974_v35 = vmul.f32 0.01, %v4873_v18  ;;  %v3816_v58 = vpop.permute.xlu1 %3815 }
 0x5c9   : > { %v4396_v21 = vpop.permute.xlu0 %4395  ;;  %v4535_v0 = vsel %vm13125_vm9, %v4503_v60, %v3816_v58  ;;  %vm13135_vm9 = vmmov %vm13126_vm2 }
 0x5ca   : > { %v5006_v39 = vsel %vm4942_vm7, %v4873_v18, %v4974_v35  ;;  %v4398_v57 = vpop.permute.xlu2 %4397  ;;  %v4567_v56 = vsel %vm13127_vm12, %v4535_v0, %v3914_v4  ;;  %vm13133_vm7 = vcmask 64512   ;;  %vm13138_vm12 = vcmask 195584   ;;  %v10616_v18 = vld [vmem:[#allocation2 + $0xff] sm:$0xff] }
 0x5cb   : > { %5038 = vst.msk [vmem:[#allocation2 + $0x80] sm:$0xff] %vm13126_vm2, %v5006_v39  ;;  %v4599_v52 = vsel %vm13128_vm14, %v4567_v56, %v4042_v23  ;;  %vm13137_vm2 = vnez %v13136_v13  ;;  %vm13139_vm14 = vcmask 261120   ;;  %v3241_v56 = vsel %vm13079_vm8, %v10185_v22, 0.0 }
 0x5cc   : > { %v3342_v49 = vsel %vm13137_vm2, %v10433_v51, 0.0  ;;  %v3412_v51 = vsel %vm13137_vm2, %v10560_v44, 0.0  ;;  %vm13147_vm8 = vmmov %vm13139_vm14 }
 0x5ce   : > { %4053 = vrot.lane.b32.xlu0 %v10499_v43, %s12673_s15  ;;  %4405 = vrot.lane.b32.xlu1 %v3480_v26, %s12401_s16 }
 0x5d0   : > { %3925 = vrot.lane.b32.xlu2 %v10513_v63, %s12654_s22  ;;  %v4170_v45 = vpop.permute.xlu1 %4169 }
 0x5d1   : > { %v3818_v41 = vpop.permute.xlu0 %3817  ;;  %v4631_v5 = vsel %vm13129_vm4, %v4599_v52, %v4170_v45  ;;  %vm13140_vm4 = vcmask 326656  }
 0x5d2   : > { %v10574_v42 = vpop.permute.xlu2 %3819  ;;  %v4663_v4 = vsel %vm13130_vm15, %v4631_v5, %v4268_v36  ;;  %vm13141_vm15 = vcmask 392192   ;;  %v5091_v22 = vld [vmem:[#allocation2 + $0x78] ss:$2 sm:$0xff] }
 0x5d3   : > { %v4695_v11 = vsel %vm13131_vm13, %v4663_v4, %v4396_v21  ;;  %vm13142_vm13 = vcmask 457728   ;;  %v10632_v21 = vld [vmem:[#allocation2 + $0x101] sm:$0xff] }
 0x5d4   : > { %6743 = vmatmul.msk.f32.gmra.mxu2 %vm13132_vm0, %v4695_v11  ;;  %vm13143_vm0 = vcmask 523264   ;;  %v3482_v39 = vsel %vm13137_vm2, %v10632_v21, 0.0  ;;  %vm13146_vm2 = vmmov %vm13135_vm9  ;;  %v10651_v4 = vld [vmem:[#allocation2 + $0x100] sm:$0xff] }
 0x5d6   : > { %4407 = vrot.lane.b32.xlu0 %v10579_v54, %s12401_s16  ;;  %3827 = vrot.lane.b32.xlu1 %v3375_v19, %s12658_s23  ;;  %v5093_v19 = vld [vmem:[#allocation2 + $0x79] ss:$2 sm:$0xff] }
 0x5d7   : > { %v4875_v53 = vpop.f32.mrf.mxu2 }
 0x5d8   : > { %4279 = vrot.lane.b32.xlu2 %v10587_v7, %s12800_s0  ;;  %v4876_v36 = vadd.f32 %v10504_v31, %v4875_v53  ;;  %v3562_v37 = vpop.permute.xlu1 %3561 }
 0x5d9   : > { %v4172_v40 = vpop.permute.xlu0 %4171  ;;  %v4472_v14 = vsel %vm13133_vm7, %v10172_v3, %v3562_v37 }
 0x5da   : > { %vm4943_vm5 = vcmp.ge.f32.partialorder %v4876_v36, 0.0  ;;  %v4975_v6 = vmul.f32 0.01, %v4876_v36  ;;  %v10592_v8 = vpop.permute.xlu2 %4173  ;;  %v4504_v28 = vsel %vm13135_vm9, %v4472_v14, %v10525_v32 }
 0x5db   : > { %v4536_v29 = vsel %vm13138_vm12, %v4504_v28, %v3818_v41 }
 0x5dc   : > { %v5007_v55 = vsel %vm4943_vm5, %v4876_v36, %v4975_v6  ;;  %vm13144_vm5 = vcmask 588800  }
 0x5dd   : > { %5039 = vst.msk [vmem:[#allocation2 + $0x88] sm:$0xff] %vm13134_vm11, %v5007_v55  ;;  %vm13145_vm11 = vcmask 64512   ;;  %v10667_v55 = vld [vmem:[#allocation2 + $0x107] sm:$0xff] }
 0x5de   : > { %3829 = vrot.lane.b32.xlu0 %v10537_v62, %s12658_s23  ;;  %4181 = vrot.lane.b32.xlu1 %v3445_v30, %s12400_s30 }
 0x5e0   : > { %3701 = vrot.lane.b32.xlu2 %v3342_v49, %s12588_s20  ;;  %v3916_v3 = vpop.permute.xlu1 %3915  ;;  %v10671_v49 = vld [vmem:[#allocation2 + $0x108] sm:$0xff] }
 0x5e1   : > { %v3564_v23 = vpop.permute.xlu0 %3563  ;;  %v4568_v2 = vsel %vm13139_vm14, %v4536_v29, %v3916_v3  ;;  %vm13148_vm14 = vmmov %vm13140_vm4 }
 0x5e2   : > { %v10613_v47 = vpop.permute.xlu2 %3565  ;;  %v4600_v32 = vsel %vm13140_vm4, %v4568_v2, %v4044_v59  ;;  %v4473_v52 = vsel %vm13145_vm11, %v3241_v56, %v3564_v23  ;;  %vm13149_vm4 = vmmov %vm13141_vm15  ;;  %v3447_v23 = vsel %vm12874_vm3, %v10667_v55, 0.0 }
 0x5e3   : > { %v4632_v25 = vsel %vm13141_vm15, %v4600_v32, %v4172_v40  ;;  %v5094_v40 = vadd.f32 %v5093_v19, %v5091_v22  ;;  %vm13150_vm15 = vmmov %vm13142_vm13 }
 0x5e6   : > { %4183 = vrot.lane.b32.xlu0 %v10616_v18, %s12400_s30  ;;  %3573 = vrot.lane.b32.xlu1 %v10443_v20, %s12529_s24 }
 0x5e8   : > { %4055 = vrot.lane.b32.xlu2 %v3412_v51, %s12673_s15  ;;  %v4270_v48 = vpop.permute.xlu1 %4269 }
 0x5e9   : > { %v3918_v35 = vpop.permute.xlu0 %3917  ;;  %v4664_v59 = vsel %vm13142_vm13, %v4632_v25, %v4270_v48  ;;  %vm13151_vm13 = vmmov %vm13143_vm0 }
 0x5ea   : > { %v10628_v58 = vpop.permute.xlu2 %3919  ;;  %v4696_v60 = vsel %vm13143_vm0, %v4664_v59, %v4398_v57  ;;  %vm13152_vm0 = vmmov %vm13146_vm2 }
 0x5eb   : > { %6744 = vmatmul.msk.f32.gmra.mxu2 %vm13144_vm5, %v4696_v60  ;;  %v4474_v60 = vsel %vm13145_vm11, %v10237_v46, %v10613_v47  ;;  %v3383_v46 = vld [vmem:[#allocation2 + $0x109] sm:$0xff] }
 0x5ee   : > { %3575 = vrot.lane.b32.xlu0 %v10513_v63, %s12529_s24  ;;  %3927 = vrot.lane.b32.xlu1 %v10529_v9, %s12654_s22  ;;  %v4878_v20 = vpop.f32.mrf.mxu2 }
 0x5ef   : > { %v4879_v0 = vadd.f32 %v10504_v31, %v4878_v20 }
 0x5f0   : > { %4409 = vrot.lane.b32.xlu2 %v3482_v39, %s12401_s16  ;;  %v3692_v57 = vpop.permute.xlu1 %3691 }
 0x5f1   : > { %vm4944_vm7 = vcmp.ge.f32.partialorder %v4879_v0, 0.0  ;;  %v4976_v26 = vmul.f32 0.01, %v4879_v0  ;;  %v4272_v63 = vpop.permute.xlu0 %4271  ;;  %v4505_v5 = vsel %vm13135_vm9, %v4473_v52, %v3692_v57 }
 0x5f2   : > { %v10647_v45 = vpop.permute.xlu2 %4273  ;;  %v4537_v11 = vsel %vm13138_vm12, %v4505_v5, %v10574_v42 }
 0x5f3   : > { %v5008_v41 = vsel %vm4944_vm7, %v4879_v0, %v4976_v26  ;;  %v4569_v37 = vsel %vm13147_vm8, %v4537_v11, %v3918_v35  ;;  %vm13156_vm8 = vmmov %vm13152_vm0 }
 0x5f4   : > { %5040 = vst.msk [vmem:[#allocation2 + $0x90] sm:$0xff] %vm13146_vm2, %v5008_v41  ;;  %vm13155_vm2 = vmmov %vm13152_vm0 }
 0x5f6   : > { %3929 = vrot.lane.b32.xlu0 %v10587_v7, %s12654_s22  ;;  %4281 = vrot.lane.b32.xlu1 %v10651_v4, %s12800_s0 }
 0x5f8   : > { %3831 = vrot.lane.b32.xlu2 %v3377_v50, %s12658_s23  ;;  %v4046_v53 = vpop.permute.xlu1 %4045  ;;  %v10713_v50 = vld [vmem:[#allocation2 + $0x111] sm:$0xff] }
 0x5f9   : > { %v3694_v36 = vpop.permute.xlu0 %3693  ;;  %v4601_v42 = vsel %vm13148_vm14, %v4569_v37, %v4046_v53  ;;  %vm13157_vm14 = vcmask 261120   ;;  %v3382_v53 = vld [vmem:[#allocation2 + $0x110] sm:$0xff] }
 0x5fa   : > { %v10665_v6 = vpop.permute.xlu2 %3695  ;;  %v4633_v13 = vsel %vm13149_vm4, %v4601_v42, %v10592_v8  ;;  %v4506_v0 = vsel %vm13155_vm2, %v4474_v60, %v3694_v36  ;;  %vm13158_vm4 = vcmask 326656   ;;  %v3453_v60 = vld [vmem:[#allocation2 + $0x119] sm:$0xff] }
 0x5fb   : > { %v5096_v14 = vld [vmem:[#allocation2 + $0x88] ss:$2 sm:$0xff]  ;;  %v5099_v28 = vld [vmem:[#allocation2 + $0x89] ss:$2 sm:$0xff]  ;;  %v4665_v32 = vsel %vm13150_vm15, %v4633_v13, %v4272_v63  ;;  %vm13159_vm15 = vcmask 392192  }
 0x5fc   : > { %v5097_v30 = vadd.f32 %v5096_v14, %v5094_v40  ;;  %v3243_v14 = vsel %vm13101_vm10, %v10299_v1, 0.0  ;;  %vm13164_vm10 = vmmov %vm13138_vm12 }
 0x5fe   : > { %v5100_v3 = vadd.f32 %v5099_v28, %v5097_v30  ;;  %4283 = vrot.lane.b32.xlu0 %v10671_v49, %s12800_s0  ;;  %3703 = vrot.lane.b32.xlu1 %v10499_v43, %s12588_s20  ;;  %v13153_v43 = vld [vmem:[#allocation147_spill] sm:$0xff] }
 0x5ff   : > { %vm13154_vm7 = vnez %v13153_v43 }
 0x600   : > { %4185 = vrot.lane.b32.xlu2 %v3447_v23, %s12400_s30  ;;  %v5148_v29 = vmul.f32 0.25, %v5100_v3  ;;  %v4400_v2 = vpop.permute.xlu1 %4399  ;;  %v3344_v35 = vsel %vm13154_vm7, %v10560_v44, 0.0  ;;  %v3484_v19 = vsel %vm13154_vm7, %v10713_v50, 0.0  ;;  %v3379_v3 = vsel %vm8322_vm6, %v10667_v55, 0.0  ;;  %v3348_v23 = vld [vmem:[#allocation2 + $0x10f] sm:$0xff]  ;;  %v3417_v55 = vld [vmem:[#allocation2 + $0x117] sm:$0xff] }
 0x601   : > { %v4048_v8 = vpop.permute.xlu0 %4047  ;;  %v4697_v51 = vsel %vm13151_vm13, %v4665_v32, %v4400_v2  ;;  %vm13160_vm13 = vcmask 457728  }
 0x602   : > { %5159 = vst.msk [vmem:[#allocation2 + $0x30] sm:$0xff] %vm13152_vm0, %v5148_v29  ;;  %v4050_v25 = vpop.permute.xlu2 %4049  ;;  %6745 = vmatmul.msk.f32.gmra.mxu2 %vm13144_vm5, %v4697_v51  ;;  %vm13161_vm0 = vcmask 523264  }
 0x605   : > { %v4881_v48 = vpop.f32.mrf.mxu2 }
 0x606   : > { %v4882_v59 = vadd.f32 %v10504_v31, %v4881_v48  ;;  %3705 = vrot.lane.b32.xlu0 %v3344_v35, %s12588_s20  ;;  %4057 = vrot.lane.b32.xlu1 %v10579_v54, %s12673_s15 }
 0x608   : > { %3577 = vrot.lane.b32.xlu2 %v10529_v9, %s12529_s24  ;;  %vm4945_vm9 = vcmp.ge.f32.partialorder %v4882_v59, 0.0  ;;  %v4977_v20 = vmul.f32 0.01, %v4882_v59  ;;  %v3822_v39 = vpop.permute.xlu1 %3821  ;;  %v3414_v9 = vsel %vm13154_vm7, %v10632_v21, 0.0  ;;  %vm13162_vm7 = vcmask 64512  }
 0x609   : > { %v4402_v44 = vpop.permute.xlu0 %4401  ;;  %v4538_v56 = vsel %vm13138_vm12, %v4506_v0, %v3822_v39  ;;  %vm13165_vm12 = vmmov %vm13157_vm14 }
 0x60a   : > { %v5009_v57 = vsel %vm4945_vm9, %v4882_v59, %v4977_v20  ;;  %v4404_v26 = vpop.permute.xlu2 %4403  ;;  %v4570_v63 = vsel %vm13157_vm14, %v4538_v56, %v10628_v58  ;;  %vm13163_vm9 = vmmov %vm13155_vm2 }
 0x60b   : > { %5041 = vst.msk [vmem:[#allocation2 + $0x98] sm:$0xff] %vm13156_vm8, %v5009_v57  ;;  %v4602_v47 = vsel %vm13158_vm4, %v4570_v63, %v4048_v8  ;;  %vm13166_vm8 = vmmov %vm13158_vm4  ;;  %v3451_v63 = vld [vmem:[#allocation2 + $0x118] sm:$0xff] }
 0x60c   : > { %vm13167_vm14 = vmmov %vm13159_vm15 }
 0x60d   : > { %vm13168_vm4 = vmmov %vm13160_vm13 }
 0x60e   : > { %4059 = vrot.lane.b32.xlu0 %v3414_v9, %s12673_s15  ;;  %4411 = vrot.lane.b32.xlu1 %v3383_v46, %s12401_s16 }
 0x610   : > { %3931 = vrot.lane.b32.xlu2 %v10651_v4, %s12654_s22  ;;  %v4176_v52 = vpop.permute.xlu1 %4175 }
 0x611   : > { %v3824_v41 = vpop.permute.xlu0 %3823  ;;  %v4634_v5 = vsel %vm13159_vm15, %v4602_v47, %v4176_v52  ;;  %vm13169_vm15 = vmmov %vm13161_vm0 }
 0x612   : > { %v3826_v11 = vpop.permute.xlu2 %3825  ;;  %v4666_v58 = vsel %vm13160_vm13, %v4634_v5, %v10647_v45  ;;  %vm13170_vm13 = vmmov %vm13144_vm5  ;;  %v3418_v5 = vld [vmem:[#allocation2 + $0x11f] sm:$0xff] }
 0x613   : > { %v4698_v22 = vsel %vm13161_vm0, %v4666_v58, %v4402_v44  ;;  %v13177_v58 = vld [vmem:[#allocation8_spill] sm:$0xff] }
 0x614   : > { %6746 = vmatmul.msk.f32.gmra.mxu2 %vm13144_vm5, %v4698_v22  ;;  %vm13171_vm5 = vmmov %vm13162_vm7  ;;  %v5168_v22 = vand.u32 7, %v13177_v58 }
 0x616   : > { %4413 = vrot.lane.b32.xlu0 %v3484_v19, %s12401_s16  ;;  %3833 = vrot.lane.b32.xlu1 %v10616_v18, %s12658_s23  ;;  %v13178_v19 = vld [vmem:[#allocation9_spill] sm:$0xff] }
 0x617   : > { %v4884_v36 = vpop.f32.mrf.mxu2 }
 0x618   : > { %4285 = vrot.lane.b32.xlu2 %v3382_v53, %s12800_s0  ;;  %v4885_v45 = vadd.f32 %v10504_v31, %v4884_v36  ;;  %v3568_v37 = vpop.permute.xlu1 %3567 }
 0x619   : > { %v4178_v40 = vpop.permute.xlu0 %4177  ;;  %v4475_v28 = vsel %vm13162_vm7, %v3243_v14, %v3568_v37  ;;  %vm13173_vm7 = vmmov %vm13155_vm2  ;;  %v5301_v37 = vld [vmem:[#allocation2 + $0x19] sm:$0xff] }
 0x61a   : > { %vm4946_vm11 = vcmp.ge.f32.partialorder %v4885_v45, 0.0  ;;  %v4978_v42 = vmul.f32 0.01, %v4885_v45  ;;  %v4180_v30 = vpop.permute.xlu2 %4179  ;;  %v4507_v29 = vsel %vm13155_vm2, %v4475_v28, %v10665_v6  ;;  %v3449_v6 = vsel %vm8322_vm6, %v3417_v55, 0.0 }
 0x61b   : > { %v4539_v2 = vsel %vm13164_vm10, %v4507_v29, %v3824_v41  ;;  %v3452_v41 = vld [vmem:[#allocation2 + $0x120] sm:$0xff]  ;;  %v5293_v29 = vld [vmem:[#allocation2 + $0x18] sm:$0xff] }
 0x61c   : > { %v5010_v13 = vsel %vm4946_vm11, %v4885_v45, %v4978_v42  ;;  %vm13172_vm11 = vmmov %vm13155_vm2 }
 0x61d   : > { %5042 = vst.msk [vmem:[#allocation2 + $0xa0] sm:$0xff] %vm13163_vm9, %v5010_v13  ;;  %vm13174_vm9 = vmmov %vm13164_vm10 }
 0x61e   : > { %3835 = vrot.lane.b32.xlu0 %v3379_v3, %s12658_s23  ;;  %4187 = vrot.lane.b32.xlu1 %v3348_v23, %s12400_s30  ;;  %vm13175_vm2 = vmmov %vm13165_vm12 }
 0x61f   : > { %vm13176_vm10 = vmmov %vm13166_vm8 }
 0x620   : > { %3707 = vrot.lane.b32.xlu2 %v10579_v54, %s12588_s20  ;;  %v3922_v33 = vpop.permute.xlu1 %3921 }
 0x621   : > { %v3570_v1 = vpop.permute.xlu0 %3569  ;;  %v4571_v32 = vsel %vm13165_vm12, %v4539_v2, %v3922_v33  ;;  %vm13179_vm12 = vmmov %vm13167_vm14 }
 0x622   : > { %v10741_v8 = vpop.permute.xlu2 %3571  ;;  %v4603_v51 = vsel %vm13166_vm8, %v4571_v32, %v4050_v25  ;;  %v4476_v57 = vsel %vm13171_vm5, %v10322_v27, %v3570_v1  ;;  %vm13180_vm8 = vnez %v12861_v17 }
 0x623   : > { %v4635_v54 = vsel %vm13167_vm14, %v4603_v51, %v4178_v40  ;;  %v3346_v36 = vsel %vm13180_vm8, %v10632_v21, 0.0  ;;  %v3416_v32 = vsel %vm13180_vm8, %v10713_v50, 0.0 }
 0x626   : > { %4189 = vrot.lane.b32.xlu0 %v3449_v6, %s12400_s30  ;;  %3579 = vrot.lane.b32.xlu1 %v10587_v7, %s12529_s24  ;;  %v10808_v6 = vld [vmem:[#allocation2 + $0x21] sm:$0xff] }
 0x628   : > { %4061 = vrot.lane.b32.xlu2 %v3383_v46, %s12673_s15  ;;  %v4276_v48 = vpop.permute.xlu1 %4275 }
 0x629   : > { %v3924_v43 = vpop.permute.xlu0 %3923  ;;  %v4667_v35 = vsel %vm13168_vm4, %v4635_v54, %v4276_v48  ;;  %v3245_v54 = vsel %vm12804_vm1, %v10376_v12, 0.0  ;;  %vm13187_vm1 = vmmov %vm13173_vm7 }
 0x62a   : > { %v10752_v59 = vpop.permute.xlu2 %3925  ;;  %v4699_v25 = vsel %vm13169_vm15, %v4667_v35, %v4404_v26  ;;  %vm10790_vm15 = vcmp.lt.s32.totalorder %v5168_v22, 7  ;;  %v4477_v48 = vsel %vm13171_vm5, %v3245_v54, %v10741_v8  ;;  %v3454_v35 = vld [vmem:[#allocation2 + $0x121] sm:$0xff]  ;;  %vm13195_vm5 = vcmask 588800  }
 0x62b   : > { %6747 = vmatmul.msk.f32.gmra.mxu2 %vm13170_vm13, %v4699_v25  ;;  %vm13185_vm13 = vcmask 523264   ;;  %v3486_v8 = vsel %vm13180_vm8, %v3454_v35, 0.0  ;;  %v5296_v35 = vld [vmem:[#allocation2 + $0x30] sm:$0xff] }
 0x62e   : > { %3581 = vrot.lane.b32.xlu0 %v10651_v4, %s12529_s24  ;;  %3933 = vrot.lane.b32.xlu1 %v10671_v49, %s12654_s22  ;;  %v4887_v7 = vpop.f32.mrf.mxu2 }
 0x62f   : > { %v4888_v20 = vadd.f32 %v10504_v31, %v4887_v7 }
 0x630   : > { %4415 = vrot.lane.b32.xlu2 %v3453_v60, %s12401_s16  ;;  %v3698_v39 = vpop.permute.xlu1 %3697 }
 0x631   : > { %vm4947_vm0 = vcmp.ge.f32.partialorder %v4888_v20, 0.0  ;;  %v4979_v0 = vmul.f32 0.01, %v4888_v20  ;;  %v4278_v44 = vpop.permute.xlu0 %4277  ;;  %v4508_v4 = vsel %vm13172_vm11, %v4476_v57, %v3698_v39  ;;  %v5294_v39 = vld [vmem:[#allocation2 + $0x20] sm:$0xff] }
 0x632   : > { %v10764_v56 = vpop.permute.xlu2 %4279  ;;  %v4540_v49 = vsel %vm13174_vm9, %v4508_v4, %v3826_v11  ;;  %v5175_v11 = vand.u32 7, %v13178_v19  ;;  %v5102_v4 = vld [vmem:[#allocation2 + $0x98] ss:$2 sm:$0xff] }
 0x633   : > { %v5011_v26 = vsel %vm4947_vm0, %v4888_v20, %v4979_v0  ;;  %v4572_v27 = vsel %vm13175_vm2, %v4540_v49, %v3924_v43  ;;  %vm13186_vm0 = vcmask 588800   ;;  %v5327_v0 = vsel %vm10790_vm15, %v5301_v37, 0.0  ;;  %v10832_v49 = vld [vmem:[#allocation2 + $0x1f] sm:$0xff] }
 0x634   : > { %5043 = vst.msk [vmem:[#allocation2 + $0xa8] sm:$0xff] %vm13173_vm7, %v5011_v26  ;;  %vm10784_vm14 = vcmp.lt.s32.totalorder %v5175_v11, 7  ;;  %v6863_v26 = vpack.i.bf16 %v5294_v39, %v5293_v29  ;;  %vm10840_vm8 = vcmp.gt.s32.totalorder %v5175_v11, 0 }
 0x635   : > { %v5309_v13 = vsel %vm10784_vm14, %v5301_v37, 0.0  ;;  %v5328_v7 = vsel %vm10784_vm14, %v10808_v6, 0.0 }
 0x636   : > { %3935 = vrot.lane.b32.xlu0 %v3382_v53, %s12654_s22  ;;  %4287 = vrot.lane.b32.xlu1 %v3451_v63, %s12800_s0  ;;  %v5104_v63 = vld [vmem:[#allocation2 + $0x99] ss:$2 sm:$0xff] }
 0x638   : > { %3837 = vrot.lane.b32.xlu2 %v3348_v23, %s12658_s23  ;;  %v4052_v9 = vpop.permute.xlu1 %4051  ;;  %v5292_v23 = vld [vmem:[#allocation2 + $0x10] sm:$0xff]  ;;  %s12071_s23 = smov 80  }
 0x639   : > { %v3700_v46 = vpop.permute.xlu0 %3699  ;;  %v4604_v47 = vsel %vm13176_vm10, %v4572_v27, %v4052_v9  ;;  %v6848_v55 = vpack.i.bf16 %v5293_v29, %v5292_v23  ;;  %v10844_v27 = vld [vmem:[#allocation2 + $0x17] sm:$0xff] }
 0x63a   : > { %v10774_v52 = vpop.permute.xlu2 %3701  ;;  %v4636_v53 = vsel %vm13179_vm12, %v4604_v47, %v4180_v30  ;;  %v5300_v30 = vld [vmem:[#allocation2 + $0x11] sm:$0xff]  ;;  %v4509_v25 = vsel %vm13173_vm7, %v4477_v48, %v3700_v46  ;;  %vm10836_vm12 = vcmp.gt.s32.totalorder %v5168_v22, 0  ;;  %v13188_v46 = vmov 0  ;;  %vm13200_vm7 = vmmov %vm13187_vm1 }
 0x63b   : > { %v4668_v40 = vsel %vm13168_vm4, %v4636_v53, %v4278_v44  ;;  %v5308_v33 = vsel %vm10790_vm15, %v5300_v30, 0.0  ;;  %v6868_v44 = vpack.i.bf16 %v5328_v7, %v5327_v0  ;;  %v13189_v46 = vsel %vm10836_vm12, 4294967295, %v13188_v46  ;;  %v5295_v53 = vld [vmem:[#allocation2 + $0x28] sm:$0xff]  ;;  %v13196_v23 = vld [vmem:[#allocation13_spill] sm:$0xff] }
 0x63c   : > { %v6853_v1 = vpack.i.bf16 %v5309_v13, %v5308_v33  ;;  %v5105_v47 = vadd.f32 %v5104_v63, %v5102_v4  ;;  %vm13192_vm4 = vcmask 392192   ;;  %v5317_v30 = vsel %vm10836_vm12, %v10844_v27, 0.0 }
 0x63d   : > { %v5189_v29 = vand.u32 7, %v13196_v23  ;;  %v6898_v0 = vpack.i.bf16 %v5296_v35, %v5295_v53  ;;  %v13205_v63 = vmov 0 }
 0x63e   : > { %4289 = vrot.lane.b32.xlu0 %v3452_v41, %s12800_s0  ;;  %3709 = vrot.lane.b32.xlu1 %v3346_v36, %s12588_s20  ;;  %v5318_v36 = vsel %vm10840_vm8, %v10832_v49, 0.0  ;;  %s7262_s0 = smov 96  }
 0x63f   : > { %v6858_v13 = vpack.i.bf16 %v5318_v36, %v5317_v30 }
 0x640   : > { %4191 = vrot.lane.b32.xlu2 %v3418_v5, %s12400_s30  ;;  %v4406_v42 = vpop.permute.xlu1 %4405 }
 0x641   : > { %v4054_v21 = vpop.permute.xlu0 %4053  ;;  %v4700_v28 = vsel %vm13185_vm13, %v4668_v40, %v4406_v42  ;;  %vm13193_vm13 = vcmask 457728  }
 0x642   : > { %v10797_v3 = vpop.permute.xlu2 %4055  ;;  %6748 = vmatmul.msk.f32.gmra.mxu2 %vm13186_vm0, %v4700_v28  ;;  %vm13194_vm0 = vcmask 523264   ;;  %v6883_v28 = vpack.i.bf16 %v5295_v53, %v5294_v39  ;;  %v5336_v39 = vsel %vm10836_vm12, %v10832_v49, 0.0 }
 0x645   : > { %v4890_v2 = vpop.f32.mrf.mxu2 }
 0x646   : > { %v4891_v51 = vadd.f32 %v10504_v31, %v4890_v2  ;;  %4063 = vrot.lane.b32.xlu1 %v3416_v32, %s12673_s15  ;;  %6854 = vrot.lane.b32.xlu0 %v6853_v1, %s12654_s22  ;;  %v13197_v1 = vld [vmem:[#allocation11_spill] sm:$0xff]  ;;  %s7261_s15 = smov 112  }
 0x647   : > { %v5182_v2 = vand.u32 7, %v13197_v1 }
 0x648   : > { %6849 = vrot.lane.b32.xlu2 %v6848_v55, %s12588_s20  ;;  %vm4948_vm11 = vcmp.ge.f32.partialorder %v4891_v51, 0.0  ;;  %v4980_v50 = vmul.f32 0.01, %v4891_v51  ;;  %v3828_v43 = vpop.permute.xlu1 %3827 }
 0x649   : > { %v4408_v60 = vpop.permute.xlu0 %4407  ;;  %v4541_v34 = vsel %vm13174_vm9, %v4509_v25, %v3828_v43 }
 0x64a   : > { %v5012_v20 = vsel %vm4948_vm11, %v4891_v51, %v4980_v50  ;;  %v10821_v12 = vpop.permute.xlu2 %4409  ;;  %v4573_v57 = vsel %vm13175_vm2, %v4541_v34, %v10752_v59  ;;  %v13190_v59 = vmov 0  ;;  %v10866_v51 = vld [vmem:[#allocation2 + $0x2f] sm:$0xff]  ;;  %vm10869_vm11 = vcmp.gt.s32.totalorder %v5189_v29, 0 }
 0x64b   : > { %5044 = vst.msk [vmem:[#allocation2 + $0xb0] sm:$0xff] %vm13187_vm1, %v5012_v20  ;;  %v4605_v17 = vsel %vm13176_vm10, %v4573_v57, %v4054_v21  ;;  %v13191_v59 = vsel %vm10840_vm8, 4294967295, %v13190_v59  ;;  %v13198_v50 = vmov 0  ;;  %v5320_v7 = vsel %vm10869_vm11, %v10866_v51, 0.0  ;;  %vm13204_vm10 = vmmov %vm13200_vm7 }
 0x64c   : > { %v13199_v50 = vsel %vm10869_vm11, 4294967295, %v13198_v50  ;;  %vm10880_vm1 = vcmp.gt.s32.totalorder %v5182_v2, 0  ;;  %v13201_v20 = vmov 0  ;;  %vm13203_vm2 = vcmask 64512  }
 0x64d   : > { %v13202_v20 = vsel %vm10880_vm1, 4294967295, %v13201_v20 }
 0x64e   : > { %4417 = vrot.lane.b32.xlu1 %v3486_v8, %s12401_s16  ;;  %6869 = vrot.lane.b32.xlu0 %v6868_v44, %s12071_s23 }
 0x650   : > { %6864 = vrot.lane.b32.xlu2 %v6863_v26, %s12401_s16  ;;  %v4182_v9 = vpop.permute.xlu1 %4181 }
 0x651   : > { %v3830_v41 = vpop.permute.xlu0 %3829  ;;  %v4637_v5 = vsel %vm13192_vm4, %v4605_v17, %v4182_v9  ;;  %vm10893_vm4 = vcmp.lt.s32.totalorder %v5189_v29, 7  ;;  %v10901_v17 = vld [vmem:[#allocation2 + $0x29] sm:$0xff]  ;;  %v13208_v9 = vmov 0 }
 0x652   : > { %v5107_v37 = vld [vmem:[#allocation2 + $0xa8] ss:$2 sm:$0xff]  ;;  %v4669_v22 = vsel %vm13193_vm13, %v4637_v5, %v10764_v56  ;;  %v10852_v11 = vpop.permute.xlu2 %3831  ;;  %v5110_v21 = vld [vmem:[#allocation2 + $0xa9] ss:$2 sm:$0xff]  ;;  %v13206_v63 = vsel %vm10893_vm4, 4294967295, %v13205_v63  ;;  %vm13207_vm13 = vmmov %vm13200_vm7 }
 0x653   : > { %v5108_v40 = vadd.f32 %v5107_v37, %v5105_v47  ;;  %v4701_v42 = vsel %vm13194_vm0, %v4669_v22, %v4408_v60  ;;  %v10862_v56 = vld [vmem:[#allocation2 + $0x27] sm:$0xff]  ;;  %vm10904_vm0 = vcmp.lt.s32.totalorder %v5182_v2, 7  ;;  %v5311_v37 = vsel %vm10893_vm4, %v10901_v17, 0.0 }
 0x654   : > { %6749 = vmatmul.msk.f32.gmra.mxu2 %vm13195_vm5, %v4701_v42  ;;  %v5337_v25 = vsel %vm10840_vm8, %v10862_v56, 0.0  ;;  %v5319_v57 = vsel %vm10880_vm1, %v10862_v56, 0.0  ;;  %v13209_v9 = vsel %vm10904_vm0, 4294967295, %v13208_v9  ;;  %vm13210_vm5 = vcmask 195584  }
 0x655   : > { %v5111_v33 = vadd.f32 %v5110_v21, %v5108_v40  ;;  %v6873_v44 = vpack.i.bf16 %v5337_v25, %v5336_v39  ;;  %v6893_v4 = vpack.i.bf16 %v5320_v7, %v5319_v57  ;;  %v5310_v42 = vsel %vm10904_vm0, %v10808_v6, 0.0 }
 0x656   : > { %6884 = vrot.lane.b32.xlu0 %v6883_v28, %s12588_s20  ;;  %6859 = vrot.lane.b32.xlu1 %v6858_v13, %s12400_s30  ;;  %v6888_v21 = vpack.i.bf16 %v5311_v37, %v5310_v42  ;;  %v3247_v25 = vsel %vm12874_vm3, %v10471_v15, 0.0  ;;  %vm13222_vm3 = vcmask 326656  }
 0x657   : > { %v5149_v32 = vmul.f32 0.25, %v5111_v33  ;;  %v4893_v55 = vpop.f32.mrf.mxu2 }
 0x658   : > { %6879 = vrot.lane.b32.xlu2 %v6883_v28, %s7261_s15  ;;  %v4894_v54 = vadd.f32 %v10504_v31, %v4893_v55  ;;  %v3574_v48 = vpop.permute.xlu1 %3573  ;;  %v5329_v55 = vsel %vm10904_vm0, %v10901_v17, 0.0  ;;  %vm13235_vm0 = vcmask 523264  }
 0x659   : > { %5160 = vst.msk [vmem:[#allocation2 + $0x38] sm:$0xff] %vm13200_vm7, %v5149_v32  ;;  %v4184_v43 = vpop.permute.xlu0 %4183  ;;  %v4478_v34 = vsel %vm13203_vm2, %v10458_v16, %v3574_v48  ;;  %vm13211_vm7 = vcmask 261120   ;;  %vm13213_vm2 = vcmask 392192  }
 0x65a   : > { %vm4949_vm9 = vcmp.ge.f32.partialorder %v4894_v54, 0.0  ;;  %v4981_v60 = vmul.f32 0.01, %v4894_v54  ;;  %v4186_v26 = vpop.permute.xlu2 %4185  ;;  %v4510_v16 = vsel %vm13207_vm13, %v4478_v34, %v10774_v52  ;;  %vm13215_vm13 = vcmask 523264  }
 0x65b   : > { %v4542_v36 = vsel %vm13210_vm5, %v4510_v16, %v3830_v41  ;;  %v5338_v41 = vsel %vm10880_vm1, %v10866_v51, 0.0  ;;  %vm13216_vm5 = vcmask 588800  }
 0x65c   : > { %v5013_v8 = vsel %vm4949_vm9, %v4894_v54, %v4981_v60  ;;  %vm13212_vm9 = vcmask 326656  }
 0x65d   : > { %5045 = vst.msk [vmem:[#allocation2 + $0xb8] sm:$0xff] %vm13204_vm10, %v5013_v8  ;;  %vm13214_vm10 = vcmask 457728  }
 0x65e   : > { %6899 = vrot.lane.b32.xlu0 %v6898_v0, %s12401_s16  ;;  %6874 = vrot.lane.b32.xlu1 %v6873_v44, %s7262_s0 }
 0x660   : > { %6894 = vrot.lane.b32.xlu2 %v6893_v4, %s12400_s30  ;;  %v3928_v47 = vpop.permute.xlu1 %3927  ;;  %v10908_v5 = vld [vmem:[#allocation2 + $0x37] sm:$0xff] }
 0x661   : > { %v3576_v53 = vpop.permute.xlu0 %3575  ;;  %v10911_v52 = vld [vmem:[#allocation2 + $0x38] sm:$0xff]  ;;  %v4574_v22 = vsel %vm13211_vm7, %v4542_v36, %v3928_v47  ;;  %v5339_v40 = vsel %vm10869_vm11, %v10908_v5, 0.0 }
 0x662   : > { %v6913_v30 = vpack.i.bf16 %v10911_v52, %v5296_v35  ;;  %v4606_v28 = vsel %vm13212_vm9, %v4574_v22, %v10797_v3  ;;  %v6908_v13 = vpack.i.bf16 %v5339_v40, %v5338_v41  ;;  %v10931_v23 = vld [vmem:[#allocation2 + $0x31] sm:$0xff]  ;;  %v3578_v29 = vpop.permute.xlu2 %3577  ;;  %vm13217_vm9 = vcmask 64512  }
 0x663   : > { %v4638_v6 = vsel %vm13213_vm2, %v4606_v28, %v4184_v43  ;;  %v5330_v3 = vsel %vm10893_vm4, %v10931_v23, 0.0  ;;  %v4479_v34 = vsel %vm13217_vm9, %v3247_v25, %v3576_v53  ;;  %vm13218_vm2 = vcmask 130048  }
 0x664   : > { %v6903_v54 = vpack.i.bf16 %v5330_v3, %v5329_v55  ;;  %vm13223_vm4 = vcmask 392192   ;;  %vm13224_vm9 = vcmask 457728   ;;  %v5638_v55 = vld [vmem:[%s11910_s7 + $0x78] sm:$0xff] }
 0x665   : > { %5669 = vmatpush.msra.mxu3 %v5638_v55 }
 0x666   : > { %6914 = vrot.lane.b32.xlu0 %v6913_v30, %s7261_s15  ;;  %6889 = vrot.lane.b32.xlu1 %v6888_v21, %s12654_s22 }
 0x668   : > { %6909 = vrot.lane.b32.xlu2 %v6908_v13, %s7262_s0  ;;  %v4282_v33 = vpop.permute.xlu1 %4281 }
 0x669   : > { %v3930_v1 = vpop.permute.xlu0 %3929  ;;  %v4670_v2 = vsel %vm13214_vm10, %v4638_v6, %v4282_v33  ;;  %vm13219_vm10 = vmmov %vm13218_vm2 }
 0x66a   : > { %v4702_v32 = vsel %vm13215_vm13, %v4670_v2, %v10821_v12  ;;  %v3932_v60 = vpop.permute.xlu2 %3931  ;;  %vm13220_vm13 = vcmask 195584  }
 0x66b   : > { %6750 = vmatmul.msk.f32.gmra.mxu2 %vm13216_vm5, %v4702_v32  ;;  %vm13221_vm5 = vcmask 261120  }
 0x66e   : > { %v4896_v48 = vpop.f32.mrf.mxu2  ;;  %6904 = vrot.lane.b32.xlu1 %v6903_v54, %s12071_s23 }
 0x66f   : > { %v4897_v43 = vadd.f32 %v10504_v31, %v4896_v48  ;;  %v5637_v48 = vld [vmem:[%s11910_s7 + $0x70] sm:$0xff] }
 0x670   : > { %v3704_v35 = vpop.permute.xlu1 %3703  ;;  %5670 = vmatpush.msra.mxu3 %v5637_v48  ;;  %v13244_v48 = vld [vmem:[#allocation16_spill] sm:$0xff] }
 0x671   : > { %vm4950_vm7 = vcmp.ge.f32.partialorder %v4897_v43, 0.0  ;;  %v4982_v12 = vmul.f32 0.01, %v4897_v43  ;;  %v4284_v7 = vpop.permute.xlu0 %4283  ;;  %v4511_v8 = vsel %vm13218_vm2, %v4479_v34, %v3704_v35  ;;  %vm13226_vm2 = vcmask 588800  }
 0x672   : > { %v4543_v0 = vsel %vm13220_vm13, %v4511_v8, %v10852_v11  ;;  %v4286_v4 = vpop.permute.xlu2 %4285  ;;  %v5636_v8 = vld [vmem:[%s11910_s7 + $0x68] sm:$0xff] }
 0x673   : > { %v5014_v39 = vsel %vm4950_vm7, %v4897_v43, %v4982_v12  ;;  %v4575_v24 = vsel %vm13221_vm5, %v4543_v0, %v3930_v1  ;;  %vm13225_vm7 = vcmask 523264   ;;  %vm13228_vm5 = vcmask 130048   ;;  %v5635_v0 = vld [vmem:[%s11910_s7 + $0x60] sm:$0xff]  ;;  %5671 = vmatpush.msra.mxu3 %v5636_v8 }
 0x674   : > { %5046 = vst.msk [vmem:[#allocation2 + $0xc0] sm:$0xff] %vm13219_vm10, %v5014_v39  ;;  %vm13227_vm10 = vcmask 64512  }
 0x675   : > { %v4480_v42 = vsel %vm13227_vm10, %v10537_v62, %v3578_v29  ;;  %vm13234_vm10 = vcmask 457728   ;;  %5672 = vmatpush.msra.mxu3 %v5635_v0 }
 0x676   : > { %6919 = vrot.lane.b32.xlu1 %v6913_v30, %s12588_s20 }
 0x677   : > { %5673 = vmatpush.msra.mxu3 %v5634_v38 }
 0x678   : > { %v4058_v44 = vpop.permute.xlu1 %4057 }
 0x679   : > { %v3706_v57 = vpop.permute.xlu0 %3705  ;;  %v4607_v15 = vsel %vm13222_vm3, %v4575_v24, %v4058_v44  ;;  %vm13230_vm3 = vmmov %vm13228_vm5 }
 0x67a   : > { %v4639_v16 = vsel %vm13223_vm4, %v4607_v15, %v4186_v26  ;;  %v3708_v11 = vpop.permute.xlu2 %3707  ;;  %v4512_v26 = vsel %vm13228_vm5, %v4480_v42, %v3706_v57  ;;  %vm13229_vm4 = vcmask 195584   ;;  %vm13236_vm5 = vcmask 588800   ;;  %v5633_v15 = vld [vmem:[%s11910_s7 + $0x50] sm:$0xff] }
 0x67b   : > { %v4671_v47 = vsel %vm13224_vm9, %v4639_v16, %v4284_v7  ;;  %vm13231_vm9 = vcmask 261120   ;;  %v3249_v7 = vsel %vm8322_vm6, %v10594_v10, 0.0  ;;  %v5113_v10 = vld [vmem:[#allocation2 + $0xb8] ss:$2 sm:$0xff]  ;;  %v5115_v57 = vld [vmem:[#allocation2 + $0xb9] ss:$2 sm:$0xff]  ;;  %5674 = vmatpush.msra.mxu3 %v5633_v15 }
 0x67c   : > { %vm13239_vm6 = vcmask 195584  }
 0x680   : > { %v4412_v53 = vpop.permute.xlu1 %4411 }
 0x681   : > { %v4060_v36 = vpop.permute.xlu0 %4059  ;;  %v4703_v37 = vsel %vm13225_vm7, %v4671_v47, %v4412_v53  ;;  %vm13232_vm7 = vcmask 326656   ;;  %v5116_v53 = vadd.f32 %v5115_v57, %v5113_v10  ;;  %v13252_v10 = vmov 0 }
 0x682   : > { %6751 = vmatmul.msk.f32.gmra.mxu2 %vm13226_vm2, %v4703_v37  ;;  %v4062_v33 = vpop.permute.xlu2 %4061  ;;  %vm13233_vm2 = vcmask 392192   ;;  %v5632_v37 = vld [vmem:[%s11910_s7 + $0x48] sm:$0xff] }
 0x683   : > { %5675 = vmatpush.msra.mxu3 %v5632_v37 }
 0x685   : > { %v4899_v22 = vpop.f32.mrf.mxu2 }
 0x686   : > { %v4900_v40 = vadd.f32 %v10504_v31, %v4899_v22  ;;  %v5631_v22 = vld [vmem:[%s11910_s7 + $0x40] sm:$0xff] }
 0x687   : > { %5676 = vmatpush.msra.mxu3 %v5631_v22  ;;  %v5623_v22 = vld [vmem:[%s11910_s7] sm:$0xff] }
 0x688   : > { %vm4951_vm13 = vcmp.ge.f32.partialorder %v4900_v40, 0.0  ;;  %v4983_v30 = vmul.f32 0.01, %v4900_v40  ;;  %v3834_v21 = vpop.permute.xlu1 %3833 }
 0x689   : > { %v4414_v41 = vpop.permute.xlu0 %4413  ;;  %v4544_v13 = vsel %vm13229_vm4, %v4512_v26, %v3834_v21  ;;  %vm13238_vm4 = vmmov %vm13230_vm3 }
 0x68a   : > { %v5015_v28 = vsel %vm4951_vm13, %v4900_v40, %v4983_v30  ;;  %v4576_v6 = vsel %vm13231_vm9, %v4544_v13, %v3932_v60  ;;  %v4416_v25 = vpop.permute.xlu2 %4415 }
 0x68b   : > { %5047 = vst.msk [vmem:[#allocation2 + $0xc8] sm:$0xff] %vm13230_vm3, %v5015_v28  ;;  %v4608_v1 = vsel %vm13232_vm7, %v4576_v6, %v4060_v36  ;;  %v5630_v28 = vld [vmem:[%s11910_s7 + $0x38] sm:$0xff] }
 0x68c   : > { %5677 = vmatpush.msra.mxu3 %v5630_v28 }
 0x690   : > { %v4188_v2 = vpop.permute.xlu1 %4187 }
 0x691   : > { %v3836_v3 = vpop.permute.xlu0 %3835  ;;  %v4640_v62 = vsel %vm13233_vm2, %v4608_v1, %v4188_v2 }
 0x692   : > { %v4672_v29 = vsel %vm13234_vm10, %v4640_v62, %v4286_v4  ;;  %v3838_v36 = vpop.permute.xlu2 %3837 }
 0x693   : > { %v4704_v32 = vsel %vm13235_vm0, %v4672_v29, %v4414_v41  ;;  %vm13237_vm0 = vcmask 64512   ;;  %v13243_v29 = vld [vmem:[#allocation15_spill] sm:$0xff] }
 0x694   : > { %6752 = vmatmul.msk.f32.gmra.mxu2 %vm13236_vm5, %v4704_v32  ;;  %vm13240_vm5 = vcmask 523264   ;;  %v5196_v32 = vand.u32 7, %v13243_v29 }
 0x697   : > { %v4902_v54 = vpop.f32.mrf.mxu2 }
 0x698   : > { %v4903_v43 = vadd.f32 %v10504_v31, %v4902_v54  ;;  %v3580_v35 = vpop.permute.xlu1 %3579  ;;  %v5627_v54 = vld [vmem:[%s11910_s7 + $0x20] sm:$0xff] }
 0x699   : > { %v4190_v60 = vpop.permute.xlu0 %4189  ;;  %v4481_v34 = vsel %vm13237_vm0, %v3249_v7, %v3580_v35  ;;  %vm13242_vm0 = vcmask 588800   ;;  %v13247_v7 = vmov 0 }
 0x69a   : > { %vm4952_vm13 = vcmp.ge.f32.partialorder %v4903_v43, 0.0  ;;  %v4984_v12 = vmul.f32 0.01, %v4903_v43  ;;  %v4513_v44 = vsel %vm13230_vm3, %v4481_v34, %v3708_v11  ;;  %v4192_v62 = vpop.permute.xlu2 %4191 }
 0x69b   : > { %v4545_v16 = vsel %vm13239_vm6, %v4513_v44, %v3836_v3  ;;  %v5628_v3 = vld [vmem:[%s11910_s7 + $0x28] sm:$0xff] }
 0x69c   : > { %v5016_v39 = vsel %vm4952_vm13, %v4903_v43, %v4984_v12  ;;  %vm13241_vm13 = vmmov %vm13230_vm3  ;;  %v5203_v43 = vand.u32 7, %v13244_v48  ;;  %v6471_v12 = vld [vmem:[%s11914_s11 + $0x78] sm:$0xff] }
 0x69d   : > { %5048 = vst.msk [vmem:[#allocation2 + $0xd0] sm:$0xff] %vm13238_vm4, %v5016_v39  ;;  %vm11031_vm4 = vcmp.lt.s32.totalorder %v5196_v32, 7  ;;  %6502 = vmatpush.msrb.mxu0 %v6471_v12  ;;  %6780 = vmatpush.msrb.mxu2 %v6471_v12 }
 0x69e   : > { %vm11035_vm3 = vcmp.lt.s32.totalorder %v5203_v43, 7 }
 0x69f   : > { %v13248_v7 = vsel %vm11035_vm3, 4294967295, %v13247_v7 }
 0x6a0   : > { %v3934_v24 = vpop.permute.xlu1 %3933 }
 0x6a1   : > { %v3582_v4 = vpop.permute.xlu0 %3581  ;;  %v4577_v47 = vsel %vm13231_vm9, %v4545_v16, %v3934_v24  ;;  %vm11039_vm9 = vcmp.gt.s32.totalorder %v5196_v32, 0 }
 0x6a2   : > { %v4609_v42 = vsel %vm13232_vm7, %v4577_v47, %v4062_v33  ;;  %v5629_v33 = vld [vmem:[%s11910_s7 + $0x30] sm:$0xff]  ;;  %vm13251_vm7 = vcmask 64512   ;;  %v5321_v16 = vsel %vm11039_vm9, %v10908_v5, 0.0 }
 0x6a3   : > { %v4641_v26 = vsel %vm13233_vm2, %v4609_v42, %v4190_v60  ;;  %5678 = vmatpush.msra.mxu3 %v5629_v33  ;;  %v5626_v60 = vld [vmem:[%s11910_s7 + $0x18] sm:$0xff]  ;;  %v4482_v8 = vsel %vm13251_vm7, %v10616_v18, %v3582_v4  ;;  %vm11051_vm2 = vcmp.gt.s32.totalorder %v5203_v43, 0  ;;  %v5625_v18 = vld [vmem:[%s11910_s7 + $0x10] sm:$0xff]  ;;  %v5624_v4 = vld [vmem:[%s11910_s7 + $0x8] sm:$0xff]  ;;  %v6850_v42 = vpop.permute.xlu2 %6849  ;;  %vm13259_vm7 = vcmask 392192  }
 0x6a4   : > { %v5118_v11 = vld [vmem:[#allocation2 + $0xc8] ss:$2 sm:$0xff]  ;;  %v5121_v30 = vld [vmem:[#allocation2 + $0xc9] ss:$2 sm:$0xff]  ;;  %v13253_v10 = vsel %vm11051_vm2, 4294967295, %v13252_v10  ;;  %v6851_v32 = vunpack.i.l.bf16 %v6850_v42 }
 0x6a5   : > { %v5119_v40 = vadd.f32 %v5118_v11, %v5116_v53  ;;  %5679 = vmatpush.msra.mxu3 %v5628_v3  ;;  %v5276_v3 = vld [vmem:[#allocation2 + $0xf] sm:$0xff] }
 0x6a7   : > { %v5122_v21 = vadd.f32 %v5121_v30, %v5119_v40  ;;  %5680 = vmatpush.msra.mxu3 %v5627_v54 }
 0x6a8   : > { %v4288_v41 = vpop.permute.xlu1 %4287 }
 0x6a9   : > { %v5150_v13 = vmul.f32 0.25, %v5122_v21  ;;  %v3936_v6 = vpop.permute.xlu0 %3935  ;;  %v4673_v1 = vsel %vm13234_vm10, %v4641_v26, %v4288_v41  ;;  %5681 = vmatpush.msra.mxu3 %v5626_v60  ;;  %vm13254_vm10 = vmmov %vm13241_vm13 }
 0x6aa   : > { %v4705_v2 = vsel %vm13240_vm5, %v4673_v1, %v4416_v25  ;;  %vm13255_vm5 = vmmov %vm13254_vm10 }
 0x6ab   : > { %5161 = vst.msk [vmem:[#allocation2 + $0x40] sm:$0xff] %vm13241_vm13, %v5150_v13  ;;  %6753 = vmatmul.msk.f32.gmra.mxu2 %vm13242_vm0, %v4705_v2  ;;  %5682 = vmatpush.msra.mxu3 %v5625_v18  ;;  %vm13256_vm13 = vcmask 195584   ;;  %vm13257_vm0 = vcmask 261120   ;;  %v6865_v2 = vpop.permute.xlu2 %6864 }
 0x6ad   : > { %5683 = vmatpush.msra.mxu3 %v5624_v4 }
 0x6ae   : > { %v4905_v55 = vpop.f32.mrf.mxu2 }
 0x6af   : > { %v4906_v35 = vadd.f32 %v10504_v31, %v4905_v55  ;;  %v13249_v31 = vmov 0  ;;  %5684 = vmatpush.msra.mxu3 %v5623_v22 }
 0x6b0   : > { %v3710_v25 = vpop.permute.xlu1 %3709  ;;  %v13250_v31 = vsel %vm11039_vm9, 4294967295, %v13249_v31 }
 0x6b1   : > { %vm4953_vm6 = vcmp.ge.f32.partialorder %v4906_v35, 0.0  ;;  %v4985_v34 = vmul.f32 0.01, %v4906_v35  ;;  %v4290_v39 = vpop.permute.xlu0 %4289  ;;  %v4514_v24 = vsel %vm13254_vm10, %v4482_v8, %v3710_v25  ;;  %vm13260_vm10 = vcmask 457728  }
 0x6b2   : > { %v11045_v0 = vld [vmem:[#allocation2 + $0x40] sm:$0xff]  ;;  %v4546_v40 = vsel %vm13256_vm13, %v4514_v24, %v3838_v36  ;;  %vm13262_vm13 = vcmask 588800   ;;  %v6852_v8 = vunpack.i.h.bf16 %v6850_v42 }
 0x6b3   : > { %v11047_v44 = vld [vmem:[#allocation2 + $0x3f] sm:$0xff]  ;;  %v5017_v57 = vsel %vm4953_vm6, %v4906_v35, %v4985_v34  ;;  %v6933_v15 = vpack.i.bf16 %v11045_v0, %v10911_v52  ;;  %v5312_v52 = vsel %vm11031_vm4, %v10931_v23, 0.0  ;;  %v4578_v21 = vsel %vm13257_vm0, %v4546_v40, %v3936_v6  ;;  %v6880_v34 = vpop.permute.xlu2 %6879 }
 0x6b4   : > { %v11049_v38 = vld [vmem:[#allocation2 + $0x39] sm:$0xff]  ;;  %5049 = vst.msk [vmem:[#allocation2 + $0xd8] sm:$0xff] %vm13255_vm5, %v5017_v57  ;;  %v5322_v47 = vsel %vm11051_vm2, %v11047_v44, 0.0  ;;  %vm13258_vm6 = vcmask 326656   ;;  %vm13261_vm5 = vcmask 523264   ;;  %v6881_v40 = vunpack.i.l.bf16 %v6880_v34 }
 0x6b5   : > { %v5313_v53 = vsel %vm11035_vm3, %v11049_v38, 0.0  ;;  %6934 = vrot.lane.b32.xlu1 %v6933_v15, %s12401_s16  ;;  %v6928_v37 = vpack.i.bf16 %v5322_v47, %v5321_v16  ;;  %v11093_v6 = vld [vmem:[%s11909_s6] ss:$0 sm:$0xff]  ;;  %v6866_v15 = vunpack.i.l.bf16 %v6865_v2  ;;  %v5285_v16 = vsel %vm10840_vm8, %v10844_v27, 0.0 }
 0x6b6   : > { %v6923_v11 = vpack.i.bf16 %v5313_v53, %v5312_v52  ;;  %vm13309_vm8 = vcmask 916480  }
 0x6b7   : > { %6929 = vrot.lane.b32.xlu0 %v6928_v37, %s12400_s30 }
 0x6b8   : > { %6924 = vrot.lane.b32.xlu2 %v6923_v11, %s12654_s22  ;;  %v4064_v30 = vpop.permute.xlu1 %4063 }
 0x6b9   : > { %v6855_v26 = vpop.permute.xlu0 %6854  ;;  %v4610_v41 = vsel %vm13258_vm6, %v4578_v21, %v4064_v30  ;;  %vm13263_vm6 = vcmask 130048   ;;  %v6867_v21 = vunpack.i.h.bf16 %v6865_v2 }
 0x6ba   : > { %v4642_v28 = vsel %vm13259_vm7, %v4610_v41, %v4192_v62  ;;  %v5284_v62 = vsel %vm10836_vm12, %v5276_v3, 0.0  ;;  %v6856_v54 = vunpack.i.l.bf16 %v6855_v26  ;;  %vm13264_vm7 = vcmask 261120  }
 0x6bb   : > { %v4674_v13 = vsel %vm13260_vm10, %v4642_v28, %v4290_v39  ;;  %v5564_v25 = vsel %vm13263_vm6, %v5284_v62, %v6851_v32  ;;  %vm13265_vm10 = vmmov %vm13263_vm6  ;;  %v6857_v18 = vunpack.i.h.bf16 %v6855_v26  ;;  %vm12076_vm6 = vcmask 654336   ;;  %v6895_v41 = vpop.permute.xlu2 %6894 }
 0x6bc   : > { %v5572_v39 = vsel %vm13264_vm7, %v5564_v25, %v6856_v54  ;;  %vm12075_vm7 = vcmask 785408   ;;  %vm12079_vm12 = vcmask 916480  }
 0x6c0   : > { %v4418_v1 = vpop.permute.xlu1 %4417 }
 0x6c1   : > { %v4706_v36 = vsel %vm13261_vm5, %v4674_v13, %v4418_v1  ;;  %v6870_v33 = vpop.permute.xlu0 %6869  ;;  %vm13266_vm5 = vcmask 392192  }
 0x6c2   : > { %6754 = vmatmul.msk.f32.gmra.mxu2 %vm13262_vm13, %v4706_v36  ;;  %vm13267_vm13 = vcmask 523264   ;;  %v6871_v53 = vunpack.i.l.bf16 %v6870_v33  ;;  %v6872_v1 = vunpack.i.h.bf16 %v6870_v33 }
 0x6c5   : > { %v4908_v29 = vpop.f32.mrf.mxu2 }
 0x6c6   : > { %v4909_v55 = vadd.f32 %v11093_v6, %v4908_v29 }
 0x6c8   : > { %vm4954_vm0 = vcmp.ge.f32.partialorder %v4909_v55, 0.0  ;;  %v4986_v48 = vmul.f32 0.01, %v4909_v55  ;;  %v6860_v43 = vpop.permute.xlu1 %6859 }
 0x6c9   : > { %v6861_v35 = vunpack.i.l.bf16 %v6860_v43  ;;  %v6885_v57 = vpop.permute.xlu0 %6884  ;;  %v6862_v4 = vunpack.i.h.bf16 %v6860_v43  ;;  %v5286_v43 = vsel %vm10880_vm1, %v10832_v49, 0.0  ;;  %v6910_v49 = vpop.permute.xlu2 %6909  ;;  %vm13308_vm1 = vcmask 392192  }
 0x6ca   : > { %v5018_v60 = vsel %vm4954_vm0, %v4909_v55, %v4986_v48  ;;  %vm13268_vm0 = vmmov %vm13265_vm10  ;;  %v6886_v3 = vunpack.i.l.bf16 %v6885_v57  ;;  %v6882_v48 = vunpack.i.h.bf16 %v6880_v34  ;;  %v6887_v25 = vunpack.i.h.bf16 %v6885_v57 }
 0x6cb   : > { %5050 = vst.msk [vmem:[#allocation2 + $0xe0] sm:$0xff] %vm13265_vm10, %v5018_v60  ;;  %v5580_v24 = vsel %vm13266_vm5, %v5572_v39, %v6861_v35  ;;  %v5565_v52 = vsel %vm13268_vm0, %v5285_v16, %v6852_v8  ;;  %vm13269_vm10 = vcmask 261120   ;;  %v5287_v34 = vsel %vm10869_vm11, %v10862_v56, 0.0 }
 0x6cc   : > { %v5588_v47 = vsel %vm13267_vm13, %v5580_v24, %v6866_v15  ;;  %v5573_v11 = vsel %vm13269_vm10, %v5565_v52, %v6857_v18  ;;  %vm13270_vm10 = vcmask 130048   ;;  %v6896_v15 = vunpack.i.l.bf16 %v6895_v41 }
 0x6cd   : > { %v5581_v42 = vsel %vm13266_vm5, %v5573_v11, %v6862_v4  ;;  %v5597_v30 = vsel %vm12076_vm6, %v5588_v47, %v6871_v53  ;;  %v5566_v33 = vsel %vm13270_vm10, %v5286_v43, %v6886_v3  ;;  %vm13271_vm5 = vcmask 261120  }
 0x6ce   : > { %v5589_v13 = vsel %vm13267_vm13, %v5581_v42, %v6867_v21  ;;  %vm13272_vm13 = vmmov %vm13270_vm10  ;;  %v6897_v53 = vunpack.i.h.bf16 %v6895_v41  ;;  %v6911_v11 = vunpack.i.l.bf16 %v6910_v49 }
 0x6cf   : > { %v5598_v62 = vsel %vm12076_vm6, %v5589_v13, %v6872_v1  ;;  %vm13274_vm6 = vcmask 392192   ;;  %v6912_v13 = vunpack.i.h.bf16 %v6910_v49  ;;  %v5340_v49 = vsel %vm11039_vm9, %v11047_v44, 0.0 }
 0x6d0   : > { %v6875_v37 = vpop.permute.xlu1 %6874 }
 0x6d1   : > { %v6876_v22 = vunpack.i.l.bf16 %v6875_v37  ;;  %v6877_v28 = vunpack.i.h.bf16 %v6875_v37  ;;  %v6900_v36 = vpop.permute.xlu0 %6899 }
 0x6d2   : > { %v6901_v4 = vunpack.i.l.bf16 %v6900_v36  ;;  %v6902_v21 = vunpack.i.h.bf16 %v6900_v36 }
 0x6d3   : > { %v5606_v27 = vsel %vm12075_vm7, %v5597_v30, %v6876_v22  ;;  %v5607_v2 = vsel %vm12075_vm7, %v5598_v62, %v6877_v28  ;;  %vm13273_vm7 = vmmov %vm13270_vm10  ;;  %vm13276_vm10 = vcmask 523264  }
 0x6d4   : > { %v5615_v26 = vsel %vm12079_vm12, %v5606_v27, %v6881_v40  ;;  %v5616_v24 = vsel %vm12079_vm12, %v5607_v2, %v6882_v48  ;;  %v5567_v18 = vsel %vm13273_vm7, %v5287_v34, %v6887_v25  ;;  %vm13279_vm7 = vcmask 785408   ;;  %v5126_v2 = vld [vmem:[#allocation2 + $0xd9] ss:$2 sm:$0xff] }
 0x6d5   : > { %5685 = vmatmul.f32.vlgmr.msra.gmra.mxu3 %v5615_v26  ;;  %vm13282_vm11 = vmmov %vm13279_vm7 }
 0x6d7   : > { %v4911_v29 = vpop.f32.mrf.mxu2 }
 0x6d8   : > { %v4912_v32 = vadd.f32 %v11093_v6, %v4911_v29  ;;  %v6890_v55 = vpop.permute.xlu1 %6889 }
 0x6d9   : > { %v6891_v54 = vunpack.i.l.bf16 %v6890_v55  ;;  %v6892_v39 = vunpack.i.h.bf16 %v6890_v55  ;;  %v6915_v16 = vpop.permute.xlu0 %6914 }
 0x6da   : > { %vm4955_vm0 = vcmp.ge.f32.partialorder %v4912_v32, 0.0  ;;  %v4987_v35 = vmul.f32 0.01, %v4912_v32  ;;  %v6916_v40 = vunpack.i.l.bf16 %v6915_v16  ;;  %v6917_v3 = vunpack.i.h.bf16 %v6915_v16 }
 0x6db   : > { %v5574_v8 = vsel %vm13271_vm5, %v5566_v33, %v6891_v54  ;;  %v5124_v54 = vld [vmem:[#allocation2 + $0xd8] ss:$2 sm:$0xff] }
 0x6dc   : > { %v5019_v60 = vsel %vm4955_vm0, %v4912_v32, %v4987_v35  ;;  %v5582_v57 = vsel %vm13274_vm6, %v5574_v8, %v6896_v15  ;;  %vm13275_vm0 = vmmov %vm13271_vm5  ;;  %v5127_v48 = vadd.f32 %v5126_v2, %v5124_v54  ;;  %v13291_v54 = vld [vmem:[#allocation19_spill] sm:$0xff] }
 0x6dd   : > { %5051 = vst.msk [vmem:[#allocation2 + $0xe8] sm:$0xff] %vm13272_vm13, %v5019_v60  ;;  %5688 = vmatmul.f32.gmra.mxu3 %v5616_v24  ;;  %v5575_v47 = vsel %vm13275_vm0, %v5567_v18, %v6892_v39  ;;  %v5590_v22 = vsel %vm13276_vm10, %v5582_v57, %v6901_v4  ;;  %vm13277_vm5 = vmmov %vm13274_vm6  ;;  %vm13278_vm13 = vcmask 654336   ;;  %v5331_v57 = vsel %vm11031_vm4, %v11049_v38, 0.0 }
 0x6de   : > { %v5583_v42 = vsel %vm13277_vm5, %v5575_v47, %v6897_v53  ;;  %vm13280_vm6 = vmmov %vm13276_vm10  ;;  %vm13283_vm5 = vcmask 130048   ;;  %v5210_v2 = vand.u32 7, %v13291_v54 }
 0x6df   : > { %v5591_v28 = vsel %vm13280_vm6, %v5583_v42, %v6902_v21  ;;  %vm13281_vm0 = vmmov %vm13278_vm13 }
 0x6e0   : > { %v6905_v52 = vpop.permute.xlu1 %6904 }
 0x6e1   : > { %v6906_v37 = vunpack.i.l.bf16 %v6905_v52  ;;  %v6907_v30 = vunpack.i.h.bf16 %v6905_v52 }
 0x6e3   : > { %v5599_v56 = vsel %vm13278_vm13, %v5590_v22, %v6906_v37  ;;  %v5600_v41 = vsel %vm13281_vm0, %v5591_v28, %v6907_v30  ;;  %vm13287_vm0 = vmmov %vm13283_vm5 }
 0x6e4   : > { %v5608_v27 = vsel %vm13279_vm7, %v5599_v56, %v6911_v11  ;;  %v5609_v1 = vsel %vm13282_vm11, %v5600_v41, %v6912_v13  ;;  %vm13284_vm11 = vmmov %vm13283_vm5 }
 0x6e5   : > { %v5617_v26 = vsel %vm12079_vm12, %v5608_v27, %v6916_v40  ;;  %v5618_v29 = vsel %vm12079_vm12, %v5609_v1, %v6917_v3  ;;  %vm13285_vm7 = vmmov %vm13283_vm5  ;;  %vm13304_vm12 = vcmask 523264  }
 0x6e6   : > { %5691 = vmatmul.f32.gmra.mxu3 %v5617_v26 }
 0x6ee   : > { %v4914_v32 = vpop.f32.mrf.mxu2  ;;  %5694 = vmatmul.f32.gmra.mxu3 %v5618_v29 }
 0x6ef   : > { %v4915_v55 = vadd.f32 %v11093_v6, %v4914_v32 }
 0x6f1   : > { %vm4956_vm10 = vcmp.ge.f32.partialorder %v4915_v55, 0.0  ;;  %v4988_v36 = vmul.f32 0.01, %v4915_v55 }
 0x6f3   : > { %v5020_v62 = vsel %vm4956_vm10, %v4915_v55, %v4988_v36 }
 0x6f4   : > { %5052 = vst.msk [vmem:[#allocation2 + $0xf0] sm:$0xff] %vm13283_vm5, %v5020_v62  ;;  %vm13288_vm5 = vmmov %vm13287_vm0 }
 0x6fb   : > { %v5129_v43 = vld [vmem:[#allocation2 + $0xe8] ss:$2 sm:$0xff]  ;;  %v5132_v25 = vld [vmem:[#allocation2 + $0xe9] ss:$2 sm:$0xff] }
 0x6fc   : > { %v5130_v35 = vadd.f32 %v5129_v43, %v5127_v48  ;;  %v13292_v48 = vld [vmem:[#allocation18_spill] sm:$0xff] }
 0x6fd   : > { %v5217_v43 = vand.u32 7, %v13292_v48 }
 0x6fe   : > { %v5133_v33 = vadd.f32 %v5132_v25, %v5130_v35  ;;  %v13295_v35 = vmov 0 }
 0x700   : > { %v5151_v60 = vmul.f32 0.25, %v5133_v33 }
 0x702   : > { %5162 = vst.msk [vmem:[#allocation2 + $0x48] sm:$0xff] %vm13284_vm11, %v5151_v60 }
 0x705   : > { %v4917_v39 = vpop.f32.mrf.mxu2 }
 0x706   : > { %v4918_v8 = vadd.f32 %v11093_v6, %v4917_v39 }
 0x708   : > { %vm4957_vm13 = vcmp.ge.f32.partialorder %v4918_v8, 0.0  ;;  %v4989_v24 = vmul.f32 0.01, %v4918_v8 }
 0x709   : > { %v5299_v15 = vld [vmem:[#allocation2 + $0x48] sm:$0xff] }
 0x70a   : > { %v11142_v34 = vld [vmem:[#allocation2 + $0x47] sm:$0xff]  ;;  %v5021_v4 = vsel %vm4957_vm13, %v4918_v8, %v4989_v24  ;;  %v6948_v16 = vpack.i.bf16 %v5299_v15, %v11045_v0  ;;  %vm13289_vm13 = vmmov %vm13287_vm0 }
 0x70b   : > { %v11147_v18 = vld [vmem:[#allocation2 + $0x41] sm:$0xff]  ;;  %v5341_v47 = vsel %vm11051_vm2, %v11142_v34, 0.0  ;;  %5053 = vst.msk [vmem:[#allocation2 + $0xf8] sm:$0xff] %vm13285_vm7, %v5021_v4  ;;  %vm13290_vm7 = vmmov %vm13287_vm0 }
 0x70c   : > { %v5332_v52 = vsel %vm11035_vm3, %v11147_v18, 0.0  ;;  %v6943_v53 = vpack.i.bf16 %v5341_v47, %v5340_v49  ;;  %6949 = vrot.lane.b32.xlu1 %v6948_v16, %s7261_s15 }
 0x70d   : > { %v6938_v37 = vpack.i.bf16 %v5332_v52, %v5331_v57 }
 0x70e   : > { %6944 = vrot.lane.b32.xlu0 %v6943_v53, %s7262_s0 }
 0x70f   : > { %6939 = vrot.lane.b32.xlu2 %v6938_v37, %s13286_s1  ;;  %v5640_v37 = vld [vmem:[%s11910_s7 + $0x88] sm:$0xff] }
 0x710   : > { %5724 = vmatpush.msrb.mxu3 %v5640_v37 }
 0x717   : > { %6954 = vrot.lane.b32.xlu2 %v6948_v16, %s12588_s20  ;;  %v4920_v0 = vpop.f32.mrf.mxu2 }
 0x718   : > { %v4921_v11 = vadd.f32 %v11093_v6, %v4920_v0  ;;  %v6920_v0 = vpop.permute.xlu1 %6919 }
 0x71a   : > { %vm4958_vm6 = vcmp.ge.f32.partialorder %v4921_v11, 0.0  ;;  %v4990_v22 = vmul.f32 0.01, %v4921_v11 }
 0x71c   : > { %v5022_v40 = vsel %vm4958_vm6, %v4921_v11, %v4990_v22  ;;  %vm11173_vm6 = vcmp.lt.s32.totalorder %v5210_v2, 7 }
 0x71d   : > { %5054 = vst.msk [vmem:[#allocation2 + $0x100] sm:$0xff] %vm13287_vm0, %v5022_v40  ;;  %vm11177_vm0 = vcmp.lt.s32.totalorder %v5217_v43, 7  ;;  %v5314_v8 = vsel %vm11173_vm6, %v11147_v18, 0.0  ;;  %v5344_v40 = vld [vmem:[#allocation2 + $0x58] sm:$0xff] }
 0x71e   : > { %v13296_v35 = vsel %vm11177_vm0, 4294967295, %v13295_v35 }
 0x724   : > { %v5135_v13 = vld [vmem:[#allocation2 + $0xf8] ss:$2 sm:$0xff]  ;;  %v5137_v1 = vld [vmem:[#allocation2 + $0xf9] ss:$2 sm:$0xff] }
 0x725   : > { %v5138_v3 = vadd.f32 %v5137_v1, %v5135_v13  ;;  %v5288_v13 = vsel %vm11039_vm9, %v10866_v51, 0.0 }
 0x72e   : > { %v4923_v42 = vpop.f32.mrf.mxu2 }
 0x72f   : > { %v4924_v30 = vadd.f32 %v11093_v6, %v4923_v42  ;;  %v6925_v42 = vpop.permute.xlu2 %6924 }
 0x731   : > { %vm4959_vm10 = vcmp.ge.f32.partialorder %v4924_v30, 0.0  ;;  %v4991_v56 = vmul.f32 0.01, %v4924_v30 }
 0x733   : > { %v5023_v21 = vsel %vm4959_vm10, %v4924_v30, %v4991_v56  ;;  %vm11181_vm10 = vcmp.gt.s32.totalorder %v5210_v2, 0 }
 0x734   : > { %5055 = vst.msk [vmem:[#allocation2 + $0x108] sm:$0xff] %vm13288_vm5, %v5023_v21  ;;  %vm11185_vm5 = vcmp.gt.s32.totalorder %v5217_v43, 0  ;;  %v5323_v4 = vsel %vm11181_vm10, %v11142_v34, 0.0  ;;  %v6935_v21 = vpop.permute.xlu1 %6934 }
 0x735   : > { %v6936_v54 = vunpack.i.l.bf16 %v6935_v21 }
 0x745   : > { %v4926_v27 = vpop.f32.mrf.mxu2 }
 0x746   : > { %v4927_v26 = vadd.f32 %v11093_v6, %v4926_v27  ;;  %v13293_v6 = vmov 0  ;;  %v6930_v27 = vpop.permute.xlu0 %6929 }
 0x747   : > { %v13294_v6 = vsel %vm11173_vm6, 4294967295, %v13293_v6  ;;  %v6932_v48 = vunpack.i.h.bf16 %v6930_v27 }
 0x748   : > { %vm4960_vm11 = vcmp.ge.f32.partialorder %v4927_v26, 0.0  ;;  %v4992_v28 = vmul.f32 0.01, %v4927_v26 }
 0x74a   : > { %v5024_v41 = vsel %vm4960_vm11, %v4927_v26, %v4992_v28  ;;  %v6921_v26 = vunpack.i.l.bf16 %v6920_v0  ;;  %v6926_v28 = vunpack.i.l.bf16 %v6925_v42  ;;  %vm13301_vm11 = vmmov %vm13290_vm7 }
 0x74b   : > { %5056 = vst.msk [vmem:[#allocation2 + $0x110] sm:$0xff] %vm13289_vm13, %v5024_v41  ;;  %v6931_v41 = vunpack.i.l.bf16 %v6930_v27  ;;  %vm13302_vm13 = vcmask 261120   ;;  %vm13305_vm9 = vmmov %vm13301_vm11 }
 0x752   : > { %v5140_v29 = vld [vmem:[#allocation2 + $0x108] ss:$2 sm:$0xff]  ;;  %v5143_v55 = vld [vmem:[#allocation2 + $0x109] ss:$2 sm:$0xff] }
 0x753   : > { %v5141_v32 = vadd.f32 %v5140_v29, %v5138_v3  ;;  %v5568_v3 = vsel %vm13301_vm11, %v5288_v13, %v6921_v26  ;;  %vm13306_vm11 = vcmask 654336  }
 0x754   : > { %v5576_v29 = vsel %vm13302_vm13, %v5568_v3, %v6926_v28 }
 0x755   : > { %v5144_v36 = vadd.f32 %v5143_v55, %v5141_v32  ;;  %v6922_v32 = vunpack.i.h.bf16 %v6920_v0 }
 0x757   : > { %v5152_v62 = vmul.f32 0.25, %v5144_v36 }
 0x759   : > { %5163 = vst.msk [vmem:[#allocation2 + $0x50] sm:$0xff] %vm13290_vm7, %v5152_v62  ;;  %vm13303_vm7 = vcmask 392192   ;;  %v6927_v62 = vunpack.i.h.bf16 %v6925_v42 }
 0x75a   : > { %v5584_v55 = vsel %vm13303_vm7, %v5576_v29, %v6931_v41  ;;  %vm13307_vm7 = vcmask 785408   ;;  %v5290_v41 = vsel %vm11181_vm10, %v11047_v44, 0.0 }
 0x75b   : > { %v5592_v51 = vsel %vm13304_vm12, %v5584_v55, %v6936_v54 }
 0x760   : > { %v5325_v60 = vld [vmem:[#allocation2 + $0x50] sm:$0xff] }
 0x761   : > { %v11189_v39 = vld [vmem:[#allocation2 + $0x49] sm:$0xff]  ;;  %v6968_v49 = vpack.i.bf16 %v5325_v60, %v5299_v15  ;;  %v11216_v11 = vld [vmem:[#allocation2 + $0x51] sm:$0xff] }
 0x762   : > { %v5316_v24 = vld [vmem:[#allocation2 + $0x4f] sm:$0xff]  ;;  %v5315_v57 = vsel %vm11177_vm0, %v11189_v39, 0.0  ;;  %v5333_v15 = vsel %vm11173_vm6, %v11189_v39, 0.0  ;;  %v5335_v22 = vld [vmem:[#allocation2 + $0x57] sm:$0xff]  ;;  %v5334_v30 = vsel %vm11177_vm0, %v11216_v11, 0.0 }
 0x763   : > { %v5324_v16 = vsel %vm11185_vm5, %v5316_v24, 0.0  ;;  %v6958_v47 = vpack.i.bf16 %v5315_v57, %v5314_v8  ;;  %6969 = vrot.lane.b32.xlu2 %v6968_v49, %s12401_s16  ;;  %v5342_v53 = vsel %vm11181_vm10, %v5316_v24, 0.0  ;;  %v5343_v56 = vsel %vm11185_vm5, %v5335_v22, 0.0 }
 0x764   : > { %v6963_v52 = vpack.i.bf16 %v5324_v16, %v5323_v4 }
 0x765   : > { %6959 = vrot.lane.b32.xlu0 %v6958_v47, %s12654_s22 }
 0x766   : > { %6964 = vrot.lane.b32.xlu1 %v6963_v52, %s12400_s30 }
 0x769   : > { %v6940_v1 = vpop.permute.xlu2 %6939 }
 0x76a   : > { %v6941_v36 = vunpack.i.l.bf16 %v6940_v1  ;;  %v6942_v52 = vunpack.i.h.bf16 %v6940_v1 }
 0x76b   : > { %5552 = vrot.lane.b32.xlu2 %v5325_v60, %s7261_s15  ;;  %v5289_v60 = vsel %vm11051_vm2, %v10908_v5, 0.0  ;;  %vm13310_vm2 = vmmov %vm13304_vm12 }
 0x76c   : > { %v5569_v24 = vsel %vm13305_vm9, %v5289_v60, %v6922_v32  ;;  %v5601_v57 = vsel %vm13306_vm11, %v5592_v51, %v6941_v36  ;;  %vm13311_vm12 = vmmov %vm13306_vm11 }
 0x76d   : > { %5495 = vrot.lane.b32.xlu0 %v5333_v15, %s13286_s1  ;;  %v5577_v4 = vsel %vm13302_vm13, %v5569_v24, %v6927_v62  ;;  %vm13312_vm9 = vmmov %vm13307_vm7 }
 0x76e   : > { %5527 = vrot.lane.b32.xlu1 %v5342_v53, %s7262_s0  ;;  %v5585_v47 = vsel %vm13308_vm1, %v5577_v4, %v6932_v48  ;;  %v6937_v53 = vunpack.i.h.bf16 %v6935_v21  ;;  %vm13313_vm11 = vmmov %vm13309_vm8 }
 0x76f   : > { %vm13315_vm1 = vmmov %vm13302_vm13  ;;  %vm13317_vm13 = vcmask 523264  }
 0x770   : > { %v5593_v5 = vsel %vm13310_vm2, %v5585_v47, %v6937_v53  ;;  %vm13316_vm2 = vcmask 392192  }
 0x771   : > { %v5602_v0 = vsel %vm13311_vm12, %v5593_v5, %v6942_v52 }
 0x773   : > { %5554 = vrot.lane.b32.xlu2 %v5344_v40, %s7261_s15 }
 0x775   : > { %5497 = vrot.lane.b32.xlu0 %v5334_v30, %s13286_s1  ;;  %v5639_v30 = vld [vmem:[%s11910_s7 + $0x80] sm:$0xff] }
 0x776   : > { %5529 = vrot.lane.b32.xlu1 %v5343_v56, %s7262_s0  ;;  %5725 = vmatpush.msrb.mxu3 %v5639_v30  ;;  %v6955_v56 = vpop.permute.xlu2 %6954  ;;  %v5345_v30 = vld [vmem:[#allocation2 + $0x59] sm:$0xff] }
 0x777   : > { %v6956_v21 = vunpack.i.l.bf16 %v6955_v56  ;;  %v6957_v32 = vunpack.i.h.bf16 %v6955_v56 }
 0x77e   : > { %v6950_v2 = vpop.permute.xlu1 %6949 }
 0x77f   : > { %v6951_v49 = vunpack.i.l.bf16 %v6950_v2  ;;  %v6952_v40 = vunpack.i.h.bf16 %v6950_v2  ;;  %v5291_v2 = vsel %vm11185_vm5, %v11142_v34, 0.0 }
 0x780   : > { %v6945_v43 = vpop.permute.xlu0 %6944 }
 0x781   : > { %v6946_v8 = vunpack.i.l.bf16 %v6945_v43  ;;  %v6947_v37 = vunpack.i.h.bf16 %v6945_v43 }
 0x783   : > { %v5610_v16 = vsel %vm13307_vm7, %v5601_v57, %v6946_v8  ;;  %v5611_v22 = vsel %vm13312_vm9, %v5602_v0, %v6947_v37  ;;  %vm13319_vm9 = vmmov %vm13315_vm1  ;;  %v7186_v0 = vld [vmem:[#allocation2 + $0x21] sm:$0xff] }
 0x784   : > { %v5619_v15 = vsel %vm13309_vm8, %v5610_v16, %v6951_v49  ;;  %v5620_v42 = vsel %vm13313_vm11, %v5611_v22, %v6952_v40  ;;  %vm13314_vm8 = vcmask 130048   ;;  %vm13320_vm11 = vcmask 785408  }
 0x785   : > { %5697 = vmatmul.f32.gmra.mxu3 %v5619_v15  ;;  %v5570_v3 = vsel %vm13314_vm8, %v5290_v41, %v6956_v21  ;;  %vm13318_vm7 = vmmov %vm13314_vm8  ;;  %vm13321_vm8 = vcmask 916480   ;;  %v5346_v22 = vsel %vm10790_vm15, %v7186_v0, 0.0  ;;  %v5347_v40 = vsel %vm10784_vm14, %v10901_v17, 0.0 }
 0x786   : > { %v5571_v60 = vsel %vm13318_vm7, %v5291_v2, %v6957_v32  ;;  %vm13325_vm7 = vmmov %vm13320_vm11  ;;  %v5350_v17 = vsel %vm11031_vm4, %v11147_v18, 0.0  ;;  %v5686_v18 = vpop.f32.mrf.mxu3 }
 0x78d   : > { %5700 = vmatmul.f32.gmra.mxu3 %v5620_v42 }
 0x78e   : > { %v5689_v21 = vpop.f32.mrf.mxu3 }
 0x7bd   : > { %v6970_v27 = vpop.permute.xlu2 %6969 }
 0x7be   : > { %v6971_v36 = vunpack.i.l.bf16 %v6970_v27  ;;  %v6972_v16 = vunpack.i.h.bf16 %v6970_v27  ;;  %v5352_v27 = vsel %vm11173_vm6, %v11216_v11, 0.0  ;;  %v11312_v11 = vld [vmem:[%s11911_s8] ss:$0 sm:$0xff] }
 0x7c5   : > { %v5553_v54 = vpop.permute.xlu2 %5552 }
 0x7cd   : > { %v5555_v34 = vpop.permute.xlu2 %5554 }
 0x7d7   : > { %v6960_v26 = vpop.permute.xlu0 %6959 }
 0x7d8   : > { %v6965_v28 = vpop.permute.xlu1 %6964  ;;  %v6961_v13 = vunpack.i.l.bf16 %v6960_v26  ;;  %v6962_v62 = vunpack.i.h.bf16 %v6960_v26  ;;  %v5692_v26 = vpop.f32.mrf.mxu3 }
 0x7d9   : > { %v6966_v1 = vunpack.i.l.bf16 %v6965_v28  ;;  %v6967_v8 = vunpack.i.h.bf16 %v6965_v28 }
 0x7da   : > { %v5578_v29 = vsel %vm13315_vm1, %v5570_v3, %v6961_v13  ;;  %v5579_v24 = vsel %vm13319_vm9, %v5571_v60, %v6962_v62  ;;  %vm13322_vm1 = vmmov %vm13316_vm2  ;;  %vm13327_vm9 = vcmask 130048   ;;  %v5687_v3 = vadd.f32 %v11312_v11, %v5686_v18 }
 0x7db   : > { %v5586_v55 = vsel %vm13316_vm2, %v5578_v29, %v6966_v1  ;;  %v5587_v4 = vsel %vm13322_vm1, %v5579_v24, %v6967_v8  ;;  %vm13323_vm2 = vmmov %vm13317_vm13  ;;  %v5690_v62 = vadd.f32 %v11312_v11, %v5689_v21 }
 0x7dc   : > { %v5594_v43 = vsel %vm13317_vm13, %v5586_v55, %v6971_v36  ;;  %v5595_v52 = vsel %vm13323_vm2, %v5587_v4, %v6972_v16  ;;  %vm13324_vm13 = vmmov %vm13311_vm12 }
 0x7dd   : > { %vm13330_vm1 = vmmov %vm13327_vm9 }
 0x7de   : > { %vm13331_vm2 = vmmov %vm13330_vm1 }
 0x7df   : > { %v5496_v48 = vpop.permute.xlu0 %5495  ;;  %5775 = vst.msk [vmem:[#allocation2 + $0x58] sm:$0xff] %vm13331_vm2, %v12801_v61  ;;  %vm13337_vm2 = vmmov %vm13330_vm1 }
 0x7e0   : > { %v5528_v44 = vpop.permute.xlu1 %5527  ;;  %v5603_v51 = vsel %vm13311_vm12, %v5594_v43, %v5496_v48  ;;  %vm13326_vm12 = vmmov %vm13321_vm8  ;;  %v5695_v28 = vpop.f32.mrf.mxu3  ;;  %v5802_v43 = vld [vmem:[#allocation2 + $0x10] sm:$0xff] }
 0x7e1   : > { %v5612_v49 = vsel %vm13320_vm11, %v5603_v51, %v5528_v44  ;;  %vm13328_vm11 = vmmov %vm13327_vm9  ;;  %v5693_v51 = vadd.f32 %v11312_v11, %v5692_v26 }
 0x7e2   : > { %v5621_v57 = vsel %vm13321_vm8, %v5612_v49, %v5553_v54  ;;  %vm13329_vm8 = vnez %v13209_v9 }
 0x7e3   : > { %5703 = vmatmul.f32.gmra.mxu3 %v5621_v57  ;;  %v5348_v42 = vsel %vm13329_vm8, %v10931_v23, 0.0  ;;  %v5351_v23 = vsel %vm11035_vm3, %v11189_v39, 0.0 }
 0x7e7   : > { %v5498_v47 = vpop.permute.xlu0 %5497 }
 0x7e8   : > { %v5530_v15 = vpop.permute.xlu1 %5529  ;;  %v5604_v53 = vsel %vm13324_vm13, %v5595_v52, %v5498_v47  ;;  %vm13332_vm13 = vmmov %vm13330_vm1 }
 0x7e9   : > { %v5613_v37 = vsel %vm13325_vm7, %v5604_v53, %v5530_v15  ;;  %5776 = vst.msk [vmem:[#allocation2 + $0x60] sm:$0xff] %vm13332_vm13, %v12801_v61  ;;  %vm13333_vm7 = vnez %v13206_v63 }
 0x7ea   : > { %v5622_v5 = vsel %vm13326_vm12, %v5613_v37, %v5555_v34  ;;  %v5349_v56 = vsel %vm13333_vm7, %v11049_v38, 0.0  ;;  %vm13334_vm12 = vmmov %vm13330_vm1  ;;  %v5353_v38 = vsel %vm11177_vm0, %v5345_v30, 0.0 }
 0x7eb   : > { %5706 = vmatmul.f32.gmra.mxu3 %v5622_v5 }
 0x7f3   : > { %6755 = vmatmul.msk.f32.vlgmr.msrb.gmra.mxu3 %vm13327_vm9, %v5346_v22  ;;  %vm13335_vm9 = vmmov %vm13330_vm1 }
 0x7fb   : > { %6756 = vmatmul.msk.f32.gmra.mxu3 %vm13328_vm11, %v5347_v40  ;;  %vm13336_vm11 = vmmov %vm13330_vm1  ;;  %v5696_v40 = vadd.f32 %v11312_v11, %v5695_v28 }
 0x803   : > { %6757 = vmatmul.msk.f32.gmra.mxu3 %vm13330_vm1, %v5348_v42 }
 0x808   : > { %v5698_v41 = vpop.f32.mrf.mxu3 }
 0x80b   : > { %6758 = vmatmul.msk.f32.gmra.mxu3 %vm13334_vm12, %v5349_v56  ;;  %vm13338_vm12 = vmmov %vm13330_vm1 }
 0x810   : > { %v11303_v13 = vpop.f32.mrf.mxu3 }
 0x813   : > { %6759 = vmatmul.msk.f32.gmra.mxu3 %vm13335_vm9, %v5350_v17 }
 0x81b   : > { %6760 = vmatmul.msk.f32.gmra.mxu3 %vm13336_vm11, %v5351_v23  ;;  %vm13339_vm11 = vmmov %vm13330_vm1 }
 0x823   : > { %6761 = vmatmul.msk.f32.gmra.mxu3 %vm13330_vm1, %v5352_v27 }
 0x82b   : > { %6762 = vmatmul.msk.f32.gmra.mxu3 %vm13337_vm2, %v5353_v38 }
 0x866   : > { %v11305_v39 = vpop.f32.mrf.mxu3 }
 0x86e   : > { %v11307_v1 = vpop.f32.mrf.mxu3 }
 0x876   : > { %v5727_v29 = vpop.f32.mrf.mxu3 }
 0x877   : > { %v5728_v32 = vadd.f32 %v5727_v29, %v5687_v3 }
 0x879   : > { %vm5751_vm13 = vcmp.ge.f32.partialorder %v5728_v32, 0.0  ;;  %v5759_v55 = vmul.f32 0.01, %v5728_v32 }
 0x87b   : > { %v5767_v36 = vsel %vm5751_vm13, %v5728_v32, %v5759_v55  ;;  %vm13340_vm13 = vnez %v13189_v46  ;;  %v5699_v55 = vadd.f32 %v11312_v11, %v5698_v41 }
 0x87c   : > { %5778 = vst.msk [vmem:[#allocation2 + $0x18] sm:$0xff] %vm13338_vm12, %v5767_v36  ;;  %vm13341_vm12 = vnez %v13191_v59 }
 0x87e   : > { %v5730_v54 = vpop.f32.mrf.mxu3 }
 0x87f   : > { %v5731_v2 = vadd.f32 %v5730_v54, %v5690_v62 }
 0x881   : > { %vm5752_vm9 = vcmp.ge.f32.partialorder %v5731_v2, 0.0  ;;  %v5760_v48 = vmul.f32 0.01, %v5731_v2 }
 0x883   : > { %v5768_v44 = vsel %vm5752_vm9, %v5731_v2, %v5760_v48  ;;  %v5803_v60 = vld [vmem:[#allocation2 + $0x18] sm:$0xff] }
 0x884   : > { %5779 = vst.msk [vmem:[#allocation2 + $0x20] sm:$0xff] %vm13339_vm11, %v5768_v44  ;;  %v6973_v8 = vpack.i.bf16 %v5803_v60, %v5802_v43  ;;  %v5810_v57 = vld [vmem:[#allocation2 + $0x11] sm:$0xff]  ;;  %vm13342_vm11 = vmmov %vm13337_vm2 }
 0x885   : > { %v11320_v16 = vld [vmem:[#allocation2 + $0x17] sm:$0xff]  ;;  %v5818_v15 = vsel %vm10790_vm15, %v5810_v57, 0.0 }
 0x886   : > { %v5733_v24 = vpop.f32.mrf.mxu3  ;;  %6974 = vrot.lane.b32.xlu0 %v6973_v8, %s12588_s20  ;;  %v5827_v0 = vsel %vm13340_vm13, %v11320_v16, 0.0 }
 0x887   : > { %v5734_v49 = vadd.f32 %v5733_v24, %v5693_v51 }
 0x889   : > { %vm5753_vm1 = vcmp.ge.f32.partialorder %v5734_v49, 0.0  ;;  %v5761_v4 = vmul.f32 0.01, %v5734_v49 }
 0x88b   : > { %v5769_v34 = vsel %vm5753_vm1, %v5734_v49, %v5761_v4  ;;  %v5804_v47 = vld [vmem:[#allocation2 + $0x20] sm:$0xff]  ;;  %v5702_v49 = vadd.f32 %v11312_v11, %v11303_v13 }
 0x88c   : > { %v5811_v52 = vld [vmem:[#allocation2 + $0x19] sm:$0xff]  ;;  %5780 = vst.msk [vmem:[#allocation2 + $0x28] sm:$0xff] %vm13337_vm2, %v5769_v34  ;;  %v6988_v37 = vpack.i.bf16 %v5804_v47, %v5803_v60 }
 0x88d   : > { %v11324_v53 = vld [vmem:[#allocation2 + $0x1f] sm:$0xff]  ;;  %v5819_v5 = vsel %vm10784_vm14, %v5811_v52, 0.0  ;;  %v5837_v21 = vsel %vm10790_vm15, %v5811_v52, 0.0 }
 0x88e   : > { %v5828_v22 = vsel %vm13341_vm12, %v11324_v53, 0.0  ;;  %v6978_v42 = vpack.i.bf16 %v5819_v5, %v5818_v15  ;;  %v5736_v56 = vpop.f32.mrf.mxu3  ;;  %6989 = vrot.lane.b32.xlu0 %v6988_v37, %s12401_s16  ;;  %v5846_v29 = vsel %vm13340_vm13, %v11324_v53, 0.0 }
 0x88f   : > { %v6983_v30 = vpack.i.bf16 %v5828_v22, %v5827_v0  ;;  %v5737_v17 = vadd.f32 %v5736_v56, %v5696_v40 }
 0x890   : > { %6979 = vrot.lane.b32.xlu1 %v6978_v42, %s12654_s22 }
 0x891   : > { %6984 = vrot.lane.b32.xlu2 %v6983_v30, %s12400_s30  ;;  %vm5754_vm9 = vcmp.ge.f32.partialorder %v5737_v17, 0.0  ;;  %v5762_v23 = vmul.f32 0.01, %v5737_v17  ;;  %v5705_v30 = vadd.f32 %v11312_v11, %v11305_v39 }
 0x893   : > { %v5770_v27 = vsel %vm5754_vm9, %v5737_v17, %v5762_v23  ;;  %v5805_v38 = vld [vmem:[#allocation2 + $0x28] sm:$0xff]  ;;  %vm13343_vm9 = vnez %v13202_v20 }
 0x894   : > { %v11339_v18 = vld [vmem:[#allocation2 + $0x21] sm:$0xff]  ;;  %5781 = vst.msk [vmem:[#allocation2 + $0x30] sm:$0xff] %vm13342_vm11, %v5770_v27  ;;  %v7003_v28 = vpack.i.bf16 %v5805_v38, %v5804_v47  ;;  %vm13344_vm11 = vnez %v13199_v50 }
 0x895   : > { %v11343_v26 = vld [vmem:[#allocation2 + $0x27] sm:$0xff]  ;;  %v5838_v3 = vsel %vm10784_vm14, %v11339_v18, 0.0  ;;  %v5820_v41 = vsel %vm13329_vm8, %v11339_v18, 0.0 }
 0x896   : > { %v5847_v32 = vsel %vm13341_vm12, %v11343_v26, 0.0  ;;  %v6993_v36 = vpack.i.bf16 %v5838_v3, %v5837_v21  ;;  %v5739_v54 = vpop.f32.mrf.mxu3  ;;  %7004 = vrot.lane.b32.xlu0 %v7003_v28, %s7261_s15  ;;  %v5829_v51 = vsel %vm13343_vm9, %v11343_v26, 0.0 }
 0x897   : > { %v6998_v62 = vpack.i.bf16 %v5847_v32, %v5846_v29  ;;  %v5740_v2 = vadd.f32 %v5739_v54, %v5699_v55  ;;  %v5708_v55 = vadd.f32 %v11312_v11, %v11307_v1 }
 0x898   : > { %6994 = vrot.lane.b32.xlu1 %v6993_v36, %s13286_s1 }
 0x899   : > { %6999 = vrot.lane.b32.xlu2 %v6998_v62, %s7262_s0  ;;  %vm5755_vm1 = vcmp.ge.f32.partialorder %v5740_v2, 0.0  ;;  %v5763_v48 = vmul.f32 0.01, %v5740_v2 }
 0x89b   : > { %v5771_v43 = vsel %vm5755_vm1, %v5740_v2, %v5763_v48  ;;  %v11359_v44 = vld [vmem:[#allocation2 + $0x29] sm:$0xff] }
 0x89c   : > { %v11361_v60 = vld [vmem:[#allocation2 + $0x2f] sm:$0xff]  ;;  %5782 = vst.msk [vmem:[#allocation2 + $0x38] sm:$0xff] %vm13337_vm2, %v5771_v43  ;;  %v5821_v8 = vsel %vm13333_vm7, %v11359_v44, 0.0  ;;  %v5839_v13 = vsel %vm13329_vm8, %v11359_v44, 0.0  ;;  %v6145_v43 = vld [vmem:[%s11912_s9 + $0x78] sm:$0xff]  ;;  %vm13347_vm8 = vnez %v13250_v31 }
 0x89d   : > { %v5830_v24 = vsel %vm13344_vm11, %v11361_v60, 0.0  ;;  %v7013_v57 = vpack.i.bf16 %v5821_v8, %v5820_v41  ;;  %v5806_v15 = vld [vmem:[#allocation2 + $0x30] sm:$0xff]  ;;  %v5848_v40 = vsel %vm13343_vm9, %v11361_v60, 0.0  ;;  %6176 = vmatpush.msra.mxu3 %v6145_v43 }
 0x89e   : > { %v7018_v4 = vpack.i.bf16 %v5830_v24, %v5829_v51  ;;  %v5742_v34 = vpop.f32.mrf.mxu3  ;;  %v7023_v56 = vpack.i.bf16 %v5806_v15, %v5805_v38 }
 0x89f   : > { %v5743_v47 = vadd.f32 %v5742_v34, %v5702_v49 }
 0x8a0   : > { %7009 = vrot.lane.b32.xlu1 %v7003_v28, %s12588_s20  ;;  %7019 = vrot.lane.b32.xlu0 %v7018_v4, %s12400_s30 }
 0x8a1   : > { %7014 = vrot.lane.b32.xlu2 %v7013_v57, %s12654_s22  ;;  %vm5756_vm1 = vcmp.ge.f32.partialorder %v5743_v47, 0.0  ;;  %v5764_v52 = vmul.f32 0.01, %v5743_v47 }
 0x8a3   : > { %v5772_v37 = vsel %vm5756_vm1, %v5743_v47, %v5764_v52  ;;  %v11381_v5 = vld [vmem:[#allocation2 + $0x31] sm:$0xff] }
 0x8a4   : > { %v11383_v0 = vld [vmem:[#allocation2 + $0x37] sm:$0xff]  ;;  %5783 = vst.msk [vmem:[#allocation2 + $0x40] sm:$0xff] %vm13337_vm2, %v5772_v37  ;;  %v5840_v22 = vsel %vm13333_vm7, %v11381_v5, 0.0  ;;  %v5822_v39 = vsel %vm11031_vm4, %v11381_v5, 0.0  ;;  %vm13346_vm7 = vcmask 130048   ;;  %v6143_v37 = vld [vmem:[%s11912_s9 + $0x68] sm:$0xff] }
 0x8a5   : > { %v5849_v42 = vsel %vm13344_vm11, %v11383_v0, 0.0  ;;  %v7028_v17 = vpack.i.bf16 %v5840_v22, %v5839_v13  ;;  %v5807_v3 = vld [vmem:[#allocation2 + $0x38] sm:$0xff]  ;;  %v5831_v24 = vsel %vm13347_vm8, %v11383_v0, 0.0 }
 0x8a6   : > { %v7033_v23 = vpack.i.bf16 %v5849_v42, %v5848_v40  ;;  %v5745_v27 = vpop.f32.mrf.mxu3  ;;  %v7038_v36 = vpack.i.bf16 %v5807_v3, %v5806_v15  ;;  %v6144_v15 = vld [vmem:[%s11912_s9 + $0x70] sm:$0xff]  ;;  %v6142_v40 = vld [vmem:[%s11912_s9 + $0x60] sm:$0xff] }
 0x8a7   : > { %v5746_v21 = vadd.f32 %v5745_v27, %v5705_v30  ;;  %6177 = vmatpush.msra.mxu3 %v6144_v15  ;;  %v6133_v15 = vld [vmem:[%s11912_s9 + $0x18] sm:$0xff] }
 0x8a8   : > { %7024 = vrot.lane.b32.xlu1 %v7023_v56, %s12401_s16  ;;  %7034 = vrot.lane.b32.xlu0 %v7033_v23, %s7262_s0 }
 0x8a9   : > { %7029 = vrot.lane.b32.xlu2 %v7028_v17, %s13286_s1  ;;  %vm5757_vm1 = vcmp.ge.f32.partialorder %v5746_v21, 0.0  ;;  %v5765_v28 = vmul.f32 0.01, %v5746_v21  ;;  %6178 = vmatpush.msra.mxu3 %v6143_v37  ;;  %v6141_v17 = vld [vmem:[%s11912_s9 + $0x58] sm:$0xff]  ;;  %v6132_v37 = vld [vmem:[%s11912_s9 + $0x10] sm:$0xff] }
 0x8ab   : > { %v5773_v29 = vsel %vm5757_vm1, %v5746_v21, %v5765_v28  ;;  %v11403_v32 = vld [vmem:[#allocation2 + $0x39] sm:$0xff]  ;;  %6179 = vmatpush.msra.mxu3 %v6142_v40 }
 0x8ac   : > { %5784 = vst.msk [vmem:[#allocation2 + $0x48] sm:$0xff] %vm13337_vm2, %v5773_v29  ;;  %v5823_v38 = vsel %vm11035_vm3, %v11403_v32, 0.0  ;;  %v11416_v48 = vld [vmem:[#allocation2 + $0x3f] sm:$0xff]  ;;  %vm13345_vm2 = vnez %v13253_v10  ;;  %v5841_v49 = vsel %vm11031_vm4, %v11403_v32, 0.0 }
 0x8ad   : > { %v7048_v62 = vpack.i.bf16 %v5823_v38, %v5822_v39  ;;  %v5832_v1 = vsel %vm13345_vm2, %v11416_v48, 0.0  ;;  %v5808_v11 = vld [vmem:[#allocation2 + $0x40] sm:$0xff]  ;;  %v5850_v42 = vsel %vm13347_vm8, %v11416_v48, 0.0  ;;  %6180 = vmatpush.msra.mxu3 %v6141_v17  ;;  %v5786_v17 = vld [vmem:[#allocation2 + $0xf] sm:$0xff]  ;;  %v5799_v31 = vsel %vm13345_vm2, %v11383_v0, 0.0 }
 0x8ae   : > { %v5748_v54 = vpop.f32.mrf.mxu3  ;;  %v7053_v4 = vpack.i.bf16 %v5832_v1, %v5831_v24  ;;  %v7058_v34 = vpack.i.bf16 %v5808_v11, %v5807_v3  ;;  %v6137_v1 = vld [vmem:[%s11912_s9 + $0x38] sm:$0xff] }
 0x8af   : > { %v5749_v2 = vadd.f32 %v5748_v54, %v5708_v55  ;;  %v6139_v54 = vld [vmem:[%s11912_s9 + $0x48] sm:$0xff]  ;;  %v5854_v24 = vld [vmem:[#allocation2 + $0x58] sm:$0xff] }
 0x8b0   : > { %7039 = vrot.lane.b32.xlu1 %v7038_v36, %s7261_s15  ;;  %7049 = vrot.lane.b32.xlu0 %v7048_v62, %s12654_s22  ;;  %v6140_v62 = vld [vmem:[%s11912_s9 + $0x50] sm:$0xff] }
 0x8b1   : > { %7044 = vrot.lane.b32.xlu2 %v7038_v36, %s12588_s20  ;;  %vm5758_vm1 = vcmp.ge.f32.partialorder %v5749_v2, 0.0  ;;  %v5766_v41 = vmul.f32 0.01, %v5749_v2  ;;  %6181 = vmatpush.msra.mxu3 %v6140_v62 }
 0x8b3   : > { %v5774_v8 = vsel %vm5758_vm1, %v5749_v2, %v5766_v41  ;;  %v11425_v51 = vld [vmem:[#allocation2 + $0x41] sm:$0xff]  ;;  %6182 = vmatpush.msra.mxu3 %v6139_v54  ;;  %vm13348_vm1 = vcmask 261120  }
 0x8b4   : > { %5785 = vst.msk [vmem:[#allocation2 + $0x50] sm:$0xff] %vm13346_vm7, %v5774_v8  ;;  %v5842_v57 = vsel %vm11035_vm3, %v11425_v51, 0.0  ;;  %v11439_v52 = vld [vmem:[#allocation2 + $0x47] sm:$0xff]  ;;  %v5824_v29 = vsel %vm11173_vm6, %v11425_v51, 0.0  ;;  %vm13354_vm3 = vcmask 654336   ;;  %v5860_v14 = vsel %vm11031_vm4, %v11425_v51, 0.0 }
 0x8b5   : > { %v7063_v47 = vpack.i.bf16 %v5842_v57, %v5841_v49  ;;  %v5851_v13 = vsel %vm13345_vm2, %v11439_v52, 0.0  ;;  %v5809_v22 = vld [vmem:[#allocation2 + $0x48] sm:$0xff]  ;;  %v5833_v39 = vsel %vm11181_vm10, %v11439_v52, 0.0  ;;  %v6138_v41 = vld [vmem:[%s11912_s9 + $0x40] sm:$0xff]  ;;  %vm13409_vm4 = vnez %v13296_v35 }
 0x8b6   : > { %v7068_v30 = vpack.i.bf16 %v5851_v13, %v5850_v42  ;;  %v7073_v56 = vpack.i.bf16 %v5809_v22, %v5808_v11  ;;  %6183 = vmatpush.msra.mxu3 %v6138_v41  ;;  %v6131_v13 = vld [vmem:[%s11912_s9 + $0x8] sm:$0xff] }
 0x8b7   : > { %v6147_v42 = vld [vmem:[%s11912_s9 + $0x88] sm:$0xff] }
 0x8b8   : > { %7054 = vrot.lane.b32.xlu1 %v7053_v4, %s12400_s30  ;;  %7064 = vrot.lane.b32.xlu0 %v7063_v47, %s13286_s1  ;;  %v6136_v4 = vld [vmem:[%s11912_s9 + $0x30] sm:$0xff]  ;;  %v6134_v47 = vld [vmem:[%s11912_s9 + $0x20] sm:$0xff] }
 0x8b9   : > { %7059 = vrot.lane.b32.xlu2 %v7058_v34, %s12401_s16  ;;  %6184 = vmatpush.msra.mxu3 %v6137_v1  ;;  %v6135_v34 = vld [vmem:[%s11912_s9 + $0x28] sm:$0xff] }
 0x8ba   : > { %v6469_v51 = vld [vmem:[%s11914_s11 + $0x68] sm:$0xff] }
 0x8bb   : > { %v11462_v23 = vld [vmem:[#allocation2 + $0x49] sm:$0xff]  ;;  %v11499_v11 = vld [vmem:[#allocation2 + $0x51] sm:$0xff]  ;;  %6185 = vmatpush.msra.mxu3 %v6136_v4 }
 0x8bc   : > { %v5826_v27 = vld [vmem:[#allocation2 + $0x4f] sm:$0xff]  ;;  %v5825_v21 = vsel %vm11177_vm0, %v11462_v23, 0.0  ;;  %v5843_v2 = vsel %vm11173_vm6, %v11462_v23, 0.0  ;;  %v5845_v8 = vld [vmem:[#allocation2 + $0x57] sm:$0xff]  ;;  %v5844_v49 = vsel %vm11177_vm0, %v11499_v11, 0.0  ;;  %vm13349_vm0 = vmmov %vm13346_vm7  ;;  %vm13350_vm6 = vcmask 392192  }
 0x8bd   : > { %v5834_v28 = vsel %vm11185_vm5, %v5826_v27, 0.0  ;;  %v5835_v3 = vld [vmem:[#allocation2 + $0x50] sm:$0xff]  ;;  %v7083_v38 = vpack.i.bf16 %v5825_v21, %v5824_v29  ;;  %v5852_v43 = vsel %vm11181_vm10, %v5826_v27, 0.0  ;;  %v5853_v57 = vsel %vm11185_vm5, %v5845_v8, 0.0  ;;  %6186 = vmatpush.msra.mxu3 %v6135_v34 }
 0x8be   : > { %v7088_v55 = vpack.i.bf16 %v5834_v28, %v5833_v39  ;;  %v7093_v36 = vpack.i.bf16 %v5835_v3, %v5809_v22  ;;  %v6130_v22 = vld [vmem:[%s11912_s9] sm:$0xff]  ;;  %v5794_v28 = vsel %vm13340_vm13, %v5786_v17, 0.0  ;;  %vm13351_vm13 = vmmov %vm13348_vm1 }
 0x8bf   : > { %6187 = vmatpush.msra.mxu3 %v6134_v47 }
 0x8c0   : > { %7069 = vrot.lane.b32.xlu1 %v7068_v30, %s7262_s0  ;;  %7079 = vrot.lane.b32.xlu0 %v7073_v56, %s12588_s20 }
 0x8c1   : > { %7074 = vrot.lane.b32.xlu2 %v7073_v56, %s7261_s15  ;;  %6188 = vmatpush.msra.mxu3 %v6133_v15 }
 0x8c3   : > { %6189 = vmatpush.msra.mxu3 %v6132_v37 }
 0x8c5   : > { %6190 = vmatpush.msra.mxu3 %v6131_v13 }
 0x8c7   : > { %6191 = vmatpush.msra.mxu3 %v6130_v22 }
 0x8c8   : > { %7084 = vrot.lane.b32.xlu1 %v7083_v38, %s12654_s22  ;;  %7094 = vrot.lane.b32.xlu0 %v7093_v36, %s12401_s16 }
 0x8c9   : > { %7089 = vrot.lane.b32.xlu2 %v7088_v55, %s12400_s30  ;;  %6231 = vmatpush.msrb.mxu3 %v6147_v42  ;;  %s6585_s30 = scalar_lea.hbm %s11916_s13, %s6779_s21 }
 0x8ca   : > { %s6588_s23 = sshll.u32 %s6585_s30, 4  ;;  %s6589_s23 = int_to_ptr.hbm [resolvable:$true] %s6588_s23 }
 0x8d0   : > { %6005 = vrot.lane.b32.xlu1 %v5843_v2, %s13286_s1  ;;  %6062 = vrot.lane.b32.xlu0 %v5835_v3, %s7261_s15  ;;  %v5795_v2 = vsel %vm13341_vm12, %v11320_v16, 0.0 }
 0x8d1   : > { %6037 = vrot.lane.b32.xlu2 %v5852_v43, %s7262_s0 }
 0x8d8   : > { %6007 = vrot.lane.b32.xlu1 %v5844_v49, %s13286_s1  ;;  %6064 = vrot.lane.b32.xlu0 %v5854_v24, %s7261_s15  ;;  %s7201_s1 = sshra.s32 %s6589_s23, 4  ;;  %s7202_s1 = int_to_ptr.hbm [resolvable:$true] %s7201_s1 }
 0x8d9   : > { %6039 = vrot.lane.b32.xlu2 %v5853_v57, %s7262_s0  ;;  %s7203_s15 = scalar_lea.hbm %s7202_s1, 16  ;;  %p7208_p0 = scmp.lt.s32.totalorder %s7202_s1, %s11916_s13 }
 0x8da   : > { %p7204_p11 = scmp.ne.s32.totalorder %s7202_s1, %s7203_s15 }
 0x8dc   : > { %p7205_p12 = pnand %p7204_p11, %p7372_p5 }
 0x8de   : > { %p7206_p13 = pneg %p7205_p12 }
 0x8eb   : > { %v6985_v40 = vpop.permute.xlu2 %6984 }
 0x8ec   : > { %v6986_v54 = vunpack.i.l.bf16 %v6985_v40  ;;  %v6987_v49 = vunpack.i.h.bf16 %v6985_v40 }
 0x8f3   : > { %v7000_v56 = vpop.permute.xlu2 %6999 }
 0x8f4   : > { %v7001_v4 = vunpack.i.l.bf16 %v7000_v56  ;;  %v7002_v17 = vunpack.i.h.bf16 %v7000_v56 }
 0x8f8   : > { %v6975_v30 = vpop.permute.xlu0 %6974 }
 0x8f9   : > { %v6976_v27 = vunpack.i.l.bf16 %v6975_v30  ;;  %v6977_v39 = vunpack.i.h.bf16 %v6975_v30 }
 0x8fb   : > { %v6074_v38 = vsel %vm13346_vm7, %v5794_v28, %v6976_v27  ;;  %v7015_v55 = vpop.permute.xlu2 %7014  ;;  %v6075_v43 = vsel %vm13349_vm0, %v5795_v2, %v6977_v39  ;;  %vm13352_vm7 = vcmask 523264   ;;  %vm13355_vm0 = vcmask 785408  }
 0x8fc   : > { %vm13357_vm12 = vmmov %vm13352_vm7 }
 0x900   : > { %v6990_v21 = vpop.permute.xlu0 %6989 }
 0x901   : > { %v6991_v1 = vunpack.i.l.bf16 %v6990_v21  ;;  %v6992_v16 = vunpack.i.h.bf16 %v6990_v21  ;;  %v5796_v21 = vsel %vm13343_vm9, %v11324_v53, 0.0  ;;  %vm13363_vm9 = vcmask 392192  }
 0x902   : > { %v6980_v3 = vpop.permute.xlu1 %6979 }
 0x903   : > { %v6981_v29 = vunpack.i.l.bf16 %v6980_v3  ;;  %v6982_v36 = vunpack.i.h.bf16 %v6980_v3  ;;  %v7030_v22 = vpop.permute.xlu2 %7029 }
 0x905   : > { %v6082_v62 = vsel %vm13348_vm1, %v6074_v38, %v6981_v29  ;;  %v6083_v8 = vsel %vm13351_vm13, %v6075_v43, %v6982_v36  ;;  %vm13353_vm1 = vmmov %vm13350_vm6 }
 0x906   : > { %v6090_v41 = vsel %vm13350_vm6, %v6082_v62, %v6986_v54  ;;  %v6091_v47 = vsel %vm13353_vm1, %v6083_v8, %v6987_v49  ;;  %vm13356_vm6 = vcmask 916480   ;;  %vm13358_vm13 = vmmov %vm13354_vm3  ;;  %v6146_v62 = vld [vmem:[%s11912_s9 + $0x80] sm:$0xff]  ;;  %v7016_v54 = vunpack.i.l.bf16 %v7015_v55 }
 0x907   : > { %v6098_v34 = vsel %vm13352_vm7, %v6090_v41, %v6991_v1  ;;  %v6099_v30 = vsel %vm13357_vm12, %v6091_v47, %v6992_v16  ;;  %vm13359_vm7 = vmmov %vm13355_vm0  ;;  %6232 = vmatpush.msrb.mxu3 %v6146_v62  ;;  %v5797_v8 = vsel %vm13344_vm11, %v11343_v26, 0.0  ;;  %v7031_v49 = vunpack.i.l.bf16 %v7030_v22 }
 0x908   : > { %v7005_v46 = vpop.permute.xlu0 %7004  ;;  %vm13361_vm1 = vmmov %vm13356_vm6 }
 0x909   : > { %v7006_v15 = vunpack.i.l.bf16 %v7005_v46  ;;  %v7007_v39 = vunpack.i.h.bf16 %v7005_v46  ;;  %vm13368_vm11 = vmmov %vm13363_vm9 }
 0x90a   : > { %v6995_v24 = vpop.permute.xlu1 %6994 }
 0x90b   : > { %v6996_v57 = vunpack.i.l.bf16 %v6995_v24  ;;  %v6997_v37 = vunpack.i.h.bf16 %v6995_v24  ;;  %v7045_v56 = vpop.permute.xlu2 %7044 }
 0x90d   : > { %v6106_v59 = vsel %vm13354_vm3, %v6098_v34, %v6996_v57  ;;  %v6107_v40 = vsel %vm13358_vm13, %v6099_v30, %v6997_v37  ;;  %vm13360_vm3 = vcmask 130048  }
 0x90e   : > { %v6114_v13 = vsel %vm13355_vm0, %v6106_v59, %v7001_v4  ;;  %v6115_v29 = vsel %vm13359_vm7, %v6107_v40, %v7002_v17  ;;  %vm13362_vm0 = vcmask 261120   ;;  %v7017_v4 = vunpack.i.h.bf16 %v7015_v55 }
 0x90f   : > { %v6122_v42 = vsel %vm13356_vm6, %v6114_v13, %v7006_v15  ;;  %v6123_v36 = vsel %vm13361_vm1, %v6115_v29, %v7007_v39  ;;  %vm13364_vm6 = vmmov %vm13357_vm12  ;;  %v7032_v55 = vunpack.i.h.bf16 %v7030_v22 }
 0x910   : > { %6192 = vmatmul.f32.vlgmr.msra.gmra.mxu3 %v6122_v42  ;;  %vm13365_vm12 = vmmov %vm13360_vm3 }
 0x911   : > { %vm13366_vm7 = vmmov %vm13362_vm0 }
 0x912   : > { %v7010_v27 = vpop.permute.xlu1 %7009  ;;  %v7020_v3 = vpop.permute.xlu0 %7019 }
 0x913   : > { %v7011_v28 = vunpack.i.l.bf16 %v7010_v27  ;;  %v7012_v41 = vunpack.i.h.bf16 %v7010_v27  ;;  %v7021_v46 = vunpack.i.l.bf16 %v7020_v3  ;;  %v7060_v16 = vpop.permute.xlu2 %7059  ;;  %v7022_v13 = vunpack.i.h.bf16 %v7020_v3 }
 0x914   : > { %v7046_v27 = vunpack.i.l.bf16 %v7045_v56  ;;  %v5798_v3 = vsel %vm13347_vm8, %v11361_v60, 0.0 }
 0x915   : > { %v6076_v38 = vsel %vm13360_vm3, %v5796_v21, %v7011_v28  ;;  %v6077_v57 = vsel %vm13365_vm12, %v5797_v8, %v7012_v41  ;;  %vm13367_vm3 = vcmask 785408  }
 0x916   : > { %v6084_v2 = vsel %vm13362_vm0, %v6076_v38, %v7016_v54  ;;  %v6085_v47 = vsel %vm13366_vm7, %v6077_v57, %v7017_v4  ;;  %vm13369_vm0 = vmmov %vm13364_vm6 }
 0x917   : > { %v6092_v53 = vsel %vm13363_vm9, %v6084_v2, %v7021_v46  ;;  %v6093_v26 = vsel %vm13368_vm11, %v6085_v47, %v7022_v13  ;;  %vm13370_vm9 = vmmov %vm13358_vm13  ;;  %v7047_v46 = vunpack.i.h.bf16 %v7045_v56 }
 0x918   : > { %6195 = vmatmul.f32.gmra.mxu3 %v6123_v36  ;;  %vm13376_vm8 = vmmov %vm13369_vm0 }
 0x919   : > { %vm13382_vm2 = vmmov %vm13376_vm8 }
 0x91a   : > { %v7025_v43 = vpop.permute.xlu1 %7024  ;;  %v7035_v20 = vpop.permute.xlu0 %7034 }
 0x91b   : > { %v7026_v1 = vunpack.i.l.bf16 %v7025_v43  ;;  %v7027_v15 = vunpack.i.h.bf16 %v7025_v43  ;;  %v7036_v37 = vunpack.i.l.bf16 %v7035_v20  ;;  %v7037_v21 = vunpack.i.h.bf16 %v7035_v20  ;;  %v7075_v43 = vpop.permute.xlu2 %7074 }
 0x91c   : > { %v7061_v20 = vunpack.i.l.bf16 %v7060_v16  ;;  %v7076_v47 = vunpack.i.l.bf16 %v7075_v43 }
 0x91d   : > { %v6100_v24 = vsel %vm13364_vm6, %v6092_v53, %v7026_v1  ;;  %v6101_v17 = vsel %vm13369_vm0, %v6093_v26, %v7027_v15  ;;  %vm13371_vm6 = vmmov %vm13365_vm12 }
 0x91e   : > { %v6108_v34 = vsel %vm13358_vm13, %v6100_v24, %v7031_v49  ;;  %v6109_v39 = vsel %vm13370_vm9, %v6101_v17, %v7032_v55  ;;  %v6078_v54 = vsel %vm13371_vm6, %v5798_v3, %v7046_v27  ;;  %vm13372_vm12 = vmmov %vm13367_vm3  ;;  %v5800_v55 = vsel %vm11181_vm10, %v11416_v48, 0.0 }
 0x91f   : > { %v6116_v50 = vsel %vm13367_vm3, %v6108_v34, %v7036_v37  ;;  %v6117_v2 = vsel %vm13372_vm12, %v6109_v39, %v7037_v21  ;;  %vm13373_vm13 = vmmov %vm13366_vm7  ;;  %v5801_v48 = vsel %vm11185_vm5, %v11439_v52, 0.0 }
 0x920   : > { %vm13374_vm7 = vmmov %vm13361_vm1 }
 0x921   : > { %vm13375_vm3 = vmmov %vm13368_vm11 }
 0x922   : > { %v7040_v59 = vpop.permute.xlu1 %7039  ;;  %v7050_v30 = vpop.permute.xlu0 %7049  ;;  %vm13377_vm11 = vmmov %vm13371_vm6 }
 0x923   : > { %v7041_v42 = vunpack.i.l.bf16 %v7040_v59  ;;  %v7042_v28 = vunpack.i.h.bf16 %v7040_v59  ;;  %v7051_v29 = vunpack.i.l.bf16 %v7050_v30  ;;  %v7052_v53 = vunpack.i.h.bf16 %v7050_v30  ;;  %vm13379_vm0 = vmmov %vm13375_vm3  ;;  %v7090_v0 = vpop.permute.xlu2 %7089 }
 0x924   : > { %v6079_v24 = vsel %vm13377_vm11, %v5799_v31, %v7047_v46  ;;  %v7062_v59 = vunpack.i.h.bf16 %v7060_v16  ;;  %vm13380_vm6 = vmmov %vm13372_vm12  ;;  %v7091_v21 = vunpack.i.l.bf16 %v7090_v0 }
 0x925   : > { %v6124_v40 = vsel %vm13361_vm1, %v6116_v50, %v7041_v42  ;;  %v6086_v22 = vsel %vm13373_vm13, %v6078_v54, %v7051_v29  ;;  %v6125_v41 = vsel %vm13374_vm7, %v6117_v2, %v7042_v28  ;;  %vm13378_vm1 = vmmov %vm13373_vm13  ;;  %v7077_v29 = vunpack.i.h.bf16 %v7075_v43 }
 0x926   : > { %6198 = vmatmul.f32.gmra.mxu3 %v6124_v40  ;;  %v6087_v4 = vsel %vm13378_vm1, %v6079_v24, %v7052_v53  ;;  %vm13381_vm12 = vmmov %vm13374_vm7 }
 0x927   : > { %vm13383_vm13 = vmmov %vm13370_vm9 }
 0x928   : > { %vm13384_vm7 = vmmov %vm13380_vm6 }
 0x929   : > { %vm13389_vm10 = vmmov %vm13382_vm2 }
 0x92a   : > { %v7055_v38 = vpop.permute.xlu1 %7054  ;;  %v7065_v62 = vpop.permute.xlu0 %7064  ;;  %vm13395_vm5 = vmmov %vm13389_vm10 }
 0x92b   : > { %v7056_v36 = vunpack.i.l.bf16 %v7055_v38  ;;  %v7057_v8 = vunpack.i.h.bf16 %v7055_v38  ;;  %v7066_v49 = vunpack.i.l.bf16 %v7065_v62  ;;  %v7067_v50 = vunpack.i.h.bf16 %v7065_v62  ;;  %v6038_v25 = vpop.permute.xlu2 %6037 }
 0x92d   : > { %v6094_v1 = vsel %vm13375_vm3, %v6086_v22, %v7056_v36  ;;  %v6095_v15 = vsel %vm13379_vm0, %v6087_v4, %v7057_v8  ;;  %vm13385_vm3 = vmmov %vm13377_vm11  ;;  %v7092_v8 = vunpack.i.h.bf16 %v7090_v0  ;;  %v6468_v0 = vld [vmem:[%s11914_s11 + $0x60] sm:$0xff] }
 0x92e   : > { %6201 = vmatmul.f32.gmra.mxu3 %v6125_v41  ;;  %v6102_v60 = vsel %vm13376_vm8, %v6094_v1, %v7061_v20  ;;  %v6103_v30 = vsel %vm13382_vm2, %v6095_v15, %v7062_v59  ;;  %vm13386_vm8 = vmmov %vm13378_vm1  ;;  %v5857_v15 = vsel %vm10784_vm14, %v11359_v44, 0.0  ;;  %vm13405_vm14 = vnez %v13248_v7  ;;  %v6487_v7 = vld [vmem:[%s11914_s11 + $0xf8] sm:$0xff]  ;;  %v6470_v44 = vld [vmem:[%s11914_s11 + $0x70] sm:$0xff] }
 0x92f   : > { %v6110_v37 = vsel %vm13370_vm9, %v6102_v60, %v7066_v49  ;;  %v6111_v17 = vsel %vm13383_vm13, %v6103_v30, %v7067_v50  ;;  %vm13387_vm11 = vmmov %vm13381_vm12  ;;  %v5861_v45 = vsel %vm13405_vm14, %v11462_v23, 0.0  ;;  %6525 = vmatpush.msrb.mxu1 %v6487_v7  ;;  %6503 = vmatpush.msrb.mxu0 %v6470_v44  ;;  %v6485_v23 = vld [vmem:[%s11914_s11 + $0xe8] sm:$0xff] }
 0x930   : > { %vm13388_vm1 = vmmov %vm13379_vm0  ;;  %6781 = vmatpush.msrb.mxu2 %v6470_v44 }
 0x931   : > { %vm13390_vm0 = vmmov %vm13385_vm3  ;;  %6504 = vmatpush.msrb.mxu0 %v6469_v51 }
 0x932   : > { %v7070_v57 = vpop.permute.xlu1 %7069  ;;  %v7080_v56 = vpop.permute.xlu0 %7079  ;;  %vm13393_vm2 = vmmov %vm13387_vm11  ;;  %6782 = vmatpush.msrb.mxu2 %v6469_v51 }
 0x933   : > { %v7071_v34 = vunpack.i.l.bf16 %v7070_v57  ;;  %v7072_v42 = vunpack.i.h.bf16 %v7070_v57  ;;  %v7081_v26 = vunpack.i.l.bf16 %v7080_v56  ;;  %v7082_v36 = vunpack.i.h.bf16 %v7080_v56  ;;  %vm13394_vm13 = vmmov %vm13388_vm1  ;;  %v6040_v49 = vpop.permute.xlu2 %6039  ;;  %6505 = vmatpush.msrb.mxu0 %v6468_v0 }
 0x934   : > { %6783 = vmatpush.msrb.mxu2 %v6468_v0 }
 0x935   : > { %v6118_v13 = vsel %vm13380_vm6, %v6110_v37, %v7071_v34  ;;  %v6119_v28 = vsel %vm13384_vm7, %v6111_v17, %v7072_v42  ;;  %v6080_v39 = vsel %vm13385_vm3, %v5800_v55, %v7081_v26  ;;  %v6081_v41 = vsel %vm13390_vm0, %v5801_v48, %v7082_v36  ;;  %vm13391_vm6 = vmmov %vm13386_vm8  ;;  %v6484_v42 = vld [vmem:[%s11914_s11 + $0xe0] sm:$0xff]  ;;  %v6483_v17 = vld [vmem:[%s11914_s11 + $0xd8] sm:$0xff] }
 0x936   : > { %v6126_v10 = vsel %vm13381_vm12, %v6118_v13, %v7076_v47  ;;  %v6127_v3 = vsel %vm13387_vm11, %v6119_v28, %v7077_v29  ;;  %vm13392_vm12 = vmmov %vm13384_vm7  ;;  %v5856_v47 = vsel %vm10790_vm15, %v11339_v18, 0.0  ;;  %v11679_v26 = vld [vmem:[%s11913_s10] ss:$0 sm:$0xff]  ;;  %v6482_v48 = vld [vmem:[%s11914_s11 + $0xd0] sm:$0xff] }
 0x937   : > { %6204 = vmatmul.f32.gmra.mxu3 %v6126_v10  ;;  %vm13396_vm7 = vmmov %vm13370_vm9 }
 0x938   : > { %vm13397_vm3 = vmmov %vm13392_vm12 }
 0x939   : > { %vm13399_vm11 = vmmov %vm13390_vm0 }
 0x93a   : > { %v7085_v40 = vpop.permute.xlu1 %7084  ;;  %v7095_v16 = vpop.permute.xlu0 %7094  ;;  %vm13404_vm15 = vmmov %vm13390_vm0 }
 0x93b   : > { %v7086_v27 = vunpack.i.l.bf16 %v7085_v40  ;;  %v7087_v54 = vunpack.i.h.bf16 %v7085_v40  ;;  %v7096_v2 = vunpack.i.l.bf16 %v7095_v16  ;;  %v7097_v33 = vunpack.i.h.bf16 %v7095_v16  ;;  %v6467_v40 = vld [vmem:[%s11914_s11 + $0x58] sm:$0xff] }
 0x93c   : > { %6506 = vmatpush.msrb.mxu0 %v6467_v40  ;;  %6784 = vmatpush.msrb.mxu2 %v6467_v40  ;;  %v6480_v40 = vld [vmem:[%s11914_s11 + $0xc0] sm:$0xff] }
 0x93d   : > { %v6088_v38 = vsel %vm13386_vm8, %v6080_v39, %v7086_v27  ;;  %v6089_v20 = vsel %vm13391_vm6, %v6081_v41, %v7087_v54  ;;  %vm13398_vm8 = vmmov %vm13393_vm2 }
 0x93e   : > { %v6096_v62 = vsel %vm13388_vm1, %v6088_v38, %v7091_v21  ;;  %v6097_v60 = vsel %vm13394_vm13, %v6089_v20, %v7092_v8  ;;  %vm13400_vm1 = vmmov %vm13390_vm0 }
 0x93f   : > { %6207 = vmatmul.f32.gmra.mxu3 %v6127_v3  ;;  %v6104_v43 = vsel %vm13389_vm10, %v6096_v62, %v7096_v2  ;;  %v6105_v24 = vsel %vm13395_vm5, %v6097_v60, %v7097_v33  ;;  %vm13401_vm10 = vnez %v13209_v9  ;;  %vm13403_vm6 = vmmov %vm13390_vm0  ;;  %v6465_v60 = vld [vmem:[%s11914_s11 + $0x48] sm:$0xff] }
 0x940   : > { %v5858_v37 = vsel %vm13401_vm10, %v11381_v5, 0.0  ;;  %vm13408_vm13 = vmmov %vm13390_vm0  ;;  %v6486_v5 = vld [vmem:[%s11914_s11 + $0xf0] sm:$0xff]  ;;  %v6481_v33 = vld [vmem:[%s11914_s11 + $0xc8] sm:$0xff] }
 0x941   : > { %vm13410_vm5 = vmmov %vm13390_vm0  ;;  %6526 = vmatpush.msrb.mxu1 %v6486_v5 }
 0x942   : > { %v6006_v22 = vpop.permute.xlu1 %6005  ;;  %v6063_v1 = vpop.permute.xlu0 %6062 }
 0x943   : > { %v6112_v46 = vsel %vm13370_vm9, %v6104_v43, %v6006_v22  ;;  %vm13402_vm9 = vnez %v13206_v63  ;;  %v5855_v63 = vld [vmem:[#allocation2 + $0x59] sm:$0xff]  ;;  %6527 = vmatpush.msrb.mxu1 %v6485_v23 }
 0x944   : > { %v6120_v53 = vsel %vm13392_vm12, %v6112_v46, %v6038_v25  ;;  %v5859_v59 = vsel %vm13402_vm9, %v11403_v32, 0.0  ;;  %vm13406_vm12 = vmmov %vm13390_vm0  ;;  %v5863_v18 = vsel %vm13409_vm4, %v5855_v63, 0.0  ;;  %v6466_v25 = vld [vmem:[%s11914_s11 + $0x50] sm:$0xff] }
 0x945   : > { %v6128_v31 = vsel %vm13393_vm2, %v6120_v53, %v6063_v1  ;;  %vm13407_vm2 = vnez %v13294_v6  ;;  %6528 = vmatpush.msrb.mxu1 %v6484_v42  ;;  %6507 = vmatpush.msrb.mxu0 %v6466_v25  ;;  %v6464_v42 = vld [vmem:[%s11914_s11 + $0x40] sm:$0xff] }
 0x946   : > { %v5862_v9 = vsel %vm13407_vm2, %v11499_v11, 0.0  ;;  %6785 = vmatpush.msrb.mxu2 %v6466_v25  ;;  %vm6332_vm2 = vcmask 1043456  }
 0x947   : > { %6210 = vmatmul.f32.gmra.mxu3 %v6128_v31  ;;  %6529 = vmatpush.msrb.mxu1 %v6483_v17  ;;  %v6463_v17 = vld [vmem:[%s11914_s11 + $0x38] sm:$0xff] }
 0x948   : > { %6508 = vmatpush.msrb.mxu0 %v6465_v60  ;;  %6786 = vmatpush.msrb.mxu2 %v6465_v60 }
 0x949   : > { %6530 = vmatpush.msrb.mxu1 %v6482_v48 }
 0x94a   : > { %v6008_v52 = vpop.permute.xlu1 %6007  ;;  %v6065_v4 = vpop.permute.xlu0 %6064  ;;  %6509 = vmatpush.msrb.mxu0 %v6464_v42  ;;  %6787 = vmatpush.msrb.mxu2 %v6464_v42 }
 0x94b   : > { %v6113_v57 = vsel %vm13396_vm7, %v6105_v24, %v6008_v52  ;;  %6531 = vmatpush.msrb.mxu1 %v6481_v33  ;;  %v6459_v33 = vld [vmem:[%s11914_s11 + $0x18] sm:$0xff] }
 0x94c   : > { %v6121_v34 = vsel %vm13397_vm3, %v6113_v57, %v6040_v49  ;;  %vm13411_vm3 = vcmask 261120   ;;  %6510 = vmatpush.msrb.mxu0 %v6463_v17  ;;  %6788 = vmatpush.msrb.mxu2 %v6463_v17 }
 0x94d   : > { %v6129_v56 = vsel %vm13398_vm8, %v6121_v34, %v6065_v4  ;;  %vm13413_vm10 = vmmov %vm13411_vm3  ;;  %6532 = vmatpush.msrb.mxu1 %v6480_v40 }
 0x94e   : > { %vm13414_vm9 = vmmov %vm13411_vm3 }
 0x94f   : > { %6213 = vmatmul.f32.gmra.mxu3 %v6129_v56  ;;  %vm13416_vm14 = vmmov %vm13411_vm3 }
 0x950   : > { %vm13418_vm4 = vmmov %vm13411_vm3 }
 0x957   : > { %6763 = vmatmul.msk.f32.vlgmr.msrb.gmra.mxu3 %vm13399_vm11, %v5856_v47  ;;  %vm13412_vm11 = vmmov %vm13411_vm3 }
 0x95f   : > { %6764 = vmatmul.msk.f32.gmra.mxu3 %vm13400_vm1, %v5857_v15 }
 0x967   : > { %6765 = vmatmul.msk.f32.gmra.mxu3 %vm13390_vm0, %v5858_v37 }
 0x96f   : > { %6766 = vmatmul.msk.f32.gmra.mxu3 %vm13403_vm6, %v5859_v59  ;;  %vm13415_vm6 = vmmov %vm13411_vm3 }
 0x977   : > { %6767 = vmatmul.msk.f32.gmra.mxu3 %vm13404_vm15, %v5860_v14 }
 0x97f   : > { %6768 = vmatmul.msk.f32.gmra.mxu3 %vm13406_vm12, %v5861_v45  ;;  %vm13417_vm12 = vmmov %vm13411_vm3 }
 0x987   : > { %6769 = vmatmul.msk.f32.gmra.mxu3 %vm13408_vm13, %v5862_v9 }
 0x98f   : > { %6770 = vmatmul.msk.f32.gmra.mxu3 %vm13410_vm5, %v5863_v18  ;;  %vm13419_vm5 = vmmov %vm13411_vm3 }
 0x993   : > { %v6193_v6 = vpop.f32.mrf.mxu3 }
 0x994   : > { %v6194_v55 = vadd.f32 %v11679_v26, %v6193_v6 }
 0x99b   : > { %v6196_v35 = vpop.f32.mrf.mxu3 }
 0x99c   : > { %v6197_v39 = vadd.f32 %v11679_v26, %v6196_v35 }
 0x9a9   : > { %v6199_v32 = vpop.f32.mrf.mxu3 }
 0x9aa   : > { %v6200_v62 = vadd.f32 %v11679_v26, %v6199_v32 }
 0x9b1   : > { %v6202_v11 = vpop.f32.mrf.mxu3 }
 0x9b2   : > { %v6203_v41 = vadd.f32 %v11679_v26, %v6202_v11 }
 0x9ba   : > { %v6205_v13 = vpop.f32.mrf.mxu3 }
 0x9bb   : > { %v6206_v52 = vadd.f32 %v11679_v26, %v6205_v13 }
 0x9c2   : > { %v11664_v10 = vpop.f32.mrf.mxu3 }
 0x9c3   : > { %v6209_v45 = vadd.f32 %v11679_v26, %v11664_v10 }
 0x9ca   : > { %v11672_v30 = vpop.f32.mrf.mxu3 }
 0x9cb   : > { %v6212_v11 = vadd.f32 %v11679_v26, %v11672_v30 }
 0x9d2   : > { %v11674_v50 = vpop.f32.mrf.mxu3 }
 0x9da   : > { %v6234_v27 = vpop.f32.mrf.mxu3 }
 0x9db   : > { %v6235_v16 = vadd.f32 %v6234_v27, %v6194_v55  ;;  %v6479_v55 = vld [vmem:[%s11914_s11 + $0xb8] sm:$0xff] }
 0x9dc   : > { %6533 = vmatpush.msrb.mxu1 %v6479_v55  ;;  %v6473_v55 = vld [vmem:[%s11914_s11 + $0x88] sm:$0xff] }
 0x9dd   : > { %vm6258_vm7 = vcmp.ge.f32.partialorder %v6235_v16, 0.0  ;;  %v6266_v28 = vmul.f32 0.01, %v6235_v16 }
 0x9df   : > { %v6274_v29 = vsel %vm6258_vm7, %v6235_v16, %v6266_v28  ;;  %vm13420_vm7 = vmmov %vm13411_vm3  ;;  %v6215_v28 = vadd.f32 %v11679_v26, %v11674_v50 }
 0x9e0   : > { %6282 = vst.msk [vmem:[#allocation2 + $0x18] sm:$0xff] %vm13411_vm3, %v6274_v29 }
 0x9e2   : > { %v6237_v21 = vpop.f32.mrf.mxu3 }
 0x9e3   : > { %v6238_v38 = vadd.f32 %v6237_v21, %v6197_v39  ;;  %v6462_v39 = vld [vmem:[%s11914_s11 + $0x30] sm:$0xff] }
 0x9e4   : > { %6511 = vmatpush.msrb.mxu0 %v6462_v39  ;;  %6789 = vmatpush.msrb.mxu2 %v6462_v39  ;;  %v6488_v39 = vld [vmem:[%s11914_s11 + $0x100] sm:$0xff] }
 0x9e5   : > { %vm6259_vm8 = vcmp.ge.f32.partialorder %v6238_v38, 0.0  ;;  %v6267_v3 = vmul.f32 0.01, %v6238_v38 }
 0x9e7   : > { %v6275_v36 = vsel %vm6259_vm8, %v6238_v38, %v6267_v3  ;;  %v6290_v57 = vld [vmem:[#allocation2 + $0x18] ss:$2 sm:$0xf]  ;;  %v6291_v4 = vld [vmem:[#allocation2 + $0x19] ss:$2 sm:$0xf]  ;;  %vm13421_vm8 = vmmov %vm13418_vm4 }
 0x9e8   : > { %6283 = vst.msk [vmem:[#allocation2 + $0x20] sm:$0xff] %vm13412_vm11, %v6275_v36  ;;  %v6292_v47 = vadd.f32 %v6291_v4, %v6290_v57  ;;  %v6346_v57 = vand.u32 3, %v13177_v58  ;;  %v6474_v4 = vld [vmem:[%s11914_s11 + $0x90] sm:$0xff] }
 0x9ea   : > { %v6240_v54 = vpop.f32.mrf.mxu3 }
 0x9eb   : > { %v6241_v2 = vadd.f32 %v6240_v54, %v6200_v62  ;;  %v6478_v62 = vld [vmem:[%s11914_s11 + $0xb0] sm:$0xff] }
 0x9ec   : > { %6534 = vmatpush.msrb.mxu1 %v6478_v62 }
 0x9ed   : > { %vm6260_vm1 = vcmp.ge.f32.partialorder %v6241_v2, 0.0  ;;  %v6268_v22 = vmul.f32 0.01, %v6241_v2 }
 0x9ef   : > { %v6276_v43 = vsel %vm6260_vm1, %v6241_v2, %v6268_v22  ;;  %v6294_v56 = vld [vmem:[#allocation2 + $0x20] ss:$2 sm:$0xf]  ;;  %v6297_v6 = vld [vmem:[#allocation2 + $0x21] ss:$2 sm:$0xf]  ;;  %vm13422_vm1 = vmmov %vm13418_vm4 }
 0x9f0   : > { %6284 = vst.msk [vmem:[#allocation2 + $0x28] sm:$0xff] %vm13413_vm10, %v6276_v43  ;;  %v6295_v9 = vadd.f32 %v6294_v56, %v6292_v47  ;;  %vm13423_vm10 = vmmov %vm13422_vm1  ;;  %v6457_v56 = vld [vmem:[%s11914_s11 + $0x8] sm:$0xff] }
 0x9f2   : > { %v6243_v46 = vpop.f32.mrf.mxu3  ;;  %v6298_v44 = vadd.f32 %v6297_v6, %v6295_v9 }
 0x9f3   : > { %v6244_v1 = vadd.f32 %v6243_v46, %v6203_v41 }
 0x9f5   : > { %vm6261_vm0 = vcmp.ge.f32.partialorder %v6244_v1, 0.0  ;;  %v6269_v20 = vmul.f32 0.01, %v6244_v1 }
 0x9f7   : > { %v6299_v53 = vld [vmem:[#allocation2 + $0x28] ss:$2 sm:$0xf]  ;;  %v6300_v8 = vld [vmem:[#allocation2 + $0x29] ss:$2 sm:$0xf]  ;;  %v6277_v31 = vsel %vm6261_vm0, %v6244_v1, %v6269_v20 }
 0x9f8   : > { %6337 = vst.msk [vmem:[#allocation2 + $0x28] sm:$0xff] %vm13414_vm9, %v12801_v61  ;;  %v6301_v15 = vadd.f32 %v6300_v8, %v6299_v53  ;;  %v6461_v20 = vld [vmem:[%s11914_s11 + $0x28] sm:$0xff]  ;;  %v6460_v8 = vld [vmem:[%s11914_s11 + $0x20] sm:$0xff]  ;;  %vm11775_vm0 = vcmp.gt.s32.totalorder %v6346_v57, 0  ;;  %vm11779_vm9 = vcmp.lt.s32.totalorder %v6346_v57, 3 }
 0x9f9   : > { %6285 = vst.msk [vmem:[#allocation2 + $0x30] sm:$0xff] %vm13415_vm6, %v6277_v31  ;;  %v6477_v53 = vld [vmem:[%s11914_s11 + $0xa8] sm:$0xff]  ;;  %6512 = vmatpush.msrb.mxu0 %v6461_v20  ;;  %6790 = vmatpush.msrb.mxu2 %v6461_v20  ;;  %v6476_v31 = vld [vmem:[%s11914_s11 + $0xa0] sm:$0xff] }
 0x9fa   : > { %v6246_v24 = vpop.f32.mrf.mxu3  ;;  %6535 = vmatpush.msrb.mxu1 %v6477_v53 }
 0x9fb   : > { %v6247_v49 = vadd.f32 %v6246_v24, %v6206_v52  ;;  %6513 = vmatpush.msrb.mxu0 %v6460_v8  ;;  %6791 = vmatpush.msrb.mxu2 %v6460_v8  ;;  %v6475_v24 = vld [vmem:[%s11914_s11 + $0x98] sm:$0xff] }
 0x9fc   : > { %6536 = vmatpush.msrb.mxu1 %v6476_v31 }
 0x9fd   : > { %vm6262_vm15 = vcmp.ge.f32.partialorder %v6247_v49, 0.0  ;;  %v6270_v34 = vmul.f32 0.01, %v6247_v49  ;;  %6514 = vmatpush.msrb.mxu0 %v6459_v33  ;;  %6792 = vmatpush.msrb.mxu2 %v6459_v33 }
 0x9fe   : > { %6537 = vmatpush.msrb.mxu1 %v6475_v24 }
 0x9ff   : > { %v6278_v37 = vsel %vm6262_vm15, %v6247_v49, %v6270_v34  ;;  %v6458_v49 = vld [vmem:[%s11914_s11 + $0x10] sm:$0xff]  ;;  %v6353_v34 = vand.u32 3, %v13178_v19 }
 0xa00   : > { %v6303_v59 = vld [vmem:[#allocation2 + $0x30] ss:$2 sm:$0xf]  ;;  %v6306_v14 = vld [vmem:[#allocation2 + $0x31] ss:$2 sm:$0xf]  ;;  %6515 = vmatpush.msrb.mxu0 %v6458_v49  ;;  %6793 = vmatpush.msrb.mxu2 %v6458_v49 }
 0xa01   : > { %v6304_v63 = vadd.f32 %v6303_v59, %v6301_v15  ;;  %6338 = vst.msk [vmem:[#allocation2 + $0x30] sm:$0xff] %vm13416_vm14, %v12801_v61  ;;  %6538 = vmatpush.msrb.mxu1 %v6474_v4  ;;  %vm11783_vm6 = vcmp.gt.s32.totalorder %v6353_v34, 0  ;;  %vm11787_vm15 = vcmp.lt.s32.totalorder %v6353_v34, 3  ;;  %vm13432_vm14 = vmmov %vm13422_vm1 }
 0xa02   : > { %6286 = vst.msk [vmem:[#allocation2 + $0x38] sm:$0xff] %vm13417_vm12, %v6278_v37  ;;  %v6249_v12 = vpop.f32.mrf.mxu3  ;;  %6516 = vmatpush.msrb.mxu0 %v6457_v56  ;;  %6794 = vmatpush.msrb.mxu2 %v6457_v56  ;;  %vm13433_vm12 = vmmov %vm13422_vm1 }
 0xa03   : > { %v6307_v18 = vadd.f32 %v6306_v14, %v6304_v63  ;;  %v6250_v7 = vadd.f32 %v6249_v12, %v6209_v45  ;;  %6539 = vmatpush.msrb.mxu1 %v6473_v55 }
 0xa05   : > { %v6327_v5 = vrot.slane %v6307_v18, 4  ;;  %vm6263_vm13 = vcmp.ge.f32.partialorder %v6250_v7, 0.0  ;;  %v6271_v35 = vmul.f32 0.01, %v6250_v7 }
 0xa07   : > { %v6333_v32 = vsel %vm6332_vm2, %v6298_v44, %v6327_v5  ;;  %v6279_v51 = vsel %vm6263_vm13, %v6250_v7, %v6271_v35 }
 0xa08   : > { %v6335_v23 = vmul.f32 0.25, %v6333_v32  ;;  %6287 = vst.msk [vmem:[#allocation2 + $0x40] sm:$0xff] %vm13418_vm4, %v6279_v51  ;;  %vm13436_vm4 = vcmask 785408  }
 0xa09   : > { %v6308_v13 = vld [vmem:[#allocation2 + $0x38] ss:$2 sm:$0xf]  ;;  %v6309_v10 = vld [vmem:[#allocation2 + $0x39] ss:$2 sm:$0xf] }
 0xa0a   : > { %6340 = vst.msk [vmem:[#allocation2 + $0x18] sm:$0xff] %vm13419_vm5, %v6335_v23  ;;  %v6252_v0 = vpop.f32.mrf.mxu3  ;;  %v6310_v26 = vadd.f32 %v6309_v10, %v6308_v13  ;;  %vm13437_vm5 = vmmov %vm13436_vm4 }
 0xa0b   : > { %6339 = vst.msk [vmem:[#allocation2 + $0x38] sm:$0xff] %vm13420_vm7, %v12801_v61  ;;  %v6253_v30 = vadd.f32 %v6252_v0, %v6212_v11  ;;  %vm13438_vm7 = vmmov %vm13422_vm1 }
 0xa0d   : > { %vm6264_vm3 = vcmp.ge.f32.partialorder %v6253_v30, 0.0  ;;  %v6272_v27 = vmul.f32 0.01, %v6253_v30 }
 0xa0f   : > { %v6280_v16 = vsel %vm6264_vm3, %v6253_v30, %v6272_v27  ;;  %v6312_v50 = vld [vmem:[#allocation2 + $0x40] ss:$2 sm:$0xf]  ;;  %v6315_v41 = vld [vmem:[#allocation2 + $0x41] ss:$2 sm:$0xf] }
 0xa10   : > { %6288 = vst.msk [vmem:[#allocation2 + $0x48] sm:$0xff] %vm13421_vm8, %v6280_v16  ;;  %v6313_v25 = vadd.f32 %v6312_v50, %v6310_v26  ;;  %v6456_v27 = vld [vmem:[%s11914_s11] sm:$0xff]  ;;  %vm13440_vm8 = vmmov %vm13436_vm4 }
 0xa11   : > { %v6380_v58 = vld [vmem:[#allocation2 + $0x17] sm:$0xff]  ;;  %6517 = vmatpush.msrb.mxu0 %v6456_v27  ;;  %6795 = vmatpush.msrb.mxu2 %v6456_v27  ;;  %v6472_v16 = vld [vmem:[%s11914_s11 + $0x80] sm:$0xff] }
 0xa12   : > { %v6255_v61 = vpop.f32.mrf.mxu3  ;;  %v6316_v46 = vadd.f32 %v6315_v41, %v6313_v25  ;;  %v6376_v37 = vld [vmem:[#allocation2 + $0x15] sm:$0xff]  ;;  %v6382_v63 = vsel %vm11775_vm0, %v6380_v58, 0.0  ;;  %6540 = vmatpush.msrb.mxu1 %v6472_v16 }
 0xa13   : > { %v6256_v29 = vadd.f32 %v6255_v61, %v6215_v28  ;;  %v6374_v14 = vld [vmem:[#allocation2 + $0x14] sm:$0xff]  ;;  %v6378_v18 = vsel %vm11779_vm9, %v6376_v37, 0.0 }
 0xa14   : > { %v6491_v28 = vld [vmem:[%s11914_s11 + $0x118] sm:$0xff]  ;;  %v6490_v61 = vld [vmem:[%s11914_s11 + $0x110] sm:$0xff] }
 0xa15   : > { %vm6265_vm11 = vcmp.ge.f32.partialorder %v6256_v29, 0.0  ;;  %v6273_v21 = vmul.f32 0.01, %v6256_v29  ;;  %6560 = vmatpush.msra.mxu0 %v6491_v28  ;;  %v6384_v8 = vld [vmem:[#allocation2 + $0x18] sm:$0xff] }
 0xa17   : > { %v6281_v38 = vsel %vm6265_vm11, %v6256_v29, %v6273_v21  ;;  %v6317_v3 = vld [vmem:[#allocation2 + $0x48] ss:$2 sm:$0xf]  ;;  %v6318_v36 = vld [vmem:[#allocation2 + $0x49] ss:$2 sm:$0xf]  ;;  %6561 = vmatpush.msra.mxu0 %v6490_v61  ;;  %vm13441_vm11 = vmmov %vm13422_vm1 }
 0xa18   : > { %6289 = vst.msk [vmem:[#allocation2 + $0x50] sm:$0xff] %vm13422_vm1, %v6281_v38  ;;  %v6319_v54 = vadd.f32 %v6318_v36, %v6317_v3  ;;  %v6489_v29 = vld [vmem:[%s11914_s11 + $0x108] sm:$0xff]  ;;  %v6370_v38 = vld [vmem:[#allocation2 + $0x13] sm:$0xff] }
 0xa19   : > { %6562 = vmatpush.msra.mxu0 %v6489_v29  ;;  %v6372_v50 = vsel %vm11775_vm0, %v6370_v38, 0.0 }
 0xa1b   : > { %6563 = vmatpush.msra.mxu0 %v6488_v39 }
 0xa1f   : > { %v6321_v2 = vld [vmem:[#allocation2 + $0x50] ss:$2 sm:$0xf]  ;;  %v6324_v22 = vld [vmem:[#allocation2 + $0x51] ss:$2 sm:$0xf] }
 0xa20   : > { %v6322_v48 = vadd.f32 %v6321_v2, %v6319_v54 }
 0xa22   : > { %v6325_v43 = vadd.f32 %v6324_v22, %v6322_v48 }
 0xa24   : > { %v6330_v1 = vrot.slane %v6325_v43, 4 }
 0xa26   : > { %v6334_v60 = vsel %vm6332_vm2, %v6316_v46, %v6330_v1  ;;  %vm13434_vm2 = vcmask 523264  }
 0xa27   : > { %v6336_v52 = vmul.f32 0.25, %v6334_v60  ;;  %vm13435_vm13 = vmmov %vm13434_vm2 }
 0xa28   : > { %vm13439_vm3 = vmmov %vm13434_vm2 }
 0xa29   : > { %6341 = vst.msk [vmem:[#allocation2 + $0x20] sm:$0xff] %vm13423_vm10, %v6336_v52  ;;  %vm13442_vm10 = vmmov %vm13434_vm2 }
 0xa30   : > { %v6375_v45 = vld [vmem:[#allocation2 + $0x1c] sm:$0xff]  ;;  %v6393_v17 = vld [vmem:[#allocation2 + $0x24] sm:$0xff] }
 0xa31   : > { %v6381_v9 = vld [vmem:[#allocation2 + $0x1f] sm:$0xff]  ;;  %v7098_v7 = vpack.i.bf16 %v6375_v45, %v6374_v14 }
 0xa32   : > { %v11793_v12 = vld [vmem:[#allocation2 + $0x1d] sm:$0xff]  ;;  %v6383_v6 = vsel %vm11783_vm6, %v6381_v9, 0.0  ;;  %v6394_v58 = vld [vmem:[#allocation2 + $0x25] sm:$0xff] }
 0xa33   : > { %v6379_v44 = vsel %vm11787_vm15, %v11793_v12, 0.0  ;;  %v6371_v5 = vld [vmem:[#allocation2 + $0x1b] sm:$0xff]  ;;  %v6395_v35 = vsel %vm11779_vm9, %v11793_v12, 0.0  ;;  %v7108_v32 = vpack.i.bf16 %v6383_v6, %v6382_v63  ;;  %7099 = vrot.lane.b32.xlu1 %v7098_v7, %s12654_s22  ;;  %v6390_v42 = vld [vmem:[#allocation2 + $0x23] sm:$0xff]  ;;  %v6396_v15 = vsel %vm11787_vm15, %v6394_v58, 0.0 }
 0xa34   : > { %v7103_v51 = vpack.i.bf16 %v6379_v44, %v6378_v18  ;;  %v6373_v23 = vsel %vm11783_vm6, %v6371_v5, 0.0  ;;  %v6386_v11 = vld [vmem:[#allocation2 + $0x19] sm:$0xff]  ;;  %v6391_v10 = vsel %vm11775_vm0, %v6371_v5, 0.0  ;;  %v6387_v0 = vld [vmem:[#allocation2 + $0x21] sm:$0xff]  ;;  %v6392_v30 = vsel %vm11783_vm6, %v6390_v42, 0.0  ;;  %vm13443_vm0 = vmmov %vm13436_vm4 }
 0xa35   : > { %7109 = vrot.lane.b32.xlu0 %v7108_v32, %s7262_s0  ;;  %v6388_v13 = vsel %vm11779_vm9, %v6386_v11, 0.0  ;;  %v6389_v40 = vsel %vm11787_vm15, %v6387_v0, 0.0  ;;  %v6385_v49 = vld [vmem:[#allocation2 + $0x20] sm:$0xff]  ;;  %vm13444_vm6 = vmmov %vm13422_vm1 }
 0xa36   : > { %7104 = vrot.lane.b32.xlu2 %v7103_v51, %s12401_s16  ;;  %v7118_v14 = vld [vmem:[%s11915_s12] ss:$0 sm:$0xff] }
 0xa3b   : > { %6423 = vrot.lane.b32.xlu1 %v6388_v13, %s12654_s22 }
 0xa3d   : > { %6438 = vrot.lane.b32.xlu0 %v6375_v45, %s7262_s0 }
 0xa3e   : > { %6431 = vrot.lane.b32.xlu2 %v6391_v10, %s12401_s16 }
 0xa43   : > { %6425 = vrot.lane.b32.xlu1 %v6389_v40, %s12654_s22  ;;  %s6655_s22 = sshll.u32 %s431_s27, 4 }
 0xa44   : > { %s433_s2 = scalar_lea.vmem [#allocation3], %s6655_s22  ;;  %s7207_s22 = scalar_lea.hbm %s11916_s13, 32 }
 0xa45   : > { %6440 = vrot.lane.b32.xlu0 %v6393_v17, %s7262_s0  ;;  %s6586_s3 = sshll.u32 %s433_s2, 4  ;;  %p7209_p1 = scmp.lt.s32.totalorder %s7207_s22, %s7203_s15  ;;  %s6587_s3 = int_to_ptr.vmem [resolvable:$true] %s6586_s3 }
 0xa46   : > { %6433 = vrot.lane.b32.xlu2 %v6392_v30, %s12401_s16 }
 0xa47   : > { %p7210_p2 = por %p7209_p1, %p7208_p0 }
 0xa49   : > { %p7211_p3 = pnand %p7210_p2, %p7206_p13 }
 0xa90   : > { %v7105_v21 = vpop.permute.xlu2 %7104 }
 0xa91   : > { %v7107_v54 = vunpack.i.h.bf16 %v7105_v21  ;;  %v7106_v2 = vunpack.i.l.bf16 %v7105_v21 }
 0xa98   : > { %v6432_v53 = vpop.permute.xlu2 %6431 }
 0xaa0   : > { %v6434_v4 = vpop.permute.xlu2 %6433 }
 0xaa5   : > { %v7100_v3 = vpop.permute.xlu1 %7099 }
 0xaa6   : > { %v7102_v36 = vunpack.i.h.bf16 %v7100_v3  ;;  %v7101_v62 = vunpack.i.l.bf16 %v7100_v3 }
 0xaa7   : > { %v7110_v26 = vpop.permute.xlu0 %7109 }
 0xaa8   : > { %v7112_v25 = vunpack.i.h.bf16 %v7110_v26  ;;  %v7111_v48 = vunpack.i.l.bf16 %v7110_v26  ;;  %v6444_v22 = vsel %vm13432_vm14, %v6372_v50, %v7101_v62  ;;  %v6445_v43 = vsel %vm13433_vm12, %v6373_v23, %v7102_v36 }
 0xaa9   : > { %v6446_v41 = vsel %vm13434_vm2, %v6444_v22, %v7106_v2  ;;  %v6447_v46 = vsel %vm13435_vm13, %v6445_v43, %v7107_v54 }
 0xaaa   : > { %v6448_v1 = vsel %vm13436_vm4, %v6446_v41, %v7111_v48  ;;  %v6449_v20 = vsel %vm13437_vm5, %v6447_v46, %v7112_v25 }
 0xaab   : > { %6518 = vmatmul.f32.vlgmr.msrb.gmra.mxu0 %v6448_v1  ;;  %6521 = vmatmul.f32.vlgmr.msrb.gmra.mxu2 %v6449_v20 }
 0xaad   : > { %v6424_v31 = vpop.permute.xlu1 %6423 }
 0xaae   : > { %v6450_v60 = vsel %vm13438_vm7, %v6384_v8, %v6424_v31 }
 0xaaf   : > { %v6439_v33 = vpop.permute.xlu0 %6438  ;;  %v6452_v52 = vsel %vm13439_vm3, %v6450_v60, %v6432_v53 }
 0xab0   : > { %v6454_v24 = vsel %vm13440_vm8, %v6452_v52, %v6439_v33 }
 0xab1   : > { %6541 = vmatmul.f32.vlgmr.msrb.gmra.mxu1 %v6454_v24 }
 0xab3   : > { %6771 = vmatmul.msk.f32.vlgmr.msra.gmra.mxu0 %vm13441_vm11, %v6395_v35 }
 0xab5   : > { %v6426_v57 = vpop.permute.xlu1 %6425 }
 0xab6   : > { %v6451_v34 = vsel %vm13422_vm1, %v6385_v49, %v6426_v57 }
 0xab7   : > { %v6441_v56 = vpop.permute.xlu0 %6440  ;;  %v6453_v47 = vsel %vm13442_vm10, %v6451_v34, %v6434_v4 }
 0xab8   : > { %v6455_v37 = vsel %vm13443_vm0, %v6453_v47, %v6441_v56 }
 0xab9   : > { %6544 = vmatmul.f32.gmra.mxu1 %v6455_v37 }
 0xabb   : > { %6772 = vmatmul.msk.f32.gmra.mxu0 %vm13444_vm6, %v6396_v15 }
 0xb28   : > { %v6519_v19 = vpop.f32.mrf.mxu0 }
 0xb29   : > { %v6520_v45 = vadd.f32 %v7118_v14, %v6519_v19 }
 0xb2e   : > { %v6542_v9 = vpop.f32.mrf.mxu1  ;;  %v6522_v7 = vpop.f32.mrf.mxu2 }
 0xb2f   : > { %v6543_v63 = vadd.f32 %v6542_v9, %v6520_v45  ;;  %v6523_v59 = vadd.f32 %v7118_v14, %v6522_v7 }
 0xb30   : > { %v6565_v12 = vpop.f32.mrf.mxu0 }
 0xb31   : > { %v6566_v18 = vadd.f32 %v6565_v12, %v6543_v63 }
 0xb33   : > { %6571 = vst [vmem:[%s433_s2] sm:$0xff] %v6566_v18 }
 0xb36   : > { %v6545_v6 = vpop.f32.mrf.mxu1 }
 0xb37   : > { %v6546_v44 = vadd.f32 %v6545_v6, %v6523_v59 }
 0xb38   : > { %v6568_v5 = vpop.f32.mrf.mxu0 }
 0xb39   : > { %v6569_v35 = vadd.f32 %v6568_v5, %v6546_v44 }
 0xb3b   : > { %6572 = vst [vmem:[%s433_s2 + $0x8] sm:$0xff] %v6569_v35 }
 0xb3c   : > { %7214 = shalt.err (!%p7211_p3)
}
 0xb3d   : > { %s7263_s27 = smov 128  }
 0xb3e   : > { %6796 = dma.vmem_to_hbm [thread:$0]  (%p7372_p5), %s6587_s3, 256, %s6589_s23, %s6574_s29, %s7263_s27, %s7263_s27, %s12529_s24  }
 0xb3f PF: > { %p6802_p4 = scmp.ge.s32.totalorder %s7249_s28, 2  ;;  %s6603_s2 = sand.u32 1, %s7237_s25  }
 0xb40   : > { %s6604_s16 = scalar_lea.sflag [#allocation4], %s6603_s2 }
 0xb41   : > { %p6799_p7 = pnand %p6802_p4, %p7376_p6 }
 0xb43   : > { %p6800_p8 = pneg %p6799_p7 }
 0xb45   : > { %7232 = dma.done.wait (%p6800_p8), %s6604_s16, 256  }
 0xb46   : > { %7234 = vsyncadd (%p6800_p8), %s6604_s16, 4294967040  ;;  %s13445_s30 = sld [smem:[#allocation6_spill]]  ;;  %p23_p9 = scmp.ge.s32.totalorder %s7359_s14, 4  }
 0xb47   : > { %s13446_s27 = sld [smem:[#allocation7_spill]]  ;;  %s13447_s25 = smov %s7241_s26 }
 0xb48   : > { %s13449_s28 = smov %s7359_s14  ;;  %25 = sbr.rel (!%p23_p9) target bundleno = 8 (0x8), region = 147 }
 0xb4c   : > { %s13448_s26 = smov %s13445_s30 }
 0xb4d   :  { %6610 = vsyncpa [#allocation4], 1 }
 0xb4e   :  { %6612 = vsyncpa [#allocation4 + $0x1], 1 }

</bundles_post_ra>
